<compile_context>
chip_gen: v5e
topology: v5e:2x2
jax: 0.10.0
libtpu: 0.0.40
codegen_flags: <defaults>
</compile_context>

<pallas_src>
import jax
import jax.numpy as jnp
import numpy as np
from jax import lax
from jax.experimental import pallas as pl
from jax.experimental.pallas import tpu as pltpu

_SQRT_2_OVER_PI = 0.7978845608028654


def _gelu(x):
    # tanh-approximate GELU, shared by kernel and reference.
    # TODO(synk): PyTorch nn.GELU() default is the exact erf form; the tanh
    # approximation (~1e-3 abs diff) is used since erf lowering inside Mosaic
    # kernels is not guaranteed.
    return 0.5 * x * (1.0 + jnp.tanh(_SQRT_2_OVER_PI * (x + 0.044715 * x * x * x)))


# ---------------------------------------------------------------------------
# Pallas kernels
# ---------------------------------------------------------------------------
def _accum_conv3x3_rows(acc_ref, xv, t_ref, first):
    """acc (+)= 3x3 conv of xv, decomposed into 3 block-Toeplitz matmuls.

    xv:      (H, W*Cin)           bf16 activation rows
    t_ref:   (3, W*Cin, W*Cout)   bf16; t_ref[ky] folds the 3 W-taps (and the W
                                  zero padding) of kernel row ky into one matrix
    acc_ref: (H, W*Cout)          f32 VMEM accumulator
    """
    h = xv.shape[0]
    center = jnp.dot(xv, t_ref[1], preferred_element_type=jnp.float32)
    if first:
        acc_ref[...] = center
    else:
        acc_ref[...] = acc_ref[...] + center
    if h > 1:
        # kernel row ky=0 reads input row y-1 -> contributes to output rows 1..H-1
        up = jnp.dot(xv[:-1, :], t_ref[0], preferred_element_type=jnp.float32)
        acc_ref[pl.ds(1, h - 1), :] = acc_ref[pl.ds(1, h - 1), :] + up
        # kernel row ky=2 reads input row y+1 -> contributes to output rows 0..H-2
        dn = jnp.dot(xv[1:, :], t_ref[2], preferred_element_type=jnp.float32)
        acc_ref[pl.ds(0, h - 1), :] = acc_ref[pl.ds(0, h - 1), :] + dn


def _encoding_block_kernel(*args):
    """Fused encoding block: [conv3x3 -> BN(eval) -> GELU] x 2 (+ eval dropout).

    args = (x_0..x_{k-1},    # (1, H, W*C_i) bf16 inputs (skip-concat fused)
            t1_0..t1_{k-1},  # per-input block-Toeplitz weights of conv1 (bf16)
            s1, b1,          # (1, W*Cout) folded BN1 scale/bias (f32)
            t2, s2, b2,      # conv2 Toeplitz weights + folded BN2
            o_ref,           # (1, H, W*Cout) bf16 output
            acc_ref)         # (H, W*Cout) f32 scratch accumulator
    """
    n_in = (len(args) - 7) // 2
    x_refs = args[:n_in]
    t1_refs = args[n_in:2 * n_in]
    s1_ref, b1_ref, t2_ref, s2_ref, b2_ref, o_ref, acc_ref = args[2 * n_in:]

    # conv1 (channel concat of the inputs is fused via per-input weight slices)
    for i in range(n_in):
        _accum_conv3x3_rows(acc_ref, x_refs[i][0], t1_refs[i], first=(i == 0))
    h1 = _gelu(acc_ref[...] * s1_ref[...] + b1_ref[...]).astype(jnp.bfloat16)

    # conv2
    _accum_conv3x3_rows(acc_ref, h1, t2_ref, first=True)
    y = _gelu(acc_ref[...] * s2_ref[...] + b2_ref[...])
    # nn.Dropout(p=0.15) is the identity in inference mode.
    o_ref[0] = y.astype(o_ref.dtype)


def _final_conv1x1_kernel(x_ref, w_ref, b_ref, o_ref):
    """Final 1x1 conv: one matmul against a block-diagonal weight matrix."""
    acc = jnp.dot(x_ref[0], w_ref[...], preferred_element_type=jnp.float32)
    o_ref[0] = (acc + b_ref[...]).astype(o_ref.dtype)


# ---------------------------------------------------------------------------
# Pallas wrappers
# ---------------------------------------------------------------------------
def encoding_block_pallas(inputs, packed):
    """One fused encoding block. `inputs` is the list of NHWC bf16 tensors the
    PyTorch model would concatenate along channels before the block."""
    n, h, w, _ = inputs[0].shape
    t1_list = packed["t1"]
    s1, b1, t2, s2, b2 = (packed["s1"], packed["b1"], packed["t2"],
                          packed["s2"], packed["b2"])
    wcout = t2.shape[2]
    cout = wcout // w

    xs = [x.reshape(n, h, w * x.shape[3]) for x in inputs]   # lane dim = W*C
    in_specs = (
        [pl.BlockSpec((1, h, x.shape[2]), lambda i: (i, 0, 0)) for x in xs]
        + [pl.BlockSpec(t.shape, lambda i: (0, 0, 0)) for t in t1_list]
        + [pl.BlockSpec(s1.shape, lambda i: (0, 0)),
           pl.BlockSpec(b1.shape, lambda i: (0, 0)),
           pl.BlockSpec(t2.shape, lambda i: (0, 0, 0)),
           pl.BlockSpec(s2.shape, lambda i: (0, 0)),
           pl.BlockSpec(b2.shape, lambda i: (0, 0))])

    out = pl.pallas_call(
        _encoding_block_kernel,
        out_shape=jax.ShapeDtypeStruct((n, h, wcout), jnp.bfloat16),
        grid_spec=pltpu.PrefetchScalarGridSpec(
            num_scalar_prefetch=0,
            grid=(n,),
            in_specs=in_specs,
            out_specs=pl.BlockSpec((1, h, wcout), lambda i: (i, 0, 0)),
            scratch_shapes=[pltpu.VMEM((h, wcout), jnp.float32)]),
        compiler_params=pltpu.CompilerParams(
            dimension_semantics=("parallel",),
            vmem_limit_bytes=32 * 1024 * 1024),
    )(*xs, *t1_list, s1, b1, t2, s2, b2)
    return out.reshape(n, h, w, cout)


def final_conv1x1_pallas(x_nhwc, packed):
    wblk, btile = packed
    n, h, w, cin = x_nhwc.shape
    wcout = wblk.shape[1]
    cout = wcout // w
    xf = x_nhwc.reshape(n, h, w * cin)
    out = pl.pallas_call(
        _final_conv1x1_kernel,
        out_shape=jax.ShapeDtypeStruct((n, h, wcout), jnp.float32),
        grid_spec=pltpu.PrefetchScalarGridSpec(
            num_scalar_prefetch=0,
            grid=(n,),
            in_specs=[pl.BlockSpec((1, h, w * cin), lambda i: (i, 0, 0)),
                      pl.BlockSpec(wblk.shape, lambda i: (0, 0)),
                      pl.BlockSpec(btile.shape, lambda i: (0, 0))],
            out_specs=pl.BlockSpec((1, h, wcout), lambda i: (i, 0, 0))),
        compiler_params=pltpu.CompilerParams(
            dimension_semantics=("parallel",)),
    )(xf, wblk, btile)
    return out.reshape(n, h, w, cout)


# ---------------------------------------------------------------------------
# Memory-bound glue shared by the Pallas path and the reference path
# ---------------------------------------------------------------------------
def maxpool2x2_nhwc(x):
    n, h, w, c = x.shape
    return jnp.max(x.reshape(n, h // 2, 2, w // 2, 2, c), axis=(2, 4))


def conv_transpose2x2_nhwc(x, w, b):
    # nn.ConvTranspose2d(k=2, s=2):  out[n, 2y+dy, 2x+dx, o] =
    #     b[o] + sum_i x[n, y, x, i] * w[i, o, dy, dx]
    y = jnp.einsum("nhwi,iokl->nhkwlo", x.astype(jnp.bfloat16),
                   w.astype(jnp.bfloat16), preferred_element_type=jnp.float32)
    n, h, _, ww, _, cout = y.shape
    y = y.reshape(n, 2 * h, 2 * ww, cout) + b.astype(jnp.float32)
    return y.astype(jnp.bfloat16)


# ---------------------------------------------------------------------------
# Parameters (PyTorch-style init), BN folding and weight packing
# ---------------------------------------------------------------------------
def _fold_bn(gamma, beta, mean, var, eps=1e-5):
    s = gamma / jnp.sqrt(var + eps)
    return s, beta - mean * s


def _init_conv(key, cout, cin, k):
    bound = 1.0 / np.sqrt(cin * k * k)
    return jax.random.uniform(key, (cout, cin, k, k), jnp.float32, -bound, bound)


def _init_block(key, cin, cout):
    ks = jax.random.split(key, 6)
    # eval-mode BatchNorm with fresh running stats (mean=0, var=1); gamma/beta
    # randomized slightly to exercise the folded-affine path.
    rm = jnp.zeros((cout,), jnp.float32)
    rv = jnp.ones((cout,), jnp.float32)
    g1 = 1.0 + 0.1 * jax.random.normal(ks[2], (cout,), jnp.float32)
    be1 = 0.1 * jax.random.normal(ks[3], (cout,), jnp.float32)
    g2 = 1.0 + 0.1 * jax.random.normal(ks[4], (cout,), jnp.float32)
    be2 = 0.1 * jax.random.normal(ks[5], (cout,), jnp.float32)
    s1, b1 = _fold_bn(g1, be1, rm, rv)
    s2, b2 = _fold_bn(g2, be2, rm, rv)
    return {"w1": _init_conv(ks[0], cout, cin, 3),
            "w2": _init_conv(ks[1], cout, cout, 3),
            "s1": s1, "b1": b1, "s2": s2, "b2": b2}


def _init_tconv(key, cin, cout):
    kw, kb = jax.random.split(key)
    bound = 1.0 / np.sqrt(cin * 4)
    w = jax.random.uniform(kw, (cin, cout, 2, 2), jnp.float32, -bound, bound)
    b = jax.random.uniform(kb, (cout,), jnp.float32, -bound, bound)
    return (w, b)


def _init_final(key, cin, cout):
    kw, kb = jax.random.split(key)
    bound = 1.0 / np.sqrt(cin)
    w = jax.random.uniform(kw, (cout, cin, 1, 1), jnp.float32, -bound, bound)
    b = jax.random.uniform(kb, (cout,), jnp.float32, -bound, bound)
    return (w, b)


def build_params(key, in_ch, out_ch, features):
    f = features
    ks = jax.random.split(key, 14)
    return {
        "conv1": _init_block(ks[0], in_ch, f[0]),
        "conv2": _init_block(ks[1], f[0], f[1]),
        "conv3": _init_block(ks[2], f[1], f[2]),
        "conv4": _init_block(ks[3], f[2], f[3]),
        "bottleneck": _init_block(ks[4], f[3], f[3] * 2),
        "conv5": _init_block(ks[5], f[3] * 2, f[3]),
        "conv6": _init_block(ks[6], f[3], f[2]),
        "conv7": _init_block(ks[7], f[2], f[1]),
        "conv8": _init_block(ks[8], f[1], f[0]),
        "tconv1": _init_tconv(ks[9], f[3] * 2, f[3]),
        "tconv2": _init_tconv(ks[10], f[3], f[2]),
        "tconv3": _init_tconv(ks[11], f[2], f[1]),
        "tconv4": _init_tconv(ks[12], f[1], f[0]),
        "final": _init_final(ks[13], f[0], out_ch),
    }


def _toeplitz3(w_oihw, wd):
    """(Cout, Cin, 3, 3) -> (3, wd*Cin, wd*Cout) block-Toeplitz matrices."""
    cout, cin = w_oihw.shape[:2]
    t = np.zeros((3, wd * cin, wd * cout), np.float32)
    for ky in range(3):
        for x in range(wd):
            for dx in (-1, 0, 1):
                xs = x + dx
                if 0 <= xs < wd:
                    t[ky, xs * cin:(xs + 1) * cin, x * cout:(x + 1) * cout] = \
                        w_oihw[:, :, ky, dx + 1].T
    return t


def _blockdiag_1x1(w_oc_ic, wd):
    cout, cin = w_oc_ic.shape
    m = np.zeros((wd * cin, wd * cout), np.float32)
    for x in range(wd):
        m[x * cin:(x + 1) * cin, x * cout:(x + 1) * cout] = w_oc_ic.T
    return m


def _tile_lane(v, wd):
    return jnp.asarray(np.tile(np.asarray(v, np.float32), wd)[None, :], jnp.float32)


def pack_block_params(raw, wd, split_cin=None):
    w1 = np.asarray(raw["w1"], np.float32)
    w2 = np.asarray(raw["w2"], np.float32)
    if split_cin is None:
        t1 = (jnp.asarray(_toeplitz3(w1, wd), jnp.bfloat16),)
    else:  # decoder block: torch.cat((skip, x)) fused by splitting conv1 weights
        t1 = (jnp.asarray(_toeplitz3(w1[:, :split_cin], wd), jnp.bfloat16),
              jnp.asarray(_toeplitz3(w1[:, split_cin:], wd), jnp.bfloat16))
    return {"t1": t1,
            "s1": _tile_lane(raw["s1"], wd), "b1": _tile_lane(raw["b1"], wd),
            "t2": jnp.asarray(_toeplitz3(w2, wd), jnp.bfloat16),
            "s2": _tile_lane(raw["s2"], wd), "b2": _tile_lane(raw["b2"], wd)}


def pack_params(raw, spatial, features):
    f, s = features, spatial
    wf, bf = raw["final"]
    wf2d = np.asarray(wf, np.float32)[:, :, 0, 0]
    return {
        "conv1": pack_block_params(raw["conv1"], s),
        "conv2": pack_block_params(raw["conv2"], s // 2),
        "conv3": pack_block_params(raw["conv3"], s // 4),
        "conv4": pack_block_params(raw["conv4"], s // 8),
        "bottleneck": pack_block_params(raw["bottleneck"], s // 16),
        "conv5": pack_block_params(raw["conv5"], s // 8, split_cin=f[3]),
        "conv6": pack_block_params(raw["conv6"], s // 4, split_cin=f[2]),
        "conv7": pack_block_params(raw["conv7"], s // 2, split_cin=f[1]),
        "conv8": pack_block_params(raw["conv8"], s, split_cin=f[0]),
        "tconv1": raw["tconv1"], "tconv2": raw["tconv2"],
        "tconv3": raw["tconv3"], "tconv4": raw["tconv4"],
        "final": (jnp.asarray(_blockdiag_1x1(wf2d, s), jnp.bfloat16),
                  _tile_lane(bf, s)),
    }


# ---------------------------------------------------------------------------
# Full forward passes
# ---------------------------------------------------------------------------
@jax.jit
def unet_forward_pallas(x_nchw, pk):
    x = jnp.transpose(x_nchw, (0, 2, 3, 1)).astype(jnp.bfloat16)   # NCHW -> NHWC
    s1 = encoding_block_pallas([x], pk["conv1"]);  x = maxpool2x2_nhwc(s1)
    s2 = encoding_block_pallas([x], pk["conv2"]);  x = maxpool2x2_nhwc(s2)
    s3 = encoding_block_pallas([x], pk["conv3"]);  x = maxpool2x2_nhwc(s3)
    s4 = encoding_block_pallas([x], pk["conv4"]);  x = maxpool2x2_nhwc(s4)
    x = encoding_block_pallas([x], pk["bottleneck"])
    x = conv_transpose2x2_nhwc(x, *pk["tconv1"])
    x = encoding_block_pallas([s4, x], pk["conv5"])   # cat((skip, x)) fused
    x = conv_transpose2x2_nhwc(x, *pk["tconv2"])
    x = encoding_block_pallas([s3, x], pk["conv6"])
    x = conv_transpose2x2_nhwc(x, *pk["tconv3"])
    x = encoding_block_pallas([s2, x], pk["conv7"])
    x = conv_transpose2x2_nhwc(x, *pk["tconv4"])
    x = encoding_block_pallas([s1, x], pk["conv8"])
    y = final_conv1x1_pallas(x, pk["final"])
    return jnp.transpose(y, (0, 3, 1, 2))              # back to NCHW


def _conv3x3_ref(x, w_oihw):
    return lax.conv_general_dilated(
        x.astype(jnp.bfloat16), w_oihw.astype(jnp.bfloat16),
        window_strides=(1, 1), padding=((1, 1), (1, 1)),
        dimension_numbers=("NHWC", "OIHW", "NHWC"),
        preferred_element_type=jnp.float32)


def encoding_block_ref(x, raw):
    h = _gelu(_conv3x3_ref(x, raw["w1"]) * raw["s1"] + raw["b1"]).astype(jnp.bfloat16)
    h = _gelu(_conv3x3_ref(h, raw["w2"]) * raw["s2"] + raw["b2"])
    return h.astype(jnp.bfloat16)


@jax.jit
def unet_forward_reference(x_nchw, raw):
    x = jnp.transpose(x_nchw, (0, 2, 3, 1)).astype(jnp.bfloat16)
    s1 = encoding_block_ref(x, raw["conv1"]);  x = maxpool2x2_nhwc(s1)
    s2 = encoding_block_ref(x, raw["conv2"]);  x = maxpool2x2_nhwc(s2)
    s3 = encoding_block_ref(x, raw["conv3"]);  x = maxpool2x2_nhwc(s3)
    s4 = encoding_block_ref(x, raw["conv4"]);  x = maxpool2x2_nhwc(s4)
    x = encoding_block_ref(x, raw["bottleneck"])
    x = conv_transpose2x2_nhwc(x, *raw["tconv1"])
    x = encoding_block_ref(jnp.concatenate([s4, x], axis=-1), raw["conv5"])
    x = conv_transpose2x2_nhwc(x, *raw["tconv2"])
    x = encoding_block_ref(jnp.concatenate([s3, x], axis=-1), raw["conv6"])
    x = conv_transpose2x2_nhwc(x, *raw["tconv3"])
    x = encoding_block_ref(jnp.concatenate([s2, x], axis=-1), raw["conv7"])
    x = conv_transpose2x2_nhwc(x, *raw["tconv4"])
    x = encoding_block_ref(jnp.concatenate([s1, x], axis=-1), raw["conv8"])
    wf, bf = raw["final"]
    y = jnp.einsum("nhwc,oc->nhwo", x.astype(jnp.bfloat16),
                   wf[:, :, 0, 0].astype(jnp.bfloat16),
                   preferred_element_type=jnp.float32) + bf
    return jnp.transpose(y, (0, 3, 1, 2))


if __name__ == "__main__":
    key = jax.random.PRNGKey(0)
    kx, kp = jax.random.split(key)

    N, IN_CH, OUT_CH, S = 2, 3, 4, 16
    FEATURES = (8, 16, 32, 64)   # scaled-down stand-in for [64, 128, 256, 512]

    x = jax.random.normal(kx, (N, IN_CH, S, S), jnp.float32)
    raw = build_params(kp, IN_CH, OUT_CH, FEATURES)
    pk = pack_params(raw, S, FEATURES)

    out = jax.block_until_ready(unet_forward_pallas(x, pk))
    ref = jax.block_until_ready(unet_forward_reference(x, raw))

    assert out.shape == (N, OUT_CH, S, S)
    assert jnp.allclose(out, ref, atol=2e-2, rtol=2e-2), \
        float(jnp.max(jnp.abs(out - ref)))
    print("KERNEL_OK")
</pallas_src>

<mosaic_0001>
module attributes {stable_mosaic.version = 11 : i64} {
  func.func @_encoding_block_kernel(%arg0: i32, %arg1: memref<1x16x48xbf16, #tpu.memory_space<vmem>>, %arg2: memref<3x48x128xbf16, #tpu.memory_space<vmem>>, %arg3: memref<1x128xf32, #tpu.memory_space<vmem>>, %arg4: memref<1x128xf32, #tpu.memory_space<vmem>>, %arg5: memref<3x128x128xbf16, #tpu.memory_space<vmem>>, %arg6: memref<1x128xf32, #tpu.memory_space<vmem>>, %arg7: memref<1x128xf32, #tpu.memory_space<vmem>>, %arg8: memref<1x16x128xbf16, #tpu.memory_space<vmem>>, %arg9: memref<16x128xf32, #tpu.memory_space<vmem>>) attributes {dimension_semantics = [#tpu.dimension_semantics<parallel>], iteration_bounds = array<i64: 2>, scalar_prefetch = 0 : i64, scratch_operands = 1 : i64, tpu.core_type = #tpu.core_type<tc>, window_params = [{transform_indices = @transform_0, window_bounds = array<i64: 1, 16, 48>}, {pipeline_mode = #tpu.pipeline_mode<synchronous>, transform_indices = @transform_1, window_bounds = array<i64: 3, 48, 128>}, {pipeline_mode = #tpu.pipeline_mode<synchronous>, transform_indices = @transform_2, window_bounds = array<i64: 1, 128>}, {pipeline_mode = #tpu.pipeline_mode<synchronous>, transform_indices = @transform_3, window_bounds = array<i64: 1, 128>}, {pipeline_mode = #tpu.pipeline_mode<synchronous>, transform_indices = @transform_4, window_bounds = array<i64: 3, 128, 128>}, {pipeline_mode = #tpu.pipeline_mode<synchronous>, transform_indices = @transform_5, window_bounds = array<i64: 1, 128>}, {pipeline_mode = #tpu.pipeline_mode<synchronous>, transform_indices = @transform_6, window_bounds = array<i64: 1, 128>}, {transform_indices = @transform_7, window_bounds = array<i64: 1, 16, 128>}]} {
    %c0 = arith.constant 0 : index
    %c0_0 = arith.constant 0 : index
    %c0_1 = arith.constant 0 : index
    %0 = vector.load %arg1[%c0, %c0_0, %c0_1] : memref<1x16x48xbf16, #tpu.memory_space<vmem>>, vector<1x16x48xbf16>
    %1 = vector.shape_cast %0 : vector<1x16x48xbf16> to vector<16x48xbf16>
    %c1 = arith.constant 1 : index
    %c0_2 = arith.constant 0 : index
    %c0_3 = arith.constant 0 : index
    %2 = vector.load %arg2[%c1, %c0_2, %c0_3] : memref<3x48x128xbf16, #tpu.memory_space<vmem>>, vector<1x48x128xbf16>
    %3 = vector.shape_cast %2 : vector<1x48x128xbf16> to vector<48x128xbf16>
    %cst = arith.constant dense<0.000000e+00> : vector<16x128xf32>
    %4 = tpu.matmul %1, %3, %cst {dimension_numbers = #tpu.dot_dimension_numbers<[1], [0], [0], [1], [0, 0, 1, 1], [], []>} : vector<16x48xbf16>, vector<48x128xbf16>, vector<16x128xf32> -> vector<16x128xf32>
    %c0_4 = arith.constant 0 : index
    %c0_5 = arith.constant 0 : index
    %5 = vector.load %arg9[%c0_4, %c0_5] : memref<16x128xf32, #tpu.memory_space<vmem>>, vector<16x128xf32>
    tpu.vector_store %arg9[%c0_4, %c0_5], %4 {strides = array<i32>} : memref<16x128xf32, #tpu.memory_space<vmem>>, vector<16x128xf32>,
    %6 = vector.extract_strided_slice %1 {offsets = [0, 0], sizes = [15, 48], strides = [1, 1]} : vector<16x48xbf16> to vector<15x48xbf16>
    %c0_6 = arith.constant 0 : index
    %c0_7 = arith.constant 0 : index
    %c0_8 = arith.constant 0 : index
    %7 = vector.load %arg2[%c0_6, %c0_7, %c0_8] : memref<3x48x128xbf16, #tpu.memory_space<vmem>>, vector<1x48x128xbf16>
    %8 = vector.shape_cast %7 : vector<1x48x128xbf16> to vector<48x128xbf16>
    %cst_9 = arith.constant dense<0.000000e+00> : vector<15x128xf32>
    %9 = tpu.matmul %6, %8, %cst_9 {dimension_numbers = #tpu.dot_dimension_numbers<[1], [0], [0], [1], [0, 0, 1, 1], [], []>} : vector<15x48xbf16>, vector<48x128xbf16>, vector<15x128xf32> -> vector<15x128xf32>
    %c1_10 = arith.constant 1 : index
    %c0_11 = arith.constant 0 : index
    %10 = vector.load %arg9[%c1_10, %c0_11] : memref<16x128xf32, #tpu.memory_space<vmem>>, vector<15x128xf32>
    %11 = arith.addf %10, %9 : vector<15x128xf32>
    %c1_12 = arith.constant 1 : index
    %c0_13 = arith.constant 0 : index
    %12 = vector.load %arg9[%c1_12, %c0_13] : memref<16x128xf32, #tpu.memory_space<vmem>>, vector<15x128xf32>
    tpu.vector_store %arg9[%c1_12, %c0_13], %11 {strides = array<i32>} : memref<16x128xf32, #tpu.memory_space<vmem>>, vector<15x128xf32>,
    %13 = vector.extract_strided_slice %1 {offsets = [1, 0], sizes = [15, 48], strides = [1, 1]} : vector<16x48xbf16> to vector<15x48xbf16>
    %c2 = arith.constant 2 : index
    %c0_14 = arith.constant 0 : index
    %c0_15 = arith.constant 0 : index
    %14 = vector.load %arg2[%c2, %c0_14, %c0_15] : memref<3x48x128xbf16, #tpu.memory_space<vmem>>, vector<1x48x128xbf16>
    %15 = vector.shape_cast %14 : vector<1x48x128xbf16> to vector<48x128xbf16>
    %cst_16 = arith.constant dense<0.000000e+00> : vector<15x128xf32>
    %16 = tpu.matmul %13, %15, %cst_16 {dimension_numbers = #tpu.dot_dimension_numbers<[1], [0], [0], [1], [0, 0, 1, 1], [], []>} : vector<15x48xbf16>, vector<48x128xbf16>, vector<15x128xf32> -> vector<15x128xf32>
    %c0_17 = arith.constant 0 : index
    %c0_18 = arith.constant 0 : index
    %17 = vector.load %arg9[%c0_17, %c0_18] : memref<16x128xf32, #tpu.memory_space<vmem>>, vector<15x128xf32>
    %18 = arith.addf %17, %16 : vector<15x128xf32>
    %c0_19 = arith.constant 0 : index
    %c0_20 = arith.constant 0 : index
    %19 = vector.load %arg9[%c0_19, %c0_20] : memref<16x128xf32, #tpu.memory_space<vmem>>, vector<15x128xf32>
    tpu.vector_store %arg9[%c0_19, %c0_20], %18 {strides = array<i32>} : memref<16x128xf32, #tpu.memory_space<vmem>>, vector<15x128xf32>,
    %c0_21 = arith.constant 0 : index
    %c0_22 = arith.constant 0 : index
    %20 = vector.load %arg9[%c0_21, %c0_22] : memref<16x128xf32, #tpu.memory_space<vmem>>, vector<16x128xf32>
    %c0_23 = arith.constant 0 : index
    %c0_24 = arith.constant 0 : index
    %21 = vector.load %arg3[%c0_23, %c0_24] : memref<1x128xf32, #tpu.memory_space<vmem>>, vector<1x128xf32>
    %22 = vector.broadcast %21 : vector<1x128xf32> to vector<16x128xf32>
    %23 = arith.mulf %20, %22 : vector<16x128xf32>
    %c0_25 = arith.constant 0 : index
    %c0_26 = arith.constant 0 : index
    %24 = vector.load %arg4[%c0_25, %c0_26] : memref<1x128xf32, #tpu.memory_space<vmem>>, vector<1x128xf32>
    %25 = vector.broadcast %24 : vector<1x128xf32> to vector<16x128xf32>
    %26 = arith.addf %23, %25 : vector<16x128xf32>
    %cst_27 = arith.constant 5.000000e-01 : f32
    %27 = vector.broadcast %cst_27 : f32 to vector<16x128xf32>
    %28 = arith.mulf %27, %26 : vector<16x128xf32>
    %cst_28 = arith.constant 4.471500e-02 : f32
    %29 = vector.broadcast %cst_28 : f32 to vector<16x128xf32>
    %30 = arith.mulf %29, %26 : vector<16x128xf32>
    %31 = arith.mulf %30, %26 : vector<16x128xf32>
    %32 = arith.mulf %31, %26 : vector<16x128xf32>
    %33 = arith.addf %26, %32 : vector<16x128xf32>
    %cst_29 = arith.constant 0.797884583 : f32
    %34 = vector.broadcast %cst_29 : f32 to vector<16x128xf32>
    %35 = arith.mulf %34, %33 : vector<16x128xf32>
    %36 = math.tanh %35 : vector<16x128xf32>
    %cst_30 = arith.constant 1.000000e+00 : f32
    %37 = vector.broadcast %cst_30 : f32 to vector<16x128xf32>
    %38 = arith.addf %37, %36 : vector<16x128xf32>
    %39 = arith.mulf %28, %38 : vector<16x128xf32>
    %40 = arith.truncf %39 : vector<16x128xf32> to vector<16x128xbf16>
    %c1_31 = arith.constant 1 : index
    %c0_32 = arith.constant 0 : index
    %c0_33 = arith.constant 0 : index
    %41 = vector.load %arg5[%c1_31, %c0_32, %c0_33] : memref<3x128x128xbf16, #tpu.memory_space<vmem>>, vector<1x128x128xbf16>
    %42 = vector.shape_cast %41 : vector<1x128x128xbf16> to vector<128x128xbf16>
    %cst_34 = arith.constant dense<0.000000e+00> : vector<16x128xf32>
    %43 = tpu.matmul %40, %42, %cst_34 {dimension_numbers = #tpu.dot_dimension_numbers<[1], [0], [0], [1], [0, 0, 1, 1], [], []>} : vector<16x128xbf16>, vector<128x128xbf16>, vector<16x128xf32> -> vector<16x128xf32>
    %c0_35 = arith.constant 0 : index
    %c0_36 = arith.constant 0 : index
    %44 = vector.load %arg9[%c0_35, %c0_36] : memref<16x128xf32, #tpu.memory_space<vmem>>, vector<16x128xf32>
    tpu.vector_store %arg9[%c0_35, %c0_36], %43 {strides = array<i32>} : memref<16x128xf32, #tpu.memory_space<vmem>>, vector<16x128xf32>,
    %45 = vector.extract_strided_slice %40 {offsets = [0, 0], sizes = [15, 128], strides = [1, 1]} : vector<16x128xbf16> to vector<15x128xbf16>
    %c0_37 = arith.constant 0 : index
    %c0_38 = arith.constant 0 : index
    %c0_39 = arith.constant 0 : index
    %46 = vector.load %arg5[%c0_37, %c0_38, %c0_39] : memref<3x128x128xbf16, #tpu.memory_space<vmem>>, vector<1x128x128xbf16>
    %47 = vector.shape_cast %46 : vector<1x128x128xbf16> to vector<128x128xbf16>
    %cst_40 = arith.constant dense<0.000000e+00> : vector<15x128xf32>
    %48 = tpu.matmul %45, %47, %cst_40 {dimension_numbers = #tpu.dot_dimension_numbers<[1], [0], [0], [1], [0, 0, 1, 1], [], []>} : vector<15x128xbf16>, vector<128x128xbf16>, vector<15x128xf32> -> vector<15x128xf32>
    %c1_41 = arith.constant 1 : index
    %c0_42 = arith.constant 0 : index
    %49 = vector.load %arg9[%c1_41, %c0_42] : memref<16x128xf32, #tpu.memory_space<vmem>>, vector<15x128xf32>
    %50 = arith.addf %49, %48 : vector<15x128xf32>
    %c1_43 = arith.constant 1 : index
    %c0_44 = arith.constant 0 : index
    %51 = vector.load %arg9[%c1_43, %c0_44] : memref<16x128xf32, #tpu.memory_space<vmem>>, vector<15x128xf32>
    tpu.vector_store %arg9[%c1_43, %c0_44], %50 {strides = array<i32>} : memref<16x128xf32, #tpu.memory_space<vmem>>, vector<15x128xf32>,
    %52 = vector.extract_strided_slice %40 {offsets = [1, 0], sizes = [15, 128], strides = [1, 1]} : vector<16x128xbf16> to vector<15x128xbf16>
    %c2_45 = arith.constant 2 : index
    %c0_46 = arith.constant 0 : index
    %c0_47 = arith.constant 0 : index
    %53 = vector.load %arg5[%c2_45, %c0_46, %c0_47] : memref<3x128x128xbf16, #tpu.memory_space<vmem>>, vector<1x128x128xbf16>
    %54 = vector.shape_cast %53 : vector<1x128x128xbf16> to vector<128x128xbf16>
    %cst_48 = arith.constant dense<0.000000e+00> : vector<15x128xf32>
    %55 = tpu.matmul %52, %54, %cst_48 {dimension_numbers = #tpu.dot_dimension_numbers<[1], [0], [0], [1], [0, 0, 1, 1], [], []>} : vector<15x128xbf16>, vector<128x128xbf16>, vector<15x128xf32> -> vector<15x128xf32>
    %c0_49 = arith.constant 0 : index
    %c0_50 = arith.constant 0 : index
    %56 = vector.load %arg9[%c0_49, %c0_50] : memref<16x128xf32, #tpu.memory_space<vmem>>, vector<15x128xf32>
    %57 = arith.addf %56, %55 : vector<15x128xf32>
    %c0_51 = arith.constant 0 : index
    %c0_52 = arith.constant 0 : index
    %58 = vector.load %arg9[%c0_51, %c0_52] : memref<16x128xf32, #tpu.memory_space<vmem>>, vector<15x128xf32>
    tpu.vector_store %arg9[%c0_51, %c0_52], %57 {strides = array<i32>} : memref<16x128xf32, #tpu.memory_space<vmem>>, vector<15x128xf32>,
    %c0_53 = arith.constant 0 : index
    %c0_54 = arith.constant 0 : index
    %59 = vector.load %arg9[%c0_53, %c0_54] : memref<16x128xf32, #tpu.memory_space<vmem>>, vector<16x128xf32>
    %c0_55 = arith.constant 0 : index
    %c0_56 = arith.constant 0 : index
    %60 = vector.load %arg6[%c0_55, %c0_56] : memref<1x128xf32, #tpu.memory_space<vmem>>, vector<1x128xf32>
    %61 = vector.broadcast %60 : vector<1x128xf32> to vector<16x128xf32>
    %62 = arith.mulf %59, %61 : vector<16x128xf32>
    %c0_57 = arith.constant 0 : index
    %c0_58 = arith.constant 0 : index
    %63 = vector.load %arg7[%c0_57, %c0_58] : memref<1x128xf32, #tpu.memory_space<vmem>>, vector<1x128xf32>
    %64 = vector.broadcast %63 : vector<1x128xf32> to vector<16x128xf32>
    %65 = arith.addf %62, %64 : vector<16x128xf32>
    %cst_59 = arith.constant 5.000000e-01 : f32
    %66 = vector.broadcast %cst_59 : f32 to vector<16x128xf32>
    %67 = arith.mulf %66, %65 : vector<16x128xf32>
    %cst_60 = arith.constant 4.471500e-02 : f32
    %68 = vector.broadcast %cst_60 : f32 to vector<16x128xf32>
    %69 = arith.mulf %68, %65 : vector<16x128xf32>
    %70 = arith.mulf %69, %65 : vector<16x128xf32>
    %71 = arith.mulf %70, %65 : vector<16x128xf32>
    %72 = arith.addf %65, %71 : vector<16x128xf32>
    %cst_61 = arith.constant 0.797884583 : f32
    %73 = vector.broadcast %cst_61 : f32 to vector<16x128xf32>
    %74 = arith.mulf %73, %72 : vector<16x128xf32>
    %75 = math.tanh %74 : vector<16x128xf32>
    %cst_62 = arith.constant 1.000000e+00 : f32
    %76 = vector.broadcast %cst_62 : f32 to vector<16x128xf32>
    %77 = arith.addf %76, %75 : vector<16x128xf32>
    %78 = arith.mulf %67, %77 : vector<16x128xf32>
    %79 = arith.truncf %78 : vector<16x128xf32> to vector<16x128xbf16>
    %c0_63 = arith.constant 0 : index
    %c0_64 = arith.constant 0 : index
    %c0_65 = arith.constant 0 : index
    %80 = vector.load %arg8[%c0_63, %c0_64, %c0_65] : memref<1x16x128xbf16, #tpu.memory_space<vmem>>, vector<1x16x128xbf16>
    %81 = vector.shape_cast %80 : vector<1x16x128xbf16> to vector<16x128xbf16>
    %82 = vector.shape_cast %79 : vector<16x128xbf16> to vector<1x16x128xbf16>
    tpu.vector_store %arg8[%c0_63, %c0_64, %c0_65], %82 {strides = array<i32>} : memref<1x16x128xbf16, #tpu.memory_space<vmem>>, vector<1x16x128xbf16>,
    return
  }
  func.func @transform_0(%arg0: i32) -> (i32, i32, i32) {
    %c0_i32 = arith.constant 0 : i32
    %c0_i32_0 = arith.constant 0 : i32
    %c0_i32_1 = arith.constant 0 : i32
    return %arg0, %c0_i32, %c0_i32_0 : i32, i32, i32
  }
  func.func @transform_1(%arg0: i32) -> (i32, i32, i32) {
    %c0_i32 = arith.constant 0 : i32
    %c0_i32_0 = arith.constant 0 : i32
    %c0_i32_1 = arith.constant 0 : i32
    %c0_i32_2 = arith.constant 0 : i32
    return %c0_i32, %c0_i32_0, %c0_i32_1 : i32, i32, i32
  }
  func.func @transform_2(%arg0: i32) -> (i32, i32) {
    %c0_i32 = arith.constant 0 : i32
    %c0_i32_0 = arith.constant 0 : i32
    %c0_i32_1 = arith.constant 0 : i32
    return %c0_i32, %c0_i32_0 : i32, i32
  }
  func.func @transform_3(%arg0: i32) -> (i32, i32) {
    %c0_i32 = arith.constant 0 : i32
    %c0_i32_0 = arith.constant 0 : i32
    %c0_i32_1 = arith.constant 0 : i32
    return %c0_i32, %c0_i32_0 : i32, i32
  }
  func.func @transform_4(%arg0: i32) -> (i32, i32, i32) {
    %c0_i32 = arith.constant 0 : i32
    %c0_i32_0 = arith.constant 0 : i32
    %c0_i32_1 = arith.constant 0 : i32
    %c0_i32_2 = arith.constant 0 : i32
    return %c0_i32, %c0_i32_0, %c0_i32_1 : i32, i32, i32
  }
  func.func @transform_5(%arg0: i32) -> (i32, i32) {
    %c0_i32 = arith.constant 0 : i32
    %c0_i32_0 = arith.constant 0 : i32
    %c0_i32_1 = arith.constant 0 : i32
    return %c0_i32, %c0_i32_0 : i32, i32
  }
  func.func @transform_6(%arg0: i32) -> (i32, i32) {
    %c0_i32 = arith.constant 0 : i32
    %c0_i32_0 = arith.constant 0 : i32
    %c0_i32_1 = arith.constant 0 : i32
    return %c0_i32, %c0_i32_0 : i32, i32
  }
  func.func @transform_7(%arg0: i32) -> (i32, i32, i32) {
    %c0_i32 = arith.constant 0 : i32
    %c0_i32_0 = arith.constant 0 : i32
    %c0_i32_1 = arith.constant 0 : i32
    return %arg0, %c0_i32, %c0_i32_0 : i32, i32, i32
  }
}

module attributes {stable_mosaic.version = 11 : i64} {
  func.func @_encoding_block_kernel(%arg0: i32, %arg1: memref<1x8x64xbf16, #tpu.memory_space<vmem>>, %arg2: memref<3x64x128xbf16, #tpu.memory_space<vmem>>, %arg3: memref<1x128xf32, #tpu.memory_space<vmem>>, %arg4: memref<1x128xf32, #tpu.memory_space<vmem>>, %arg5: memref<3x128x128xbf16, #tpu.memory_space<vmem>>, %arg6: memref<1x128xf32, #tpu.memory_space<vmem>>, %arg7: memref<1x128xf32, #tpu.memory_space<vmem>>, %arg8: memref<1x8x128xbf16, #tpu.memory_space<vmem>>, %arg9: memref<8x128xf32, #tpu.memory_space<vmem>>) attributes {dimension_semantics = [#tpu.dimension_semantics<parallel>], iteration_bounds = array<i64: 2>, scalar_prefetch = 0 : i64, scratch_operands = 1 : i64, tpu.core_type = #tpu.core_type<tc>, window_params = [{transform_indices = @transform_0, window_bounds = array<i64: 1, 8, 64>}, {pipeline_mode = #tpu.pipeline_mode<synchronous>, transform_indices = @transform_1, window_bounds = array<i64: 3, 64, 128>}, {pipeline_mode = #tpu.pipeline_mode<synchronous>, transform_indices = @transform_2, window_bounds = array<i64: 1, 128>}, {pipeline_mode = #tpu.pipeline_mode<synchronous>, transform_indices = @transform_3, window_bounds = array<i64: 1, 128>}, {pipeline_mode = #tpu.pipeline_mode<synchronous>, transform_indices = @transform_4, window_bounds = array<i64: 3, 128, 128>}, {pipeline_mode = #tpu.pipeline_mode<synchronous>, transform_indices = @transform_5, window_bounds = array<i64: 1, 128>}, {pipeline_mode = #tpu.pipeline_mode<synchronous>, transform_indices = @transform_6, window_bounds = array<i64: 1, 128>}, {transform_indices = @transform_7, window_bounds = array<i64: 1, 8, 128>}]} {
    %c0 = arith.constant 0 : index
    %c0_0 = arith.constant 0 : index
    %c0_1 = arith.constant 0 : index
    %0 = vector.load %arg1[%c0, %c0_0, %c0_1] : memref<1x8x64xbf16, #tpu.memory_space<vmem>>, vector<1x8x64xbf16>
    %1 = vector.shape_cast %0 : vector<1x8x64xbf16> to vector<8x64xbf16>
    %c1 = arith.constant 1 : index
    %c0_2 = arith.constant 0 : index
    %c0_3 = arith.constant 0 : index
    %2 = vector.load %arg2[%c1, %c0_2, %c0_3] : memref<3x64x128xbf16, #tpu.memory_space<vmem>>, vector<1x64x128xbf16>
    %3 = vector.shape_cast %2 : vector<1x64x128xbf16> to vector<64x128xbf16>
    %cst = arith.constant dense<0.000000e+00> : vector<8x128xf32>
    %4 = tpu.matmul %1, %3, %cst {dimension_numbers = #tpu.dot_dimension_numbers<[1], [0], [0], [1], [0, 0, 1, 1], [], []>} : vector<8x64xbf16>, vector<64x128xbf16>, vector<8x128xf32> -> vector<8x128xf32>
    %c0_4 = arith.constant 0 : index
    %c0_5 = arith.constant 0 : index
    %5 = vector.load %arg9[%c0_4, %c0_5] : memref<8x128xf32, #tpu.memory_space<vmem>>, vector<8x128xf32>
    tpu.vector_store %arg9[%c0_4, %c0_5], %4 {strides = array<i32>} : memref<8x128xf32, #tpu.memory_space<vmem>>, vector<8x128xf32>,
    %6 = vector.extract_strided_slice %1 {offsets = [0, 0], sizes = [7, 64], strides = [1, 1]} : vector<8x64xbf16> to vector<7x64xbf16>
    %c0_6 = arith.constant 0 : index
    %c0_7 = arith.constant 0 : index
    %c0_8 = arith.constant 0 : index
    %7 = vector.load %arg2[%c0_6, %c0_7, %c0_8] : memref<3x64x128xbf16, #tpu.memory_space<vmem>>, vector<1x64x128xbf16>
    %8 = vector.shape_cast %7 : vector<1x64x128xbf16> to vector<64x128xbf16>
    %cst_9 = arith.constant dense<0.000000e+00> : vector<7x128xf32>
    %9 = tpu.matmul %6, %8, %cst_9 {dimension_numbers = #tpu.dot_dimension_numbers<[1], [0], [0], [1], [0, 0, 1, 1], [], []>} : vector<7x64xbf16>, vector<64x128xbf16>, vector<7x128xf32> -> vector<7x128xf32>
    %c1_10 = arith.constant 1 : index
    %c0_11 = arith.constant 0 : index
    %10 = vector.load %arg9[%c1_10, %c0_11] : memref<8x128xf32, #tpu.memory_space<vmem>>, vector<7x128xf32>
    %11 = arith.addf %10, %9 : vector<7x128xf32>
    %c1_12 = arith.constant 1 : index
    %c0_13 = arith.constant 0 : index
    %12 = vector.load %arg9[%c1_12, %c0_13] : memref<8x128xf32, #tpu.memory_space<vmem>>, vector<7x128xf32>
    tpu.vector_store %arg9[%c1_12, %c0_13], %11 {strides = array<i32>} : memref<8x128xf32, #tpu.memory_space<vmem>>, vector<7x128xf32>,
    %13 = vector.extract_strided_slice %1 {offsets = [1, 0], sizes = [7, 64], strides = [1, 1]} : vector<8x64xbf16> to vector<7x64xbf16>
    %c2 = arith.constant 2 : index
    %c0_14 = arith.constant 0 : index
    %c0_15 = arith.constant 0 : index
    %14 = vector.load %arg2[%c2, %c0_14, %c0_15] : memref<3x64x128xbf16, #tpu.memory_space<vmem>>, vector<1x64x128xbf16>
    %15 = vector.shape_cast %14 : vector<1x64x128xbf16> to vector<64x128xbf16>
    %cst_16 = arith.constant dense<0.000000e+00> : vector<7x128xf32>
    %16 = tpu.matmul %13, %15, %cst_16 {dimension_numbers = #tpu.dot_dimension_numbers<[1], [0], [0], [1], [0, 0, 1, 1], [], []>} : vector<7x64xbf16>, vector<64x128xbf16>, vector<7x128xf32> -> vector<7x128xf32>
    %c0_17 = arith.constant 0 : index
    %c0_18 = arith.constant 0 : index
    %17 = vector.load %arg9[%c0_17, %c0_18] : memref<8x128xf32, #tpu.memory_space<vmem>>, vector<7x128xf32>
    %18 = arith.addf %17, %16 : vector<7x128xf32>
    %c0_19 = arith.constant 0 : index
    %c0_20 = arith.constant 0 : index
    %19 = vector.load %arg9[%c0_19, %c0_20] : memref<8x128xf32, #tpu.memory_space<vmem>>, vector<7x128xf32>
    tpu.vector_store %arg9[%c0_19, %c0_20], %18 {strides = array<i32>} : memref<8x128xf32, #tpu.memory_space<vmem>>, vector<7x128xf32>,
    %c0_21 = arith.constant 0 : index
    %c0_22 = arith.constant 0 : index
    %20 = vector.load %arg9[%c0_21, %c0_22] : memref<8x128xf32, #tpu.memory_space<vmem>>, vector<8x128xf32>
    %c0_23 = arith.constant 0 : index
    %c0_24 = arith.constant 0 : index
    %21 = vector.load %arg3[%c0_23, %c0_24] : memref<1x128xf32, #tpu.memory_space<vmem>>, vector<1x128xf32>
    %22 = vector.broadcast %21 : vector<1x128xf32> to vector<8x128xf32>
    %23 = arith.mulf %20, %22 : vector<8x128xf32>
    %c0_25 = arith.constant 0 : index
    %c0_26 = arith.constant 0 : index
    %24 = vector.load %arg4[%c0_25, %c0_26] : memref<1x128xf32, #tpu.memory_space<vmem>>, vector<1x128xf32>
    %25 = vector.broadcast %24 : vector<1x128xf32> to vector<8x128xf32>
    %26 = arith.addf %23, %25 : vector<8x128xf32>
    %cst_27 = arith.constant 5.000000e-01 : f32
    %27 = vector.broadcast %cst_27 : f32 to vector<8x128xf32>
    %28 = arith.mulf %27, %26 : vector<8x128xf32>
    %cst_28 = arith.constant 4.471500e-02 : f32
    %29 = vector.broadcast %cst_28 : f32 to vector<8x128xf32>
    %30 = arith.mulf %29, %26 : vector<8x128xf32>
    %31 = arith.mulf %30, %26 : vector<8x128xf32>
    %32 = arith.mulf %31, %26 : vector<8x128xf32>
    %33 = arith.addf %26, %32 : vector<8x128xf32>
    %cst_29 = arith.constant 0.797884583 : f32
    %34 = vector.broadcast %cst_29 : f32 to vector<8x128xf32>
    %35 = arith.mulf %34, %33 : vector<8x128xf32>
    %36 = math.tanh %35 : vector<8x128xf32>
    %cst_30 = arith.constant 1.000000e+00 : f32
    %37 = vector.broadcast %cst_30 : f32 to vector<8x128xf32>
    %38 = arith.addf %37, %36 : vector<8x128xf32>
    %39 = arith.mulf %28, %38 : vector<8x128xf32>
    %40 = arith.truncf %39 : vector<8x128xf32> to vector<8x128xbf16>
    %c1_31 = arith.constant 1 : index
    %c0_32 = arith.constant 0 : index
    %c0_33 = arith.constant 0 : index
    %41 = vector.load %arg5[%c1_31, %c0_32, %c0_33] : memref<3x128x128xbf16, #tpu.memory_space<vmem>>, vector<1x128x128xbf16>
    %42 = vector.shape_cast %41 : vector<1x128x128xbf16> to vector<128x128xbf16>
    %cst_34 = arith.constant dense<0.000000e+00> : vector<8x128xf32>
    %43 = tpu.matmul %40, %42, %cst_34 {dimension_numbers = #tpu.dot_dimension_numbers<[1], [0], [0], [1], [0, 0, 1, 1], [], []>} : vector<8x128xbf16>, vector<128x128xbf16>, vector<8x128xf32> -> vector<8x128xf32>
    %c0_35 = arith.constant 0 : index
    %c0_36 = arith.constant 0 : index
    %44 = vector.load %arg9[%c0_35, %c0_36] : memref<8x128xf32, #tpu.memory_space<vmem>>, vector<8x128xf32>
    tpu.vector_store %arg9[%c0_35, %c0_36], %43 {strides = array<i32>} : memref<8x128xf32, #tpu.memory_space<vmem>>, vector<8x128xf32>,
    %45 = vector.extract_strided_slice %40 {offsets = [0, 0], sizes = [7, 128], strides = [1, 1]} : vector<8x128xbf16> to vector<7x128xbf16>
    %c0_37 = arith.constant 0 : index
    %c0_38 = arith.constant 0 : index
    %c0_39 = arith.constant 0 : index
    %46 = vector.load %arg5[%c0_37, %c0_38, %c0_39] : memref<3x128x128xbf16, #tpu.memory_space<vmem>>, vector<1x128x128xbf16>
    %47 = vector.shape_cast %46 : vector<1x128x128xbf16> to vector<128x128xbf16>
    %cst_40 = arith.constant dense<0.000000e+00> : vector<7x128xf32>
    %48 = tpu.matmul %45, %47, %cst_40 {dimension_numbers = #tpu.dot_dimension_numbers<[1], [0], [0], [1], [0, 0, 1, 1], [], []>} : vector<7x128xbf16>, vector<128x128xbf16>, vector<7x128xf32> -> vector<7x128xf32>
    %c1_41 = arith.constant 1 : index
    %c0_42 = arith.constant 0 : index
    %49 = vector.load %arg9[%c1_41, %c0_42] : memref<8x128xf32, #tpu.memory_space<vmem>>, vector<7x128xf32>
    %50 = arith.addf %49, %48 : vector<7x128xf32>
    %c1_43 = arith.constant 1 : index
    %c0_44 = arith.constant 0 : index
    %51 = vector.load %arg9[%c1_43, %c0_44] : memref<8x128xf32, #tpu.memory_space<vmem>>, vector<7x128xf32>
    tpu.vector_store %arg9[%c1_43, %c0_44], %50 {strides = array<i32>} : memref<8x128xf32, #tpu.memory_space<vmem>>, vector<7x128xf32>,
    %52 = vector.extract_strided_slice %40 {offsets = [1, 0], sizes = [7, 128], strides = [1, 1]} : vector<8x128xbf16> to vector<7x128xbf16>
    %c2_45 = arith.constant 2 : index
    %c0_46 = arith.constant 0 : index
    %c0_47 = arith.constant 0 : index
    %53 = vector.load %arg5[%c2_45, %c0_46, %c0_47] : memref<3x128x128xbf16, #tpu.memory_space<vmem>>, vector<1x128x128xbf16>
    %54 = vector.shape_cast %53 : vector<1x128x128xbf16> to vector<128x128xbf16>
    %cst_48 = arith.constant dense<0.000000e+00> : vector<7x128xf32>
    %55 = tpu.matmul %52, %54, %cst_48 {dimension_numbers = #tpu.dot_dimension_numbers<[1], [0], [0], [1], [0, 0, 1, 1], [], []>} : vector<7x128xbf16>, vector<128x128xbf16>, vector<7x128xf32> -> vector<7x128xf32>
    %c0_49 = arith.constant 0 : index
    %c0_50 = arith.constant 0 : index
    %56 = vector.load %arg9[%c0_49, %c0_50] : memref<8x128xf32, #tpu.memory_space<vmem>>, vector<7x128xf32>
    %57 = arith.addf %56, %55 : vector<7x128xf32>
    %c0_51 = arith.constant 0 : index
    %c0_52 = arith.constant 0 : index
    %58 = vector.load %arg9[%c0_51, %c0_52] : memref<8x128xf32, #tpu.memory_space<vmem>>, vector<7x128xf32>
    tpu.vector_store %arg9[%c0_51, %c0_52], %57 {strides = array<i32>} : memref<8x128xf32, #tpu.memory_space<vmem>>, vector<7x128xf32>,
    %c0_53 = arith.constant 0 : index
    %c0_54 = arith.constant 0 : index
    %59 = vector.load %arg9[%c0_53, %c0_54] : memref<8x128xf32, #tpu.memory_space<vmem>>, vector<8x128xf32>
    %c0_55 = arith.constant 0 : index
    %c0_56 = arith.constant 0 : index
    %60 = vector.load %arg6[%c0_55, %c0_56] : memref<1x128xf32, #tpu.memory_space<vmem>>, vector<1x128xf32>
    %61 = vector.broadcast %60 : vector<1x128xf32> to vector<8x128xf32>
    %62 = arith.mulf %59, %61 : vector<8x128xf32>
    %c0_57 = arith.constant 0 : index
    %c0_58 = arith.constant 0 : index
    %63 = vector.load %arg7[%c0_57, %c0_58] : memref<1x128xf32, #tpu.memory_space<vmem>>, vector<1x128xf32>
    %64 = vector.broadcast %63 : vector<1x128xf32> to vector<8x128xf32>
    %65 = arith.addf %62, %64 : vector<8x128xf32>
    %cst_59 = arith.constant 5.000000e-01 : f32
    %66 = vector.broadcast %cst_59 : f32 to vector<8x128xf32>
    %67 = arith.mulf %66, %65 : vector<8x128xf32>
    %cst_60 = arith.constant 4.471500e-02 : f32
    %68 = vector.broadcast %cst_60 : f32 to vector<8x128xf32>
    %69 = arith.mulf %68, %65 : vector<8x128xf32>
    %70 = arith.mulf %69, %65 : vector<8x128xf32>
    %71 = arith.mulf %70, %65 : vector<8x128xf32>
    %72 = arith.addf %65, %71 : vector<8x128xf32>
    %cst_61 = arith.constant 0.797884583 : f32
    %73 = vector.broadcast %cst_61 : f32 to vector<8x128xf32>
    %74 = arith.mulf %73, %72 : vector<8x128xf32>
    %75 = math.tanh %74 : vector<8x128xf32>
    %cst_62 = arith.constant 1.000000e+00 : f32
    %76 = vector.broadcast %cst_62 : f32 to vector<8x128xf32>
    %77 = arith.addf %76, %75 : vector<8x128xf32>
    %78 = arith.mulf %67, %77 : vector<8x128xf32>
    %79 = arith.truncf %78 : vector<8x128xf32> to vector<8x128xbf16>
    %c0_63 = arith.constant 0 : index
    %c0_64 = arith.constant 0 : index
    %c0_65 = arith.constant 0 : index
    %80 = vector.load %arg8[%c0_63, %c0_64, %c0_65] : memref<1x8x128xbf16, #tpu.memory_space<vmem>>, vector<1x8x128xbf16>
    %81 = vector.shape_cast %80 : vector<1x8x128xbf16> to vector<8x128xbf16>
    %82 = vector.shape_cast %79 : vector<8x128xbf16> to vector<1x8x128xbf16>
    tpu.vector_store %arg8[%c0_63, %c0_64, %c0_65], %82 {strides = array<i32>} : memref<1x8x128xbf16, #tpu.memory_space<vmem>>, vector<1x8x128xbf16>,
    return
  }
  func.func @transform_0(%arg0: i32) -> (i32, i32, i32) {
    %c0_i32 = arith.constant 0 : i32
    %c0_i32_0 = arith.constant 0 : i32
    %c0_i32_1 = arith.constant 0 : i32
    return %arg0, %c0_i32, %c0_i32_0 : i32, i32, i32
  }
  func.func @transform_1(%arg0: i32) -> (i32, i32, i32) {
    %c0_i32 = arith.constant 0 : i32
    %c0_i32_0 = arith.constant 0 : i32
    %c0_i32_1 = arith.constant 0 : i32
    %c0_i32_2 = arith.constant 0 : i32
    return %c0_i32, %c0_i32_0, %c0_i32_1 : i32, i32, i32
  }
  func.func @transform_2(%arg0: i32) -> (i32, i32) {
    %c0_i32 = arith.constant 0 : i32
    %c0_i32_0 = arith.constant 0 : i32
    %c0_i32_1 = arith.constant 0 : i32
    return %c0_i32, %c0_i32_0 : i32, i32
  }
  func.func @transform_3(%arg0: i32) -> (i32, i32) {
    %c0_i32 = arith.constant 0 : i32
    %c0_i32_0 = arith.constant 0 : i32
    %c0_i32_1 = arith.constant 0 : i32
    return %c0_i32, %c0_i32_0 : i32, i32
  }
  func.func @transform_4(%arg0: i32) -> (i32, i32, i32) {
    %c0_i32 = arith.constant 0 : i32
    %c0_i32_0 = arith.constant 0 : i32
    %c0_i32_1 = arith.constant 0 : i32
    %c0_i32_2 = arith.constant 0 : i32
    return %c0_i32, %c0_i32_0, %c0_i32_1 : i32, i32, i32
  }
  func.func @transform_5(%arg0: i32) -> (i32, i32) {
    %c0_i32 = arith.constant 0 : i32
    %c0_i32_0 = arith.constant 0 : i32
    %c0_i32_1 = arith.constant 0 : i32
    return %c0_i32, %c0_i32_0 : i32, i32
  }
  func.func @transform_6(%arg0: i32) -> (i32, i32) {
    %c0_i32 = arith.constant 0 : i32
    %c0_i32_0 = arith.constant 0 : i32
    %c0_i32_1 = arith.constant 0 : i32
    return %c0_i32, %c0_i32_0 : i32, i32
  }
  func.func @transform_7(%arg0: i32) -> (i32, i32, i32) {
    %c0_i32 = arith.constant 0 : i32
    %c0_i32_0 = arith.constant 0 : i32
    %c0_i32_1 = arith.constant 0 : i32
    return %arg0, %c0_i32, %c0_i32_0 : i32, i32, i32
  }
}

module attributes {stable_mosaic.version = 11 : i64} {
  func.func @_encoding_block_kernel(%arg0: i32, %arg1: memref<1x4x64xbf16, #tpu.memory_space<vmem>>, %arg2: memref<3x64x128xbf16, #tpu.memory_space<vmem>>, %arg3: memref<1x128xf32, #tpu.memory_space<vmem>>, %arg4: memref<1x128xf32, #tpu.memory_space<vmem>>, %arg5: memref<3x128x128xbf16, #tpu.memory_space<vmem>>, %arg6: memref<1x128xf32, #tpu.memory_space<vmem>>, %arg7: memref<1x128xf32, #tpu.memory_space<vmem>>, %arg8: memref<1x4x128xbf16, #tpu.memory_space<vmem>>, %arg9: memref<4x128xf32, #tpu.memory_space<vmem>>) attributes {dimension_semantics = [#tpu.dimension_semantics<parallel>], iteration_bounds = array<i64: 2>, scalar_prefetch = 0 : i64, scratch_operands = 1 : i64, tpu.core_type = #tpu.core_type<tc>, window_params = [{transform_indices = @transform_0, window_bounds = array<i64: 1, 4, 64>}, {pipeline_mode = #tpu.pipeline_mode<synchronous>, transform_indices = @transform_1, window_bounds = array<i64: 3, 64, 128>}, {pipeline_mode = #tpu.pipeline_mode<synchronous>, transform_indices = @transform_2, window_bounds = array<i64: 1, 128>}, {pipeline_mode = #tpu.pipeline_mode<synchronous>, transform_indices = @transform_3, window_bounds = array<i64: 1, 128>}, {pipeline_mode = #tpu.pipeline_mode<synchronous>, transform_indices = @transform_4, window_bounds = array<i64: 3, 128, 128>}, {pipeline_mode = #tpu.pipeline_mode<synchronous>, transform_indices = @transform_5, window_bounds = array<i64: 1, 128>}, {pipeline_mode = #tpu.pipeline_mode<synchronous>, transform_indices = @transform_6, window_bounds = array<i64: 1, 128>}, {transform_indices = @transform_7, window_bounds = array<i64: 1, 4, 128>}]} {
    %c0 = arith.constant 0 : index
    %c0_0 = arith.constant 0 : index
    %c0_1 = arith.constant 0 : index
    %0 = vector.load %arg1[%c0, %c0_0, %c0_1] : memref<1x4x64xbf16, #tpu.memory_space<vmem>>, vector<1x4x64xbf16>
    %1 = vector.shape_cast %0 : vector<1x4x64xbf16> to vector<4x64xbf16>
    %c1 = arith.constant 1 : index
    %c0_2 = arith.constant 0 : index
    %c0_3 = arith.constant 0 : index
    %2 = vector.load %arg2[%c1, %c0_2, %c0_3] : memref<3x64x128xbf16, #tpu.memory_space<vmem>>, vector<1x64x128xbf16>
    %3 = vector.shape_cast %2 : vector<1x64x128xbf16> to vector<64x128xbf16>
    %cst = arith.constant dense<0.000000e+00> : vector<4x128xf32>
    %4 = tpu.matmul %1, %3, %cst {dimension_numbers = #tpu.dot_dimension_numbers<[1], [0], [0], [1], [0, 0, 1, 1], [], []>} : vector<4x64xbf16>, vector<64x128xbf16>, vector<4x128xf32> -> vector<4x128xf32>
    %c0_4 = arith.constant 0 : index
    %c0_5 = arith.constant 0 : index
    %5 = vector.load %arg9[%c0_4, %c0_5] : memref<4x128xf32, #tpu.memory_space<vmem>>, vector<4x128xf32>
    tpu.vector_store %arg9[%c0_4, %c0_5], %4 {strides = array<i32>} : memref<4x128xf32, #tpu.memory_space<vmem>>, vector<4x128xf32>,
    %6 = vector.extract_strided_slice %1 {offsets = [0, 0], sizes = [3, 64], strides = [1, 1]} : vector<4x64xbf16> to vector<3x64xbf16>
    %c0_6 = arith.constant 0 : index
    %c0_7 = arith.constant 0 : index
    %c0_8 = arith.constant 0 : index
    %7 = vector.load %arg2[%c0_6, %c0_7, %c0_8] : memref<3x64x128xbf16, #tpu.memory_space<vmem>>, vector<1x64x128xbf16>
    %8 = vector.shape_cast %7 : vector<1x64x128xbf16> to vector<64x128xbf16>
    %cst_9 = arith.constant dense<0.000000e+00> : vector<3x128xf32>
    %9 = tpu.matmul %6, %8, %cst_9 {dimension_numbers = #tpu.dot_dimension_numbers<[1], [0], [0], [1], [0, 0, 1, 1], [], []>} : vector<3x64xbf16>, vector<64x128xbf16>, vector<3x128xf32> -> vector<3x128xf32>
    %c1_10 = arith.constant 1 : index
    %c0_11 = arith.constant 0 : index
    %10 = vector.load %arg9[%c1_10, %c0_11] : memref<4x128xf32, #tpu.memory_space<vmem>>, vector<3x128xf32>
    %11 = arith.addf %10, %9 : vector<3x128xf32>
    %c1_12 = arith.constant 1 : index
    %c0_13 = arith.constant 0 : index
    %12 = vector.load %arg9[%c1_12, %c0_13] : memref<4x128xf32, #tpu.memory_space<vmem>>, vector<3x128xf32>
    tpu.vector_store %arg9[%c1_12, %c0_13], %11 {strides = array<i32>} : memref<4x128xf32, #tpu.memory_space<vmem>>, vector<3x128xf32>,
    %13 = vector.extract_strided_slice %1 {offsets = [1, 0], sizes = [3, 64], strides = [1, 1]} : vector<4x64xbf16> to vector<3x64xbf16>
    %c2 = arith.constant 2 : index
    %c0_14 = arith.constant 0 : index
    %c0_15 = arith.constant 0 : index
    %14 = vector.load %arg2[%c2, %c0_14, %c0_15] : memref<3x64x128xbf16, #tpu.memory_space<vmem>>, vector<1x64x128xbf16>
    %15 = vector.shape_cast %14 : vector<1x64x128xbf16> to vector<64x128xbf16>
    %cst_16 = arith.constant dense<0.000000e+00> : vector<3x128xf32>
    %16 = tpu.matmul %13, %15, %cst_16 {dimension_numbers = #tpu.dot_dimension_numbers<[1], [0], [0], [1], [0, 0, 1, 1], [], []>} : vector<3x64xbf16>, vector<64x128xbf16>, vector<3x128xf32> -> vector<3x128xf32>
    %c0_17 = arith.constant 0 : index
    %c0_18 = arith.constant 0 : index
    %17 = vector.load %arg9[%c0_17, %c0_18] : memref<4x128xf32, #tpu.memory_space<vmem>>, vector<3x128xf32>
    %18 = arith.addf %17, %16 : vector<3x128xf32>
    %c0_19 = arith.constant 0 : index
    %c0_20 = arith.constant 0 : index
    %19 = vector.load %arg9[%c0_19, %c0_20] : memref<4x128xf32, #tpu.memory_space<vmem>>, vector<3x128xf32>
    tpu.vector_store %arg9[%c0_19, %c0_20], %18 {strides = array<i32>} : memref<4x128xf32, #tpu.memory_space<vmem>>, vector<3x128xf32>,
    %c0_21 = arith.constant 0 : index
    %c0_22 = arith.constant 0 : index
    %20 = vector.load %arg9[%c0_21, %c0_22] : memref<4x128xf32, #tpu.memory_space<vmem>>, vector<4x128xf32>
    %c0_23 = arith.constant 0 : index
    %c0_24 = arith.constant 0 : index
    %21 = vector.load %arg3[%c0_23, %c0_24] : memref<1x128xf32, #tpu.memory_space<vmem>>, vector<1x128xf32>
    %22 = vector.broadcast %21 : vector<1x128xf32> to vector<4x128xf32>
    %23 = arith.mulf %20, %22 : vector<4x128xf32>
    %c0_25 = arith.constant 0 : index
    %c0_26 = arith.constant 0 : index
    %24 = vector.load %arg4[%c0_25, %c0_26] : memref<1x128xf32, #tpu.memory_space<vmem>>, vector<1x128xf32>
    %25 = vector.broadcast %24 : vector<1x128xf32> to vector<4x128xf32>
    %26 = arith.addf %23, %25 : vector<4x128xf32>
    %cst_27 = arith.constant 5.000000e-01 : f32
    %27 = vector.broadcast %cst_27 : f32 to vector<4x128xf32>
    %28 = arith.mulf %27, %26 : vector<4x128xf32>
    %cst_28 = arith.constant 4.471500e-02 : f32
    %29 = vector.broadcast %cst_28 : f32 to vector<4x128xf32>
    %30 = arith.mulf %29, %26 : vector<4x128xf32>
    %31 = arith.mulf %30, %26 : vector<4x128xf32>
    %32 = arith.mulf %31, %26 : vector<4x128xf32>
    %33 = arith.addf %26, %32 : vector<4x128xf32>
    %cst_29 = arith.constant 0.797884583 : f32
    %34 = vector.broadcast %cst_29 : f32 to vector<4x128xf32>
    %35 = arith.mulf %34, %33 : vector<4x128xf32>
    %36 = math.tanh %35 : vector<4x128xf32>
    %cst_30 = arith.constant 1.000000e+00 : f32
    %37 = vector.broadcast %cst_30 : f32 to vector<4x128xf32>
    %38 = arith.addf %37, %36 : vector<4x128xf32>
    %39 = arith.mulf %28, %38 : vector<4x128xf32>
    %40 = arith.truncf %39 : vector<4x128xf32> to vector<4x128xbf16>
    %c1_31 = arith.constant 1 : index
    %c0_32 = arith.constant 0 : index
    %c0_33 = arith.constant 0 : index
    %41 = vector.load %arg5[%c1_31, %c0_32, %c0_33] : memref<3x128x128xbf16, #tpu.memory_space<vmem>>, vector<1x128x128xbf16>
    %42 = vector.shape_cast %41 : vector<1x128x128xbf16> to vector<128x128xbf16>
    %cst_34 = arith.constant dense<0.000000e+00> : vector<4x128xf32>
    %43 = tpu.matmul %40, %42, %cst_34 {dimension_numbers = #tpu.dot_dimension_numbers<[1], [0], [0], [1], [0, 0, 1, 1], [], []>} : vector<4x128xbf16>, vector<128x128xbf16>, vector<4x128xf32> -> vector<4x128xf32>
    %c0_35 = arith.constant 0 : index
    %c0_36 = arith.constant 0 : index
    %44 = vector.load %arg9[%c0_35, %c0_36] : memref<4x128xf32, #tpu.memory_space<vmem>>, vector<4x128xf32>
    tpu.vector_store %arg9[%c0_35, %c0_36], %43 {strides = array<i32>} : memref<4x128xf32, #tpu.memory_space<vmem>>, vector<4x128xf32>,
    %45 = vector.extract_strided_slice %40 {offsets = [0, 0], sizes = [3, 128], strides = [1, 1]} : vector<4x128xbf16> to vector<3x128xbf16>
    %c0_37 = arith.constant 0 : index
    %c0_38 = arith.constant 0 : index
    %c0_39 = arith.constant 0 : index
    %46 = vector.load %arg5[%c0_37, %c0_38, %c0_39] : memref<3x128x128xbf16, #tpu.memory_space<vmem>>, vector<1x128x128xbf16>
    %47 = vector.shape_cast %46 : vector<1x128x128xbf16> to vector<128x128xbf16>
    %cst_40 = arith.constant dense<0.000000e+00> : vector<3x128xf32>
    %48 = tpu.matmul %45, %47, %cst_40 {dimension_numbers = #tpu.dot_dimension_numbers<[1], [0], [0], [1], [0, 0, 1, 1], [], []>} : vector<3x128xbf16>, vector<128x128xbf16>, vector<3x128xf32> -> vector<3x128xf32>
    %c1_41 = arith.constant 1 : index
    %c0_42 = arith.constant 0 : index
    %49 = vector.load %arg9[%c1_41, %c0_42] : memref<4x128xf32, #tpu.memory_space<vmem>>, vector<3x128xf32>
    %50 = arith.addf %49, %48 : vector<3x128xf32>
    %c1_43 = arith.constant 1 : index
    %c0_44 = arith.constant 0 : index
    %51 = vector.load %arg9[%c1_43, %c0_44] : memref<4x128xf32, #tpu.memory_space<vmem>>, vector<3x128xf32>
    tpu.vector_store %arg9[%c1_43, %c0_44], %50 {strides = array<i32>} : memref<4x128xf32, #tpu.memory_space<vmem>>, vector<3x128xf32>,
    %52 = vector.extract_strided_slice %40 {offsets = [1, 0], sizes = [3, 128], strides = [1, 1]} : vector<4x128xbf16> to vector<3x128xbf16>
    %c2_45 = arith.constant 2 : index
    %c0_46 = arith.constant 0 : index
    %c0_47 = arith.constant 0 : index
    %53 = vector.load %arg5[%c2_45, %c0_46, %c0_47] : memref<3x128x128xbf16, #tpu.memory_space<vmem>>, vector<1x128x128xbf16>
    %54 = vector.shape_cast %53 : vector<1x128x128xbf16> to vector<128x128xbf16>
    %cst_48 = arith.constant dense<0.000000e+00> : vector<3x128xf32>
    %55 = tpu.matmul %52, %54, %cst_48 {dimension_numbers = #tpu.dot_dimension_numbers<[1], [0], [0], [1], [0, 0, 1, 1], [], []>} : vector<3x128xbf16>, vector<128x128xbf16>, vector<3x128xf32> -> vector<3x128xf32>
    %c0_49 = arith.constant 0 : index
    %c0_50 = arith.constant 0 : index
    %56 = vector.load %arg9[%c0_49, %c0_50] : memref<4x128xf32, #tpu.memory_space<vmem>>, vector<3x128xf32>
    %57 = arith.addf %56, %55 : vector<3x128xf32>
    %c0_51 = arith.constant 0 : index
    %c0_52 = arith.constant 0 : index
    %58 = vector.load %arg9[%c0_51, %c0_52] : memref<4x128xf32, #tpu.memory_space<vmem>>, vector<3x128xf32>
    tpu.vector_store %arg9[%c0_51, %c0_52], %57 {strides = array<i32>} : memref<4x128xf32, #tpu.memory_space<vmem>>, vector<3x128xf32>,
    %c0_53 = arith.constant 0 : index
    %c0_54 = arith.constant 0 : index
    %59 = vector.load %arg9[%c0_53, %c0_54] : memref<4x128xf32, #tpu.memory_space<vmem>>, vector<4x128xf32>
    %c0_55 = arith.constant 0 : index
    %c0_56 = arith.constant 0 : index
    %60 = vector.load %arg6[%c0_55, %c0_56] : memref<1x128xf32, #tpu.memory_space<vmem>>, vector<1x128xf32>
    %61 = vector.broadcast %60 : vector<1x128xf32> to vector<4x128xf32>
    %62 = arith.mulf %59, %61 : vector<4x128xf32>
    %c0_57 = arith.constant 0 : index
    %c0_58 = arith.constant 0 : index
    %63 = vector.load %arg7[%c0_57, %c0_58] : memref<1x128xf32, #tpu.memory_space<vmem>>, vector<1x128xf32>
    %64 = vector.broadcast %63 : vector<1x128xf32> to vector<4x128xf32>
    %65 = arith.addf %62, %64 : vector<4x128xf32>
    %cst_59 = arith.constant 5.000000e-01 : f32
    %66 = vector.broadcast %cst_59 : f32 to vector<4x128xf32>
    %67 = arith.mulf %66, %65 : vector<4x128xf32>
    %cst_60 = arith.constant 4.471500e-02 : f32
    %68 = vector.broadcast %cst_60 : f32 to vector<4x128xf32>
    %69 = arith.mulf %68, %65 : vector<4x128xf32>
    %70 = arith.mulf %69, %65 : vector<4x128xf32>
    %71 = arith.mulf %70, %65 : vector<4x128xf32>
    %72 = arith.addf %65, %71 : vector<4x128xf32>
    %cst_61 = arith.constant 0.797884583 : f32
    %73 = vector.broadcast %cst_61 : f32 to vector<4x128xf32>
    %74 = arith.mulf %73, %72 : vector<4x128xf32>
    %75 = math.tanh %74 : vector<4x128xf32>
    %cst_62 = arith.constant 1.000000e+00 : f32
    %76 = vector.broadcast %cst_62 : f32 to vector<4x128xf32>
    %77 = arith.addf %76, %75 : vector<4x128xf32>
    %78 = arith.mulf %67, %77 : vector<4x128xf32>
    %79 = arith.truncf %78 : vector<4x128xf32> to vector<4x128xbf16>
    %c0_63 = arith.constant 0 : index
    %c0_64 = arith.constant 0 : index
    %c0_65 = arith.constant 0 : index
    %80 = vector.load %arg8[%c0_63, %c0_64, %c0_65] : memref<1x4x128xbf16, #tpu.memory_space<vmem>>, vector<1x4x128xbf16>
    %81 = vector.shape_cast %80 : vector<1x4x128xbf16> to vector<4x128xbf16>
    %82 = vector.shape_cast %79 : vector<4x128xbf16> to vector<1x4x128xbf16>
    tpu.vector_store %arg8[%c0_63, %c0_64, %c0_65], %82 {strides = array<i32>} : memref<1x4x128xbf16, #tpu.memory_space<vmem>>, vector<1x4x128xbf16>,
    return
  }
  func.func @transform_0(%arg0: i32) -> (i32, i32, i32) {
    %c0_i32 = arith.constant 0 : i32
    %c0_i32_0 = arith.constant 0 : i32
    %c0_i32_1 = arith.constant 0 : i32
    return %arg0, %c0_i32, %c0_i32_0 : i32, i32, i32
  }
  func.func @transform_1(%arg0: i32) -> (i32, i32, i32) {
    %c0_i32 = arith.constant 0 : i32
    %c0_i32_0 = arith.constant 0 : i32
    %c0_i32_1 = arith.constant 0 : i32
    %c0_i32_2 = arith.constant 0 : i32
    return %c0_i32, %c0_i32_0, %c0_i32_1 : i32, i32, i32
  }
  func.func @transform_2(%arg0: i32) -> (i32, i32) {
    %c0_i32 = arith.constant 0 : i32
    %c0_i32_0 = arith.constant 0 : i32
    %c0_i32_1 = arith.constant 0 : i32
    return %c0_i32, %c0_i32_0 : i32, i32
  }
  func.func @transform_3(%arg0: i32) -> (i32, i32) {
    %c0_i32 = arith.constant 0 : i32
    %c0_i32_0 = arith.constant 0 : i32
    %c0_i32_1 = arith.constant 0 : i32
    return %c0_i32, %c0_i32_0 : i32, i32
  }
  func.func @transform_4(%arg0: i32) -> (i32, i32, i32) {
    %c0_i32 = arith.constant 0 : i32
    %c0_i32_0 = arith.constant 0 : i32
    %c0_i32_1 = arith.constant 0 : i32
    %c0_i32_2 = arith.constant 0 : i32
    return %c0_i32, %c0_i32_0, %c0_i32_1 : i32, i32, i32
  }
  func.func @transform_5(%arg0: i32) -> (i32, i32) {
    %c0_i32 = arith.constant 0 : i32
    %c0_i32_0 = arith.constant 0 : i32
    %c0_i32_1 = arith.constant 0 : i32
    return %c0_i32, %c0_i32_0 : i32, i32
  }
  func.func @transform_6(%arg0: i32) -> (i32, i32) {
    %c0_i32 = arith.constant 0 : i32
    %c0_i32_0 = arith.constant 0 : i32
    %c0_i32_1 = arith.constant 0 : i32
    return %c0_i32, %c0_i32_0 : i32, i32
  }
  func.func @transform_7(%arg0: i32) -> (i32, i32, i32) {
    %c0_i32 = arith.constant 0 : i32
    %c0_i32_0 = arith.constant 0 : i32
    %c0_i32_1 = arith.constant 0 : i32
    return %arg0, %c0_i32, %c0_i32_0 : i32, i32, i32
  }
}

module attributes {stable_mosaic.version = 11 : i64} {
  func.func @_encoding_block_kernel(%arg0: i32, %arg1: memref<1x2x64xbf16, #tpu.memory_space<vmem>>, %arg2: memref<3x64x128xbf16, #tpu.memory_space<vmem>>, %arg3: memref<1x128xf32, #tpu.memory_space<vmem>>, %arg4: memref<1x128xf32, #tpu.memory_space<vmem>>, %arg5: memref<3x128x128xbf16, #tpu.memory_space<vmem>>, %arg6: memref<1x128xf32, #tpu.memory_space<vmem>>, %arg7: memref<1x128xf32, #tpu.memory_space<vmem>>, %arg8: memref<1x2x128xbf16, #tpu.memory_space<vmem>>, %arg9: memref<2x128xf32, #tpu.memory_space<vmem>>) attributes {dimension_semantics = [#tpu.dimension_semantics<parallel>], iteration_bounds = array<i64: 2>, scalar_prefetch = 0 : i64, scratch_operands = 1 : i64, tpu.core_type = #tpu.core_type<tc>, window_params = [{transform_indices = @transform_0, window_bounds = array<i64: 1, 2, 64>}, {pipeline_mode = #tpu.pipeline_mode<synchronous>, transform_indices = @transform_1, window_bounds = array<i64: 3, 64, 128>}, {pipeline_mode = #tpu.pipeline_mode<synchronous>, transform_indices = @transform_2, window_bounds = array<i64: 1, 128>}, {pipeline_mode = #tpu.pipeline_mode<synchronous>, transform_indices = @transform_3, window_bounds = array<i64: 1, 128>}, {pipeline_mode = #tpu.pipeline_mode<synchronous>, transform_indices = @transform_4, window_bounds = array<i64: 3, 128, 128>}, {pipeline_mode = #tpu.pipeline_mode<synchronous>, transform_indices = @transform_5, window_bounds = array<i64: 1, 128>}, {pipeline_mode = #tpu.pipeline_mode<synchronous>, transform_indices = @transform_6, window_bounds = array<i64: 1, 128>}, {transform_indices = @transform_7, window_bounds = array<i64: 1, 2, 128>}]} {
    %c0 = arith.constant 0 : index
    %c0_0 = arith.constant 0 : index
    %c0_1 = arith.constant 0 : index
    %0 = vector.load %arg1[%c0, %c0_0, %c0_1] : memref<1x2x64xbf16, #tpu.memory_space<vmem>>, vector<1x2x64xbf16>
    %1 = vector.shape_cast %0 : vector<1x2x64xbf16> to vector<2x64xbf16>
    %c1 = arith.constant 1 : index
    %c0_2 = arith.constant 0 : index
    %c0_3 = arith.constant 0 : index
    %2 = vector.load %arg2[%c1, %c0_2, %c0_3] : memref<3x64x128xbf16, #tpu.memory_space<vmem>>, vector<1x64x128xbf16>
    %3 = vector.shape_cast %2 : vector<1x64x128xbf16> to vector<64x128xbf16>
    %cst = arith.constant dense<0.000000e+00> : vector<2x128xf32>
    %4 = tpu.matmul %1, %3, %cst {dimension_numbers = #tpu.dot_dimension_numbers<[1], [0], [0], [1], [0, 0, 1, 1], [], []>} : vector<2x64xbf16>, vector<64x128xbf16>, vector<2x128xf32> -> vector<2x128xf32>
    %c0_4 = arith.constant 0 : index
    %c0_5 = arith.constant 0 : index
    %5 = vector.load %arg9[%c0_4, %c0_5] : memref<2x128xf32, #tpu.memory_space<vmem>>, vector<2x128xf32>
    tpu.vector_store %arg9[%c0_4, %c0_5], %4 {strides = array<i32>} : memref<2x128xf32, #tpu.memory_space<vmem>>, vector<2x128xf32>,
    %6 = vector.extract_strided_slice %1 {offsets = [0, 0], sizes = [1, 64], strides = [1, 1]} : vector<2x64xbf16> to vector<1x64xbf16>
    %c0_6 = arith.constant 0 : index
    %c0_7 = arith.constant 0 : index
    %c0_8 = arith.constant 0 : index
    %7 = vector.load %arg2[%c0_6, %c0_7, %c0_8] : memref<3x64x128xbf16, #tpu.memory_space<vmem>>, vector<1x64x128xbf16>
    %8 = vector.shape_cast %7 : vector<1x64x128xbf16> to vector<64x128xbf16>
    %cst_9 = arith.constant dense<0.000000e+00> : vector<1x128xf32>
    %9 = tpu.matmul %6, %8, %cst_9 {dimension_numbers = #tpu.dot_dimension_numbers<[1], [0], [0], [1], [0, 0, 1, 1], [], []>} : vector<1x64xbf16>, vector<64x128xbf16>, vector<1x128xf32> -> vector<1x128xf32>
    %c1_10 = arith.constant 1 : index
    %c0_11 = arith.constant 0 : index
    %10 = vector.load %arg9[%c1_10, %c0_11] : memref<2x128xf32, #tpu.memory_space<vmem>>, vector<1x128xf32>
    %11 = arith.addf %10, %9 : vector<1x128xf32>
    %c1_12 = arith.constant 1 : index
    %c0_13 = arith.constant 0 : index
    %12 = vector.load %arg9[%c1_12, %c0_13] : memref<2x128xf32, #tpu.memory_space<vmem>>, vector<1x128xf32>
    tpu.vector_store %arg9[%c1_12, %c0_13], %11 {strides = array<i32>} : memref<2x128xf32, #tpu.memory_space<vmem>>, vector<1x128xf32>,
    %13 = vector.extract_strided_slice %1 {offsets = [1, 0], sizes = [1, 64], strides = [1, 1]} : vector<2x64xbf16> to vector<1x64xbf16>
    %c2 = arith.constant 2 : index
    %c0_14 = arith.constant 0 : index
    %c0_15 = arith.constant 0 : index
    %14 = vector.load %arg2[%c2, %c0_14, %c0_15] : memref<3x64x128xbf16, #tpu.memory_space<vmem>>, vector<1x64x128xbf16>
    %15 = vector.shape_cast %14 : vector<1x64x128xbf16> to vector<64x128xbf16>
    %cst_16 = arith.constant dense<0.000000e+00> : vector<1x128xf32>
    %16 = tpu.matmul %13, %15, %cst_16 {dimension_numbers = #tpu.dot_dimension_numbers<[1], [0], [0], [1], [0, 0, 1, 1], [], []>} : vector<1x64xbf16>, vector<64x128xbf16>, vector<1x128xf32> -> vector<1x128xf32>
    %c0_17 = arith.constant 0 : index
    %c0_18 = arith.constant 0 : index
    %17 = vector.load %arg9[%c0_17, %c0_18] : memref<2x128xf32, #tpu.memory_space<vmem>>, vector<1x128xf32>
    %18 = arith.addf %17, %16 : vector<1x128xf32>
    %c0_19 = arith.constant 0 : index
    %c0_20 = arith.constant 0 : index
    %19 = vector.load %arg9[%c0_19, %c0_20] : memref<2x128xf32, #tpu.memory_space<vmem>>, vector<1x128xf32>
    tpu.vector_store %arg9[%c0_19, %c0_20], %18 {strides = array<i32>} : memref<2x128xf32, #tpu.memory_space<vmem>>, vector<1x128xf32>,
    %c0_21 = arith.constant 0 : index
    %c0_22 = arith.constant 0 : index
    %20 = vector.load %arg9[%c0_21, %c0_22] : memref<2x128xf32, #tpu.memory_space<vmem>>, vector<2x128xf32>
    %c0_23 = arith.constant 0 : index
    %c0_24 = arith.constant 0 : index
    %21 = vector.load %arg3[%c0_23, %c0_24] : memref<1x128xf32, #tpu.memory_space<vmem>>, vector<1x128xf32>
    %22 = vector.broadcast %21 : vector<1x128xf32> to vector<2x128xf32>
    %23 = arith.mulf %20, %22 : vector<2x128xf32>
    %c0_25 = arith.constant 0 : index
    %c0_26 = arith.constant 0 : index
    %24 = vector.load %arg4[%c0_25, %c0_26] : memref<1x128xf32, #tpu.memory_space<vmem>>, vector<1x128xf32>
    %25 = vector.broadcast %24 : vector<1x128xf32> to vector<2x128xf32>
    %26 = arith.addf %23, %25 : vector<2x128xf32>
    %cst_27 = arith.constant 5.000000e-01 : f32
    %27 = vector.broadcast %cst_27 : f32 to vector<2x128xf32>
    %28 = arith.mulf %27, %26 : vector<2x128xf32>
    %cst_28 = arith.constant 4.471500e-02 : f32
    %29 = vector.broadcast %cst_28 : f32 to vector<2x128xf32>
    %30 = arith.mulf %29, %26 : vector<2x128xf32>
    %31 = arith.mulf %30, %26 : vector<2x128xf32>
    %32 = arith.mulf %31, %26 : vector<2x128xf32>
    %33 = arith.addf %26, %32 : vector<2x128xf32>
    %cst_29 = arith.constant 0.797884583 : f32
    %34 = vector.broadcast %cst_29 : f32 to vector<2x128xf32>
    %35 = arith.mulf %34, %33 : vector<2x128xf32>
    %36 = math.tanh %35 : vector<2x128xf32>
    %cst_30 = arith.constant 1.000000e+00 : f32
    %37 = vector.broadcast %cst_30 : f32 to vector<2x128xf32>
    %38 = arith.addf %37, %36 : vector<2x128xf32>
    %39 = arith.mulf %28, %38 : vector<2x128xf32>
    %40 = arith.truncf %39 : vector<2x128xf32> to vector<2x128xbf16>
    %c1_31 = arith.constant 1 : index
    %c0_32 = arith.constant 0 : index
    %c0_33 = arith.constant 0 : index
    %41 = vector.load %arg5[%c1_31, %c0_32, %c0_33] : memref<3x128x128xbf16, #tpu.memory_space<vmem>>, vector<1x128x128xbf16>
    %42 = vector.shape_cast %41 : vector<1x128x128xbf16> to vector<128x128xbf16>
    %cst_34 = arith.constant dense<0.000000e+00> : vector<2x128xf32>
    %43 = tpu.matmul %40, %42, %cst_34 {dimension_numbers = #tpu.dot_dimension_numbers<[1], [0], [0], [1], [0, 0, 1, 1], [], []>} : vector<2x128xbf16>, vector<128x128xbf16>, vector<2x128xf32> -> vector<2x128xf32>
    %c0_35 = arith.constant 0 : index
    %c0_36 = arith.constant 0 : index
    %44 = vector.load %arg9[%c0_35, %c0_36] : memref<2x128xf32, #tpu.memory_space<vmem>>, vector<2x128xf32>
    tpu.vector_store %arg9[%c0_35, %c0_36], %43 {strides = array<i32>} : memref<2x128xf32, #tpu.memory_space<vmem>>, vector<2x128xf32>,
    %45 = vector.extract_strided_slice %40 {offsets = [0, 0], sizes = [1, 128], strides = [1, 1]} : vector<2x128xbf16> to vector<1x128xbf16>
    %c0_37 = arith.constant 0 : index
    %c0_38 = arith.constant 0 : index
    %c0_39 = arith.constant 0 : index
    %46 = vector.load %arg5[%c0_37, %c0_38, %c0_39] : memref<3x128x128xbf16, #tpu.memory_space<vmem>>, vector<1x128x128xbf16>
    %47 = vector.shape_cast %46 : vector<1x128x128xbf16> to vector<128x128xbf16>
    %cst_40 = arith.constant dense<0.000000e+00> : vector<1x128xf32>
    %48 = tpu.matmul %45, %47, %cst_40 {dimension_numbers = #tpu.dot_dimension_numbers<[1], [0], [0], [1], [0, 0, 1, 1], [], []>} : vector<1x128xbf16>, vector<128x128xbf16>, vector<1x128xf32> -> vector<1x128xf32>
    %c1_41 = arith.constant 1 : index
    %c0_42 = arith.constant 0 : index
    %49 = vector.load %arg9[%c1_41, %c0_42] : memref<2x128xf32, #tpu.memory_space<vmem>>, vector<1x128xf32>
    %50 = arith.addf %49, %48 : vector<1x128xf32>
    %c1_43 = arith.constant 1 : index
    %c0_44 = arith.constant 0 : index
    %51 = vector.load %arg9[%c1_43, %c0_44] : memref<2x128xf32, #tpu.memory_space<vmem>>, vector<1x128xf32>
    tpu.vector_store %arg9[%c1_43, %c0_44], %50 {strides = array<i32>} : memref<2x128xf32, #tpu.memory_space<vmem>>, vector<1x128xf32>,
    %52 = vector.extract_strided_slice %40 {offsets = [1, 0], sizes = [1, 128], strides = [1, 1]} : vector<2x128xbf16> to vector<1x128xbf16>
    %c2_45 = arith.constant 2 : index
    %c0_46 = arith.constant 0 : index
    %c0_47 = arith.constant 0 : index
    %53 = vector.load %arg5[%c2_45, %c0_46, %c0_47] : memref<3x128x128xbf16, #tpu.memory_space<vmem>>, vector<1x128x128xbf16>
    %54 = vector.shape_cast %53 : vector<1x128x128xbf16> to vector<128x128xbf16>
    %cst_48 = arith.constant dense<0.000000e+00> : vector<1x128xf32>
    %55 = tpu.matmul %52, %54, %cst_48 {dimension_numbers = #tpu.dot_dimension_numbers<[1], [0], [0], [1], [0, 0, 1, 1], [], []>} : vector<1x128xbf16>, vector<128x128xbf16>, vector<1x128xf32> -> vector<1x128xf32>
    %c0_49 = arith.constant 0 : index
    %c0_50 = arith.constant 0 : index
    %56 = vector.load %arg9[%c0_49, %c0_50] : memref<2x128xf32, #tpu.memory_space<vmem>>, vector<1x128xf32>
    %57 = arith.addf %56, %55 : vector<1x128xf32>
    %c0_51 = arith.constant 0 : index
    %c0_52 = arith.constant 0 : index
    %58 = vector.load %arg9[%c0_51, %c0_52] : memref<2x128xf32, #tpu.memory_space<vmem>>, vector<1x128xf32>
    tpu.vector_store %arg9[%c0_51, %c0_52], %57 {strides = array<i32>} : memref<2x128xf32, #tpu.memory_space<vmem>>, vector<1x128xf32>,
    %c0_53 = arith.constant 0 : index
    %c0_54 = arith.constant 0 : index
    %59 = vector.load %arg9[%c0_53, %c0_54] : memref<2x128xf32, #tpu.memory_space<vmem>>, vector<2x128xf32>
    %c0_55 = arith.constant 0 : index
    %c0_56 = arith.constant 0 : index
    %60 = vector.load %arg6[%c0_55, %c0_56] : memref<1x128xf32, #tpu.memory_space<vmem>>, vector<1x128xf32>
    %61 = vector.broadcast %60 : vector<1x128xf32> to vector<2x128xf32>
    %62 = arith.mulf %59, %61 : vector<2x128xf32>
    %c0_57 = arith.constant 0 : index
    %c0_58 = arith.constant 0 : index
    %63 = vector.load %arg7[%c0_57, %c0_58] : memref<1x128xf32, #tpu.memory_space<vmem>>, vector<1x128xf32>
    %64 = vector.broadcast %63 : vector<1x128xf32> to vector<2x128xf32>
    %65 = arith.addf %62, %64 : vector<2x128xf32>
    %cst_59 = arith.constant 5.000000e-01 : f32
    %66 = vector.broadcast %cst_59 : f32 to vector<2x128xf32>
    %67 = arith.mulf %66, %65 : vector<2x128xf32>
    %cst_60 = arith.constant 4.471500e-02 : f32
    %68 = vector.broadcast %cst_60 : f32 to vector<2x128xf32>
    %69 = arith.mulf %68, %65 : vector<2x128xf32>
    %70 = arith.mulf %69, %65 : vector<2x128xf32>
    %71 = arith.mulf %70, %65 : vector<2x128xf32>
    %72 = arith.addf %65, %71 : vector<2x128xf32>
    %cst_61 = arith.constant 0.797884583 : f32
    %73 = vector.broadcast %cst_61 : f32 to vector<2x128xf32>
    %74 = arith.mulf %73, %72 : vector<2x128xf32>
    %75 = math.tanh %74 : vector<2x128xf32>
    %cst_62 = arith.constant 1.000000e+00 : f32
    %76 = vector.broadcast %cst_62 : f32 to vector<2x128xf32>
    %77 = arith.addf %76, %75 : vector<2x128xf32>
    %78 = arith.mulf %67, %77 : vector<2x128xf32>
    %79 = arith.truncf %78 : vector<2x128xf32> to vector<2x128xbf16>
    %c0_63 = arith.constant 0 : index
    %c0_64 = arith.constant 0 : index
    %c0_65 = arith.constant 0 : index
    %80 = vector.load %arg8[%c0_63, %c0_64, %c0_65] : memref<1x2x128xbf16, #tpu.memory_space<vmem>>, vector<1x2x128xbf16>
    %81 = vector.shape_cast %80 : vector<1x2x128xbf16> to vector<2x128xbf16>
    %82 = vector.shape_cast %79 : vector<2x128xbf16> to vector<1x2x128xbf16>
    tpu.vector_store %arg8[%c0_63, %c0_64, %c0_65], %82 {strides = array<i32>} : memref<1x2x128xbf16, #tpu.memory_space<vmem>>, vector<1x2x128xbf16>,
    return
  }
  func.func @transform_0(%arg0: i32) -> (i32, i32, i32) {
    %c0_i32 = arith.constant 0 : i32
    %c0_i32_0 = arith.constant 0 : i32
    %c0_i32_1 = arith.constant 0 : i32
    return %arg0, %c0_i32, %c0_i32_0 : i32, i32, i32
  }
  func.func @transform_1(%arg0: i32) -> (i32, i32, i32) {
    %c0_i32 = arith.constant 0 : i32
    %c0_i32_0 = arith.constant 0 : i32
    %c0_i32_1 = arith.constant 0 : i32
    %c0_i32_2 = arith.constant 0 : i32
    return %c0_i32, %c0_i32_0, %c0_i32_1 : i32, i32, i32
  }
  func.func @transform_2(%arg0: i32) -> (i32, i32) {
    %c0_i32 = arith.constant 0 : i32
    %c0_i32_0 = arith.constant 0 : i32
    %c0_i32_1 = arith.constant 0 : i32
    return %c0_i32, %c0_i32_0 : i32, i32
  }
  func.func @transform_3(%arg0: i32) -> (i32, i32) {
    %c0_i32 = arith.constant 0 : i32
    %c0_i32_0 = arith.constant 0 : i32
    %c0_i32_1 = arith.constant 0 : i32
    return %c0_i32, %c0_i32_0 : i32, i32
  }
  func.func @transform_4(%arg0: i32) -> (i32, i32, i32) {
    %c0_i32 = arith.constant 0 : i32
    %c0_i32_0 = arith.constant 0 : i32
    %c0_i32_1 = arith.constant 0 : i32
    %c0_i32_2 = arith.constant 0 : i32
    return %c0_i32, %c0_i32_0, %c0_i32_1 : i32, i32, i32
  }
  func.func @transform_5(%arg0: i32) -> (i32, i32) {
    %c0_i32 = arith.constant 0 : i32
    %c0_i32_0 = arith.constant 0 : i32
    %c0_i32_1 = arith.constant 0 : i32
    return %c0_i32, %c0_i32_0 : i32, i32
  }
  func.func @transform_6(%arg0: i32) -> (i32, i32) {
    %c0_i32 = arith.constant 0 : i32
    %c0_i32_0 = arith.constant 0 : i32
    %c0_i32_1 = arith.constant 0 : i32
    return %c0_i32, %c0_i32_0 : i32, i32
  }
  func.func @transform_7(%arg0: i32) -> (i32, i32, i32) {
    %c0_i32 = arith.constant 0 : i32
    %c0_i32_0 = arith.constant 0 : i32
    %c0_i32_1 = arith.constant 0 : i32
    return %arg0, %c0_i32, %c0_i32_0 : i32, i32, i32
  }
}

module attributes {stable_mosaic.version = 11 : i64} {
  func.func @_encoding_block_kernel(%arg0: i32, %arg1: memref<1x1x64xbf16, #tpu.memory_space<vmem>>, %arg2: memref<3x64x128xbf16, #tpu.memory_space<vmem>>, %arg3: memref<1x128xf32, #tpu.memory_space<vmem>>, %arg4: memref<1x128xf32, #tpu.memory_space<vmem>>, %arg5: memref<3x128x128xbf16, #tpu.memory_space<vmem>>, %arg6: memref<1x128xf32, #tpu.memory_space<vmem>>, %arg7: memref<1x128xf32, #tpu.memory_space<vmem>>, %arg8: memref<1x1x128xbf16, #tpu.memory_space<vmem>>, %arg9: memref<1x128xf32, #tpu.memory_space<vmem>>) attributes {dimension_semantics = [#tpu.dimension_semantics<parallel>], iteration_bounds = array<i64: 2>, scalar_prefetch = 0 : i64, scratch_operands = 1 : i64, tpu.core_type = #tpu.core_type<tc>, window_params = [{transform_indices = @transform_0, window_bounds = array<i64: 1, 1, 64>}, {pipeline_mode = #tpu.pipeline_mode<synchronous>, transform_indices = @transform_1, window_bounds = array<i64: 3, 64, 128>}, {pipeline_mode = #tpu.pipeline_mode<synchronous>, transform_indices = @transform_2, window_bounds = array<i64: 1, 128>}, {pipeline_mode = #tpu.pipeline_mode<synchronous>, transform_indices = @transform_3, window_bounds = array<i64: 1, 128>}, {pipeline_mode = #tpu.pipeline_mode<synchronous>, transform_indices = @transform_4, window_bounds = array<i64: 3, 128, 128>}, {pipeline_mode = #tpu.pipeline_mode<synchronous>, transform_indices = @transform_5, window_bounds = array<i64: 1, 128>}, {pipeline_mode = #tpu.pipeline_mode<synchronous>, transform_indices = @transform_6, window_bounds = array<i64: 1, 128>}, {transform_indices = @transform_7, window_bounds = array<i64: 1, 1, 128>}]} {
    %c0 = arith.constant 0 : index
    %c0_0 = arith.constant 0 : index
    %c0_1 = arith.constant 0 : index
    %0 = vector.load %arg1[%c0, %c0_0, %c0_1] : memref<1x1x64xbf16, #tpu.memory_space<vmem>>, vector<1x1x64xbf16>
    %1 = vector.shape_cast %0 : vector<1x1x64xbf16> to vector<1x64xbf16>
    %c1 = arith.constant 1 : index
    %c0_2 = arith.constant 0 : index
    %c0_3 = arith.constant 0 : index
    %2 = vector.load %arg2[%c1, %c0_2, %c0_3] : memref<3x64x128xbf16, #tpu.memory_space<vmem>>, vector<1x64x128xbf16>
    %3 = vector.shape_cast %2 : vector<1x64x128xbf16> to vector<64x128xbf16>
    %cst = arith.constant dense<0.000000e+00> : vector<1x128xf32>
    %4 = tpu.matmul %1, %3, %cst {dimension_numbers = #tpu.dot_dimension_numbers<[1], [0], [0], [1], [0, 0, 1, 1], [], []>} : vector<1x64xbf16>, vector<64x128xbf16>, vector<1x128xf32> -> vector<1x128xf32>
    %c0_4 = arith.constant 0 : index
    %c0_5 = arith.constant 0 : index
    %5 = vector.load %arg9[%c0_4, %c0_5] : memref<1x128xf32, #tpu.memory_space<vmem>>, vector<1x128xf32>
    tpu.vector_store %arg9[%c0_4, %c0_5], %4 {strides = array<i32>} : memref<1x128xf32, #tpu.memory_space<vmem>>, vector<1x128xf32>,
    %c0_6 = arith.constant 0 : index
    %c0_7 = arith.constant 0 : index
    %6 = vector.load %arg9[%c0_6, %c0_7] : memref<1x128xf32, #tpu.memory_space<vmem>>, vector<1x128xf32>
    %c0_8 = arith.constant 0 : index
    %c0_9 = arith.constant 0 : index
    %7 = vector.load %arg3[%c0_8, %c0_9] : memref<1x128xf32, #tpu.memory_space<vmem>>, vector<1x128xf32>
    %8 = arith.mulf %6, %7 : vector<1x128xf32>
    %c0_10 = arith.constant 0 : index
    %c0_11 = arith.constant 0 : index
    %9 = vector.load %arg4[%c0_10, %c0_11] : memref<1x128xf32, #tpu.memory_space<vmem>>, vector<1x128xf32>
    %10 = arith.addf %8, %9 : vector<1x128xf32>
    %cst_12 = arith.constant 5.000000e-01 : f32
    %11 = vector.broadcast %cst_12 : f32 to vector<1x128xf32>
    %12 = arith.mulf %11, %10 : vector<1x128xf32>
    %cst_13 = arith.constant 4.471500e-02 : f32
    %13 = vector.broadcast %cst_13 : f32 to vector<1x128xf32>
    %14 = arith.mulf %13, %10 : vector<1x128xf32>
    %15 = arith.mulf %14, %10 : vector<1x128xf32>
    %16 = arith.mulf %15, %10 : vector<1x128xf32>
    %17 = arith.addf %10, %16 : vector<1x128xf32>
    %cst_14 = arith.constant 0.797884583 : f32
    %18 = vector.broadcast %cst_14 : f32 to vector<1x128xf32>
    %19 = arith.mulf %18, %17 : vector<1x128xf32>
    %20 = math.tanh %19 : vector<1x128xf32>
    %cst_15 = arith.constant 1.000000e+00 : f32
    %21 = vector.broadcast %cst_15 : f32 to vector<1x128xf32>
    %22 = arith.addf %21, %20 : vector<1x128xf32>
    %23 = arith.mulf %12, %22 : vector<1x128xf32>
    %24 = arith.truncf %23 : vector<1x128xf32> to vector<1x128xbf16>
    %c1_16 = arith.constant 1 : index
    %c0_17 = arith.constant 0 : index
    %c0_18 = arith.constant 0 : index
    %25 = vector.load %arg5[%c1_16, %c0_17, %c0_18] : memref<3x128x128xbf16, #tpu.memory_space<vmem>>, vector<1x128x128xbf16>
    %26 = vector.shape_cast %25 : vector<1x128x128xbf16> to vector<128x128xbf16>
    %cst_19 = arith.constant dense<0.000000e+00> : vector<1x128xf32>
    %27 = tpu.matmul %24, %26, %cst_19 {dimension_numbers = #tpu.dot_dimension_numbers<[1], [0], [0], [1], [0, 0, 1, 1], [], []>} : vector<1x128xbf16>, vector<128x128xbf16>, vector<1x128xf32> -> vector<1x128xf32>
    %c0_20 = arith.constant 0 : index
    %c0_21 = arith.constant 0 : index
    %28 = vector.load %arg9[%c0_20, %c0_21] : memref<1x128xf32, #tpu.memory_space<vmem>>, vector<1x128xf32>
    tpu.vector_store %arg9[%c0_20, %c0_21], %27 {strides = array<i32>} : memref<1x128xf32, #tpu.memory_space<vmem>>, vector<1x128xf32>,
    %c0_22 = arith.constant 0 : index
    %c0_23 = arith.constant 0 : index
    %29 = vector.load %arg9[%c0_22, %c0_23] : memref<1x128xf32, #tpu.memory_space<vmem>>, vector<1x128xf32>
    %c0_24 = arith.constant 0 : index
    %c0_25 = arith.constant 0 : index
    %30 = vector.load %arg6[%c0_24, %c0_25] : memref<1x128xf32, #tpu.memory_space<vmem>>, vector<1x128xf32>
    %31 = arith.mulf %29, %30 : vector<1x128xf32>
    %c0_26 = arith.constant 0 : index
    %c0_27 = arith.constant 0 : index
    %32 = vector.load %arg7[%c0_26, %c0_27] : memref<1x128xf32, #tpu.memory_space<vmem>>, vector<1x128xf32>
    %33 = arith.addf %31, %32 : vector<1x128xf32>
    %cst_28 = arith.constant 5.000000e-01 : f32
    %34 = vector.broadcast %cst_28 : f32 to vector<1x128xf32>
    %35 = arith.mulf %34, %33 : vector<1x128xf32>
    %cst_29 = arith.constant 4.471500e-02 : f32
    %36 = vector.broadcast %cst_29 : f32 to vector<1x128xf32>
    %37 = arith.mulf %36, %33 : vector<1x128xf32>
    %38 = arith.mulf %37, %33 : vector<1x128xf32>
    %39 = arith.mulf %38, %33 : vector<1x128xf32>
    %40 = arith.addf %33, %39 : vector<1x128xf32>
    %cst_30 = arith.constant 0.797884583 : f32
    %41 = vector.broadcast %cst_30 : f32 to vector<1x128xf32>
    %42 = arith.mulf %41, %40 : vector<1x128xf32>
    %43 = math.tanh %42 : vector<1x128xf32>
    %cst_31 = arith.constant 1.000000e+00 : f32
    %44 = vector.broadcast %cst_31 : f32 to vector<1x128xf32>
    %45 = arith.addf %44, %43 : vector<1x128xf32>
    %46 = arith.mulf %35, %45 : vector<1x128xf32>
    %47 = arith.truncf %46 : vector<1x128xf32> to vector<1x128xbf16>
    %c0_32 = arith.constant 0 : index
    %c0_33 = arith.constant 0 : index
    %c0_34 = arith.constant 0 : index
    %48 = vector.load %arg8[%c0_32, %c0_33, %c0_34] : memref<1x1x128xbf16, #tpu.memory_space<vmem>>, vector<1x1x128xbf16>
    %49 = vector.shape_cast %48 : vector<1x1x128xbf16> to vector<1x128xbf16>
    %50 = vector.shape_cast %47 : vector<1x128xbf16> to vector<1x1x128xbf16>
    tpu.vector_store %arg8[%c0_32, %c0_33, %c0_34], %50 {strides = array<i32>} : memref<1x1x128xbf16, #tpu.memory_space<vmem>>, vector<1x1x128xbf16>,
    return
  }
  func.func @transform_0(%arg0: i32) -> (i32, i32, i32) {
    %c0_i32 = arith.constant 0 : i32
    %c0_i32_0 = arith.constant 0 : i32
    %c0_i32_1 = arith.constant 0 : i32
    return %arg0, %c0_i32, %c0_i32_0 : i32, i32, i32
  }
  func.func @transform_1(%arg0: i32) -> (i32, i32, i32) {
    %c0_i32 = arith.constant 0 : i32
    %c0_i32_0 = arith.constant 0 : i32
    %c0_i32_1 = arith.constant 0 : i32
    %c0_i32_2 = arith.constant 0 : i32
    return %c0_i32, %c0_i32_0, %c0_i32_1 : i32, i32, i32
  }
  func.func @transform_2(%arg0: i32) -> (i32, i32) {
    %c0_i32 = arith.constant 0 : i32
    %c0_i32_0 = arith.constant 0 : i32
    %c0_i32_1 = arith.constant 0 : i32
    return %c0_i32, %c0_i32_0 : i32, i32
  }
  func.func @transform_3(%arg0: i32) -> (i32, i32) {
    %c0_i32 = arith.constant 0 : i32
    %c0_i32_0 = arith.constant 0 : i32
    %c0_i32_1 = arith.constant 0 : i32
    return %c0_i32, %c0_i32_0 : i32, i32
  }
  func.func @transform_4(%arg0: i32) -> (i32, i32, i32) {
    %c0_i32 = arith.constant 0 : i32
    %c0_i32_0 = arith.constant 0 : i32
    %c0_i32_1 = arith.constant 0 : i32
    %c0_i32_2 = arith.constant 0 : i32
    return %c0_i32, %c0_i32_0, %c0_i32_1 : i32, i32, i32
  }
  func.func @transform_5(%arg0: i32) -> (i32, i32) {
    %c0_i32 = arith.constant 0 : i32
    %c0_i32_0 = arith.constant 0 : i32
    %c0_i32_1 = arith.constant 0 : i32
    return %c0_i32, %c0_i32_0 : i32, i32
  }
  func.func @transform_6(%arg0: i32) -> (i32, i32) {
    %c0_i32 = arith.constant 0 : i32
    %c0_i32_0 = arith.constant 0 : i32
    %c0_i32_1 = arith.constant 0 : i32
    return %c0_i32, %c0_i32_0 : i32, i32
  }
  func.func @transform_7(%arg0: i32) -> (i32, i32, i32) {
    %c0_i32 = arith.constant 0 : i32
    %c0_i32_0 = arith.constant 0 : i32
    %c0_i32_1 = arith.constant 0 : i32
    return %arg0, %c0_i32, %c0_i32_0 : i32, i32, i32
  }
}

module attributes {stable_mosaic.version = 11 : i64} {
  func.func @_encoding_block_kernel(%arg0: i32, %arg1: memref<1x2x128xbf16, #tpu.memory_space<vmem>>, %arg2: memref<1x2x128xbf16, #tpu.memory_space<vmem>>, %arg3: memref<3x128x128xbf16, #tpu.memory_space<vmem>>, %arg4: memref<3x128x128xbf16, #tpu.memory_space<vmem>>, %arg5: memref<1x128xf32, #tpu.memory_space<vmem>>, %arg6: memref<1x128xf32, #tpu.memory_space<vmem>>, %arg7: memref<3x128x128xbf16, #tpu.memory_space<vmem>>, %arg8: memref<1x128xf32, #tpu.memory_space<vmem>>, %arg9: memref<1x128xf32, #tpu.memory_space<vmem>>, %arg10: memref<1x2x128xbf16, #tpu.memory_space<vmem>>, %arg11: memref<2x128xf32, #tpu.memory_space<vmem>>) attributes {dimension_semantics = [#tpu.dimension_semantics<parallel>], iteration_bounds = array<i64: 2>, scalar_prefetch = 0 : i64, scratch_operands = 1 : i64, tpu.core_type = #tpu.core_type<tc>, window_params = [{transform_indices = @transform_0, window_bounds = array<i64: 1, 2, 128>}, {transform_indices = @transform_1, window_bounds = array<i64: 1, 2, 128>}, {pipeline_mode = #tpu.pipeline_mode<synchronous>, transform_indices = @transform_2, window_bounds = array<i64: 3, 128, 128>}, {pipeline_mode = #tpu.pipeline_mode<synchronous>, transform_indices = @transform_3, window_bounds = array<i64: 3, 128, 128>}, {pipeline_mode = #tpu.pipeline_mode<synchronous>, transform_indices = @transform_4, window_bounds = array<i64: 1, 128>}, {pipeline_mode = #tpu.pipeline_mode<synchronous>, transform_indices = @transform_5, window_bounds = array<i64: 1, 128>}, {pipeline_mode = #tpu.pipeline_mode<synchronous>, transform_indices = @transform_6, window_bounds = array<i64: 3, 128, 128>}, {pipeline_mode = #tpu.pipeline_mode<synchronous>, transform_indices = @transform_7, window_bounds = array<i64: 1, 128>}, {pipeline_mode = #tpu.pipeline_mode<synchronous>, transform_indices = @transform_8, window_bounds = array<i64: 1, 128>}, {transform_indices = @transform_9, window_bounds = array<i64: 1, 2, 128>}]} {
    %c0 = arith.constant 0 : index
    %c0_0 = arith.constant 0 : index
    %c0_1 = arith.constant 0 : index
    %0 = vector.load %arg1[%c0, %c0_0, %c0_1] : memref<1x2x128xbf16, #tpu.memory_space<vmem>>, vector<1x2x128xbf16>
    %1 = vector.shape_cast %0 : vector<1x2x128xbf16> to vector<2x128xbf16>
    %c1 = arith.constant 1 : index
    %c0_2 = arith.constant 0 : index
    %c0_3 = arith.constant 0 : index
    %2 = vector.load %arg3[%c1, %c0_2, %c0_3] : memref<3x128x128xbf16, #tpu.memory_space<vmem>>, vector<1x128x128xbf16>
    %3 = vector.shape_cast %2 : vector<1x128x128xbf16> to vector<128x128xbf16>
    %cst = arith.constant dense<0.000000e+00> : vector<2x128xf32>
    %4 = tpu.matmul %1, %3, %cst {dimension_numbers = #tpu.dot_dimension_numbers<[1], [0], [0], [1], [0, 0, 1, 1], [], []>} : vector<2x128xbf16>, vector<128x128xbf16>, vector<2x128xf32> -> vector<2x128xf32>
    %c0_4 = arith.constant 0 : index
    %c0_5 = arith.constant 0 : index
    %5 = vector.load %arg11[%c0_4, %c0_5] : memref<2x128xf32, #tpu.memory_space<vmem>>, vector<2x128xf32>
    tpu.vector_store %arg11[%c0_4, %c0_5], %4 {strides = array<i32>} : memref<2x128xf32, #tpu.memory_space<vmem>>, vector<2x128xf32>,
    %6 = vector.extract_strided_slice %1 {offsets = [0, 0], sizes = [1, 128], strides = [1, 1]} : vector<2x128xbf16> to vector<1x128xbf16>
    %c0_6 = arith.constant 0 : index
    %c0_7 = arith.constant 0 : index
    %c0_8 = arith.constant 0 : index
    %7 = vector.load %arg3[%c0_6, %c0_7, %c0_8] : memref<3x128x128xbf16, #tpu.memory_space<vmem>>, vector<1x128x128xbf16>
    %8 = vector.shape_cast %7 : vector<1x128x128xbf16> to vector<128x128xbf16>
    %cst_9 = arith.constant dense<0.000000e+00> : vector<1x128xf32>
    %9 = tpu.matmul %6, %8, %cst_9 {dimension_numbers = #tpu.dot_dimension_numbers<[1], [0], [0], [1], [0, 0, 1, 1], [], []>} : vector<1x128xbf16>, vector<128x128xbf16>, vector<1x128xf32> -> vector<1x128xf32>
    %c1_10 = arith.constant 1 : index
    %c0_11 = arith.constant 0 : index
    %10 = vector.load %arg11[%c1_10, %c0_11] : memref<2x128xf32, #tpu.memory_space<vmem>>, vector<1x128xf32>
    %11 = arith.addf %10, %9 : vector<1x128xf32>
    %c1_12 = arith.constant 1 : index
    %c0_13 = arith.constant 0 : index
    %12 = vector.load %arg11[%c1_12, %c0_13] : memref<2x128xf32, #tpu.memory_space<vmem>>, vector<1x128xf32>
    tpu.vector_store %arg11[%c1_12, %c0_13], %11 {strides = array<i32>} : memref<2x128xf32, #tpu.memory_space<vmem>>, vector<1x128xf32>,
    %13 = vector.extract_strided_slice %1 {offsets = [1, 0], sizes = [1, 128], strides = [1, 1]} : vector<2x128xbf16> to vector<1x128xbf16>
    %c2 = arith.constant 2 : index
    %c0_14 = arith.constant 0 : index
    %c0_15 = arith.constant 0 : index
    %14 = vector.load %arg3[%c2, %c0_14, %c0_15] : memref<3x128x128xbf16, #tpu.memory_space<vmem>>, vector<1x128x128xbf16>
    %15 = vector.shape_cast %14 : vector<1x128x128xbf16> to vector<128x128xbf16>
    %cst_16 = arith.constant dense<0.000000e+00> : vector<1x128xf32>
    %16 = tpu.matmul %13, %15, %cst_16 {dimension_numbers = #tpu.dot_dimension_numbers<[1], [0], [0], [1], [0, 0, 1, 1], [], []>} : vector<1x128xbf16>, vector<128x128xbf16>, vector<1x128xf32> -> vector<1x128xf32>
    %c0_17 = arith.constant 0 : index
    %c0_18 = arith.constant 0 : index
    %17 = vector.load %arg11[%c0_17, %c0_18] : memref<2x128xf32, #tpu.memory_space<vmem>>, vector<1x128xf32>
    %18 = arith.addf %17, %16 : vector<1x128xf32>
    %c0_19 = arith.constant 0 : index
    %c0_20 = arith.constant 0 : index
    %19 = vector.load %arg11[%c0_19, %c0_20] : memref<2x128xf32, #tpu.memory_space<vmem>>, vector<1x128xf32>
    tpu.vector_store %arg11[%c0_19, %c0_20], %18 {strides = array<i32>} : memref<2x128xf32, #tpu.memory_space<vmem>>, vector<1x128xf32>,
    %c0_21 = arith.constant 0 : index
    %c0_22 = arith.constant 0 : index
    %c0_23 = arith.constant 0 : index
    %20 = vector.load %arg2[%c0_21, %c0_22, %c0_23] : memref<1x2x128xbf16, #tpu.memory_space<vmem>>, vector<1x2x128xbf16>
    %21 = vector.shape_cast %20 : vector<1x2x128xbf16> to vector<2x128xbf16>
    %c1_24 = arith.constant 1 : index
    %c0_25 = arith.constant 0 : index
    %c0_26 = arith.constant 0 : index
    %22 = vector.load %arg4[%c1_24, %c0_25, %c0_26] : memref<3x128x128xbf16, #tpu.memory_space<vmem>>, vector<1x128x128xbf16>
    %23 = vector.shape_cast %22 : vector<1x128x128xbf16> to vector<128x128xbf16>
    %cst_27 = arith.constant dense<0.000000e+00> : vector<2x128xf32>
    %24 = tpu.matmul %21, %23, %cst_27 {dimension_numbers = #tpu.dot_dimension_numbers<[1], [0], [0], [1], [0, 0, 1, 1], [], []>} : vector<2x128xbf16>, vector<128x128xbf16>, vector<2x128xf32> -> vector<2x128xf32>
    %c0_28 = arith.constant 0 : index
    %c0_29 = arith.constant 0 : index
    %25 = vector.load %arg11[%c0_28, %c0_29] : memref<2x128xf32, #tpu.memory_space<vmem>>, vector<2x128xf32>
    %26 = arith.addf %25, %24 : vector<2x128xf32>
    %c0_30 = arith.constant 0 : index
    %c0_31 = arith.constant 0 : index
    %27 = vector.load %arg11[%c0_30, %c0_31] : memref<2x128xf32, #tpu.memory_space<vmem>>, vector<2x128xf32>
    tpu.vector_store %arg11[%c0_30, %c0_31], %26 {strides = array<i32>} : memref<2x128xf32, #tpu.memory_space<vmem>>, vector<2x128xf32>,
    %28 = vector.extract_strided_slice %21 {offsets = [0, 0], sizes = [1, 128], strides = [1, 1]} : vector<2x128xbf16> to vector<1x128xbf16>
    %c0_32 = arith.constant 0 : index
    %c0_33 = arith.constant 0 : index
    %c0_34 = arith.constant 0 : index
    %29 = vector.load %arg4[%c0_32, %c0_33, %c0_34] : memref<3x128x128xbf16, #tpu.memory_space<vmem>>, vector<1x128x128xbf16>
    %30 = vector.shape_cast %29 : vector<1x128x128xbf16> to vector<128x128xbf16>
    %cst_35 = arith.constant dense<0.000000e+00> : vector<1x128xf32>
    %31 = tpu.matmul %28, %30, %cst_35 {dimension_numbers = #tpu.dot_dimension_numbers<[1], [0], [0], [1], [0, 0, 1, 1], [], []>} : vector<1x128xbf16>, vector<128x128xbf16>, vector<1x128xf32> -> vector<1x128xf32>
    %c1_36 = arith.constant 1 : index
    %c0_37 = arith.constant 0 : index
    %32 = vector.load %arg11[%c1_36, %c0_37] : memref<2x128xf32, #tpu.memory_space<vmem>>, vector<1x128xf32>
    %33 = arith.addf %32, %31 : vector<1x128xf32>
    %c1_38 = arith.constant 1 : index
    %c0_39 = arith.constant 0 : index
    %34 = vector.load %arg11[%c1_38, %c0_39] : memref<2x128xf32, #tpu.memory_space<vmem>>, vector<1x128xf32>
    tpu.vector_store %arg11[%c1_38, %c0_39], %33 {strides = array<i32>} : memref<2x128xf32, #tpu.memory_space<vmem>>, vector<1x128xf32>,
    %35 = vector.extract_strided_slice %21 {offsets = [1, 0], sizes = [1, 128], strides = [1, 1]} : vector<2x128xbf16> to vector<1x128xbf16>
    %c2_40 = arith.constant 2 : index
    %c0_41 = arith.constant 0 : index
    %c0_42 = arith.constant 0 : index
    %36 = vector.load %arg4[%c2_40, %c0_41, %c0_42] : memref<3x128x128xbf16, #tpu.memory_space<vmem>>, vector<1x128x128xbf16>
    %37 = vector.shape_cast %36 : vector<1x128x128xbf16> to vector<128x128xbf16>
    %cst_43 = arith.constant dense<0.000000e+00> : vector<1x128xf32>
    %38 = tpu.matmul %35, %37, %cst_43 {dimension_numbers = #tpu.dot_dimension_numbers<[1], [0], [0], [1], [0, 0, 1, 1], [], []>} : vector<1x128xbf16>, vector<128x128xbf16>, vector<1x128xf32> -> vector<1x128xf32>
    %c0_44 = arith.constant 0 : index
    %c0_45 = arith.constant 0 : index
    %39 = vector.load %arg11[%c0_44, %c0_45] : memref<2x128xf32, #tpu.memory_space<vmem>>, vector<1x128xf32>
    %40 = arith.addf %39, %38 : vector<1x128xf32>
    %c0_46 = arith.constant 0 : index
    %c0_47 = arith.constant 0 : index
    %41 = vector.load %arg11[%c0_46, %c0_47] : memref<2x128xf32, #tpu.memory_space<vmem>>, vector<1x128xf32>
    tpu.vector_store %arg11[%c0_46, %c0_47], %40 {strides = array<i32>} : memref<2x128xf32, #tpu.memory_space<vmem>>, vector<1x128xf32>,
    %c0_48 = arith.constant 0 : index
    %c0_49 = arith.constant 0 : index
    %42 = vector.load %arg11[%c0_48, %c0_49] : memref<2x128xf32, #tpu.memory_space<vmem>>, vector<2x128xf32>
    %c0_50 = arith.constant 0 : index
    %c0_51 = arith.constant 0 : index
    %43 = vector.load %arg5[%c0_50, %c0_51] : memref<1x128xf32, #tpu.memory_space<vmem>>, vector<1x128xf32>
    %44 = vector.broadcast %43 : vector<1x128xf32> to vector<2x128xf32>
    %45 = arith.mulf %42, %44 : vector<2x128xf32>
    %c0_52 = arith.constant 0 : index
    %c0_53 = arith.constant 0 : index
    %46 = vector.load %arg6[%c0_52, %c0_53] : memref<1x128xf32, #tpu.memory_space<vmem>>, vector<1x128xf32>
    %47 = vector.broadcast %46 : vector<1x128xf32> to vector<2x128xf32>
    %48 = arith.addf %45, %47 : vector<2x128xf32>
    %cst_54 = arith.constant 5.000000e-01 : f32
    %49 = vector.broadcast %cst_54 : f32 to vector<2x128xf32>
    %50 = arith.mulf %49, %48 : vector<2x128xf32>
    %cst_55 = arith.constant 4.471500e-02 : f32
    %51 = vector.broadcast %cst_55 : f32 to vector<2x128xf32>
    %52 = arith.mulf %51, %48 : vector<2x128xf32>
    %53 = arith.mulf %52, %48 : vector<2x128xf32>
    %54 = arith.mulf %53, %48 : vector<2x128xf32>
    %55 = arith.addf %48, %54 : vector<2x128xf32>
    %cst_56 = arith.constant 0.797884583 : f32
    %56 = vector.broadcast %cst_56 : f32 to vector<2x128xf32>
    %57 = arith.mulf %56, %55 : vector<2x128xf32>
    %58 = math.tanh %57 : vector<2x128xf32>
    %cst_57 = arith.constant 1.000000e+00 : f32
    %59 = vector.broadcast %cst_57 : f32 to vector<2x128xf32>
    %60 = arith.addf %59, %58 : vector<2x128xf32>
    %61 = arith.mulf %50, %60 : vector<2x128xf32>
    %62 = arith.truncf %61 : vector<2x128xf32> to vector<2x128xbf16>
    %c1_58 = arith.constant 1 : index
    %c0_59 = arith.constant 0 : index
    %c0_60 = arith.constant 0 : index
    %63 = vector.load %arg7[%c1_58, %c0_59, %c0_60] : memref<3x128x128xbf16, #tpu.memory_space<vmem>>, vector<1x128x128xbf16>
    %64 = vector.shape_cast %63 : vector<1x128x128xbf16> to vector<128x128xbf16>
    %cst_61 = arith.constant dense<0.000000e+00> : vector<2x128xf32>
    %65 = tpu.matmul %62, %64, %cst_61 {dimension_numbers = #tpu.dot_dimension_numbers<[1], [0], [0], [1], [0, 0, 1, 1], [], []>} : vector<2x128xbf16>, vector<128x128xbf16>, vector<2x128xf32> -> vector<2x128xf32>
    %c0_62 = arith.constant 0 : index
    %c0_63 = arith.constant 0 : index
    %66 = vector.load %arg11[%c0_62, %c0_63] : memref<2x128xf32, #tpu.memory_space<vmem>>, vector<2x128xf32>
    tpu.vector_store %arg11[%c0_62, %c0_63], %65 {strides = array<i32>} : memref<2x128xf32, #tpu.memory_space<vmem>>, vector<2x128xf32>,
    %67 = vector.extract_strided_slice %62 {offsets = [0, 0], sizes = [1, 128], strides = [1, 1]} : vector<2x128xbf16> to vector<1x128xbf16>
    %c0_64 = arith.constant 0 : index
    %c0_65 = arith.constant 0 : index
    %c0_66 = arith.constant 0 : index
    %68 = vector.load %arg7[%c0_64, %c0_65, %c0_66] : memref<3x128x128xbf16, #tpu.memory_space<vmem>>, vector<1x128x128xbf16>
    %69 = vector.shape_cast %68 : vector<1x128x128xbf16> to vector<128x128xbf16>
    %cst_67 = arith.constant dense<0.000000e+00> : vector<1x128xf32>
    %70 = tpu.matmul %67, %69, %cst_67 {dimension_numbers = #tpu.dot_dimension_numbers<[1], [0], [0], [1], [0, 0, 1, 1], [], []>} : vector<1x128xbf16>, vector<128x128xbf16>, vector<1x128xf32> -> vector<1x128xf32>
    %c1_68 = arith.constant 1 : index
    %c0_69 = arith.constant 0 : index
    %71 = vector.load %arg11[%c1_68, %c0_69] : memref<2x128xf32, #tpu.memory_space<vmem>>, vector<1x128xf32>
    %72 = arith.addf %71, %70 : vector<1x128xf32>
    %c1_70 = arith.constant 1 : index
    %c0_71 = arith.constant 0 : index
    %73 = vector.load %arg11[%c1_70, %c0_71] : memref<2x128xf32, #tpu.memory_space<vmem>>, vector<1x128xf32>
    tpu.vector_store %arg11[%c1_70, %c0_71], %72 {strides = array<i32>} : memref<2x128xf32, #tpu.memory_space<vmem>>, vector<1x128xf32>,
    %74 = vector.extract_strided_slice %62 {offsets = [1, 0], sizes = [1, 128], strides = [1, 1]} : vector<2x128xbf16> to vector<1x128xbf16>
    %c2_72 = arith.constant 2 : index
    %c0_73 = arith.constant 0 : index
    %c0_74 = arith.constant 0 : index
    %75 = vector.load %arg7[%c2_72, %c0_73, %c0_74] : memref<3x128x128xbf16, #tpu.memory_space<vmem>>, vector<1x128x128xbf16>
    %76 = vector.shape_cast %75 : vector<1x128x128xbf16> to vector<128x128xbf16>
    %cst_75 = arith.constant dense<0.000000e+00> : vector<1x128xf32>
    %77 = tpu.matmul %74, %76, %cst_75 {dimension_numbers = #tpu.dot_dimension_numbers<[1], [0], [0], [1], [0, 0, 1, 1], [], []>} : vector<1x128xbf16>, vector<128x128xbf16>, vector<1x128xf32> -> vector<1x128xf32>
    %c0_76 = arith.constant 0 : index
    %c0_77 = arith.constant 0 : index
    %78 = vector.load %arg11[%c0_76, %c0_77] : memref<2x128xf32, #tpu.memory_space<vmem>>, vector<1x128xf32>
    %79 = arith.addf %78, %77 : vector<1x128xf32>
    %c0_78 = arith.constant 0 : index
    %c0_79 = arith.constant 0 : index
    %80 = vector.load %arg11[%c0_78, %c0_79] : memref<2x128xf32, #tpu.memory_space<vmem>>, vector<1x128xf32>
    tpu.vector_store %arg11[%c0_78, %c0_79], %79 {strides = array<i32>} : memref<2x128xf32, #tpu.memory_space<vmem>>, vector<1x128xf32>,
    %c0_80 = arith.constant 0 : index
    %c0_81 = arith.constant 0 : index
    %81 = vector.load %arg11[%c0_80, %c0_81] : memref<2x128xf32, #tpu.memory_space<vmem>>, vector<2x128xf32>
    %c0_82 = arith.constant 0 : index
    %c0_83 = arith.constant 0 : index
    %82 = vector.load %arg8[%c0_82, %c0_83] : memref<1x128xf32, #tpu.memory_space<vmem>>, vector<1x128xf32>
    %83 = vector.broadcast %82 : vector<1x128xf32> to vector<2x128xf32>
    %84 = arith.mulf %81, %83 : vector<2x128xf32>
    %c0_84 = arith.constant 0 : index
    %c0_85 = arith.constant 0 : index
    %85 = vector.load %arg9[%c0_84, %c0_85] : memref<1x128xf32, #tpu.memory_space<vmem>>, vector<1x128xf32>
    %86 = vector.broadcast %85 : vector<1x128xf32> to vector<2x128xf32>
    %87 = arith.addf %84, %86 : vector<2x128xf32>
    %cst_86 = arith.constant 5.000000e-01 : f32
    %88 = vector.broadcast %cst_86 : f32 to vector<2x128xf32>
    %89 = arith.mulf %88, %87 : vector<2x128xf32>
    %cst_87 = arith.constant 4.471500e-02 : f32
    %90 = vector.broadcast %cst_87 : f32 to vector<2x128xf32>
    %91 = arith.mulf %90, %87 : vector<2x128xf32>
    %92 = arith.mulf %91, %87 : vector<2x128xf32>
    %93 = arith.mulf %92, %87 : vector<2x128xf32>
    %94 = arith.addf %87, %93 : vector<2x128xf32>
    %cst_88 = arith.constant 0.797884583 : f32
    %95 = vector.broadcast %cst_88 : f32 to vector<2x128xf32>
    %96 = arith.mulf %95, %94 : vector<2x128xf32>
    %97 = math.tanh %96 : vector<2x128xf32>
    %cst_89 = arith.constant 1.000000e+00 : f32
    %98 = vector.broadcast %cst_89 : f32 to vector<2x128xf32>
    %99 = arith.addf %98, %97 : vector<2x128xf32>
    %100 = arith.mulf %89, %99 : vector<2x128xf32>
    %101 = arith.truncf %100 : vector<2x128xf32> to vector<2x128xbf16>
    %c0_90 = arith.constant 0 : index
    %c0_91 = arith.constant 0 : index
    %c0_92 = arith.constant 0 : index
    %102 = vector.load %arg10[%c0_90, %c0_91, %c0_92] : memref<1x2x128xbf16, #tpu.memory_space<vmem>>, vector<1x2x128xbf16>
    %103 = vector.shape_cast %102 : vector<1x2x128xbf16> to vector<2x128xbf16>
    %104 = vector.shape_cast %101 : vector<2x128xbf16> to vector<1x2x128xbf16>
    tpu.vector_store %arg10[%c0_90, %c0_91, %c0_92], %104 {strides = array<i32>} : memref<1x2x128xbf16, #tpu.memory_space<vmem>>, vector<1x2x128xbf16>,
    return
  }
  func.func @transform_0(%arg0: i32) -> (i32, i32, i32) {
    %c0_i32 = arith.constant 0 : i32
    %c0_i32_0 = arith.constant 0 : i32
    %c0_i32_1 = arith.constant 0 : i32
    return %arg0, %c0_i32, %c0_i32_0 : i32, i32, i32
  }
  func.func @transform_1(%arg0: i32) -> (i32, i32, i32) {
    %c0_i32 = arith.constant 0 : i32
    %c0_i32_0 = arith.constant 0 : i32
    %c0_i32_1 = arith.constant 0 : i32
    return %arg0, %c0_i32, %c0_i32_0 : i32, i32, i32
  }
  func.func @transform_2(%arg0: i32) -> (i32, i32, i32) {
    %c0_i32 = arith.constant 0 : i32
    %c0_i32_0 = arith.constant 0 : i32
    %c0_i32_1 = arith.constant 0 : i32
    %c0_i32_2 = arith.constant 0 : i32
    return %c0_i32, %c0_i32_0, %c0_i32_1 : i32, i32, i32
  }
  func.func @transform_3(%arg0: i32) -> (i32, i32, i32) {
    %c0_i32 = arith.constant 0 : i32
    %c0_i32_0 = arith.constant 0 : i32
    %c0_i32_1 = arith.constant 0 : i32
    %c0_i32_2 = arith.constant 0 : i32
    return %c0_i32, %c0_i32_0, %c0_i32_1 : i32, i32, i32
  }
  func.func @transform_4(%arg0: i32) -> (i32, i32) {
    %c0_i32 = arith.constant 0 : i32
    %c0_i32_0 = arith.constant 0 : i32
    %c0_i32_1 = arith.constant 0 : i32
    return %c0_i32, %c0_i32_0 : i32, i32
  }
  func.func @transform_5(%arg0: i32) -> (i32, i32) {
    %c0_i32 = arith.constant 0 : i32
    %c0_i32_0 = arith.constant 0 : i32
    %c0_i32_1 = arith.constant 0 : i32
    return %c0_i32, %c0_i32_0 : i32, i32
  }
  func.func @transform_6(%arg0: i32) -> (i32, i32, i32) {
    %c0_i32 = arith.constant 0 : i32
    %c0_i32_0 = arith.constant 0 : i32
    %c0_i32_1 = arith.constant 0 : i32
    %c0_i32_2 = arith.constant 0 : i32
    return %c0_i32, %c0_i32_0, %c0_i32_1 : i32, i32, i32
  }
  func.func @transform_7(%arg0: i32) -> (i32, i32) {
    %c0_i32 = arith.constant 0 : i32
    %c0_i32_0 = arith.constant 0 : i32
    %c0_i32_1 = arith.constant 0 : i32
    return %c0_i32, %c0_i32_0 : i32, i32
  }
  func.func @transform_8(%arg0: i32) -> (i32, i32) {
    %c0_i32 = arith.constant 0 : i32
    %c0_i32_0 = arith.constant 0 : i32
    %c0_i32_1 = arith.constant 0 : i32
    return %c0_i32, %c0_i32_0 : i32, i32
  }
  func.func @transform_9(%arg0: i32) -> (i32, i32, i32) {
    %c0_i32 = arith.constant 0 : i32
    %c0_i32_0 = arith.constant 0 : i32
    %c0_i32_1 = arith.constant 0 : i32
    return %arg0, %c0_i32, %c0_i32_0 : i32, i32, i32
  }
}

module attributes {stable_mosaic.version = 11 : i64} {
  func.func @_encoding_block_kernel(%arg0: i32, %arg1: memref<1x4x128xbf16, #tpu.memory_space<vmem>>, %arg2: memref<1x4x128xbf16, #tpu.memory_space<vmem>>, %arg3: memref<3x128x128xbf16, #tpu.memory_space<vmem>>, %arg4: memref<3x128x128xbf16, #tpu.memory_space<vmem>>, %arg5: memref<1x128xf32, #tpu.memory_space<vmem>>, %arg6: memref<1x128xf32, #tpu.memory_space<vmem>>, %arg7: memref<3x128x128xbf16, #tpu.memory_space<vmem>>, %arg8: memref<1x128xf32, #tpu.memory_space<vmem>>, %arg9: memref<1x128xf32, #tpu.memory_space<vmem>>, %arg10: memref<1x4x128xbf16, #tpu.memory_space<vmem>>, %arg11: memref<4x128xf32, #tpu.memory_space<vmem>>) attributes {dimension_semantics = [#tpu.dimension_semantics<parallel>], iteration_bounds = array<i64: 2>, scalar_prefetch = 0 : i64, scratch_operands = 1 : i64, tpu.core_type = #tpu.core_type<tc>, window_params = [{transform_indices = @transform_0, window_bounds = array<i64: 1, 4, 128>}, {transform_indices = @transform_1, window_bounds = array<i64: 1, 4, 128>}, {pipeline_mode = #tpu.pipeline_mode<synchronous>, transform_indices = @transform_2, window_bounds = array<i64: 3, 128, 128>}, {pipeline_mode = #tpu.pipeline_mode<synchronous>, transform_indices = @transform_3, window_bounds = array<i64: 3, 128, 128>}, {pipeline_mode = #tpu.pipeline_mode<synchronous>, transform_indices = @transform_4, window_bounds = array<i64: 1, 128>}, {pipeline_mode = #tpu.pipeline_mode<synchronous>, transform_indices = @transform_5, window_bounds = array<i64: 1, 128>}, {pipeline_mode = #tpu.pipeline_mode<synchronous>, transform_indices = @transform_6, window_bounds = array<i64: 3, 128, 128>}, {pipeline_mode = #tpu.pipeline_mode<synchronous>, transform_indices = @transform_7, window_bounds = array<i64: 1, 128>}, {pipeline_mode = #tpu.pipeline_mode<synchronous>, transform_indices = @transform_8, window_bounds = array<i64: 1, 128>}, {transform_indices = @transform_9, window_bounds = array<i64: 1, 4, 128>}]} {
    %c0 = arith.constant 0 : index
    %c0_0 = arith.constant 0 : index
    %c0_1 = arith.constant 0 : index
    %0 = vector.load %arg1[%c0, %c0_0, %c0_1] : memref<1x4x128xbf16, #tpu.memory_space<vmem>>, vector<1x4x128xbf16>
    %1 = vector.shape_cast %0 : vector<1x4x128xbf16> to vector<4x128xbf16>
    %c1 = arith.constant 1 : index
    %c0_2 = arith.constant 0 : index
    %c0_3 = arith.constant 0 : index
    %2 = vector.load %arg3[%c1, %c0_2, %c0_3] : memref<3x128x128xbf16, #tpu.memory_space<vmem>>, vector<1x128x128xbf16>
    %3 = vector.shape_cast %2 : vector<1x128x128xbf16> to vector<128x128xbf16>
    %cst = arith.constant dense<0.000000e+00> : vector<4x128xf32>
    %4 = tpu.matmul %1, %3, %cst {dimension_numbers = #tpu.dot_dimension_numbers<[1], [0], [0], [1], [0, 0, 1, 1], [], []>} : vector<4x128xbf16>, vector<128x128xbf16>, vector<4x128xf32> -> vector<4x128xf32>
    %c0_4 = arith.constant 0 : index
    %c0_5 = arith.constant 0 : index
    %5 = vector.load %arg11[%c0_4, %c0_5] : memref<4x128xf32, #tpu.memory_space<vmem>>, vector<4x128xf32>
    tpu.vector_store %arg11[%c0_4, %c0_5], %4 {strides = array<i32>} : memref<4x128xf32, #tpu.memory_space<vmem>>, vector<4x128xf32>,
    %6 = vector.extract_strided_slice %1 {offsets = [0, 0], sizes = [3, 128], strides = [1, 1]} : vector<4x128xbf16> to vector<3x128xbf16>
    %c0_6 = arith.constant 0 : index
    %c0_7 = arith.constant 0 : index
    %c0_8 = arith.constant 0 : index
    %7 = vector.load %arg3[%c0_6, %c0_7, %c0_8] : memref<3x128x128xbf16, #tpu.memory_space<vmem>>, vector<1x128x128xbf16>
    %8 = vector.shape_cast %7 : vector<1x128x128xbf16> to vector<128x128xbf16>
    %cst_9 = arith.constant dense<0.000000e+00> : vector<3x128xf32>
    %9 = tpu.matmul %6, %8, %cst_9 {dimension_numbers = #tpu.dot_dimension_numbers<[1], [0], [0], [1], [0, 0, 1, 1], [], []>} : vector<3x128xbf16>, vector<128x128xbf16>, vector<3x128xf32> -> vector<3x128xf32>
    %c1_10 = arith.constant 1 : index
    %c0_11 = arith.constant 0 : index
    %10 = vector.load %arg11[%c1_10, %c0_11] : memref<4x128xf32, #tpu.memory_space<vmem>>, vector<3x128xf32>
    %11 = arith.addf %10, %9 : vector<3x128xf32>
    %c1_12 = arith.constant 1 : index
    %c0_13 = arith.constant 0 : index
    %12 = vector.load %arg11[%c1_12, %c0_13] : memref<4x128xf32, #tpu.memory_space<vmem>>, vector<3x128xf32>
    tpu.vector_store %arg11[%c1_12, %c0_13], %11 {strides = array<i32>} : memref<4x128xf32, #tpu.memory_space<vmem>>, vector<3x128xf32>,
    %13 = vector.extract_strided_slice %1 {offsets = [1, 0], sizes = [3, 128], strides = [1, 1]} : vector<4x128xbf16> to vector<3x128xbf16>
    %c2 = arith.constant 2 : index
    %c0_14 = arith.constant 0 : index
    %c0_15 = arith.constant 0 : index
    %14 = vector.load %arg3[%c2, %c0_14, %c0_15] : memref<3x128x128xbf16, #tpu.memory_space<vmem>>, vector<1x128x128xbf16>
    %15 = vector.shape_cast %14 : vector<1x128x128xbf16> to vector<128x128xbf16>
    %cst_16 = arith.constant dense<0.000000e+00> : vector<3x128xf32>
    %16 = tpu.matmul %13, %15, %cst_16 {dimension_numbers = #tpu.dot_dimension_numbers<[1], [0], [0], [1], [0, 0, 1, 1], [], []>} : vector<3x128xbf16>, vector<128x128xbf16>, vector<3x128xf32> -> vector<3x128xf32>
    %c0_17 = arith.constant 0 : index
    %c0_18 = arith.constant 0 : index
    %17 = vector.load %arg11[%c0_17, %c0_18] : memref<4x128xf32, #tpu.memory_space<vmem>>, vector<3x128xf32>
    %18 = arith.addf %17, %16 : vector<3x128xf32>
    %c0_19 = arith.constant 0 : index
    %c0_20 = arith.constant 0 : index
    %19 = vector.load %arg11[%c0_19, %c0_20] : memref<4x128xf32, #tpu.memory_space<vmem>>, vector<3x128xf32>
    tpu.vector_store %arg11[%c0_19, %c0_20], %18 {strides = array<i32>} : memref<4x128xf32, #tpu.memory_space<vmem>>, vector<3x128xf32>,
    %c0_21 = arith.constant 0 : index
    %c0_22 = arith.constant 0 : index
    %c0_23 = arith.constant 0 : index
    %20 = vector.load %arg2[%c0_21, %c0_22, %c0_23] : memref<1x4x128xbf16, #tpu.memory_space<vmem>>, vector<1x4x128xbf16>
    %21 = vector.shape_cast %20 : vector<1x4x128xbf16> to vector<4x128xbf16>
    %c1_24 = arith.constant 1 : index
    %c0_25 = arith.constant 0 : index
    %c0_26 = arith.constant 0 : index
    %22 = vector.load %arg4[%c1_24, %c0_25, %c0_26] : memref<3x128x128xbf16, #tpu.memory_space<vmem>>, vector<1x128x128xbf16>
    %23 = vector.shape_cast %22 : vector<1x128x128xbf16> to vector<128x128xbf16>
    %cst_27 = arith.constant dense<0.000000e+00> : vector<4x128xf32>
    %24 = tpu.matmul %21, %23, %cst_27 {dimension_numbers = #tpu.dot_dimension_numbers<[1], [0], [0], [1], [0, 0, 1, 1], [], []>} : vector<4x128xbf16>, vector<128x128xbf16>, vector<4x128xf32> -> vector<4x128xf32>
    %c0_28 = arith.constant 0 : index
    %c0_29 = arith.constant 0 : index
    %25 = vector.load %arg11[%c0_28, %c0_29] : memref<4x128xf32, #tpu.memory_space<vmem>>, vector<4x128xf32>
    %26 = arith.addf %25, %24 : vector<4x128xf32>
    %c0_30 = arith.constant 0 : index
    %c0_31 = arith.constant 0 : index
    %27 = vector.load %arg11[%c0_30, %c0_31] : memref<4x128xf32, #tpu.memory_space<vmem>>, vector<4x128xf32>
    tpu.vector_store %arg11[%c0_30, %c0_31], %26 {strides = array<i32>} : memref<4x128xf32, #tpu.memory_space<vmem>>, vector<4x128xf32>,
    %28 = vector.extract_strided_slice %21 {offsets = [0, 0], sizes = [3, 128], strides = [1, 1]} : vector<4x128xbf16> to vector<3x128xbf16>
    %c0_32 = arith.constant 0 : index
    %c0_33 = arith.constant 0 : index
    %c0_34 = arith.constant 0 : index
    %29 = vector.load %arg4[%c0_32, %c0_33, %c0_34] : memref<3x128x128xbf16, #tpu.memory_space<vmem>>, vector<1x128x128xbf16>
    %30 = vector.shape_cast %29 : vector<1x128x128xbf16> to vector<128x128xbf16>
    %cst_35 = arith.constant dense<0.000000e+00> : vector<3x128xf32>
    %31 = tpu.matmul %28, %30, %cst_35 {dimension_numbers = #tpu.dot_dimension_numbers<[1], [0], [0], [1], [0, 0, 1, 1], [], []>} : vector<3x128xbf16>, vector<128x128xbf16>, vector<3x128xf32> -> vector<3x128xf32>
    %c1_36 = arith.constant 1 : index
    %c0_37 = arith.constant 0 : index
    %32 = vector.load %arg11[%c1_36, %c0_37] : memref<4x128xf32, #tpu.memory_space<vmem>>, vector<3x128xf32>
    %33 = arith.addf %32, %31 : vector<3x128xf32>
    %c1_38 = arith.constant 1 : index
    %c0_39 = arith.constant 0 : index
    %34 = vector.load %arg11[%c1_38, %c0_39] : memref<4x128xf32, #tpu.memory_space<vmem>>, vector<3x128xf32>
    tpu.vector_store %arg11[%c1_38, %c0_39], %33 {strides = array<i32>} : memref<4x128xf32, #tpu.memory_space<vmem>>, vector<3x128xf32>,
    %35 = vector.extract_strided_slice %21 {offsets = [1, 0], sizes = [3, 128], strides = [1, 1]} : vector<4x128xbf16> to vector<3x128xbf16>
    %c2_40 = arith.constant 2 : index
    %c0_41 = arith.constant 0 : index
    %c0_42 = arith.constant 0 : index
    %36 = vector.load %arg4[%c2_40, %c0_41, %c0_42] : memref<3x128x128xbf16, #tpu.memory_space<vmem>>, vector<1x128x128xbf16>
    %37 = vector.shape_cast %36 : vector<1x128x128xbf16> to vector<128x128xbf16>
    %cst_43 = arith.constant dense<0.000000e+00> : vector<3x128xf32>
    %38 = tpu.matmul %35, %37, %cst_43 {dimension_numbers = #tpu.dot_dimension_numbers<[1], [0], [0], [1], [0, 0, 1, 1], [], []>} : vector<3x128xbf16>, vector<128x128xbf16>, vector<3x128xf32> -> vector<3x128xf32>
    %c0_44 = arith.constant 0 : index
    %c0_45 = arith.constant 0 : index
    %39 = vector.load %arg11[%c0_44, %c0_45] : memref<4x128xf32, #tpu.memory_space<vmem>>, vector<3x128xf32>
    %40 = arith.addf %39, %38 : vector<3x128xf32>
    %c0_46 = arith.constant 0 : index
    %c0_47 = arith.constant 0 : index
    %41 = vector.load %arg11[%c0_46, %c0_47] : memref<4x128xf32, #tpu.memory_space<vmem>>, vector<3x128xf32>
    tpu.vector_store %arg11[%c0_46, %c0_47], %40 {strides = array<i32>} : memref<4x128xf32, #tpu.memory_space<vmem>>, vector<3x128xf32>,
    %c0_48 = arith.constant 0 : index
    %c0_49 = arith.constant 0 : index
    %42 = vector.load %arg11[%c0_48, %c0_49] : memref<4x128xf32, #tpu.memory_space<vmem>>, vector<4x128xf32>
    %c0_50 = arith.constant 0 : index
    %c0_51 = arith.constant 0 : index
    %43 = vector.load %arg5[%c0_50, %c0_51] : memref<1x128xf32, #tpu.memory_space<vmem>>, vector<1x128xf32>
    %44 = vector.broadcast %43 : vector<1x128xf32> to vector<4x128xf32>
    %45 = arith.mulf %42, %44 : vector<4x128xf32>
    %c0_52 = arith.constant 0 : index
    %c0_53 = arith.constant 0 : index
    %46 = vector.load %arg6[%c0_52, %c0_53] : memref<1x128xf32, #tpu.memory_space<vmem>>, vector<1x128xf32>
    %47 = vector.broadcast %46 : vector<1x128xf32> to vector<4x128xf32>
    %48 = arith.addf %45, %47 : vector<4x128xf32>
    %cst_54 = arith.constant 5.000000e-01 : f32
    %49 = vector.broadcast %cst_54 : f32 to vector<4x128xf32>
    %50 = arith.mulf %49, %48 : vector<4x128xf32>
    %cst_55 = arith.constant 4.471500e-02 : f32
    %51 = vector.broadcast %cst_55 : f32 to vector<4x128xf32>
    %52 = arith.mulf %51, %48 : vector<4x128xf32>
    %53 = arith.mulf %52, %48 : vector<4x128xf32>
    %54 = arith.mulf %53, %48 : vector<4x128xf32>
    %55 = arith.addf %48, %54 : vector<4x128xf32>
    %cst_56 = arith.constant 0.797884583 : f32
    %56 = vector.broadcast %cst_56 : f32 to vector<4x128xf32>
    %57 = arith.mulf %56, %55 : vector<4x128xf32>
    %58 = math.tanh %57 : vector<4x128xf32>
    %cst_57 = arith.constant 1.000000e+00 : f32
    %59 = vector.broadcast %cst_57 : f32 to vector<4x128xf32>
    %60 = arith.addf %59, %58 : vector<4x128xf32>
    %61 = arith.mulf %50, %60 : vector<4x128xf32>
    %62 = arith.truncf %61 : vector<4x128xf32> to vector<4x128xbf16>
    %c1_58 = arith.constant 1 : index
    %c0_59 = arith.constant 0 : index
    %c0_60 = arith.constant 0 : index
    %63 = vector.load %arg7[%c1_58, %c0_59, %c0_60] : memref<3x128x128xbf16, #tpu.memory_space<vmem>>, vector<1x128x128xbf16>
    %64 = vector.shape_cast %63 : vector<1x128x128xbf16> to vector<128x128xbf16>
    %cst_61 = arith.constant dense<0.000000e+00> : vector<4x128xf32>
    %65 = tpu.matmul %62, %64, %cst_61 {dimension_numbers = #tpu.dot_dimension_numbers<[1], [0], [0], [1], [0, 0, 1, 1], [], []>} : vector<4x128xbf16>, vector<128x128xbf16>, vector<4x128xf32> -> vector<4x128xf32>
    %c0_62 = arith.constant 0 : index
    %c0_63 = arith.constant 0 : index
    %66 = vector.load %arg11[%c0_62, %c0_63] : memref<4x128xf32, #tpu.memory_space<vmem>>, vector<4x128xf32>
    tpu.vector_store %arg11[%c0_62, %c0_63], %65 {strides = array<i32>} : memref<4x128xf32, #tpu.memory_space<vmem>>, vector<4x128xf32>,
    %67 = vector.extract_strided_slice %62 {offsets = [0, 0], sizes = [3, 128], strides = [1, 1]} : vector<4x128xbf16> to vector<3x128xbf16>
    %c0_64 = arith.constant 0 : index
    %c0_65 = arith.constant 0 : index
    %c0_66 = arith.constant 0 : index
    %68 = vector.load %arg7[%c0_64, %c0_65, %c0_66] : memref<3x128x128xbf16, #tpu.memory_space<vmem>>, vector<1x128x128xbf16>
    %69 = vector.shape_cast %68 : vector<1x128x128xbf16> to vector<128x128xbf16>
    %cst_67 = arith.constant dense<0.000000e+00> : vector<3x128xf32>
    %70 = tpu.matmul %67, %69, %cst_67 {dimension_numbers = #tpu.dot_dimension_numbers<[1], [0], [0], [1], [0, 0, 1, 1], [], []>} : vector<3x128xbf16>, vector<128x128xbf16>, vector<3x128xf32> -> vector<3x128xf32>
    %c1_68 = arith.constant 1 : index
    %c0_69 = arith.constant 0 : index
    %71 = vector.load %arg11[%c1_68, %c0_69] : memref<4x128xf32, #tpu.memory_space<vmem>>, vector<3x128xf32>
    %72 = arith.addf %71, %70 : vector<3x128xf32>
    %c1_70 = arith.constant 1 : index
    %c0_71 = arith.constant 0 : index
    %73 = vector.load %arg11[%c1_70, %c0_71] : memref<4x128xf32, #tpu.memory_space<vmem>>, vector<3x128xf32>
    tpu.vector_store %arg11[%c1_70, %c0_71], %72 {strides = array<i32>} : memref<4x128xf32, #tpu.memory_space<vmem>>, vector<3x128xf32>,
    %74 = vector.extract_strided_slice %62 {offsets = [1, 0], sizes = [3, 128], strides = [1, 1]} : vector<4x128xbf16> to vector<3x128xbf16>
    %c2_72 = arith.constant 2 : index
    %c0_73 = arith.constant 0 : index
    %c0_74 = arith.constant 0 : index
    %75 = vector.load %arg7[%c2_72, %c0_73, %c0_74] : memref<3x128x128xbf16, #tpu.memory_space<vmem>>, vector<1x128x128xbf16>
    %76 = vector.shape_cast %75 : vector<1x128x128xbf16> to vector<128x128xbf16>
    %cst_75 = arith.constant dense<0.000000e+00> : vector<3x128xf32>
    %77 = tpu.matmul %74, %76, %cst_75 {dimension_numbers = #tpu.dot_dimension_numbers<[1], [0], [0], [1], [0, 0, 1, 1], [], []>} : vector<3x128xbf16>, vector<128x128xbf16>, vector<3x128xf32> -> vector<3x128xf32>
    %c0_76 = arith.constant 0 : index
    %c0_77 = arith.constant 0 : index
    %78 = vector.load %arg11[%c0_76, %c0_77] : memref<4x128xf32, #tpu.memory_space<vmem>>, vector<3x128xf32>
    %79 = arith.addf %78, %77 : vector<3x128xf32>
    %c0_78 = arith.constant 0 : index
    %c0_79 = arith.constant 0 : index
    %80 = vector.load %arg11[%c0_78, %c0_79] : memref<4x128xf32, #tpu.memory_space<vmem>>, vector<3x128xf32>
    tpu.vector_store %arg11[%c0_78, %c0_79], %79 {strides = array<i32>} : memref<4x128xf32, #tpu.memory_space<vmem>>, vector<3x128xf32>,
    %c0_80 = arith.constant 0 : index
    %c0_81 = arith.constant 0 : index
    %81 = vector.load %arg11[%c0_80, %c0_81] : memref<4x128xf32, #tpu.memory_space<vmem>>, vector<4x128xf32>
    %c0_82 = arith.constant 0 : index
    %c0_83 = arith.constant 0 : index
    %82 = vector.load %arg8[%c0_82, %c0_83] : memref<1x128xf32, #tpu.memory_space<vmem>>, vector<1x128xf32>
    %83 = vector.broadcast %82 : vector<1x128xf32> to vector<4x128xf32>
    %84 = arith.mulf %81, %83 : vector<4x128xf32>
    %c0_84 = arith.constant 0 : index
    %c0_85 = arith.constant 0 : index
    %85 = vector.load %arg9[%c0_84, %c0_85] : memref<1x128xf32, #tpu.memory_space<vmem>>, vector<1x128xf32>
    %86 = vector.broadcast %85 : vector<1x128xf32> to vector<4x128xf32>
    %87 = arith.addf %84, %86 : vector<4x128xf32>
    %cst_86 = arith.constant 5.000000e-01 : f32
    %88 = vector.broadcast %cst_86 : f32 to vector<4x128xf32>
    %89 = arith.mulf %88, %87 : vector<4x128xf32>
    %cst_87 = arith.constant 4.471500e-02 : f32
    %90 = vector.broadcast %cst_87 : f32 to vector<4x128xf32>
    %91 = arith.mulf %90, %87 : vector<4x128xf32>
    %92 = arith.mulf %91, %87 : vector<4x128xf32>
    %93 = arith.mulf %92, %87 : vector<4x128xf32>
    %94 = arith.addf %87, %93 : vector<4x128xf32>
    %cst_88 = arith.constant 0.797884583 : f32
    %95 = vector.broadcast %cst_88 : f32 to vector<4x128xf32>
    %96 = arith.mulf %95, %94 : vector<4x128xf32>
    %97 = math.tanh %96 : vector<4x128xf32>
    %cst_89 = arith.constant 1.000000e+00 : f32
    %98 = vector.broadcast %cst_89 : f32 to vector<4x128xf32>
    %99 = arith.addf %98, %97 : vector<4x128xf32>
    %100 = arith.mulf %89, %99 : vector<4x128xf32>
    %101 = arith.truncf %100 : vector<4x128xf32> to vector<4x128xbf16>
    %c0_90 = arith.constant 0 : index
    %c0_91 = arith.constant 0 : index
    %c0_92 = arith.constant 0 : index
    %102 = vector.load %arg10[%c0_90, %c0_91, %c0_92] : memref<1x4x128xbf16, #tpu.memory_space<vmem>>, vector<1x4x128xbf16>
    %103 = vector.shape_cast %102 : vector<1x4x128xbf16> to vector<4x128xbf16>
    %104 = vector.shape_cast %101 : vector<4x128xbf16> to vector<1x4x128xbf16>
    tpu.vector_store %arg10[%c0_90, %c0_91, %c0_92], %104 {strides = array<i32>} : memref<1x4x128xbf16, #tpu.memory_space<vmem>>, vector<1x4x128xbf16>,
    return
  }
  func.func @transform_0(%arg0: i32) -> (i32, i32, i32) {
    %c0_i32 = arith.constant 0 : i32
    %c0_i32_0 = arith.constant 0 : i32
    %c0_i32_1 = arith.constant 0 : i32
    return %arg0, %c0_i32, %c0_i32_0 : i32, i32, i32
  }
  func.func @transform_1(%arg0: i32) -> (i32, i32, i32) {
    %c0_i32 = arith.constant 0 : i32
    %c0_i32_0 = arith.constant 0 : i32
    %c0_i32_1 = arith.constant 0 : i32
    return %arg0, %c0_i32, %c0_i32_0 : i32, i32, i32
  }
  func.func @transform_2(%arg0: i32) -> (i32, i32, i32) {
    %c0_i32 = arith.constant 0 : i32
    %c0_i32_0 = arith.constant 0 : i32
    %c0_i32_1 = arith.constant 0 : i32
    %c0_i32_2 = arith.constant 0 : i32
    return %c0_i32, %c0_i32_0, %c0_i32_1 : i32, i32, i32
  }
  func.func @transform_3(%arg0: i32) -> (i32, i32, i32) {
    %c0_i32 = arith.constant 0 : i32
    %c0_i32_0 = arith.constant 0 : i32
    %c0_i32_1 = arith.constant 0 : i32
    %c0_i32_2 = arith.constant 0 : i32
    return %c0_i32, %c0_i32_0, %c0_i32_1 : i32, i32, i32
  }
  func.func @transform_4(%arg0: i32) -> (i32, i32) {
    %c0_i32 = arith.constant 0 : i32
    %c0_i32_0 = arith.constant 0 : i32
    %c0_i32_1 = arith.constant 0 : i32
    return %c0_i32, %c0_i32_0 : i32, i32
  }
  func.func @transform_5(%arg0: i32) -> (i32, i32) {
    %c0_i32 = arith.constant 0 : i32
    %c0_i32_0 = arith.constant 0 : i32
    %c0_i32_1 = arith.constant 0 : i32
    return %c0_i32, %c0_i32_0 : i32, i32
  }
  func.func @transform_6(%arg0: i32) -> (i32, i32, i32) {
    %c0_i32 = arith.constant 0 : i32
    %c0_i32_0 = arith.constant 0 : i32
    %c0_i32_1 = arith.constant 0 : i32
    %c0_i32_2 = arith.constant 0 : i32
    return %c0_i32, %c0_i32_0, %c0_i32_1 : i32, i32, i32
  }
  func.func @transform_7(%arg0: i32) -> (i32, i32) {
    %c0_i32 = arith.constant 0 : i32
    %c0_i32_0 = arith.constant 0 : i32
    %c0_i32_1 = arith.constant 0 : i32
    return %c0_i32, %c0_i32_0 : i32, i32
  }
  func.func @transform_8(%arg0: i32) -> (i32, i32) {
    %c0_i32 = arith.constant 0 : i32
    %c0_i32_0 = arith.constant 0 : i32
    %c0_i32_1 = arith.constant 0 : i32
    return %c0_i32, %c0_i32_0 : i32, i32
  }
  func.func @transform_9(%arg0: i32) -> (i32, i32, i32) {
    %c0_i32 = arith.constant 0 : i32
    %c0_i32_0 = arith.constant 0 : i32
    %c0_i32_1 = arith.constant 0 : i32
    return %arg0, %c0_i32, %c0_i32_0 : i32, i32, i32
  }
}

module attributes {stable_mosaic.version = 11 : i64} {
  func.func @_encoding_block_kernel(%arg0: i32, %arg1: memref<1x8x128xbf16, #tpu.memory_space<vmem>>, %arg2: memref<1x8x128xbf16, #tpu.memory_space<vmem>>, %arg3: memref<3x128x128xbf16, #tpu.memory_space<vmem>>, %arg4: memref<3x128x128xbf16, #tpu.memory_space<vmem>>, %arg5: memref<1x128xf32, #tpu.memory_space<vmem>>, %arg6: memref<1x128xf32, #tpu.memory_space<vmem>>, %arg7: memref<3x128x128xbf16, #tpu.memory_space<vmem>>, %arg8: memref<1x128xf32, #tpu.memory_space<vmem>>, %arg9: memref<1x128xf32, #tpu.memory_space<vmem>>, %arg10: memref<1x8x128xbf16, #tpu.memory_space<vmem>>, %arg11: memref<8x128xf32, #tpu.memory_space<vmem>>) attributes {dimension_semantics = [#tpu.dimension_semantics<parallel>], iteration_bounds = array<i64: 2>, scalar_prefetch = 0 : i64, scratch_operands = 1 : i64, tpu.core_type = #tpu.core_type<tc>, window_params = [{transform_indices = @transform_0, window_bounds = array<i64: 1, 8, 128>}, {transform_indices = @transform_1, window_bounds = array<i64: 1, 8, 128>}, {pipeline_mode = #tpu.pipeline_mode<synchronous>, transform_indices = @transform_2, window_bounds = array<i64: 3, 128, 128>}, {pipeline_mode = #tpu.pipeline_mode<synchronous>, transform_indices = @transform_3, window_bounds = array<i64: 3, 128, 128>}, {pipeline_mode = #tpu.pipeline_mode<synchronous>, transform_indices = @transform_4, window_bounds = array<i64: 1, 128>}, {pipeline_mode = #tpu.pipeline_mode<synchronous>, transform_indices = @transform_5, window_bounds = array<i64: 1, 128>}, {pipeline_mode = #tpu.pipeline_mode<synchronous>, transform_indices = @transform_6, window_bounds = array<i64: 3, 128, 128>}, {pipeline_mode = #tpu.pipeline_mode<synchronous>, transform_indices = @transform_7, window_bounds = array<i64: 1, 128>}, {pipeline_mode = #tpu.pipeline_mode<synchronous>, transform_indices = @transform_8, window_bounds = array<i64: 1, 128>}, {transform_indices = @transform_9, window_bounds = array<i64: 1, 8, 128>}]} {
    %c0 = arith.constant 0 : index
    %c0_0 = arith.constant 0 : index
    %c0_1 = arith.constant 0 : index
    %0 = vector.load %arg1[%c0, %c0_0, %c0_1] : memref<1x8x128xbf16, #tpu.memory_space<vmem>>, vector<1x8x128xbf16>
    %1 = vector.shape_cast %0 : vector<1x8x128xbf16> to vector<8x128xbf16>
    %c1 = arith.constant 1 : index
    %c0_2 = arith.constant 0 : index
    %c0_3 = arith.constant 0 : index
    %2 = vector.load %arg3[%c1, %c0_2, %c0_3] : memref<3x128x128xbf16, #tpu.memory_space<vmem>>, vector<1x128x128xbf16>
    %3 = vector.shape_cast %2 : vector<1x128x128xbf16> to vector<128x128xbf16>
    %cst = arith.constant dense<0.000000e+00> : vector<8x128xf32>
    %4 = tpu.matmul %1, %3, %cst {dimension_numbers = #tpu.dot_dimension_numbers<[1], [0], [0], [1], [0, 0, 1, 1], [], []>} : vector<8x128xbf16>, vector<128x128xbf16>, vector<8x128xf32> -> vector<8x128xf32>
    %c0_4 = arith.constant 0 : index
    %c0_5 = arith.constant 0 : index
    %5 = vector.load %arg11[%c0_4, %c0_5] : memref<8x128xf32, #tpu.memory_space<vmem>>, vector<8x128xf32>
    tpu.vector_store %arg11[%c0_4, %c0_5], %4 {strides = array<i32>} : memref<8x128xf32, #tpu.memory_space<vmem>>, vector<8x128xf32>,
    %6 = vector.extract_strided_slice %1 {offsets = [0, 0], sizes = [7, 128], strides = [1, 1]} : vector<8x128xbf16> to vector<7x128xbf16>
    %c0_6 = arith.constant 0 : index
    %c0_7 = arith.constant 0 : index
    %c0_8 = arith.constant 0 : index
    %7 = vector.load %arg3[%c0_6, %c0_7, %c0_8] : memref<3x128x128xbf16, #tpu.memory_space<vmem>>, vector<1x128x128xbf16>
    %8 = vector.shape_cast %7 : vector<1x128x128xbf16> to vector<128x128xbf16>
    %cst_9 = arith.constant dense<0.000000e+00> : vector<7x128xf32>
    %9 = tpu.matmul %6, %8, %cst_9 {dimension_numbers = #tpu.dot_dimension_numbers<[1], [0], [0], [1], [0, 0, 1, 1], [], []>} : vector<7x128xbf16>, vector<128x128xbf16>, vector<7x128xf32> -> vector<7x128xf32>
    %c1_10 = arith.constant 1 : index
    %c0_11 = arith.constant 0 : index
    %10 = vector.load %arg11[%c1_10, %c0_11] : memref<8x128xf32, #tpu.memory_space<vmem>>, vector<7x128xf32>
    %11 = arith.addf %10, %9 : vector<7x128xf32>
    %c1_12 = arith.constant 1 : index
    %c0_13 = arith.constant 0 : index
    %12 = vector.load %arg11[%c1_12, %c0_13] : memref<8x128xf32, #tpu.memory_space<vmem>>, vector<7x128xf32>
    tpu.vector_store %arg11[%c1_12, %c0_13], %11 {strides = array<i32>} : memref<8x128xf32, #tpu.memory_space<vmem>>, vector<7x128xf32>,
    %13 = vector.extract_strided_slice %1 {offsets = [1, 0], sizes = [7, 128], strides = [1, 1]} : vector<8x128xbf16> to vector<7x128xbf16>
    %c2 = arith.constant 2 : index
    %c0_14 = arith.constant 0 : index
    %c0_15 = arith.constant 0 : index
    %14 = vector.load %arg3[%c2, %c0_14, %c0_15] : memref<3x128x128xbf16, #tpu.memory_space<vmem>>, vector<1x128x128xbf16>
    %15 = vector.shape_cast %14 : vector<1x128x128xbf16> to vector<128x128xbf16>
    %cst_16 = arith.constant dense<0.000000e+00> : vector<7x128xf32>
    %16 = tpu.matmul %13, %15, %cst_16 {dimension_numbers = #tpu.dot_dimension_numbers<[1], [0], [0], [1], [0, 0, 1, 1], [], []>} : vector<7x128xbf16>, vector<128x128xbf16>, vector<7x128xf32> -> vector<7x128xf32>
    %c0_17 = arith.constant 0 : index
    %c0_18 = arith.constant 0 : index
    %17 = vector.load %arg11[%c0_17, %c0_18] : memref<8x128xf32, #tpu.memory_space<vmem>>, vector<7x128xf32>
    %18 = arith.addf %17, %16 : vector<7x128xf32>
    %c0_19 = arith.constant 0 : index
    %c0_20 = arith.constant 0 : index
    %19 = vector.load %arg11[%c0_19, %c0_20] : memref<8x128xf32, #tpu.memory_space<vmem>>, vector<7x128xf32>
    tpu.vector_store %arg11[%c0_19, %c0_20], %18 {strides = array<i32>} : memref<8x128xf32, #tpu.memory_space<vmem>>, vector<7x128xf32>,
    %c0_21 = arith.constant 0 : index
    %c0_22 = arith.constant 0 : index
    %c0_23 = arith.constant 0 : index
    %20 = vector.load %arg2[%c0_21, %c0_22, %c0_23] : memref<1x8x128xbf16, #tpu.memory_space<vmem>>, vector<1x8x128xbf16>
    %21 = vector.shape_cast %20 : vector<1x8x128xbf16> to vector<8x128xbf16>
    %c1_24 = arith.constant 1 : index
    %c0_25 = arith.constant 0 : index
    %c0_26 = arith.constant 0 : index
    %22 = vector.load %arg4[%c1_24, %c0_25, %c0_26] : memref<3x128x128xbf16, #tpu.memory_space<vmem>>, vector<1x128x128xbf16>
    %23 = vector.shape_cast %22 : vector<1x128x128xbf16> to vector<128x128xbf16>
    %cst_27 = arith.constant dense<0.000000e+00> : vector<8x128xf32>
    %24 = tpu.matmul %21, %23, %cst_27 {dimension_numbers = #tpu.dot_dimension_numbers<[1], [0], [0], [1], [0, 0, 1, 1], [], []>} : vector<8x128xbf16>, vector<128x128xbf16>, vector<8x128xf32> -> vector<8x128xf32>
    %c0_28 = arith.constant 0 : index
    %c0_29 = arith.constant 0 : index
    %25 = vector.load %arg11[%c0_28, %c0_29] : memref<8x128xf32, #tpu.memory_space<vmem>>, vector<8x128xf32>
    %26 = arith.addf %25, %24 : vector<8x128xf32>
    %c0_30 = arith.constant 0 : index
    %c0_31 = arith.constant 0 : index
    %27 = vector.load %arg11[%c0_30, %c0_31] : memref<8x128xf32, #tpu.memory_space<vmem>>, vector<8x128xf32>
    tpu.vector_store %arg11[%c0_30, %c0_31], %26 {strides = array<i32>} : memref<8x128xf32, #tpu.memory_space<vmem>>, vector<8x128xf32>,
    %28 = vector.extract_strided_slice %21 {offsets = [0, 0], sizes = [7, 128], strides = [1, 1]} : vector<8x128xbf16> to vector<7x128xbf16>
    %c0_32 = arith.constant 0 : index
    %c0_33 = arith.constant 0 : index
    %c0_34 = arith.constant 0 : index
    %29 = vector.load %arg4[%c0_32, %c0_33, %c0_34] : memref<3x128x128xbf16, #tpu.memory_space<vmem>>, vector<1x128x128xbf16>
    %30 = vector.shape_cast %29 : vector<1x128x128xbf16> to vector<128x128xbf16>
    %cst_35 = arith.constant dense<0.000000e+00> : vector<7x128xf32>
    %31 = tpu.matmul %28, %30, %cst_35 {dimension_numbers = #tpu.dot_dimension_numbers<[1], [0], [0], [1], [0, 0, 1, 1], [], []>} : vector<7x128xbf16>, vector<128x128xbf16>, vector<7x128xf32> -> vector<7x128xf32>
    %c1_36 = arith.constant 1 : index
    %c0_37 = arith.constant 0 : index
    %32 = vector.load %arg11[%c1_36, %c0_37] : memref<8x128xf32, #tpu.memory_space<vmem>>, vector<7x128xf32>
    %33 = arith.addf %32, %31 : vector<7x128xf32>
    %c1_38 = arith.constant 1 : index
    %c0_39 = arith.constant 0 : index
    %34 = vector.load %arg11[%c1_38, %c0_39] : memref<8x128xf32, #tpu.memory_space<vmem>>, vector<7x128xf32>
    tpu.vector_store %arg11[%c1_38, %c0_39], %33 {strides = array<i32>} : memref<8x128xf32, #tpu.memory_space<vmem>>, vector<7x128xf32>,
    %35 = vector.extract_strided_slice %21 {offsets = [1, 0], sizes = [7, 128], strides = [1, 1]} : vector<8x128xbf16> to vector<7x128xbf16>
    %c2_40 = arith.constant 2 : index
    %c0_41 = arith.constant 0 : index
    %c0_42 = arith.constant 0 : index
    %36 = vector.load %arg4[%c2_40, %c0_41, %c0_42] : memref<3x128x128xbf16, #tpu.memory_space<vmem>>, vector<1x128x128xbf16>
    %37 = vector.shape_cast %36 : vector<1x128x128xbf16> to vector<128x128xbf16>
    %cst_43 = arith.constant dense<0.000000e+00> : vector<7x128xf32>
    %38 = tpu.matmul %35, %37, %cst_43 {dimension_numbers = #tpu.dot_dimension_numbers<[1], [0], [0], [1], [0, 0, 1, 1], [], []>} : vector<7x128xbf16>, vector<128x128xbf16>, vector<7x128xf32> -> vector<7x128xf32>
    %c0_44 = arith.constant 0 : index
    %c0_45 = arith.constant 0 : index
    %39 = vector.load %arg11[%c0_44, %c0_45] : memref<8x128xf32, #tpu.memory_space<vmem>>, vector<7x128xf32>
    %40 = arith.addf %39, %38 : vector<7x128xf32>
    %c0_46 = arith.constant 0 : index
    %c0_47 = arith.constant 0 : index
    %41 = vector.load %arg11[%c0_46, %c0_47] : memref<8x128xf32, #tpu.memory_space<vmem>>, vector<7x128xf32>
    tpu.vector_store %arg11[%c0_46, %c0_47], %40 {strides = array<i32>} : memref<8x128xf32, #tpu.memory_space<vmem>>, vector<7x128xf32>,
    %c0_48 = arith.constant 0 : index
    %c0_49 = arith.constant 0 : index
    %42 = vector.load %arg11[%c0_48, %c0_49] : memref<8x128xf32, #tpu.memory_space<vmem>>, vector<8x128xf32>
    %c0_50 = arith.constant 0 : index
    %c0_51 = arith.constant 0 : index
    %43 = vector.load %arg5[%c0_50, %c0_51] : memref<1x128xf32, #tpu.memory_space<vmem>>, vector<1x128xf32>
    %44 = vector.broadcast %43 : vector<1x128xf32> to vector<8x128xf32>
    %45 = arith.mulf %42, %44 : vector<8x128xf32>
    %c0_52 = arith.constant 0 : index
    %c0_53 = arith.constant 0 : index
    %46 = vector.load %arg6[%c0_52, %c0_53] : memref<1x128xf32, #tpu.memory_space<vmem>>, vector<1x128xf32>
    %47 = vector.broadcast %46 : vector<1x128xf32> to vector<8x128xf32>
    %48 = arith.addf %45, %47 : vector<8x128xf32>
    %cst_54 = arith.constant 5.000000e-01 : f32
    %49 = vector.broadcast %cst_54 : f32 to vector<8x128xf32>
    %50 = arith.mulf %49, %48 : vector<8x128xf32>
    %cst_55 = arith.constant 4.471500e-02 : f32
    %51 = vector.broadcast %cst_55 : f32 to vector<8x128xf32>
    %52 = arith.mulf %51, %48 : vector<8x128xf32>
    %53 = arith.mulf %52, %48 : vector<8x128xf32>
    %54 = arith.mulf %53, %48 : vector<8x128xf32>
    %55 = arith.addf %48, %54 : vector<8x128xf32>
    %cst_56 = arith.constant 0.797884583 : f32
    %56 = vector.broadcast %cst_56 : f32 to vector<8x128xf32>
    %57 = arith.mulf %56, %55 : vector<8x128xf32>
    %58 = math.tanh %57 : vector<8x128xf32>
    %cst_57 = arith.constant 1.000000e+00 : f32
    %59 = vector.broadcast %cst_57 : f32 to vector<8x128xf32>
    %60 = arith.addf %59, %58 : vector<8x128xf32>
    %61 = arith.mulf %50, %60 : vector<8x128xf32>
    %62 = arith.truncf %61 : vector<8x128xf32> to vector<8x128xbf16>
    %c1_58 = arith.constant 1 : index
    %c0_59 = arith.constant 0 : index
    %c0_60 = arith.constant 0 : index
    %63 = vector.load %arg7[%c1_58, %c0_59, %c0_60] : memref<3x128x128xbf16, #tpu.memory_space<vmem>>, vector<1x128x128xbf16>
    %64 = vector.shape_cast %63 : vector<1x128x128xbf16> to vector<128x128xbf16>
    %cst_61 = arith.constant dense<0.000000e+00> : vector<8x128xf32>
    %65 = tpu.matmul %62, %64, %cst_61 {dimension_numbers = #tpu.dot_dimension_numbers<[1], [0], [0], [1], [0, 0, 1, 1], [], []>} : vector<8x128xbf16>, vector<128x128xbf16>, vector<8x128xf32> -> vector<8x128xf32>
    %c0_62 = arith.constant 0 : index
    %c0_63 = arith.constant 0 : index
    %66 = vector.load %arg11[%c0_62, %c0_63] : memref<8x128xf32, #tpu.memory_space<vmem>>, vector<8x128xf32>
    tpu.vector_store %arg11[%c0_62, %c0_63], %65 {strides = array<i32>} : memref<8x128xf32, #tpu.memory_space<vmem>>, vector<8x128xf32>,
    %67 = vector.extract_strided_slice %62 {offsets = [0, 0], sizes = [7, 128], strides = [1, 1]} : vector<8x128xbf16> to vector<7x128xbf16>
    %c0_64 = arith.constant 0 : index
    %c0_65 = arith.constant 0 : index
    %c0_66 = arith.constant 0 : index
    %68 = vector.load %arg7[%c0_64, %c0_65, %c0_66] : memref<3x128x128xbf16, #tpu.memory_space<vmem>>, vector<1x128x128xbf16>
    %69 = vector.shape_cast %68 : vector<1x128x128xbf16> to vector<128x128xbf16>
    %cst_67 = arith.constant dense<0.000000e+00> : vector<7x128xf32>
    %70 = tpu.matmul %67, %69, %cst_67 {dimension_numbers = #tpu.dot_dimension_numbers<[1], [0], [0], [1], [0, 0, 1, 1], [], []>} : vector<7x128xbf16>, vector<128x128xbf16>, vector<7x128xf32> -> vector<7x128xf32>
    %c1_68 = arith.constant 1 : index
    %c0_69 = arith.constant 0 : index
    %71 = vector.load %arg11[%c1_68, %c0_69] : memref<8x128xf32, #tpu.memory_space<vmem>>, vector<7x128xf32>
    %72 = arith.addf %71, %70 : vector<7x128xf32>
    %c1_70 = arith.constant 1 : index
    %c0_71 = arith.constant 0 : index
    %73 = vector.load %arg11[%c1_70, %c0_71] : memref<8x128xf32, #tpu.memory_space<vmem>>, vector<7x128xf32>
    tpu.vector_store %arg11[%c1_70, %c0_71], %72 {strides = array<i32>} : memref<8x128xf32, #tpu.memory_space<vmem>>, vector<7x128xf32>,
    %74 = vector.extract_strided_slice %62 {offsets = [1, 0], sizes = [7, 128], strides = [1, 1]} : vector<8x128xbf16> to vector<7x128xbf16>
    %c2_72 = arith.constant 2 : index
    %c0_73 = arith.constant 0 : index
    %c0_74 = arith.constant 0 : index
    %75 = vector.load %arg7[%c2_72, %c0_73, %c0_74] : memref<3x128x128xbf16, #tpu.memory_space<vmem>>, vector<1x128x128xbf16>
    %76 = vector.shape_cast %75 : vector<1x128x128xbf16> to vector<128x128xbf16>
    %cst_75 = arith.constant dense<0.000000e+00> : vector<7x128xf32>
    %77 = tpu.matmul %74, %76, %cst_75 {dimension_numbers = #tpu.dot_dimension_numbers<[1], [0], [0], [1], [0, 0, 1, 1], [], []>} : vector<7x128xbf16>, vector<128x128xbf16>, vector<7x128xf32> -> vector<7x128xf32>
    %c0_76 = arith.constant 0 : index
    %c0_77 = arith.constant 0 : index
    %78 = vector.load %arg11[%c0_76, %c0_77] : memref<8x128xf32, #tpu.memory_space<vmem>>, vector<7x128xf32>
    %79 = arith.addf %78, %77 : vector<7x128xf32>
    %c0_78 = arith.constant 0 : index
    %c0_79 = arith.constant 0 : index
    %80 = vector.load %arg11[%c0_78, %c0_79] : memref<8x128xf32, #tpu.memory_space<vmem>>, vector<7x128xf32>
    tpu.vector_store %arg11[%c0_78, %c0_79], %79 {strides = array<i32>} : memref<8x128xf32, #tpu.memory_space<vmem>>, vector<7x128xf32>,
    %c0_80 = arith.constant 0 : index
    %c0_81 = arith.constant 0 : index
    %81 = vector.load %arg11[%c0_80, %c0_81] : memref<8x128xf32, #tpu.memory_space<vmem>>, vector<8x128xf32>
    %c0_82 = arith.constant 0 : index
    %c0_83 = arith.constant 0 : index
    %82 = vector.load %arg8[%c0_82, %c0_83] : memref<1x128xf32, #tpu.memory_space<vmem>>, vector<1x128xf32>
    %83 = vector.broadcast %82 : vector<1x128xf32> to vector<8x128xf32>
    %84 = arith.mulf %81, %83 : vector<8x128xf32>
    %c0_84 = arith.constant 0 : index
    %c0_85 = arith.constant 0 : index
    %85 = vector.load %arg9[%c0_84, %c0_85] : memref<1x128xf32, #tpu.memory_space<vmem>>, vector<1x128xf32>
    %86 = vector.broadcast %85 : vector<1x128xf32> to vector<8x128xf32>
    %87 = arith.addf %84, %86 : vector<8x128xf32>
    %cst_86 = arith.constant 5.000000e-01 : f32
    %88 = vector.broadcast %cst_86 : f32 to vector<8x128xf32>
    %89 = arith.mulf %88, %87 : vector<8x128xf32>
    %cst_87 = arith.constant 4.471500e-02 : f32
    %90 = vector.broadcast %cst_87 : f32 to vector<8x128xf32>
    %91 = arith.mulf %90, %87 : vector<8x128xf32>
    %92 = arith.mulf %91, %87 : vector<8x128xf32>
    %93 = arith.mulf %92, %87 : vector<8x128xf32>
    %94 = arith.addf %87, %93 : vector<8x128xf32>
    %cst_88 = arith.constant 0.797884583 : f32
    %95 = vector.broadcast %cst_88 : f32 to vector<8x128xf32>
    %96 = arith.mulf %95, %94 : vector<8x128xf32>
    %97 = math.tanh %96 : vector<8x128xf32>
    %cst_89 = arith.constant 1.000000e+00 : f32
    %98 = vector.broadcast %cst_89 : f32 to vector<8x128xf32>
    %99 = arith.addf %98, %97 : vector<8x128xf32>
    %100 = arith.mulf %89, %99 : vector<8x128xf32>
    %101 = arith.truncf %100 : vector<8x128xf32> to vector<8x128xbf16>
    %c0_90 = arith.constant 0 : index
    %c0_91 = arith.constant 0 : index
    %c0_92 = arith.constant 0 : index
    %102 = vector.load %arg10[%c0_90, %c0_91, %c0_92] : memref<1x8x128xbf16, #tpu.memory_space<vmem>>, vector<1x8x128xbf16>
    %103 = vector.shape_cast %102 : vector<1x8x128xbf16> to vector<8x128xbf16>
    %104 = vector.shape_cast %101 : vector<8x128xbf16> to vector<1x8x128xbf16>
    tpu.vector_store %arg10[%c0_90, %c0_91, %c0_92], %104 {strides = array<i32>} : memref<1x8x128xbf16, #tpu.memory_space<vmem>>, vector<1x8x128xbf16>,
    return
  }
  func.func @transform_0(%arg0: i32) -> (i32, i32, i32) {
    %c0_i32 = arith.constant 0 : i32
    %c0_i32_0 = arith.constant 0 : i32
    %c0_i32_1 = arith.constant 0 : i32
    return %arg0, %c0_i32, %c0_i32_0 : i32, i32, i32
  }
  func.func @transform_1(%arg0: i32) -> (i32, i32, i32) {
    %c0_i32 = arith.constant 0 : i32
    %c0_i32_0 = arith.constant 0 : i32
    %c0_i32_1 = arith.constant 0 : i32
    return %arg0, %c0_i32, %c0_i32_0 : i32, i32, i32
  }
  func.func @transform_2(%arg0: i32) -> (i32, i32, i32) {
    %c0_i32 = arith.constant 0 : i32
    %c0_i32_0 = arith.constant 0 : i32
    %c0_i32_1 = arith.constant 0 : i32
    %c0_i32_2 = arith.constant 0 : i32
    return %c0_i32, %c0_i32_0, %c0_i32_1 : i32, i32, i32
  }
  func.func @transform_3(%arg0: i32) -> (i32, i32, i32) {
    %c0_i32 = arith.constant 0 : i32
    %c0_i32_0 = arith.constant 0 : i32
    %c0_i32_1 = arith.constant 0 : i32
    %c0_i32_2 = arith.constant 0 : i32
    return %c0_i32, %c0_i32_0, %c0_i32_1 : i32, i32, i32
  }
  func.func @transform_4(%arg0: i32) -> (i32, i32) {
    %c0_i32 = arith.constant 0 : i32
    %c0_i32_0 = arith.constant 0 : i32
    %c0_i32_1 = arith.constant 0 : i32
    return %c0_i32, %c0_i32_0 : i32, i32
  }
  func.func @transform_5(%arg0: i32) -> (i32, i32) {
    %c0_i32 = arith.constant 0 : i32
    %c0_i32_0 = arith.constant 0 : i32
    %c0_i32_1 = arith.constant 0 : i32
    return %c0_i32, %c0_i32_0 : i32, i32
  }
  func.func @transform_6(%arg0: i32) -> (i32, i32, i32) {
    %c0_i32 = arith.constant 0 : i32
    %c0_i32_0 = arith.constant 0 : i32
    %c0_i32_1 = arith.constant 0 : i32
    %c0_i32_2 = arith.constant 0 : i32
    return %c0_i32, %c0_i32_0, %c0_i32_1 : i32, i32, i32
  }
  func.func @transform_7(%arg0: i32) -> (i32, i32) {
    %c0_i32 = arith.constant 0 : i32
    %c0_i32_0 = arith.constant 0 : i32
    %c0_i32_1 = arith.constant 0 : i32
    return %c0_i32, %c0_i32_0 : i32, i32
  }
  func.func @transform_8(%arg0: i32) -> (i32, i32) {
    %c0_i32 = arith.constant 0 : i32
    %c0_i32_0 = arith.constant 0 : i32
    %c0_i32_1 = arith.constant 0 : i32
    return %c0_i32, %c0_i32_0 : i32, i32
  }
  func.func @transform_9(%arg0: i32) -> (i32, i32, i32) {
    %c0_i32 = arith.constant 0 : i32
    %c0_i32_0 = arith.constant 0 : i32
    %c0_i32_1 = arith.constant 0 : i32
    return %arg0, %c0_i32, %c0_i32_0 : i32, i32, i32
  }
}

module attributes {stable_mosaic.version = 11 : i64} {
  func.func @_encoding_block_kernel(%arg0: i32, %arg1: memref<1x16x128xbf16, #tpu.memory_space<vmem>>, %arg2: memref<1x16x128xbf16, #tpu.memory_space<vmem>>, %arg3: memref<3x128x128xbf16, #tpu.memory_space<vmem>>, %arg4: memref<3x128x128xbf16, #tpu.memory_space<vmem>>, %arg5: memref<1x128xf32, #tpu.memory_space<vmem>>, %arg6: memref<1x128xf32, #tpu.memory_space<vmem>>, %arg7: memref<3x128x128xbf16, #tpu.memory_space<vmem>>, %arg8: memref<1x128xf32, #tpu.memory_space<vmem>>, %arg9: memref<1x128xf32, #tpu.memory_space<vmem>>, %arg10: memref<1x16x128xbf16, #tpu.memory_space<vmem>>, %arg11: memref<16x128xf32, #tpu.memory_space<vmem>>) attributes {dimension_semantics = [#tpu.dimension_semantics<parallel>], iteration_bounds = array<i64: 2>, scalar_prefetch = 0 : i64, scratch_operands = 1 : i64, tpu.core_type = #tpu.core_type<tc>, window_params = [{transform_indices = @transform_0, window_bounds = array<i64: 1, 16, 128>}, {transform_indices = @transform_1, window_bounds = array<i64: 1, 16, 128>}, {pipeline_mode = #tpu.pipeline_mode<synchronous>, transform_indices = @transform_2, window_bounds = array<i64: 3, 128, 128>}, {pipeline_mode = #tpu.pipeline_mode<synchronous>, transform_indices = @transform_3, window_bounds = array<i64: 3, 128, 128>}, {pipeline_mode = #tpu.pipeline_mode<synchronous>, transform_indices = @transform_4, window_bounds = array<i64: 1, 128>}, {pipeline_mode = #tpu.pipeline_mode<synchronous>, transform_indices = @transform_5, window_bounds = array<i64: 1, 128>}, {pipeline_mode = #tpu.pipeline_mode<synchronous>, transform_indices = @transform_6, window_bounds = array<i64: 3, 128, 128>}, {pipeline_mode = #tpu.pipeline_mode<synchronous>, transform_indices = @transform_7, window_bounds = array<i64: 1, 128>}, {pipeline_mode = #tpu.pipeline_mode<synchronous>, transform_indices = @transform_8, window_bounds = array<i64: 1, 128>}, {transform_indices = @transform_9, window_bounds = array<i64: 1, 16, 128>}]} {
    %c0 = arith.constant 0 : index
    %c0_0 = arith.constant 0 : index
    %c0_1 = arith.constant 0 : index
    %0 = vector.load %arg1[%c0, %c0_0, %c0_1] : memref<1x16x128xbf16, #tpu.memory_space<vmem>>, vector<1x16x128xbf16>
    %1 = vector.shape_cast %0 : vector<1x16x128xbf16> to vector<16x128xbf16>
    %c1 = arith.constant 1 : index
    %c0_2 = arith.constant 0 : index
    %c0_3 = arith.constant 0 : index
    %2 = vector.load %arg3[%c1, %c0_2, %c0_3] : memref<3x128x128xbf16, #tpu.memory_space<vmem>>, vector<1x128x128xbf16>
    %3 = vector.shape_cast %2 : vector<1x128x128xbf16> to vector<128x128xbf16>
    %cst = arith.constant dense<0.000000e+00> : vector<16x128xf32>
    %4 = tpu.matmul %1, %3, %cst {dimension_numbers = #tpu.dot_dimension_numbers<[1], [0], [0], [1], [0, 0, 1, 1], [], []>} : vector<16x128xbf16>, vector<128x128xbf16>, vector<16x128xf32> -> vector<16x128xf32>
    %c0_4 = arith.constant 0 : index
    %c0_5 = arith.constant 0 : index
    %5 = vector.load %arg11[%c0_4, %c0_5] : memref<16x128xf32, #tpu.memory_space<vmem>>, vector<16x128xf32>
    tpu.vector_store %arg11[%c0_4, %c0_5], %4 {strides = array<i32>} : memref<16x128xf32, #tpu.memory_space<vmem>>, vector<16x128xf32>,
    %6 = vector.extract_strided_slice %1 {offsets = [0, 0], sizes = [15, 128], strides = [1, 1]} : vector<16x128xbf16> to vector<15x128xbf16>
    %c0_6 = arith.constant 0 : index
    %c0_7 = arith.constant 0 : index
    %c0_8 = arith.constant 0 : index
    %7 = vector.load %arg3[%c0_6, %c0_7, %c0_8] : memref<3x128x128xbf16, #tpu.memory_space<vmem>>, vector<1x128x128xbf16>
    %8 = vector.shape_cast %7 : vector<1x128x128xbf16> to vector<128x128xbf16>
    %cst_9 = arith.constant dense<0.000000e+00> : vector<15x128xf32>
    %9 = tpu.matmul %6, %8, %cst_9 {dimension_numbers = #tpu.dot_dimension_numbers<[1], [0], [0], [1], [0, 0, 1, 1], [], []>} : vector<15x128xbf16>, vector<128x128xbf16>, vector<15x128xf32> -> vector<15x128xf32>
    %c1_10 = arith.constant 1 : index
    %c0_11 = arith.constant 0 : index
    %10 = vector.load %arg11[%c1_10, %c0_11] : memref<16x128xf32, #tpu.memory_space<vmem>>, vector<15x128xf32>
    %11 = arith.addf %10, %9 : vector<15x128xf32>
    %c1_12 = arith.constant 1 : index
    %c0_13 = arith.constant 0 : index
    %12 = vector.load %arg11[%c1_12, %c0_13] : memref<16x128xf32, #tpu.memory_space<vmem>>, vector<15x128xf32>
    tpu.vector_store %arg11[%c1_12, %c0_13], %11 {strides = array<i32>} : memref<16x128xf32, #tpu.memory_space<vmem>>, vector<15x128xf32>,
    %13 = vector.extract_strided_slice %1 {offsets = [1, 0], sizes = [15, 128], strides = [1, 1]} : vector<16x128xbf16> to vector<15x128xbf16>
    %c2 = arith.constant 2 : index
    %c0_14 = arith.constant 0 : index
    %c0_15 = arith.constant 0 : index
    %14 = vector.load %arg3[%c2, %c0_14, %c0_15] : memref<3x128x128xbf16, #tpu.memory_space<vmem>>, vector<1x128x128xbf16>
    %15 = vector.shape_cast %14 : vector<1x128x128xbf16> to vector<128x128xbf16>
    %cst_16 = arith.constant dense<0.000000e+00> : vector<15x128xf32>
    %16 = tpu.matmul %13, %15, %cst_16 {dimension_numbers = #tpu.dot_dimension_numbers<[1], [0], [0], [1], [0, 0, 1, 1], [], []>} : vector<15x128xbf16>, vector<128x128xbf16>, vector<15x128xf32> -> vector<15x128xf32>
    %c0_17 = arith.constant 0 : index
    %c0_18 = arith.constant 0 : index
    %17 = vector.load %arg11[%c0_17, %c0_18] : memref<16x128xf32, #tpu.memory_space<vmem>>, vector<15x128xf32>
    %18 = arith.addf %17, %16 : vector<15x128xf32>
    %c0_19 = arith.constant 0 : index
    %c0_20 = arith.constant 0 : index
    %19 = vector.load %arg11[%c0_19, %c0_20] : memref<16x128xf32, #tpu.memory_space<vmem>>, vector<15x128xf32>
    tpu.vector_store %arg11[%c0_19, %c0_20], %18 {strides = array<i32>} : memref<16x128xf32, #tpu.memory_space<vmem>>, vector<15x128xf32>,
    %c0_21 = arith.constant 0 : index
    %c0_22 = arith.constant 0 : index
    %c0_23 = arith.constant 0 : index
    %20 = vector.load %arg2[%c0_21, %c0_22, %c0_23] : memref<1x16x128xbf16, #tpu.memory_space<vmem>>, vector<1x16x128xbf16>
    %21 = vector.shape_cast %20 : vector<1x16x128xbf16> to vector<16x128xbf16>
    %c1_24 = arith.constant 1 : index
    %c0_25 = arith.constant 0 : index
    %c0_26 = arith.constant 0 : index
    %22 = vector.load %arg4[%c1_24, %c0_25, %c0_26] : memref<3x128x128xbf16, #tpu.memory_space<vmem>>, vector<1x128x128xbf16>
    %23 = vector.shape_cast %22 : vector<1x128x128xbf16> to vector<128x128xbf16>
    %cst_27 = arith.constant dense<0.000000e+00> : vector<16x128xf32>
    %24 = tpu.matmul %21, %23, %cst_27 {dimension_numbers = #tpu.dot_dimension_numbers<[1], [0], [0], [1], [0, 0, 1, 1], [], []>} : vector<16x128xbf16>, vector<128x128xbf16>, vector<16x128xf32> -> vector<16x128xf32>
    %c0_28 = arith.constant 0 : index
    %c0_29 = arith.constant 0 : index
    %25 = vector.load %arg11[%c0_28, %c0_29] : memref<16x128xf32, #tpu.memory_space<vmem>>, vector<16x128xf32>
    %26 = arith.addf %25, %24 : vector<16x128xf32>
    %c0_30 = arith.constant 0 : index
    %c0_31 = arith.constant 0 : index
    %27 = vector.load %arg11[%c0_30, %c0_31] : memref<16x128xf32, #tpu.memory_space<vmem>>, vector<16x128xf32>
    tpu.vector_store %arg11[%c0_30, %c0_31], %26 {strides = array<i32>} : memref<16x128xf32, #tpu.memory_space<vmem>>, vector<16x128xf32>,
    %28 = vector.extract_strided_slice %21 {offsets = [0, 0], sizes = [15, 128], strides = [1, 1]} : vector<16x128xbf16> to vector<15x128xbf16>
    %c0_32 = arith.constant 0 : index
    %c0_33 = arith.constant 0 : index
    %c0_34 = arith.constant 0 : index
    %29 = vector.load %arg4[%c0_32, %c0_33, %c0_34] : memref<3x128x128xbf16, #tpu.memory_space<vmem>>, vector<1x128x128xbf16>
    %30 = vector.shape_cast %29 : vector<1x128x128xbf16> to vector<128x128xbf16>
    %cst_35 = arith.constant dense<0.000000e+00> : vector<15x128xf32>
    %31 = tpu.matmul %28, %30, %cst_35 {dimension_numbers = #tpu.dot_dimension_numbers<[1], [0], [0], [1], [0, 0, 1, 1], [], []>} : vector<15x128xbf16>, vector<128x128xbf16>, vector<15x128xf32> -> vector<15x128xf32>
    %c1_36 = arith.constant 1 : index
    %c0_37 = arith.constant 0 : index
    %32 = vector.load %arg11[%c1_36, %c0_37] : memref<16x128xf32, #tpu.memory_space<vmem>>, vector<15x128xf32>
    %33 = arith.addf %32, %31 : vector<15x128xf32>
    %c1_38 = arith.constant 1 : index
    %c0_39 = arith.constant 0 : index
    %34 = vector.load %arg11[%c1_38, %c0_39] : memref<16x128xf32, #tpu.memory_space<vmem>>, vector<15x128xf32>
    tpu.vector_store %arg11[%c1_38, %c0_39], %33 {strides = array<i32>} : memref<16x128xf32, #tpu.memory_space<vmem>>, vector<15x128xf32>,
    %35 = vector.extract_strided_slice %21 {offsets = [1, 0], sizes = [15, 128], strides = [1, 1]} : vector<16x128xbf16> to vector<15x128xbf16>
    %c2_40 = arith.constant 2 : index
    %c0_41 = arith.constant 0 : index
    %c0_42 = arith.constant 0 : index
    %36 = vector.load %arg4[%c2_40, %c0_41, %c0_42] : memref<3x128x128xbf16, #tpu.memory_space<vmem>>, vector<1x128x128xbf16>
    %37 = vector.shape_cast %36 : vector<1x128x128xbf16> to vector<128x128xbf16>
    %cst_43 = arith.constant dense<0.000000e+00> : vector<15x128xf32>
    %38 = tpu.matmul %35, %37, %cst_43 {dimension_numbers = #tpu.dot_dimension_numbers<[1], [0], [0], [1], [0, 0, 1, 1], [], []>} : vector<15x128xbf16>, vector<128x128xbf16>, vector<15x128xf32> -> vector<15x128xf32>
    %c0_44 = arith.constant 0 : index
    %c0_45 = arith.constant 0 : index
    %39 = vector.load %arg11[%c0_44, %c0_45] : memref<16x128xf32, #tpu.memory_space<vmem>>, vector<15x128xf32>
    %40 = arith.addf %39, %38 : vector<15x128xf32>
    %c0_46 = arith.constant 0 : index
    %c0_47 = arith.constant 0 : index
    %41 = vector.load %arg11[%c0_46, %c0_47] : memref<16x128xf32, #tpu.memory_space<vmem>>, vector<15x128xf32>
    tpu.vector_store %arg11[%c0_46, %c0_47], %40 {strides = array<i32>} : memref<16x128xf32, #tpu.memory_space<vmem>>, vector<15x128xf32>,
    %c0_48 = arith.constant 0 : index
    %c0_49 = arith.constant 0 : index
    %42 = vector.load %arg11[%c0_48, %c0_49] : memref<16x128xf32, #tpu.memory_space<vmem>>, vector<16x128xf32>
    %c0_50 = arith.constant 0 : index
    %c0_51 = arith.constant 0 : index
    %43 = vector.load %arg5[%c0_50, %c0_51] : memref<1x128xf32, #tpu.memory_space<vmem>>, vector<1x128xf32>
    %44 = vector.broadcast %43 : vector<1x128xf32> to vector<16x128xf32>
    %45 = arith.mulf %42, %44 : vector<16x128xf32>
    %c0_52 = arith.constant 0 : index
    %c0_53 = arith.constant 0 : index
    %46 = vector.load %arg6[%c0_52, %c0_53] : memref<1x128xf32, #tpu.memory_space<vmem>>, vector<1x128xf32>
    %47 = vector.broadcast %46 : vector<1x128xf32> to vector<16x128xf32>
    %48 = arith.addf %45, %47 : vector<16x128xf32>
    %cst_54 = arith.constant 5.000000e-01 : f32
    %49 = vector.broadcast %cst_54 : f32 to vector<16x128xf32>
    %50 = arith.mulf %49, %48 : vector<16x128xf32>
    %cst_55 = arith.constant 4.471500e-02 : f32
    %51 = vector.broadcast %cst_55 : f32 to vector<16x128xf32>
    %52 = arith.mulf %51, %48 : vector<16x128xf32>
    %53 = arith.mulf %52, %48 : vector<16x128xf32>
    %54 = arith.mulf %53, %48 : vector<16x128xf32>
    %55 = arith.addf %48, %54 : vector<16x128xf32>
    %cst_56 = arith.constant 0.797884583 : f32
    %56 = vector.broadcast %cst_56 : f32 to vector<16x128xf32>
    %57 = arith.mulf %56, %55 : vector<16x128xf32>
    %58 = math.tanh %57 : vector<16x128xf32>
    %cst_57 = arith.constant 1.000000e+00 : f32
    %59 = vector.broadcast %cst_57 : f32 to vector<16x128xf32>
    %60 = arith.addf %59, %58 : vector<16x128xf32>
    %61 = arith.mulf %50, %60 : vector<16x128xf32>
    %62 = arith.truncf %61 : vector<16x128xf32> to vector<16x128xbf16>
    %c1_58 = arith.constant 1 : index
    %c0_59 = arith.constant 0 : index
    %c0_60 = arith.constant 0 : index
    %63 = vector.load %arg7[%c1_58, %c0_59, %c0_60] : memref<3x128x128xbf16, #tpu.memory_space<vmem>>, vector<1x128x128xbf16>
    %64 = vector.shape_cast %63 : vector<1x128x128xbf16> to vector<128x128xbf16>
    %cst_61 = arith.constant dense<0.000000e+00> : vector<16x128xf32>
    %65 = tpu.matmul %62, %64, %cst_61 {dimension_numbers = #tpu.dot_dimension_numbers<[1], [0], [0], [1], [0, 0, 1, 1], [], []>} : vector<16x128xbf16>, vector<128x128xbf16>, vector<16x128xf32> -> vector<16x128xf32>
    %c0_62 = arith.constant 0 : index
    %c0_63 = arith.constant 0 : index
    %66 = vector.load %arg11[%c0_62, %c0_63] : memref<16x128xf32, #tpu.memory_space<vmem>>, vector<16x128xf32>
    tpu.vector_store %arg11[%c0_62, %c0_63], %65 {strides = array<i32>} : memref<16x128xf32, #tpu.memory_space<vmem>>, vector<16x128xf32>,
    %67 = vector.extract_strided_slice %62 {offsets = [0, 0], sizes = [15, 128], strides = [1, 1]} : vector<16x128xbf16> to vector<15x128xbf16>
    %c0_64 = arith.constant 0 : index
    %c0_65 = arith.constant 0 : index
    %c0_66 = arith.constant 0 : index
    %68 = vector.load %arg7[%c0_64, %c0_65, %c0_66] : memref<3x128x128xbf16, #tpu.memory_space<vmem>>, vector<1x128x128xbf16>
    %69 = vector.shape_cast %68 : vector<1x128x128xbf16> to vector<128x128xbf16>
    %cst_67 = arith.constant dense<0.000000e+00> : vector<15x128xf32>
    %70 = tpu.matmul %67, %69, %cst_67 {dimension_numbers = #tpu.dot_dimension_numbers<[1], [0], [0], [1], [0, 0, 1, 1], [], []>} : vector<15x128xbf16>, vector<128x128xbf16>, vector<15x128xf32> -> vector<15x128xf32>
    %c1_68 = arith.constant 1 : index
    %c0_69 = arith.constant 0 : index
    %71 = vector.load %arg11[%c1_68, %c0_69] : memref<16x128xf32, #tpu.memory_space<vmem>>, vector<15x128xf32>
    %72 = arith.addf %71, %70 : vector<15x128xf32>
    %c1_70 = arith.constant 1 : index
    %c0_71 = arith.constant 0 : index
    %73 = vector.load %arg11[%c1_70, %c0_71] : memref<16x128xf32, #tpu.memory_space<vmem>>, vector<15x128xf32>
    tpu.vector_store %arg11[%c1_70, %c0_71], %72 {strides = array<i32>} : memref<16x128xf32, #tpu.memory_space<vmem>>, vector<15x128xf32>,
    %74 = vector.extract_strided_slice %62 {offsets = [1, 0], sizes = [15, 128], strides = [1, 1]} : vector<16x128xbf16> to vector<15x128xbf16>
    %c2_72 = arith.constant 2 : index
    %c0_73 = arith.constant 0 : index
    %c0_74 = arith.constant 0 : index
    %75 = vector.load %arg7[%c2_72, %c0_73, %c0_74] : memref<3x128x128xbf16, #tpu.memory_space<vmem>>, vector<1x128x128xbf16>
    %76 = vector.shape_cast %75 : vector<1x128x128xbf16> to vector<128x128xbf16>
    %cst_75 = arith.constant dense<0.000000e+00> : vector<15x128xf32>
    %77 = tpu.matmul %74, %76, %cst_75 {dimension_numbers = #tpu.dot_dimension_numbers<[1], [0], [0], [1], [0, 0, 1, 1], [], []>} : vector<15x128xbf16>, vector<128x128xbf16>, vector<15x128xf32> -> vector<15x128xf32>
    %c0_76 = arith.constant 0 : index
    %c0_77 = arith.constant 0 : index
    %78 = vector.load %arg11[%c0_76, %c0_77] : memref<16x128xf32, #tpu.memory_space<vmem>>, vector<15x128xf32>
    %79 = arith.addf %78, %77 : vector<15x128xf32>
    %c0_78 = arith.constant 0 : index
    %c0_79 = arith.constant 0 : index
    %80 = vector.load %arg11[%c0_78, %c0_79] : memref<16x128xf32, #tpu.memory_space<vmem>>, vector<15x128xf32>
    tpu.vector_store %arg11[%c0_78, %c0_79], %79 {strides = array<i32>} : memref<16x128xf32, #tpu.memory_space<vmem>>, vector<15x128xf32>,
    %c0_80 = arith.constant 0 : index
    %c0_81 = arith.constant 0 : index
    %81 = vector.load %arg11[%c0_80, %c0_81] : memref<16x128xf32, #tpu.memory_space<vmem>>, vector<16x128xf32>
    %c0_82 = arith.constant 0 : index
    %c0_83 = arith.constant 0 : index
    %82 = vector.load %arg8[%c0_82, %c0_83] : memref<1x128xf32, #tpu.memory_space<vmem>>, vector<1x128xf32>
    %83 = vector.broadcast %82 : vector<1x128xf32> to vector<16x128xf32>
    %84 = arith.mulf %81, %83 : vector<16x128xf32>
    %c0_84 = arith.constant 0 : index
    %c0_85 = arith.constant 0 : index
    %85 = vector.load %arg9[%c0_84, %c0_85] : memref<1x128xf32, #tpu.memory_space<vmem>>, vector<1x128xf32>
    %86 = vector.broadcast %85 : vector<1x128xf32> to vector<16x128xf32>
    %87 = arith.addf %84, %86 : vector<16x128xf32>
    %cst_86 = arith.constant 5.000000e-01 : f32
    %88 = vector.broadcast %cst_86 : f32 to vector<16x128xf32>
    %89 = arith.mulf %88, %87 : vector<16x128xf32>
    %cst_87 = arith.constant 4.471500e-02 : f32
    %90 = vector.broadcast %cst_87 : f32 to vector<16x128xf32>
    %91 = arith.mulf %90, %87 : vector<16x128xf32>
    %92 = arith.mulf %91, %87 : vector<16x128xf32>
    %93 = arith.mulf %92, %87 : vector<16x128xf32>
    %94 = arith.addf %87, %93 : vector<16x128xf32>
    %cst_88 = arith.constant 0.797884583 : f32
    %95 = vector.broadcast %cst_88 : f32 to vector<16x128xf32>
    %96 = arith.mulf %95, %94 : vector<16x128xf32>
    %97 = math.tanh %96 : vector<16x128xf32>
    %cst_89 = arith.constant 1.000000e+00 : f32
    %98 = vector.broadcast %cst_89 : f32 to vector<16x128xf32>
    %99 = arith.addf %98, %97 : vector<16x128xf32>
    %100 = arith.mulf %89, %99 : vector<16x128xf32>
    %101 = arith.truncf %100 : vector<16x128xf32> to vector<16x128xbf16>
    %c0_90 = arith.constant 0 : index
    %c0_91 = arith.constant 0 : index
    %c0_92 = arith.constant 0 : index
    %102 = vector.load %arg10[%c0_90, %c0_91, %c0_92] : memref<1x16x128xbf16, #tpu.memory_space<vmem>>, vector<1x16x128xbf16>
    %103 = vector.shape_cast %102 : vector<1x16x128xbf16> to vector<16x128xbf16>
    %104 = vector.shape_cast %101 : vector<16x128xbf16> to vector<1x16x128xbf16>
    tpu.vector_store %arg10[%c0_90, %c0_91, %c0_92], %104 {strides = array<i32>} : memref<1x16x128xbf16, #tpu.memory_space<vmem>>, vector<1x16x128xbf16>,
    return
  }
  func.func @transform_0(%arg0: i32) -> (i32, i32, i32) {
    %c0_i32 = arith.constant 0 : i32
    %c0_i32_0 = arith.constant 0 : i32
    %c0_i32_1 = arith.constant 0 : i32
    return %arg0, %c0_i32, %c0_i32_0 : i32, i32, i32
  }
  func.func @transform_1(%arg0: i32) -> (i32, i32, i32) {
    %c0_i32 = arith.constant 0 : i32
    %c0_i32_0 = arith.constant 0 : i32
    %c0_i32_1 = arith.constant 0 : i32
    return %arg0, %c0_i32, %c0_i32_0 : i32, i32, i32
  }
  func.func @transform_2(%arg0: i32) -> (i32, i32, i32) {
    %c0_i32 = arith.constant 0 : i32
    %c0_i32_0 = arith.constant 0 : i32
    %c0_i32_1 = arith.constant 0 : i32
    %c0_i32_2 = arith.constant 0 : i32
    return %c0_i32, %c0_i32_0, %c0_i32_1 : i32, i32, i32
  }
  func.func @transform_3(%arg0: i32) -> (i32, i32, i32) {
    %c0_i32 = arith.constant 0 : i32
    %c0_i32_0 = arith.constant 0 : i32
    %c0_i32_1 = arith.constant 0 : i32
    %c0_i32_2 = arith.constant 0 : i32
    return %c0_i32, %c0_i32_0, %c0_i32_1 : i32, i32, i32
  }
  func.func @transform_4(%arg0: i32) -> (i32, i32) {
    %c0_i32 = arith.constant 0 : i32
    %c0_i32_0 = arith.constant 0 : i32
    %c0_i32_1 = arith.constant 0 : i32
    return %c0_i32, %c0_i32_0 : i32, i32
  }
  func.func @transform_5(%arg0: i32) -> (i32, i32) {
    %c0_i32 = arith.constant 0 : i32
    %c0_i32_0 = arith.constant 0 : i32
    %c0_i32_1 = arith.constant 0 : i32
    return %c0_i32, %c0_i32_0 : i32, i32
  }
  func.func @transform_6(%arg0: i32) -> (i32, i32, i32) {
    %c0_i32 = arith.constant 0 : i32
    %c0_i32_0 = arith.constant 0 : i32
    %c0_i32_1 = arith.constant 0 : i32
    %c0_i32_2 = arith.constant 0 : i32
    return %c0_i32, %c0_i32_0, %c0_i32_1 : i32, i32, i32
  }
  func.func @transform_7(%arg0: i32) -> (i32, i32) {
    %c0_i32 = arith.constant 0 : i32
    %c0_i32_0 = arith.constant 0 : i32
    %c0_i32_1 = arith.constant 0 : i32
    return %c0_i32, %c0_i32_0 : i32, i32
  }
  func.func @transform_8(%arg0: i32) -> (i32, i32) {
    %c0_i32 = arith.constant 0 : i32
    %c0_i32_0 = arith.constant 0 : i32
    %c0_i32_1 = arith.constant 0 : i32
    return %c0_i32, %c0_i32_0 : i32, i32
  }
  func.func @transform_9(%arg0: i32) -> (i32, i32, i32) {
    %c0_i32 = arith.constant 0 : i32
    %c0_i32_0 = arith.constant 0 : i32
    %c0_i32_1 = arith.constant 0 : i32
    return %arg0, %c0_i32, %c0_i32_0 : i32, i32, i32
  }
}

module attributes {stable_mosaic.version = 11 : i64} {
  func.func @_final_conv1x1_kernel(%arg0: i32, %arg1: memref<1x16x128xbf16, #tpu.memory_space<vmem>>, %arg2: memref<128x64xbf16, #tpu.memory_space<vmem>>, %arg3: memref<1x64xf32, #tpu.memory_space<vmem>>, %arg4: memref<1x16x64xf32, #tpu.memory_space<vmem>>) attributes {dimension_semantics = [#tpu.dimension_semantics<parallel>], iteration_bounds = array<i64: 2>, scalar_prefetch = 0 : i64, scratch_operands = 0 : i64, tpu.core_type = #tpu.core_type<tc>, window_params = [{transform_indices = @transform_0, window_bounds = array<i64: 1, 16, 128>}, {pipeline_mode = #tpu.pipeline_mode<synchronous>, transform_indices = @transform_1, window_bounds = array<i64: 128, 64>}, {pipeline_mode = #tpu.pipeline_mode<synchronous>, transform_indices = @transform_2, window_bounds = array<i64: 1, 64>}, {transform_indices = @transform_3, window_bounds = array<i64: 1, 16, 64>}]} {
    %c0 = arith.constant 0 : index
    %c0_0 = arith.constant 0 : index
    %c0_1 = arith.constant 0 : index
    %0 = vector.load %arg1[%c0, %c0_0, %c0_1] : memref<1x16x128xbf16, #tpu.memory_space<vmem>>, vector<1x16x128xbf16>
    %1 = vector.shape_cast %0 : vector<1x16x128xbf16> to vector<16x128xbf16>
    %c0_2 = arith.constant 0 : index
    %c0_3 = arith.constant 0 : index
    %2 = vector.load %arg2[%c0_2, %c0_3] : memref<128x64xbf16, #tpu.memory_space<vmem>>, vector<128x64xbf16>
    %cst = arith.constant dense<0.000000e+00> : vector<16x64xf32>
    %3 = tpu.matmul %1, %2, %cst {dimension_numbers = #tpu.dot_dimension_numbers<[1], [0], [0], [1], [0, 0, 1, 1], [], []>} : vector<16x128xbf16>, vector<128x64xbf16>, vector<16x64xf32> -> vector<16x64xf32>
    %c0_4 = arith.constant 0 : index
    %c0_5 = arith.constant 0 : index
    %4 = vector.load %arg3[%c0_4, %c0_5] : memref<1x64xf32, #tpu.memory_space<vmem>>, vector<1x64xf32>
    %5 = vector.broadcast %4 : vector<1x64xf32> to vector<16x64xf32>
    %6 = arith.addf %3, %5 : vector<16x64xf32>
    %c0_6 = arith.constant 0 : index
    %c0_7 = arith.constant 0 : index
    %c0_8 = arith.constant 0 : index
    %7 = vector.load %arg4[%c0_6, %c0_7, %c0_8] : memref<1x16x64xf32, #tpu.memory_space<vmem>>, vector<1x16x64xf32>
    %8 = vector.shape_cast %7 : vector<1x16x64xf32> to vector<16x64xf32>
    %9 = vector.shape_cast %6 : vector<16x64xf32> to vector<1x16x64xf32>
    tpu.vector_store %arg4[%c0_6, %c0_7, %c0_8], %9 {strides = array<i32>} : memref<1x16x64xf32, #tpu.memory_space<vmem>>, vector<1x16x64xf32>,
    return
  }
  func.func @transform_0(%arg0: i32) -> (i32, i32, i32) {
    %c0_i32 = arith.constant 0 : i32
    %c0_i32_0 = arith.constant 0 : i32
    %c0_i32_1 = arith.constant 0 : i32
    return %arg0, %c0_i32, %c0_i32_0 : i32, i32, i32
  }
  func.func @transform_1(%arg0: i32) -> (i32, i32) {
    %c0_i32 = arith.constant 0 : i32
    %c0_i32_0 = arith.constant 0 : i32
    %c0_i32_1 = arith.constant 0 : i32
    return %c0_i32, %c0_i32_0 : i32, i32
  }
  func.func @transform_2(%arg0: i32) -> (i32, i32) {
    %c0_i32 = arith.constant 0 : i32
    %c0_i32_0 = arith.constant 0 : i32
    %c0_i32_1 = arith.constant 0 : i32
    return %c0_i32, %c0_i32_0 : i32, i32
  }
  func.func @transform_3(%arg0: i32) -> (i32, i32, i32) {
    %c0_i32 = arith.constant 0 : i32
    %c0_i32_0 = arith.constant 0 : i32
    %c0_i32_1 = arith.constant 0 : i32
    return %arg0, %c0_i32, %c0_i32_0 : i32, i32, i32
  }
}

</mosaic_0001>

<bundles_post_ra>
// kernel: unet_forward_pallas.11
= control target key start
LH: loop header
LB: loop body
LE: loop exit
PB: predicated region body
PF: predicated region fallthrough
CT: control target
= control target key end

     0   :  { %s1088_s24 = smov 0   ;;  %s1235_s0 = inlined_call_operand.vmem [shape: bf16[2,8,64], index: 0, kind: input, shape index: {}]   ;;  %s1236_s1 = inlined_call_operand.vmem [shape: bf16[3,64,128], index: 1, kind: input, shape index: {}]   ;;  %s1237_s2 = inlined_call_operand.vmem [shape: f32[1,128], index: 2, kind: input, shape index: {}]   ;;  %s1238_s3 = inlined_call_operand.vmem [shape: f32[1,128], index: 3, kind: input, shape index: {}]   ;;  %s1239_s4 = inlined_call_operand.vmem [shape: bf16[3,128,128], index: 4, kind: input, shape index: {}]   ;;  %s1240_s5 = inlined_call_operand.vmem [shape: f32[1,128], index: 5, kind: input, shape index: {}]   ;;  %s1241_s6 = inlined_call_operand.vmem [shape: f32[1,128], index: 6, kind: input, shape index: {}]   ;;  %s1242_s7 = inlined_call_operand.vmem [shape: bf16[2,8,128], index: 7, kind: output, shape index: {}]  }
   0x1 LB: > { %s784_s25 = sadd.s32 4294967295, %s1046_s24   ;;  %p788_p0 = scmp.ge.s32.totalorder %s1046_s24, 1  ;;  %s1046_s24 = sphi %s1088_s24, %s17_s24  }
   0x2   : > { %p236_p1 = scmp.lt.s32.totalorder %s1046_s24, 3 }
   0x4   : > { %p237_p2 = pnand %p788_p0, %p236_p1 }
   0x5   : > { %p266_p3 = scmp.lt.s32.totalorder (!%p237_p2), %s784_s25, 1 }
   0x6   : > { %240 = sbr.rel (%p237_p2) target bundleno = 402 (0x192), region = 48 }
   0xb   : > { %v991_v0 = vld [vmem:[%s1236_s1 + $0x38] sm:$0xff]  ;;  %v990_v2 = vld [vmem:[%s1236_s1 + $0x30] sm:$0xff]  ;;  %s1244_s25 = smov (!%p266_p3, %s784_s25), 1  ;;  %v989_v4 = vld [vmem:[%s1236_s1 + $0x28] sm:$0xff]  ;;  %vm309_vm0 = vcmask 523264  }
   0xc   : > { %v995_v1 = vld [vmem:[%s1236_s1 + $0x18] sm:$0xff]  ;;  %317 = vmatpush.bf16.msra.mxu2 %v991_v0  ;;  %v994_v3 = vld [vmem:[%s1236_s1 + $0x10] sm:$0xff]  ;;  %v993_v5 = vld [vmem:[%s1236_s1 + $0x8] sm:$0xff]  ;;  %s789_s15 = sshll.u32 %s1244_s25, 2 }
   0xd   : > { %363 = vmatpush.bf16.msra.mxu1 %v995_v1  ;;  %s269_s18 = scalar_lea.vmem %s1235_s0, %s789_s15  ;;  %v988_v6 = vld [vmem:[%s1236_s1 + $0x20] sm:$0xff]  ;;  %v999_v8 = vld [vmem:[%s1236_s1 + $0x58] sm:$0xff]  ;;  %v998_v11 = vld [vmem:[%s1236_s1 + $0x50] sm:$0xff]  ;;  %s273_s8 = scalar_lea.vmem %s1242_s7, %s789_s15 }
   0xe   : > { %v992_v7 = vld [vmem:[%s1236_s1] sm:$0xff]  ;;  %v997_v13 = vld [vmem:[%s1236_s1 + $0x48] sm:$0xff]  ;;  %v1007_v19 = vld [vmem:[%s1239_s4 + $0x78] sm:$0xff] }
   0xf   : > { %v275_v9 = vld [vmem:[%s269_s18] sm:$0xf]  ;;  %v1015_v20 = vld [vmem:[%s1239_s4 + $0x38] sm:$0xff]  ;;  %523 = vmatpush.bf16.msra.mxu3 %v1007_v19  ;;  %v1006_v21 = vld [vmem:[%s1239_s4 + $0x70] sm:$0xff] }
  0x10   : > { %318 = vmatpush.bf16.msra.mxu2 %v990_v2  ;;  %v385_v10 = vunpack.c.l.b16 %v275_v9  ;;  %v996_v15 = vld [vmem:[%s1236_s1 + $0x40] sm:$0xff]  ;;  %601 = vmatpush.bf16.msra.mxu0 %v1015_v20  ;;  %v1014_v22 = vld [vmem:[%s1239_s4 + $0x30] sm:$0xff]  ;;  %v1023_v23 = vld [vmem:[%s1239_s4 + $0xb8] sm:$0xff] }
  0x11   : > { %364 = vmatpush.bf16.msra.mxu1 %v994_v3  ;;  %v1022_v25 = vld [vmem:[%s1239_s4 + $0xb0] sm:$0xff]  ;;  %v1005_v26 = vld [vmem:[%s1239_s4 + $0x68] sm:$0xff]  ;;  %v1004_v30 = vld [vmem:[%s1239_s4 + $0x60] sm:$0xff] }
  0x12   : > { %v386_v12 = vpack.c.b16 %v385_v10, %v385_v10  ;;  %v1013_v27 = vld [vmem:[%s1239_s4 + $0x28] sm:$0xff]  ;;  %v1012_v31 = vld [vmem:[%s1239_s4 + $0x20] sm:$0xff]  ;;  %v1003_v34 = vld [vmem:[%s1239_s4 + $0x58] sm:$0xff] }
  0x13   : > { %524 = vmatpush.bf16.msra.mxu3 %v1006_v21  ;;  %v1021_v28 = vld [vmem:[%s1239_s4 + $0xa8] sm:$0xff]  ;;  %v1020_v33 = vld [vmem:[%s1239_s4 + $0xa0] sm:$0xff]  ;;  %v1011_v35 = vld [vmem:[%s1239_s4 + $0x18] sm:$0xff] }
  0x14   : > { %319 = vmatpush.bf16.msra.mxu2 %v989_v4  ;;  %v390_v14 = vshll.u32 %v386_v12, 16  ;;  %v388_v16 = vshrl.u32 %v386_v12, 16  ;;  %602 = vmatpush.bf16.msra.mxu0 %v1014_v22  ;;  %v1019_v36 = vld [vmem:[%s1239_s4 + $0x98] sm:$0xff]  ;;  %v1002_v40 = vld [vmem:[%s1239_s4 + $0x50] sm:$0xff]  ;;  %v1001_v43 = vld [vmem:[%s1239_s4 + $0x48] sm:$0xff] }
  0x15   : > { %365 = vmatpush.bf16.msra.mxu1 %v993_v5  ;;  %v1010_v41 = vld [vmem:[%s1239_s4 + $0x10] sm:$0xff]  ;;  %v1009_v44 = vld [vmem:[%s1239_s4 + $0x8] sm:$0xff]  ;;  %v1000_v46 = vld [vmem:[%s1239_s4 + $0x40] sm:$0xff] }
  0x16   : > { %v392_v17 = vrot.slane %v390_v14, 1  ;;  %v1018_v42 = vld [vmem:[%s1239_s4 + $0x90] sm:$0xff]  ;;  %v1008_v47 = vld [vmem:[%s1239_s4] sm:$0xff]  ;;  %v1017_v51 = vld [vmem:[%s1239_s4 + $0x88] sm:$0xff] }
  0x17   : > { %525 = vmatpush.bf16.msra.mxu3 %v1005_v26  ;;  %v1032_v52 = vld [vmem:[%s1237_s2] ss:$0 sm:$0xff] }
  0x18   : > { %320 = vmatpush.bf16.msra.mxu2 %v988_v6  ;;  %v393_v18 = vor.u32 %v392_v17, %v388_v16  ;;  %603 = vmatpush.bf16.msra.mxu0 %v1013_v27  ;;  %v1016_v53 = vld [vmem:[%s1239_s4 + $0x80] sm:$0xff] }
  0x19   : > { %366 = vmatpush.bf16.msra.mxu1 %v992_v7  ;;  %v1033_v54 = vld [vmem:[%s1238_s3] ss:$0 sm:$0xff] }
  0x1a   : > { %v1034_v20 = vld [vmem:[%s1240_s5] ss:$0 sm:$0xff] }
  0x1b   : > { %815 = vmatmul.msk.bf16.vlgmr.msra.gmra.mxu2 %vm309_vm0, %v275_v9  ;;  %526 = vmatpush.bf16.msra.mxu3 %v1004_v30  ;;  %v1035_v21 = vld [vmem:[%s1241_s6] ss:$0 sm:$0xff] }
  0x1c   : > { %425 = vmatpush.bf16.msrb.mxu2 %v999_v8  ;;  %832 = vmatmul.msk.bf16.vlgmr.msra.gmra.mxu1 %vm309_vm0, %v275_v9 }
  0x1d   : > { %693 = vmatpush.bf16.msrb.mxu1 %v1023_v23  ;;  %604 = vmatpush.bf16.msra.mxu0 %v1012_v31 }
  0x1f   : > { %527 = vmatpush.bf16.msra.mxu3 %v1003_v34 }
  0x20   : > { %426 = vmatpush.bf16.msrb.mxu2 %v998_v11 }
  0x21   : > { %694 = vmatpush.bf16.msrb.mxu1 %v1022_v25  ;;  %605 = vmatpush.bf16.msra.mxu0 %v1011_v35 }
  0x23   : > { %528 = vmatpush.bf16.msra.mxu3 %v1002_v40 }
  0x24   : > { %427 = vmatpush.bf16.msrb.mxu2 %v997_v13 }
  0x25   : > { %695 = vmatpush.bf16.msrb.mxu1 %v1021_v28  ;;  %606 = vmatpush.bf16.msra.mxu0 %v1010_v41 }
  0x27   : > { %529 = vmatpush.bf16.msra.mxu3 %v1001_v43 }
  0x28   : > { %428 = vmatpush.bf16.msrb.mxu2 %v996_v15 }
  0x29   : > { %696 = vmatpush.bf16.msrb.mxu1 %v1020_v33  ;;  %607 = vmatpush.bf16.msra.mxu0 %v1009_v44 }
  0x2b   : > { %857 = vmatmul.msk.bf16.vlgmr.msrb.gmra.mxu2 %vm309_vm0, %v393_v18  ;;  %530 = vmatpush.bf16.msra.mxu3 %v1000_v46 }
  0x2d   : > { %697 = vmatpush.bf16.msrb.mxu1 %v1019_v36  ;;  %608 = vmatpush.bf16.msra.mxu0 %v1008_v47 }
  0x31   : > { %698 = vmatpush.bf16.msrb.mxu1 %v1018_v42 }
  0x35   : > { %699 = vmatpush.bf16.msrb.mxu1 %v1017_v51 }
  0x39   : > { %700 = vmatpush.bf16.msrb.mxu1 %v1016_v53 }
  0x99   : > { %v368_v24 = vpop.f32.mrf.mxu1 }
  0x9e   : > { %v322_v29 = vpop.f32.mrf.mxu2 }
  0x9f   : > { %326 = vst [vmem:[#allocation2] sm:$0xff] %v322_v29 }
  0xa1   : > { %v370_v32 = vpop.f32.mrf.mxu1 }
  0xa6   : > { %v372_v37 = vld [vmem:[#allocation2 + $0x1] sm:$0x7f]  ;;  %v324_v38 = vpop.f32.mrf.mxu2 }
  0xa7   : > { %v373_v39 = vadd.f32 %v372_v37, %v368_v24 }
  0xa9   : > { %374 = vst [vmem:[#allocation2 + $0x1] sm:$0x7f] %v373_v39 }
  0xae   : > { %v430_v45 = vpop.f32.mrf.mxu2 }
  0xb0   : > { %v434_v48 = vld [vmem:[#allocation2] sm:$0x7f] }
  0xb1   : > { %v435_v49 = vadd.f32 %v434_v48, %v430_v45 }
  0xb3   : > { %436 = vst [vmem:[#allocation2] sm:$0x7f] %v435_v49 }
  0xb6   : > { %v432_v50 = vpop.f32.mrf.mxu2 }
  0xba   : > { %v437_v55 = vld [vmem:[#allocation2] sm:$0xff] }
  0xbb   : > { %v442_v56 = vmul.f32 %v1032_v52, %v437_v55 }
  0xbd   : > { %v447_v57 = vadd.f32 %v1033_v54, %v442_v56 }
  0xbf   : > { %v449_v58 = vmul.f32 0.044715, %v447_v57  ;;  %v448_v0 = vmul.f32 0.5, %v447_v57 }
  0xc1   : > { %v450_v59 = vmul.f32 %v449_v58, %v447_v57 }
  0xc3   : > { %v451_v60 = vmul.f32 %v450_v59, %v447_v57 }
  0xc5   : > { %v452_v61 = vadd.f32 %v451_v60, %v447_v57 }
  0xc7   : > { %v453_v62 = vmul.f32 0.7978846, %v452_v61 }
  0xc9   : > { %1036 = vtanh.f32 %v453_v62 }
  0xcf   : > { %v1037_v63 = vpop.eup %1036 }
  0xd0   : > { %v455_v1 = vadd.f32 1.0, %v1037_v63 }
  0xd2   : > { %v456_v2 = vmul.f32 %v455_v1, %v448_v0 }
  0xd4   : > { %v457_v3 = vpack.c.bf16 %v456_v2, %v456_v2 }
  0xd6   : > { %531 = vmatmul.bf16.vlgmr.msra.gmra.mxu3 %v457_v3  ;;  %609 = vmatmul.bf16.vlgmr.msra.gmra.mxu0 %v457_v3  ;;  %v635_v4 = vunpack.c.l.b16 %v457_v3 }
  0xd8   : > { %v636_v5 = vpack.c.b16 %v635_v4, %v635_v4 }
  0xda   : > { %v640_v6 = vshll.u32 %v636_v5, 16  ;;  %v638_v7 = vshrl.u32 %v636_v5, 16 }
  0xdc   : > { %v642_v8 = vrot.slane %v640_v6, 1 }
  0xde   : > { %v643_v9 = vor.u32 %v642_v8, %v638_v7 }
  0xe0   : > { %701 = vmatmul.bf16.vlgmr.msrb.gmra.mxu1 %v643_v9 }
 0x153   : > { %v610_v10 = vpop.f32.mrf.mxu0 }
 0x159   : > { %v532_v11 = vpop.f32.mrf.mxu3 }
 0x15a   : > { %536 = vst [vmem:[#allocation2] sm:$0xff] %v532_v11 }
 0x15b   : > { %v612_v12 = vpop.f32.mrf.mxu0 }
 0x15d   : > { %v702_v13 = vpop.f32.mrf.mxu1 }
 0x161   : > { %v614_v14 = vld [vmem:[#allocation2 + $0x1] sm:$0x7f]  ;;  %v534_v15 = vpop.f32.mrf.mxu3 }
 0x162   : > { %v615_v16 = vadd.f32 %v614_v14, %v610_v10 }
 0x164   : > { %616 = vst [vmem:[#allocation2 + $0x1] sm:$0x7f] %v615_v16 }
 0x165   : > { %v704_v17 = vpop.f32.mrf.mxu1 }
 0x16b   : > { %v706_v18 = vld [vmem:[#allocation2] sm:$0x7f] }
 0x16c   : > { %v707_v19 = vadd.f32 %v706_v18, %v702_v13 }
 0x16e   : > { %708 = vst [vmem:[#allocation2] sm:$0x7f] %v707_v19 }
 0x175   : > { %v709_v22 = vld [vmem:[#allocation2] sm:$0xff] }
 0x176   : > { %v714_v23 = vmul.f32 %v1034_v20, %v709_v22 }
 0x178   : > { %v719_v24 = vadd.f32 %v1035_v21, %v714_v23 }
 0x17a   : > { %v721_v25 = vmul.f32 0.044715, %v719_v24  ;;  %v720_v31 = vmul.f32 0.5, %v719_v24 }
 0x17c   : > { %v722_v26 = vmul.f32 %v721_v25, %v719_v24 }
 0x17e   : > { %v723_v27 = vmul.f32 %v722_v26, %v719_v24 }
 0x180   : > { %v724_v28 = vadd.f32 %v723_v27, %v719_v24 }
 0x182   : > { %v725_v29 = vmul.f32 0.7978846, %v724_v28 }
 0x184   : > { %1038 = vtanh.f32 %v725_v29 }
 0x18a   : > { %v1039_v30 = vpop.eup %1038 }
 0x18b   : > { %v727_v32 = vadd.f32 1.0, %v1039_v30 }
 0x18d   : > { %v728_v33 = vmul.f32 %v727_v32, %v720_v31 }
 0x18f   : > { %v729_v34 = vpack.c.bf16 %v728_v33, %v728_v33 }
 0x191   : > { %730 = vst [vmem:[%s273_s8] sm:$0xf] %v729_v34 }
 0x192 PF: > { %s17_s24 = sadd.s32 1, %s1046_s24  }
 0x193   : > { %p14_p4 = scmp.ge.s32.totalorder %s17_s24, 4  }
 0x195   :  { %16 = sbr.rel (!%p14_p4) target bundleno = 1 (0x1), region = 82 }

// kernel: unet_forward_pallas.10
= control target key start
LH: loop header
LB: loop body
LE: loop exit
PB: predicated region body
PF: predicated region fallthrough
CT: control target
= control target key end

     0   :  { %s1122_s24 = smov 0   ;;  %s1257_s0 = inlined_call_operand.vmem [shape: bf16[2,16,48], index: 0, kind: input, shape index: {}]   ;;  %s1258_s1 = inlined_call_operand.vmem [shape: bf16[3,48,128], index: 1, kind: input, shape index: {}]   ;;  %s1259_s2 = inlined_call_operand.vmem [shape: f32[1,128], index: 2, kind: input, shape index: {}]   ;;  %s1260_s3 = inlined_call_operand.vmem [shape: f32[1,128], index: 3, kind: input, shape index: {}]   ;;  %s1261_s4 = inlined_call_operand.vmem [shape: bf16[3,128,128], index: 4, kind: input, shape index: {}]   ;;  %s1262_s5 = inlined_call_operand.vmem [shape: f32[1,128], index: 5, kind: input, shape index: {}]   ;;  %s1263_s6 = inlined_call_operand.vmem [shape: f32[1,128], index: 6, kind: input, shape index: {}]   ;;  %s1264_s7 = inlined_call_operand.vmem [shape: bf16[2,16,128], index: 7, kind: output, shape index: {}]  }
   0x1 LB: > { %s819_s25 = sadd.s32 4294967295, %s1080_s24   ;;  %p823_p0 = scmp.ge.s32.totalorder %s1080_s24, 1  ;;  %s1080_s24 = sphi %s1122_s24, %s17_s24  }
   0x2   : > { %p237_p1 = scmp.lt.s32.totalorder %s1080_s24, 3 }
   0x4   : > { %p238_p2 = pnand %p823_p0, %p237_p1 }
   0x5   : > { %p269_p3 = scmp.lt.s32.totalorder (!%p238_p2), %s819_s25, 1 }
   0x6   : > { %241 = sbr.rel (%p238_p2) target bundleno = 420 (0x1a4), region = 48 }
   0xb   : > { %v1018_v0 = vld [vmem:[%s1258_s1 + $0x28] sm:$0xff]  ;;  %v1021_v1 = vld [vmem:[%s1258_s1 + $0x10] sm:$0xff]  ;;  %v1017_v2 = vld [vmem:[%s1258_s1 + $0x20] sm:$0xff]  ;;  %s1266_s25 = smov (!%p269_p3, %s819_s25), 1  ;;  %vm312_vm0 = vcmask 392192  }
   0xc   : > { %321 = vmatpush.bf16.msra.mxu2 %v1018_v0  ;;  %361 = vmatpush.bf16.msra.mxu1 %v1021_v1  ;;  %v1020_v3 = vld [vmem:[%s1258_s1 + $0x8] sm:$0xff]  ;;  %s1013_s11 = sshll.u32 %s1266_s25, 3  ;;  %v1016_v4 = vld [vmem:[%s1258_s1 + $0x18] sm:$0xff]  ;;  %v1019_v5 = vld [vmem:[%s1258_s1] sm:$0xff] }
   0xd   : > { %s273_s16 = scalar_lea.vmem %s1257_s0, %s1013_s11  ;;  %v1024_v6 = vld [vmem:[%s1258_s1 + $0x40] sm:$0xff]  ;;  %v1023_v8 = vld [vmem:[%s1258_s1 + $0x38] sm:$0xff]  ;;  %v1022_v9 = vld [vmem:[%s1258_s1 + $0x30] sm:$0xff]  ;;  %s278_s23 = scalar_lea.vmem %s1264_s7, %s1013_s11 }
   0xe   : > { %v1015_v7 = vld [vmem:[%s273_s16] sm:$0xff]  ;;  %v1032_v14 = vld [vmem:[%s1261_s4 + $0x78] sm:$0xff]  ;;  %v1031_v18 = vld [vmem:[%s1261_s4 + $0x70] sm:$0xff] }
   0xf   : > { %v385_v10 = vshll.u32 %v1015_v7, 16  ;;  %v383_v11 = vshrl.u32 %v1015_v7, 16  ;;  %v1040_v15 = vld [vmem:[%s1261_s4 + $0x38] sm:$0xff]  ;;  %535 = vmatpush.bf16.msra.mxu3 %v1032_v14  ;;  %v1039_v19 = vld [vmem:[%s1261_s4 + $0x30] sm:$0xff]  ;;  %v1030_v21 = vld [vmem:[%s1261_s4 + $0x68] sm:$0xff] }
  0x10   : > { %322 = vmatpush.bf16.msra.mxu2 %v1017_v2  ;;  %362 = vmatpush.bf16.msra.mxu1 %v1020_v3  ;;  %v1048_v16 = vld [vmem:[%s1261_s4 + $0xb8] sm:$0xff]  ;;  %v1047_v20 = vld [vmem:[%s1261_s4 + $0xb0] sm:$0xff]  ;;  %v1038_v22 = vld [vmem:[%s1261_s4 + $0x28] sm:$0xff] }
  0x11   : > { %v387_v12 = vrot.slane %v385_v10, 1  ;;  %615 = vmatpush.bf16.msra.mxu0 %v1040_v15  ;;  %v1046_v23 = vld [vmem:[%s1261_s4 + $0xa8] sm:$0xff]  ;;  %v1029_v26 = vld [vmem:[%s1261_s4 + $0x60] sm:$0xff]  ;;  %v1028_v29 = vld [vmem:[%s1261_s4 + $0x58] sm:$0xff] }
  0x12   : > { %v1037_v27 = vld [vmem:[%s1261_s4 + $0x20] sm:$0xff]  ;;  %v1036_v30 = vld [vmem:[%s1261_s4 + $0x18] sm:$0xff]  ;;  %v1027_v32 = vld [vmem:[%s1261_s4 + $0x50] sm:$0xff] }
  0x13   : > { %v388_v13 = vor.u32 %v387_v12, %v383_v11  ;;  %536 = vmatpush.bf16.msra.mxu3 %v1031_v18  ;;  %v1045_v28 = vld [vmem:[%s1261_s4 + $0xa0] sm:$0xff]  ;;  %v1044_v31 = vld [vmem:[%s1261_s4 + $0x98] sm:$0xff]  ;;  %v1035_v36 = vld [vmem:[%s1261_s4 + $0x10] sm:$0xff] }
  0x14   : > { %323 = vmatpush.bf16.msra.mxu2 %v1016_v4  ;;  %363 = vmatpush.bf16.msra.mxu1 %v1019_v5  ;;  %v1043_v40 = vld [vmem:[%s1261_s4 + $0x90] sm:$0xff]  ;;  %v1026_v41 = vld [vmem:[%s1261_s4 + $0x48] sm:$0xff]  ;;  %v1025_v44 = vld [vmem:[%s1261_s4 + $0x40] sm:$0xff] }
  0x15   : > { %616 = vmatpush.bf16.msra.mxu0 %v1039_v19  ;;  %v1034_v42 = vld [vmem:[%s1261_s4 + $0x8] sm:$0xff]  ;;  %v1033_v45 = vld [vmem:[%s1261_s4] sm:$0xff] }
  0x16   : > { %v1042_v43 = vld [vmem:[%s1261_s4 + $0x88] sm:$0xff]  ;;  %v1062_v46 = vld [vmem:[%s1259_s2] ss:$0 sm:$0xff] }
  0x17   : > { %850 = vmatmul.msk.bf16.vlgmr.msra.gmra.mxu2 %vm312_vm0, %v1015_v7  ;;  %863 = vmatmul.msk.bf16.vlgmr.msra.gmra.mxu1 %vm312_vm0, %v1015_v7  ;;  %v1063_v51 = vld [vmem:[%s1260_s3] ss:$0 sm:$0xff] }
  0x18   : > { %415 = vmatpush.bf16.msrb.mxu2 %v1024_v6  ;;  %708 = vmatpush.bf16.msrb.mxu1 %v1048_v16  ;;  %v1041_v59 = vld [vmem:[%s1261_s4 + $0x80] sm:$0xff] }
  0x19   : > { %537 = vmatpush.bf16.msra.mxu3 %v1030_v21  ;;  %617 = vmatpush.bf16.msra.mxu0 %v1038_v22 }
  0x1c   : > { %416 = vmatpush.bf16.msrb.mxu2 %v1023_v8  ;;  %709 = vmatpush.bf16.msrb.mxu1 %v1047_v20 }
  0x1d   : > { %538 = vmatpush.bf16.msra.mxu3 %v1029_v26  ;;  %618 = vmatpush.bf16.msra.mxu0 %v1037_v27 }
  0x20   : > { %417 = vmatpush.bf16.msrb.mxu2 %v1022_v9  ;;  %710 = vmatpush.bf16.msrb.mxu1 %v1046_v23 }
  0x21   : > { %539 = vmatpush.bf16.msra.mxu3 %v1028_v29  ;;  %619 = vmatpush.bf16.msra.mxu0 %v1036_v30 }
  0x24   : > { %711 = vmatpush.bf16.msrb.mxu1 %v1045_v28 }
  0x25   : > { %540 = vmatpush.bf16.msra.mxu3 %v1027_v32  ;;  %620 = vmatpush.bf16.msra.mxu0 %v1035_v36  ;;  %v1065_v36 = vld [vmem:[%s1263_s6] ss:$0 sm:$0xff] }
  0x27   : > { %882 = vmatmul.msk.bf16.vlgmr.msrb.gmra.mxu2 %vm312_vm0, %v388_v13 }
  0x28   : > { %712 = vmatpush.bf16.msrb.mxu1 %v1044_v31  ;;  %v1064_v31 = vld [vmem:[%s1262_s5] ss:$0 sm:$0xff] }
  0x29   : > { %541 = vmatpush.bf16.msra.mxu3 %v1026_v41  ;;  %621 = vmatpush.bf16.msra.mxu0 %v1034_v42 }
  0x2c   : > { %713 = vmatpush.bf16.msrb.mxu1 %v1043_v40 }
  0x2d   : > { %542 = vmatpush.bf16.msra.mxu3 %v1025_v44  ;;  %622 = vmatpush.bf16.msra.mxu0 %v1033_v45 }
  0x30   : > { %714 = vmatpush.bf16.msrb.mxu1 %v1042_v43 }
  0x34   : > { %715 = vmatpush.bf16.msrb.mxu1 %v1041_v59 }
  0x94   : > { %v365_v24 = vpop.f32.mrf.mxu1 }
  0x9a   : > { %v325_v17 = vpop.f32.mrf.mxu2 }
  0x9b   : > { %330 = vst [vmem:[#allocation2] sm:$0xff] %v325_v17 }
  0x9c   : > { %v367_v34 = vpop.f32.mrf.mxu1 }
  0xa2   : > { %v327_v25 = vpop.f32.mrf.mxu2 }
  0xa3   : > { %331 = vst [vmem:[#allocation2 + $0x8] sm:$0xff] %v327_v25 }
  0xaa   : > { %v370_v33 = vld [vmem:[#allocation2 + $0x1] sm:$0xff]  ;;  %v371_v35 = vld [vmem:[#allocation2 + $0x9] sm:$0x7f]  ;;  %v419_v39 = vpop.f32.mrf.mxu2 }
  0xab   : > { %v372_v37 = vadd.f32 %v370_v33, %v365_v24  ;;  %v373_v38 = vadd.f32 %v371_v35, %v367_v34 }
  0xad   : > { %374 = vst [vmem:[#allocation2 + $0x1] sm:$0xff] %v372_v37 }
  0xae   : > { %375 = vst [vmem:[#allocation2 + $0x9] sm:$0x7f] %v373_v38 }
  0xb2   : > { %v421_v49 = vpop.f32.mrf.mxu2 }
  0xb4   : > { %v424_v47 = vld [vmem:[#allocation2] sm:$0xff] }
  0xb5   : > { %v426_v48 = vadd.f32 %v424_v47, %v419_v39  ;;  %v425_v50 = vld [vmem:[#allocation2 + $0x8] sm:$0x7f] }
  0xb6   : > { %v427_v52 = vadd.f32 %v425_v50, %v421_v49 }
  0xb7   : > { %v436_v53 = vmul.f32 %v1062_v46, %v426_v48 }
  0xb8   : > { %429 = vst [vmem:[#allocation2 + $0x8] sm:$0x7f] %v427_v52 }
  0xb9   : > { %v442_v54 = vadd.f32 %v1063_v51, %v436_v53 }
  0xbb   : > { %v446_v55 = vmul.f32 0.044715, %v442_v54  ;;  %v444_v7 = vmul.f32 0.5, %v442_v54 }
  0xbd   : > { %v448_v56 = vmul.f32 %v446_v55, %v442_v54 }
  0xbf   : > { %v431_v57 = vld [vmem:[#allocation2 + $0x8] sm:$0xff]  ;;  %v450_v58 = vmul.f32 %v448_v56, %v442_v54 }
  0xc0   : > { %v437_v60 = vmul.f32 %v1062_v46, %v431_v57 }
  0xc1   : > { %v452_v61 = vadd.f32 %v450_v58, %v442_v54 }
  0xc2   : > { %v443_v62 = vadd.f32 %v1063_v51, %v437_v60 }
  0xc3   : > { %v454_v63 = vmul.f32 0.7978846, %v452_v61 }
  0xc4   : > { %v447_v0 = vmul.f32 0.044715, %v443_v62  ;;  %v445_v10 = vmul.f32 0.5, %v443_v62 }
  0xc5   : > { %1066 = vtanh.f32 %v454_v63 }
  0xc6   : > { %v449_v1 = vmul.f32 %v447_v0, %v443_v62 }
  0xc8   : > { %v451_v2 = vmul.f32 %v449_v1, %v443_v62 }
  0xca   : > { %v453_v3 = vadd.f32 %v451_v2, %v443_v62 }
  0xcb   : > { %v1067_v4 = vpop.eup %1066 }
  0xcc   : > { %v455_v5 = vmul.f32 0.7978846, %v453_v3  ;;  %v458_v6 = vadd.f32 1.0, %v1067_v4 }
  0xce   : > { %1068 = vtanh.f32 %v455_v5  ;;  %v460_v8 = vmul.f32 %v458_v6, %v444_v7 }
  0xd0   : > { %v462_v13 = vpack.c.bf16 %v460_v8, %v460_v8 }
  0xd2   : > { %v483_v15 = vunpack.c.l.b16 %v462_v13 }
  0xd4   : > { %v1069_v9 = vpop.eup %1068 }
  0xd5   : > { %v459_v11 = vadd.f32 1.0, %v1069_v9 }
  0xd7   : > { %v461_v12 = vmul.f32 %v459_v11, %v445_v10 }
  0xd9   : > { %v463_v14 = vpack.c.bf16 %v461_v12, %v461_v12 }
  0xdb   : > { %v484_v16 = vunpack.c.l.b16 %v463_v14 }
  0xdd   : > { %v485_v17 = vpack.c.b16 %v484_v16, %v483_v15 }
  0xdf   : > { %543 = vmatmul.bf16.vlgmr.msra.gmra.mxu3 %v485_v17  ;;  %623 = vmatmul.bf16.vlgmr.msra.gmra.mxu0 %v485_v17  ;;  %v655_v18 = vshll.u32 %v485_v17, 16  ;;  %v653_v19 = vshrl.u32 %v485_v17, 16 }
  0xe1   : > { %v657_v20 = vrot.slane %v655_v18, 1 }
  0xe3   : > { %v658_v21 = vor.u32 %v657_v20, %v653_v19 }
  0xe5   : > { %716 = vmatmul.bf16.vlgmr.msrb.gmra.mxu1 %v658_v21 }
 0x15c   : > { %v624_v23 = vpop.f32.mrf.mxu0 }
 0x162   : > { %v544_v22 = vpop.f32.mrf.mxu3  ;;  %v717_v28 = vpop.f32.mrf.mxu1 }
 0x163   : > { %549 = vst [vmem:[#allocation2] sm:$0xff] %v544_v22 }
 0x164   : > { %v626_v25 = vpop.f32.mrf.mxu0 }
 0x16a   : > { %v546_v24 = vpop.f32.mrf.mxu3  ;;  %v719_v34 = vpop.f32.mrf.mxu1 }
 0x16b   : > { %550 = vst [vmem:[#allocation2 + $0x8] sm:$0xff] %v546_v24 }
 0x172   : > { %v629_v26 = vld [vmem:[#allocation2 + $0x1] sm:$0xff]  ;;  %v630_v27 = vld [vmem:[#allocation2 + $0x9] sm:$0x7f] }
 0x173   : > { %v631_v29 = vadd.f32 %v629_v26, %v624_v23  ;;  %v632_v30 = vadd.f32 %v630_v27, %v626_v25 }
 0x175   : > { %633 = vst [vmem:[#allocation2 + $0x1] sm:$0xff] %v631_v29 }
 0x176   : > { %634 = vst [vmem:[#allocation2 + $0x9] sm:$0x7f] %v632_v30 }
 0x17c   : > { %v722_v32 = vld [vmem:[#allocation2] sm:$0xff] }
 0x17d   : > { %v724_v33 = vadd.f32 %v722_v32, %v717_v28  ;;  %v723_v35 = vld [vmem:[#allocation2 + $0x8] sm:$0x7f] }
 0x17e   : > { %v725_v37 = vadd.f32 %v723_v35, %v719_v34 }
 0x17f   : > { %726 = vst [vmem:[#allocation2] sm:$0xff] %v724_v33  ;;  %v734_v38 = vmul.f32 %v1064_v31, %v724_v33 }
 0x180   : > { %727 = vst [vmem:[#allocation2 + $0x8] sm:$0x7f] %v725_v37 }
 0x181   : > { %v740_v39 = vadd.f32 %v1065_v36, %v734_v38 }
 0x183   : > { %v744_v40 = vmul.f32 0.044715, %v740_v39  ;;  %v742_v56 = vmul.f32 0.5, %v740_v39 }
 0x185   : > { %v746_v41 = vmul.f32 %v744_v40, %v740_v39 }
 0x187   : > { %v729_v42 = vld [vmem:[#allocation2 + $0x8] sm:$0xff]  ;;  %v748_v43 = vmul.f32 %v746_v41, %v740_v39 }
 0x188   : > { %v735_v44 = vmul.f32 %v1064_v31, %v729_v42 }
 0x189   : > { %v750_v46 = vadd.f32 %v748_v43, %v740_v39 }
 0x18a   : > { %v741_v45 = vadd.f32 %v1065_v36, %v735_v44 }
 0x18b   : > { %v752_v49 = vmul.f32 0.7978846, %v750_v46 }
 0x18c   : > { %v745_v47 = vmul.f32 0.044715, %v741_v45  ;;  %v743_v57 = vmul.f32 0.5, %v741_v45 }
 0x18d   : > { %1070 = vtanh.f32 %v752_v49 }
 0x18e   : > { %v747_v48 = vmul.f32 %v745_v47, %v741_v45 }
 0x190   : > { %v749_v50 = vmul.f32 %v747_v48, %v741_v45 }
 0x192   : > { %v751_v51 = vadd.f32 %v749_v50, %v741_v45 }
 0x193   : > { %v1071_v53 = vpop.eup %1070 }
 0x194   : > { %v753_v52 = vmul.f32 0.7978846, %v751_v51  ;;  %v756_v54 = vadd.f32 1.0, %v1071_v53 }
 0x196   : > { %1072 = vtanh.f32 %v753_v52  ;;  %v758_v59 = vmul.f32 %v756_v54, %v742_v56 }
 0x19c   : > { %v1073_v55 = vpop.eup %1072 }
 0x19d   : > { %v757_v58 = vadd.f32 1.0, %v1073_v55 }
 0x19f   : > { %v759_v60 = vmul.f32 %v757_v58, %v743_v57 }
 0x1a1   : > { %v1052_v61 = vpack.c.bf16 %v759_v60, %v758_v59 }
 0x1a3   : > { %1053 = vst [vmem:[%s278_s23] sm:$0xff] %v1052_v61  }
 0x1a4 PF: > { %s17_s24 = sadd.s32 1, %s1080_s24  }
 0x1a5   : > { %p14_p4 = scmp.ge.s32.totalorder %s17_s24, 4  }
 0x1a7   :  { %16 = sbr.rel (!%p14_p4) target bundleno = 1 (0x1), region = 82 }

// kernel: unet_forward_pallas.12
= control target key start
LH: loop header
LB: loop body
LE: loop exit
PB: predicated region body
PF: predicated region fallthrough
CT: control target
= control target key end

     0   :  { %12 = vsyncpa [#allocation4], 0  ;;  %s1151_s24 = smov 0   ;;  %s1265_s0 = inlined_call_operand.vmem [shape: bf16[2,4,64], index: 0, kind: input, shape index: {}]   ;;  %s1266_s1 = inlined_call_operand.hbm [shape: bf16[3,64,128], index: 1, kind: input, shape index: {}]   ;;  %s1267_s2 = inlined_call_operand.vmem [shape: f32[1,128], index: 2, kind: input, shape index: {}]   ;;  %s1268_s3 = inlined_call_operand.vmem [shape: f32[1,128], index: 3, kind: input, shape index: {}]   ;;  %s1269_s4 = inlined_call_operand.vmem [shape: bf16[3,128,128], index: 4, kind: input, shape index: {}]   ;;  %s1270_s5 = inlined_call_operand.vmem [shape: f32[1,128], index: 5, kind: input, shape index: {}]   ;;  %s1271_s6 = inlined_call_operand.vmem [shape: f32[1,128], index: 6, kind: input, shape index: {}]   ;;  %s1272_s7 = inlined_call_operand.vmem [shape: bf16[2,4,128], index: 7, kind: output, shape index: {}]  }
   0x1 LB: > { %s212_s27 = sshll.u32 %s1266_s1, 4  ;;  %s811_s28 = sadd.s32 4294967295, %s1106_s24   ;;  %s1106_s24 = sphi %s1151_s24, %s18_s24   ;;  %s213_s27 = int_to_ptr.hbm [resolvable:$true] %s212_s27 }
   0x2   : > { %p813_p0 = scmp.ge.s32.totalorder %s1106_s24, 1  ;;  %p201_p1 = scmp.lt.s32.totalorder %s1106_s24, 3 }
   0x3   : > { %p1045_p2 = scmp.eq.s32.totalorder %s811_s28, 0  ;;  %s1108_s29 = smov [#allocation3]  }
   0x4   : > { %p202_p3 = pnand %p813_p0, %p201_p1  ;;  %s214_s30 = sshll.u32 %s1108_s29, 4  ;;  %s215_s30 = int_to_ptr.vmem [resolvable:$true] %s214_s30 }
   0x5   : > { %s1109_s8 = smov 64   ;;  %s1110_s9 = smov 4  }
   0x6   : > { %p1041_p4 = pneg %p202_p3  ;;  %252 = sbr.rel (%p202_p3) target bundleno = 403 (0x193), region = 48 }
   0x8   : > { %p1042_p5 = pnand %p1045_p2, %p1041_p4 }
   0xa   : > { %1044 = dma.hbm_to_vmem [thread:$0]  (!%p1042_p5), %s213_s27, 1536, %s215_s30, [#allocation4], %s1109_s8, %s1109_s8, %s1110_s9  }
   0xb   : > { %1101 = dma.done.wait (%p1045_p2), [#allocation4], 1536  }
   0xc   : > { %1103 = vsyncadd (%p1045_p2), [#allocation4], 4294965760  ;;  %p283_p6 = scmp.lt.s32.totalorder %s811_s28, 1  ;;  %v1004_v0 = vld [vmem:[#allocation3 + $0x38] sm:$0xff]  ;;  %v1003_v2 = vld [vmem:[#allocation3 + $0x30] sm:$0xff]  ;;  %vm326_vm0 = vcmask 523264  }
   0xd   : > { %v1008_v1 = vld [vmem:[#allocation3 + $0x18] sm:$0xff]  ;;  %334 = vmatpush.bf16.msra.mxu2 %v1004_v0  ;;  %v1007_v3 = vld [vmem:[#allocation3 + $0x10] sm:$0xff]  ;;  %v1002_v5 = vld [vmem:[#allocation3 + $0x28] sm:$0xff] }
   0xe   : > { %s1274_s28 = smov (!%p283_p6, %s811_s28), 1  ;;  %380 = vmatpush.bf16.msra.mxu1 %v1008_v1  ;;  %v1006_v6 = vld [vmem:[#allocation3 + $0x8] sm:$0xff]  ;;  %v1001_v7 = vld [vmem:[#allocation3 + $0x20] sm:$0xff]  ;;  %v1012_v9 = vld [vmem:[#allocation3 + $0x58] sm:$0xff] }
   0xf   : > { %s818_s10 = sshll.u32 %s1274_s28, 1  ;;  %v1005_v8 = vld [vmem:[#allocation3] sm:$0xff]  ;;  %v1011_v10 = vld [vmem:[#allocation3 + $0x50] sm:$0xff]  ;;  %v1010_v12 = vld [vmem:[#allocation3 + $0x48] sm:$0xff] }
  0x10   : > { %s286_s13 = scalar_lea.vmem %s1265_s0, %s818_s10  ;;  %v1009_v14 = vld [vmem:[#allocation3 + $0x40] sm:$0xff]  ;;  %v1020_v18 = vld [vmem:[%s1269_s4 + $0x78] sm:$0xff]  ;;  %v1017_v29 = vld [vmem:[%s1269_s4 + $0x60] sm:$0xff]  ;;  %s290_s12 = scalar_lea.vmem %s1272_s7, %s818_s10 }
  0x11   : > { %v292_v4 = vld [vmem:[%s286_s13] sm:$0x3]  ;;  %335 = vmatpush.bf16.msra.mxu2 %v1003_v2  ;;  %v1028_v19 = vld [vmem:[%s1269_s4 + $0x38] sm:$0xff]  ;;  %538 = vmatpush.bf16.msra.mxu3 %v1020_v18  ;;  %v1019_v20 = vld [vmem:[%s1269_s4 + $0x70] sm:$0xff] }
  0x12   : > { %401 = vst [vmem:[#allocation1] ss:$4 sm:$0xff] %v292_v4  ;;  %381 = vmatpush.bf16.msra.mxu1 %v1007_v3  ;;  %616 = vmatpush.bf16.msra.mxu0 %v1028_v19  ;;  %v1027_v21 = vld [vmem:[%s1269_s4 + $0x30] sm:$0xff]  ;;  %v1036_v22 = vld [vmem:[%s1269_s4 + $0xb8] sm:$0xff]  ;;  %v1018_v25 = vld [vmem:[%s1269_s4 + $0x68] sm:$0xff] }
  0x13   : > { %v1035_v24 = vld [vmem:[%s1269_s4 + $0xb0] sm:$0xff]  ;;  %v1026_v26 = vld [vmem:[%s1269_s4 + $0x28] sm:$0xff]  ;;  %v1025_v30 = vld [vmem:[%s1269_s4 + $0x20] sm:$0xff] }
  0x14   : > { %v1034_v27 = vld [vmem:[%s1269_s4 + $0xa8] sm:$0xff]  ;;  %v1033_v32 = vld [vmem:[%s1269_s4 + $0xa0] sm:$0xff]  ;;  %v1016_v33 = vld [vmem:[%s1269_s4 + $0x58] sm:$0xff] }
  0x15   : > { %336 = vmatpush.bf16.msra.mxu2 %v1002_v5  ;;  %539 = vmatpush.bf16.msra.mxu3 %v1019_v20  ;;  %v1024_v34 = vld [vmem:[%s1269_s4 + $0x18] sm:$0xff]  ;;  %v1015_v39 = vld [vmem:[%s1269_s4 + $0x50] sm:$0xff]  ;;  %v1014_v42 = vld [vmem:[%s1269_s4 + $0x48] sm:$0xff] }
  0x16   : > { %382 = vmatpush.bf16.msra.mxu1 %v1006_v6  ;;  %617 = vmatpush.bf16.msra.mxu0 %v1027_v21  ;;  %v1032_v35 = vld [vmem:[%s1269_s4 + $0x98] sm:$0xff]  ;;  %v1023_v40 = vld [vmem:[%s1269_s4 + $0x10] sm:$0xff]  ;;  %v1022_v43 = vld [vmem:[%s1269_s4 + $0x8] sm:$0xff] }
  0x17   : > { %v1031_v41 = vld [vmem:[%s1269_s4 + $0x90] sm:$0xff]  ;;  %v1013_v45 = vld [vmem:[%s1269_s4 + $0x40] sm:$0xff]  ;;  %v1030_v50 = vld [vmem:[%s1269_s4 + $0x88] sm:$0xff] }
  0x18   : > { %v1021_v46 = vld [vmem:[%s1269_s4] sm:$0xff] }
  0x19   : > { %337 = vmatpush.bf16.msra.mxu2 %v1001_v7  ;;  %v402_v11 = vld.sshfl [vmem:[#allocation1] sm:$0xff pattern:$0x73625140]  ;;  %540 = vmatpush.bf16.msra.mxu3 %v1018_v25 }
  0x1a   : > { %383 = vmatpush.bf16.msra.mxu1 %v1005_v8  ;;  %v405_v13 = vshll.u32 %v402_v11, 16  ;;  %v403_v15 = vshrl.u32 %v402_v11, 16  ;;  %618 = vmatpush.bf16.msra.mxu0 %v1026_v26  ;;  %v1058_v51 = vld [vmem:[%s1267_s2] ss:$0 sm:$0xff] }
  0x1b   : > { %v1029_v52 = vld [vmem:[%s1269_s4 + $0x80] sm:$0xff] }
  0x1c   : > { %836 = vmatmul.msk.bf16.vlgmr.msra.gmra.mxu2 %vm326_vm0, %v292_v4  ;;  %v407_v16 = vrot.slane %v405_v13, 1  ;;  %v1059_v53 = vld [vmem:[%s1268_s3] ss:$0 sm:$0xff] }
  0x1d   : > { %440 = vmatpush.bf16.msrb.mxu2 %v1012_v9  ;;  %853 = vmatmul.msk.bf16.vlgmr.msra.gmra.mxu1 %vm326_vm0, %v292_v4  ;;  %v1060_v19 = vld [vmem:[%s1270_s5] ss:$0 sm:$0xff] }
  0x1e   : > { %v408_v17 = vor.u32 %v407_v16, %v403_v15  ;;  %708 = vmatpush.bf16.msrb.mxu1 %v1036_v22  ;;  %541 = vmatpush.bf16.msra.mxu3 %v1017_v29  ;;  %v1061_v20 = vld [vmem:[%s1271_s6] ss:$0 sm:$0xff] }
  0x1f   : > { %619 = vmatpush.bf16.msra.mxu0 %v1025_v30 }
  0x21   : > { %441 = vmatpush.bf16.msrb.mxu2 %v1011_v10 }
  0x22   : > { %709 = vmatpush.bf16.msrb.mxu1 %v1035_v24  ;;  %542 = vmatpush.bf16.msra.mxu3 %v1016_v33 }
  0x23   : > { %620 = vmatpush.bf16.msra.mxu0 %v1024_v34 }
  0x25   : > { %442 = vmatpush.bf16.msrb.mxu2 %v1010_v12 }
  0x26   : > { %710 = vmatpush.bf16.msrb.mxu1 %v1034_v27  ;;  %543 = vmatpush.bf16.msra.mxu3 %v1015_v39 }
  0x27   : > { %621 = vmatpush.bf16.msra.mxu0 %v1023_v40 }
  0x29   : > { %443 = vmatpush.bf16.msrb.mxu2 %v1009_v14 }
  0x2a   : > { %711 = vmatpush.bf16.msrb.mxu1 %v1033_v32  ;;  %544 = vmatpush.bf16.msra.mxu3 %v1014_v42 }
  0x2b   : > { %622 = vmatpush.bf16.msra.mxu0 %v1022_v43 }
  0x2c   : > { %870 = vmatmul.msk.bf16.vlgmr.msrb.gmra.mxu2 %vm326_vm0, %v408_v17 }
  0x2e   : > { %712 = vmatpush.bf16.msrb.mxu1 %v1032_v35  ;;  %545 = vmatpush.bf16.msra.mxu3 %v1013_v45 }
  0x2f   : > { %623 = vmatpush.bf16.msra.mxu0 %v1021_v46 }
  0x32   : > { %713 = vmatpush.bf16.msrb.mxu1 %v1031_v41 }
  0x36   : > { %714 = vmatpush.bf16.msrb.mxu1 %v1030_v50 }
  0x3a   : > { %715 = vmatpush.bf16.msrb.mxu1 %v1029_v52 }
  0x9a   : > { %v385_v23 = vpop.f32.mrf.mxu1 }
  0x9f   : > { %v339_v28 = vpop.f32.mrf.mxu2 }
  0xa0   : > { %343 = vst [vmem:[#allocation2] sm:$0xf] %v339_v28 }
  0xa2   : > { %v387_v31 = vpop.f32.mrf.mxu1 }
  0xa7   : > { %v389_v36 = vld [vmem:[#allocation2 + $0x1] sm:$0x7]  ;;  %v341_v37 = vpop.f32.mrf.mxu2 }
  0xa8   : > { %v390_v38 = vadd.f32 %v389_v36, %v385_v23 }
  0xaa   : > { %391 = vst [vmem:[#allocation2 + $0x1] sm:$0x7] %v390_v38 }
  0xaf   : > { %v445_v44 = vpop.f32.mrf.mxu2 }
  0xb1   : > { %v449_v47 = vld [vmem:[#allocation2] sm:$0x7] }
  0xb2   : > { %v450_v48 = vadd.f32 %v449_v47, %v445_v44 }
  0xb4   : > { %451 = vst [vmem:[#allocation2] sm:$0x7] %v450_v48 }
  0xb7   : > { %v447_v49 = vpop.f32.mrf.mxu2 }
  0xbb   : > { %v452_v54 = vld [vmem:[#allocation2] sm:$0xf] }
  0xbc   : > { %v457_v55 = vmul.f32 %v1058_v51, %v452_v54 }
  0xbe   : > { %v462_v56 = vadd.f32 %v1059_v53, %v457_v55 }
  0xc0   : > { %v464_v57 = vmul.f32 0.044715, %v462_v56  ;;  %v463_v63 = vmul.f32 0.5, %v462_v56 }
  0xc2   : > { %v465_v58 = vmul.f32 %v464_v57, %v462_v56 }
  0xc4   : > { %v466_v59 = vmul.f32 %v465_v58, %v462_v56 }
  0xc6   : > { %v467_v60 = vadd.f32 %v466_v59, %v462_v56 }
  0xc8   : > { %v468_v61 = vmul.f32 0.7978846, %v467_v60 }
  0xca   : > { %1062 = vtanh.f32 %v468_v61 }
  0xd0   : > { %v1063_v62 = vpop.eup %1062 }
  0xd1   : > { %v470_v0 = vadd.f32 1.0, %v1063_v62 }
  0xd3   : > { %v471_v1 = vmul.f32 %v470_v0, %v463_v63 }
  0xd5   : > { %v472_v2 = vpack.c.bf16 %v471_v1, %v471_v1 }
  0xd7   : > { %546 = vmatmul.bf16.vlgmr.msra.gmra.mxu3 %v472_v2  ;;  %624 = vmatmul.bf16.vlgmr.msra.gmra.mxu0 %v472_v2  ;;  %v650_v3 = vunpack.c.l.b16 %v472_v2 }
  0xd9   : > { %v651_v4 = vpack.c.b16 %v650_v3, %v650_v3 }
  0xdb   : > { %v655_v5 = vshll.u32 %v651_v4, 16  ;;  %v653_v6 = vshrl.u32 %v651_v4, 16 }
  0xdd   : > { %v657_v7 = vrot.slane %v655_v5, 1 }
  0xdf   : > { %v658_v8 = vor.u32 %v657_v7, %v653_v6 }
  0xe1   : > { %716 = vmatmul.bf16.vlgmr.msrb.gmra.mxu1 %v658_v8 }
 0x154   : > { %v625_v9 = vpop.f32.mrf.mxu0 }
 0x15a   : > { %v547_v10 = vpop.f32.mrf.mxu3 }
 0x15b   : > { %551 = vst [vmem:[#allocation2] sm:$0xf] %v547_v10 }
 0x15c   : > { %v627_v11 = vpop.f32.mrf.mxu0 }
 0x15e   : > { %v717_v12 = vpop.f32.mrf.mxu1 }
 0x162   : > { %v629_v13 = vld [vmem:[#allocation2 + $0x1] sm:$0x7]  ;;  %v549_v14 = vpop.f32.mrf.mxu3 }
 0x163   : > { %v630_v15 = vadd.f32 %v629_v13, %v625_v9 }
 0x165   : > { %631 = vst [vmem:[#allocation2 + $0x1] sm:$0x7] %v630_v15 }
 0x166   : > { %v719_v16 = vpop.f32.mrf.mxu1 }
 0x16c   : > { %v721_v17 = vld [vmem:[#allocation2] sm:$0x7] }
 0x16d   : > { %v722_v18 = vadd.f32 %v721_v17, %v717_v12 }
 0x16f   : > { %723 = vst [vmem:[#allocation2] sm:$0x7] %v722_v18 }
 0x176   : > { %v724_v21 = vld [vmem:[#allocation2] sm:$0xf] }
 0x177   : > { %v729_v22 = vmul.f32 %v1060_v19, %v724_v21 }
 0x179   : > { %v734_v23 = vadd.f32 %v1061_v20, %v729_v22 }
 0x17b   : > { %v736_v24 = vmul.f32 0.044715, %v734_v23  ;;  %v735_v30 = vmul.f32 0.5, %v734_v23 }
 0x17d   : > { %v737_v25 = vmul.f32 %v736_v24, %v734_v23 }
 0x17f   : > { %v738_v26 = vmul.f32 %v737_v25, %v734_v23 }
 0x181   : > { %v739_v27 = vadd.f32 %v738_v26, %v734_v23 }
 0x183   : > { %v740_v28 = vmul.f32 0.7978846, %v739_v27 }
 0x185   : > { %1064 = vtanh.f32 %v740_v28 }
 0x18b   : > { %v1065_v29 = vpop.eup %1064 }
 0x18c   : > { %v742_v31 = vadd.f32 1.0, %v1065_v29 }
 0x18e   : > { %v743_v32 = vmul.f32 %v742_v31, %v735_v30 }
 0x190   : > { %v744_v33 = vpack.c.bf16 %v743_v32, %v743_v32 }
 0x192   : > { %745 = vst [vmem:[%s290_s12] sm:$0x3] %v744_v33 }
 0x193 PF: > { %s18_s24 = sadd.s32 1, %s1106_s24  }
 0x194   : > { %p15_p7 = scmp.ge.s32.totalorder %s18_s24, 4  }
 0x196   :  { %17 = sbr.rel (!%p15_p7) target bundleno = 1 (0x1), region = 87 }
 0x19b   :  { %765 = vsyncpa [#allocation4], 1 }
 0x19c   :  { %767 = vsyncpa [#allocation4 + $0x1], 1 }

// kernel: unet_forward_pallas.14
= control target key start
LH: loop header
LB: loop body
LE: loop exit
PB: predicated region body
PF: predicated region fallthrough
CT: control target
= control target key end

     0   :  { %12 = vsyncpa [#allocation4], 0  ;;  %s826_s0 = inlined_call_operand.vmem [shape: bf16[2,1,64], index: 0, kind: input, shape index: {}]   ;;  %s827_s1 = inlined_call_operand.hbm [shape: bf16[3,64,128], index: 1, kind: input, shape index: {}]   ;;  %s828_s2 = inlined_call_operand.vmem [shape: f32[1,128], index: 2, kind: input, shape index: {}]   ;;  %s829_s3 = inlined_call_operand.vmem [shape: f32[1,128], index: 3, kind: input, shape index: {}]   ;;  %s830_s4 = inlined_call_operand.hbm [shape: bf16[3,128,128], index: 4, kind: input, shape index: {}]   ;;  %s831_s5 = inlined_call_operand.vmem [shape: f32[1,128], index: 5, kind: input, shape index: {}]   ;;  %s832_s6 = inlined_call_operand.vmem [shape: f32[1,128], index: 6, kind: input, shape index: {}]   ;;  %s833_s7 = inlined_call_operand.vmem [shape: bf16[2,1,128], index: 7, kind: output, shape index: {}]  }
   0x1   :  { %13 = vsyncpa [#allocation6], 0  ;;  %s764_s24 = smov 0  }
   0x2 LB: > { %s213_s27 = sshll.u32 %s827_s1, 4  ;;  %s773_s28 = sadd.s32 4294967295, %s718_s24   ;;  %s718_s24 = sphi %s764_s24, %s19_s24   ;;  %s214_s27 = int_to_ptr.hbm [resolvable:$true] %s213_s27 }
   0x3   : > { %p539_p0 = scmp.ge.s32.totalorder %s718_s24, 1  ;;  %p202_p1 = scmp.lt.s32.totalorder %s718_s24, 3 }
   0x4   : > { %p624_p2 = scmp.eq.s32.totalorder %s773_s28, 0  ;;  %s720_s30 = smov [#allocation3]  }
   0x5   : > { %p778_p3 = pnand %p539_p0, %p202_p1  ;;  %s215_s8 = sshll.u32 %s720_s30, 4  ;;  %s216_s8 = int_to_ptr.vmem [resolvable:$true] %s215_s8 }
   0x6   : > { %s233_s11 = sshll.u32 %s830_s4, 4  ;;  %s721_s12 = smov [#allocation5]   ;;  %s234_s11 = int_to_ptr.hbm [resolvable:$true] %s233_s11 }
   0x7   : > { %p617_p4 = pneg %p778_p3  ;;  %s235_s13 = sshll.u32 %s721_s12, 4  ;;  %s236_s13 = int_to_ptr.vmem [resolvable:$true] %s235_s13 }
   0x8   : > { %s722_s14 = smov 64   ;;  %s723_s15 = smov 4  }
   0x9   : > { %p618_p5 = pnand %p624_p2, %p617_p4  ;;  %263 = sbr.rel (%p778_p3) target bundleno = 357 (0x165), region = 48 }
   0xb   : > { %620 = dma.hbm_to_vmem [thread:$0]  (!%p618_p5), %s214_s27, 1536, %s216_s8, [#allocation4], %s722_s14, %s722_s14, %s723_s15  }
   0xc   : > { %623 = dma.hbm_to_vmem [thread:$0]  (!%p618_p5), %s234_s11, 3072, %s236_s13, [#allocation6], %s722_s14, %s722_s14, %s723_s15  }
   0xe   : > { %709 = dma.done.wait (%p624_p2), [#allocation4], 1536  }
   0xf   : > { %711 = vsyncadd (%p624_p2), [#allocation4], 4294965760 }
  0x10   : > { %713 = dma.done.wait (%p624_p2), [#allocation6], 3072  }
  0x11   : > { %715 = vsyncadd (%p624_p2), [#allocation6], 4294964224  ;;  %v600_v0 = vld [vmem:[#allocation3 + $0x38] sm:$0xff]  ;;  %v599_v1 = vld [vmem:[#allocation3 + $0x30] sm:$0xff]  ;;  %p297_p6 = scmp.lt.s32.totalorder %s773_s28, 1  ;;  %vm338_vm0 = vcmask 523264  }
  0x12   : > { %346 = vmatpush.bf16.msra.mxu0 %v600_v0  ;;  %v598_v2 = vld [vmem:[#allocation3 + $0x28] sm:$0xff]  ;;  %v597_v3 = vld [vmem:[#allocation3 + $0x20] sm:$0xff]  ;;  %v608_v5 = vld [vmem:[#allocation5 + $0x78] sm:$0xff]  ;;  %vm465_vm1 = vcmask 1040384   ;;  %vm466_vm2 = vsmask.f32 256 }
  0x13   : > { %s836_s28 = smov (!%p297_p6, %s773_s28), 1  ;;  %436 = vmatpush.bf16.msra.mxu1 %v608_v5  ;;  %v607_v6 = vld [vmem:[#allocation5 + $0x70] sm:$0xff]  ;;  %v606_v7 = vld [vmem:[#allocation5 + $0x68] sm:$0xff]  ;;  %v605_v8 = vld [vmem:[#allocation5 + $0x60] sm:$0xff] }
  0x14   : > { %s299_s18 = scalar_lea.vmem %s826_s0, %s836_s28  ;;  %v604_v9 = vld [vmem:[#allocation5 + $0x58] sm:$0xff]  ;;  %v603_v10 = vld [vmem:[#allocation5 + $0x50] sm:$0xff]  ;;  %v602_v11 = vld [vmem:[#allocation5 + $0x48] sm:$0xff]  ;;  %s302_s8 = scalar_lea.vmem %s833_s7, %s836_s28 }
  0x15   : > { %v304_v4 = vld [vmem:[%s299_s18] sm:$0x1]  ;;  %v601_v12 = vld [vmem:[#allocation5 + $0x40] sm:$0xff]  ;;  %vm467_vm3 = vmand %vm465_vm1, %vm466_vm2 }
  0x16   : > { %347 = vmatpush.bf16.msra.mxu0 %v599_v1  ;;  %v357_v14 = vld [vmem:[%s828_s2] sm:$0x1] }
  0x17   : > { %437 = vmatpush.bf16.msra.mxu1 %v607_v6  ;;  %v359_v17 = vld [vmem:[%s829_s3] sm:$0x1] }
  0x18   : > { %v451_v31 = vld [vmem:[%s831_s5] sm:$0x1] }
  0x19   : > { %v453_v33 = vld [vmem:[%s832_s6] sm:$0x1] }
  0x1a   : > { %348 = vmatpush.bf16.msra.mxu0 %v598_v2  ;;  %v468_v46 = vld [vmem:[%s302_s8] sm:$0x1] }
  0x1b   : > { %438 = vmatpush.bf16.msra.mxu1 %v606_v7 }
  0x1e   : > { %349 = vmatpush.bf16.msra.mxu0 %v597_v3 }
  0x1f   : > { %439 = vmatpush.bf16.msra.mxu1 %v605_v8 }
  0x21   : > { %562 = vmatmul.msk.bf16.vlgmr.msra.gmra.mxu0 %vm338_vm0, %v304_v4 }
  0x23   : > { %440 = vmatpush.bf16.msra.mxu1 %v604_v9 }
  0x27   : > { %441 = vmatpush.bf16.msra.mxu1 %v603_v10 }
  0x2b   : > { %442 = vmatpush.bf16.msra.mxu1 %v602_v11 }
  0x2f   : > { %443 = vmatpush.bf16.msra.mxu1 %v601_v12 }
  0x9e   : > { %v351_v13 = vpop.f32.mrf.mxu0 }
  0x9f   : > { %355 = vst [vmem:[#allocation2] sm:$0x1] %v351_v13 }
  0xa6   : > { %v353_v15 = vpop.f32.mrf.mxu0  ;;  %v356_v16 = vld [vmem:[#allocation2] sm:$0x1] }
  0xa7   : > { %v358_v18 = vmul.f32 %v357_v14, %v356_v16 }
  0xa9   : > { %v360_v19 = vadd.f32 %v359_v17, %v358_v18 }
  0xab   : > { %v362_v20 = vmul.f32 0.044715, %v360_v19  ;;  %v361_v26 = vmul.f32 0.5, %v360_v19 }
  0xad   : > { %v363_v21 = vmul.f32 %v362_v20, %v360_v19 }
  0xaf   : > { %v364_v22 = vmul.f32 %v363_v21, %v360_v19 }
  0xb1   : > { %v365_v23 = vadd.f32 %v364_v22, %v360_v19 }
  0xb3   : > { %v366_v24 = vmul.f32 0.7978846, %v365_v23 }
  0xb5   : > { %640 = vtanh.f32 %v366_v24 }
  0xbb   : > { %v641_v25 = vpop.eup %640 }
  0xbc   : > { %v368_v27 = vadd.f32 1.0, %v641_v25 }
  0xbe   : > { %v369_v28 = vmul.f32 %v368_v27, %v361_v26 }
  0xc0   : > { %v370_v29 = vpack.c.bf16 %v369_v28, %v369_v28 }
  0xc2   : > { %444 = vmatmul.bf16.vlgmr.msra.gmra.mxu1 %v370_v29 }
 0x13f   : > { %v445_v30 = vpop.f32.mrf.mxu1 }
 0x140   : > { %449 = vst [vmem:[#allocation2] sm:$0x1] %v445_v30 }
 0x147   : > { %v450_v32 = vld [vmem:[#allocation2] sm:$0x1]  ;;  %v447_v34 = vpop.f32.mrf.mxu1 }
 0x148   : > { %v452_v35 = vmul.f32 %v451_v31, %v450_v32 }
 0x14a   : > { %v454_v36 = vadd.f32 %v453_v33, %v452_v35 }
 0x14c   : > { %v456_v37 = vmul.f32 0.044715, %v454_v36  ;;  %v455_v43 = vmul.f32 0.5, %v454_v36 }
 0x14e   : > { %v457_v38 = vmul.f32 %v456_v37, %v454_v36 }
 0x150   : > { %v458_v39 = vmul.f32 %v457_v38, %v454_v36 }
 0x152   : > { %v459_v40 = vadd.f32 %v458_v39, %v454_v36 }
 0x154   : > { %v460_v41 = vmul.f32 0.7978846, %v459_v40 }
 0x156   : > { %642 = vtanh.f32 %v460_v41 }
 0x15c   : > { %v643_v42 = vpop.eup %642 }
 0x15d   : > { %v462_v44 = vadd.f32 1.0, %v643_v42 }
 0x15f   : > { %v463_v45 = vmul.f32 %v462_v44, %v455_v43 }
 0x161   : > { %v464_v47 = vpack.c.bf16 %v463_v45, %v463_v45 }
 0x163   : > { %v469_v48 = vsel %vm467_vm3, %v464_v47, %v468_v46 }
 0x164   : > { %470 = vst [vmem:[%s302_s8] sm:$0x1] %v469_v48 }
 0x165 PF: > { %s19_s24 = sadd.s32 1, %s718_s24  }
 0x166   : > { %p16_p7 = scmp.ge.s32.totalorder %s19_s24, 4  }
 0x168   :  { %18 = sbr.rel (!%p16_p7) target bundleno = 2 (0x2), region = 89 }
 0x16d   :  { %488 = vsyncpa [#allocation4], 1 }
 0x16e   :  { %490 = vsyncpa [#allocation4 + $0x1], 1 }
 0x16f   :  { %491 = vsyncpa [#allocation6], 1 }

// kernel: unet_forward_pallas.13
= control target key start
LH: loop header
LB: loop body
LE: loop exit
PB: predicated region body
PF: predicated region fallthrough
CT: control target
= control target key end

     0   :  { %12 = vsyncpa [#allocation4], 0  ;;  %s1127_s24 = smov 0   ;;  %s1235_s0 = inlined_call_operand.vmem [shape: bf16[2,2,64], index: 0, kind: input, shape index: {}]   ;;  %s1236_s1 = inlined_call_operand.hbm [shape: bf16[3,64,128], index: 1, kind: input, shape index: {}]   ;;  %s1237_s2 = inlined_call_operand.vmem [shape: f32[1,128], index: 2, kind: input, shape index: {}]   ;;  %s1238_s3 = inlined_call_operand.vmem [shape: f32[1,128], index: 3, kind: input, shape index: {}]   ;;  %s1239_s4 = inlined_call_operand.vmem [shape: bf16[3,128,128], index: 4, kind: input, shape index: {}]   ;;  %s1240_s5 = inlined_call_operand.vmem [shape: f32[1,128], index: 5, kind: input, shape index: {}]   ;;  %s1241_s6 = inlined_call_operand.vmem [shape: f32[1,128], index: 6, kind: input, shape index: {}]   ;;  %s1242_s7 = inlined_call_operand.vmem [shape: bf16[2,2,128], index: 7, kind: output, shape index: {}]  }
   0x1 LB: > { %s212_s27 = sshll.u32 %s1236_s1, 4  ;;  %s789_s28 = sadd.s32 4294967295, %s1082_s24   ;;  %s1082_s24 = sphi %s1127_s24, %s18_s24   ;;  %s213_s27 = int_to_ptr.hbm [resolvable:$true] %s212_s27 }
   0x2   : > { %p791_p0 = scmp.ge.s32.totalorder %s1082_s24, 1  ;;  %p201_p1 = scmp.lt.s32.totalorder %s1082_s24, 3 }
   0x3   : > { %p1021_p2 = scmp.eq.s32.totalorder %s789_s28, 0  ;;  %s1084_s29 = smov [#allocation3]  }
   0x4   : > { %p202_p3 = pnand %p791_p0, %p201_p1  ;;  %s214_s30 = sshll.u32 %s1084_s29, 4  ;;  %s215_s30 = int_to_ptr.vmem [resolvable:$true] %s214_s30 }
   0x5   : > { %s1085_s8 = smov 64   ;;  %s1086_s9 = smov 4  }
   0x6   : > { %p1017_p4 = pneg %p202_p3  ;;  %251 = sbr.rel (%p202_p3) target bundleno = 392 (0x188), region = 48 }
   0x8   : > { %p1018_p5 = pnand %p1021_p2, %p1017_p4 }
   0xa   : > { %1020 = dma.hbm_to_vmem [thread:$0]  (!%p1018_p5), %s213_s27, 1536, %s215_s30, [#allocation4], %s1085_s8, %s1085_s8, %s1086_s9  }
   0xb   : > { %1077 = dma.done.wait (%p1021_p2), [#allocation4], 1536  }
   0xc   : > { %1079 = vsyncadd (%p1021_p2), [#allocation4], 4294965760  ;;  %p280_p6 = scmp.lt.s32.totalorder %s789_s28, 1  ;;  %v980_v0 = vld [vmem:[#allocation3 + $0x38] sm:$0xff]  ;;  %v979_v3 = vld [vmem:[#allocation3 + $0x30] sm:$0xff]  ;;  %vm321_vm0 = vcmask 523264  }
   0xd   : > { %v984_v1 = vld [vmem:[#allocation3 + $0x18] sm:$0xff]  ;;  %329 = vmatpush.bf16.msra.mxu2 %v980_v0  ;;  %v983_v4 = vld [vmem:[#allocation3 + $0x10] sm:$0xff]  ;;  %v978_v5 = vld [vmem:[#allocation3 + $0x28] sm:$0xff] }
   0xe   : > { %s1244_s28 = smov (!%p280_p6, %s789_s28), 1  ;;  %375 = vmatpush.bf16.msra.mxu1 %v984_v1  ;;  %v982_v6 = vld [vmem:[#allocation3 + $0x8] sm:$0xff]  ;;  %v977_v7 = vld [vmem:[#allocation3 + $0x20] sm:$0xff]  ;;  %v988_v8 = vld [vmem:[#allocation3 + $0x58] sm:$0xff] }
   0xf   : > { %s282_s12 = scalar_lea.vmem %s1235_s0, %s1244_s28  ;;  %v981_v9 = vld [vmem:[#allocation3] sm:$0xff]  ;;  %v987_v10 = vld [vmem:[#allocation3 + $0x50] sm:$0xff]  ;;  %v986_v11 = vld [vmem:[#allocation3 + $0x48] sm:$0xff]  ;;  %s285_s8 = scalar_lea.vmem %s1242_s7, %s1244_s28 }
  0x10   : > { %v287_v2 = vld [vmem:[%s282_s12] sm:$0x1]  ;;  %v985_v12 = vld [vmem:[#allocation3 + $0x40] sm:$0xff]  ;;  %v996_v15 = vld [vmem:[%s1239_s4 + $0x78] sm:$0xff] }
  0x11   : > { %396 = vst [vmem:[#allocation1] ss:$9 sm:$0xff] %v287_v2  ;;  %330 = vmatpush.bf16.msra.mxu2 %v979_v3  ;;  %v1004_v16 = vld [vmem:[%s1239_s4 + $0x38] sm:$0xff]  ;;  %529 = vmatpush.bf16.msra.mxu3 %v996_v15  ;;  %v995_v17 = vld [vmem:[%s1239_s4 + $0x70] sm:$0xff]  ;;  %v994_v20 = vld [vmem:[%s1239_s4 + $0x68] sm:$0xff] }
  0x12   : > { %376 = vmatpush.bf16.msra.mxu1 %v983_v4  ;;  %607 = vmatpush.bf16.msra.mxu0 %v1004_v16  ;;  %v1003_v18 = vld [vmem:[%s1239_s4 + $0x30] sm:$0xff]  ;;  %v1012_v19 = vld [vmem:[%s1239_s4 + $0xb8] sm:$0xff]  ;;  %v1002_v21 = vld [vmem:[%s1239_s4 + $0x28] sm:$0xff] }
  0x13   : > { %v1011_v23 = vld [vmem:[%s1239_s4 + $0xb0] sm:$0xff]  ;;  %v993_v24 = vld [vmem:[%s1239_s4 + $0x60] sm:$0xff]  ;;  %v1010_v26 = vld [vmem:[%s1239_s4 + $0xa8] sm:$0xff] }
  0x14   : > { %v1001_v25 = vld [vmem:[%s1239_s4 + $0x20] sm:$0xff]  ;;  %v992_v28 = vld [vmem:[%s1239_s4 + $0x58] sm:$0xff]  ;;  %v991_v32 = vld [vmem:[%s1239_s4 + $0x50] sm:$0xff] }
  0x15   : > { %331 = vmatpush.bf16.msra.mxu2 %v978_v5  ;;  %530 = vmatpush.bf16.msra.mxu3 %v995_v17  ;;  %v1000_v29 = vld [vmem:[%s1239_s4 + $0x18] sm:$0xff]  ;;  %v1009_v31 = vld [vmem:[%s1239_s4 + $0xa0] sm:$0xff]  ;;  %v999_v33 = vld [vmem:[%s1239_s4 + $0x10] sm:$0xff] }
  0x16   : > { %377 = vmatpush.bf16.msra.mxu1 %v982_v6  ;;  %608 = vmatpush.bf16.msra.mxu0 %v1003_v18  ;;  %v1008_v34 = vld [vmem:[%s1239_s4 + $0x98] sm:$0xff]  ;;  %v990_v38 = vld [vmem:[%s1239_s4 + $0x48] sm:$0xff]  ;;  %v1007_v40 = vld [vmem:[%s1239_s4 + $0x90] sm:$0xff] }
  0x17   : > { %v998_v39 = vld [vmem:[%s1239_s4 + $0x8] sm:$0xff]  ;;  %v989_v41 = vld [vmem:[%s1239_s4 + $0x40] sm:$0xff] }
  0x18   : > { %v397_v13 = vld [vmem:[#allocation1] sm:$0xff]  ;;  %v1006_v43 = vld [vmem:[%s1239_s4 + $0x88] sm:$0xff] }
  0x19   : > { %332 = vmatpush.bf16.msra.mxu2 %v977_v7  ;;  %v398_v14 = vshrl.u32 %v397_v13, 16  ;;  %531 = vmatpush.bf16.msra.mxu3 %v994_v20  ;;  %v997_v42 = vld [vmem:[%s1239_s4] sm:$0xff] }
  0x1a   : > { %378 = vmatpush.bf16.msra.mxu1 %v981_v9  ;;  %609 = vmatpush.bf16.msra.mxu0 %v1002_v21  ;;  %v1005_v47 = vld [vmem:[%s1239_s4 + $0x80] sm:$0xff] }
  0x1b   : > { %v1034_v48 = vld [vmem:[%s1237_s2] ss:$0 sm:$0xff] }
  0x1c   : > { %812 = vmatmul.msk.bf16.vlgmr.msra.gmra.mxu2 %vm321_vm0, %v287_v2  ;;  %v1035_v50 = vld [vmem:[%s1238_s3] ss:$0 sm:$0xff] }
  0x1d   : > { %431 = vmatpush.bf16.msrb.mxu2 %v988_v8  ;;  %829 = vmatmul.msk.bf16.vlgmr.msra.gmra.mxu1 %vm321_vm0, %v287_v2  ;;  %v1036_v13 = vld [vmem:[%s1240_s5] ss:$0 sm:$0xff] }
  0x1e   : > { %695 = vmatpush.bf16.msrb.mxu1 %v1012_v19  ;;  %532 = vmatpush.bf16.msra.mxu3 %v993_v24 }
  0x1f   : > { %610 = vmatpush.bf16.msra.mxu0 %v1001_v25 }
  0x21   : > { %432 = vmatpush.bf16.msrb.mxu2 %v987_v10 }
  0x22   : > { %696 = vmatpush.bf16.msrb.mxu1 %v1011_v23  ;;  %533 = vmatpush.bf16.msra.mxu3 %v992_v28 }
  0x23   : > { %611 = vmatpush.bf16.msra.mxu0 %v1000_v29 }
  0x25   : > { %433 = vmatpush.bf16.msrb.mxu2 %v986_v11 }
  0x26   : > { %697 = vmatpush.bf16.msrb.mxu1 %v1010_v26  ;;  %534 = vmatpush.bf16.msra.mxu3 %v991_v32 }
  0x27   : > { %612 = vmatpush.bf16.msra.mxu0 %v999_v33 }
  0x29   : > { %434 = vmatpush.bf16.msrb.mxu2 %v985_v12 }
  0x2a   : > { %698 = vmatpush.bf16.msrb.mxu1 %v1009_v31  ;;  %535 = vmatpush.bf16.msra.mxu3 %v990_v38 }
  0x2b   : > { %613 = vmatpush.bf16.msra.mxu0 %v998_v39 }
  0x2c   : > { %846 = vmatmul.msk.bf16.vlgmr.msrb.gmra.mxu2 %vm321_vm0, %v398_v14  ;;  %v1037_v14 = vld [vmem:[%s1241_s6] ss:$0 sm:$0xff] }
  0x2e   : > { %699 = vmatpush.bf16.msrb.mxu1 %v1008_v34  ;;  %536 = vmatpush.bf16.msra.mxu3 %v989_v41 }
  0x2f   : > { %614 = vmatpush.bf16.msra.mxu0 %v997_v42 }
  0x32   : > { %700 = vmatpush.bf16.msrb.mxu1 %v1007_v40 }
  0x36   : > { %701 = vmatpush.bf16.msrb.mxu1 %v1006_v43 }
  0x3a   : > { %702 = vmatpush.bf16.msrb.mxu1 %v1005_v47 }
  0x9a   : > { %v380_v22 = vpop.f32.mrf.mxu1 }
  0x9f   : > { %v334_v27 = vpop.f32.mrf.mxu2 }
  0xa0   : > { %338 = vst [vmem:[#allocation2] sm:$0x3] %v334_v27 }
  0xa2   : > { %v382_v30 = vpop.f32.mrf.mxu1 }
  0xa7   : > { %v336_v35 = vpop.f32.mrf.mxu2  ;;  %v384_v36 = vld [vmem:[#allocation2 + $0x1] sm:$0x1]  ;;  %v440_v45 = vld [vmem:[#allocation2] sm:$0x1] }
  0xa8   : > { %v385_v37 = vadd.f32 %v384_v36, %v380_v22 }
  0xaa   : > { %386 = vst [vmem:[#allocation2 + $0x1] sm:$0x1] %v385_v37 }
  0xaf   : > { %v436_v44 = vpop.f32.mrf.mxu2 }
  0xb0   : > { %v441_v46 = vadd.f32 %v440_v45, %v436_v44 }
  0xb2   : > { %442 = vst [vmem:[#allocation2] sm:$0x1] %v441_v46 }
  0xb7   : > { %v438_v49 = vpop.f32.mrf.mxu2 }
  0xb9   : > { %v443_v51 = vld [vmem:[#allocation2] sm:$0x3] }
  0xba   : > { %v448_v52 = vmul.f32 %v1034_v48, %v443_v51 }
  0xbc   : > { %v453_v53 = vadd.f32 %v1035_v50, %v448_v52 }
  0xbe   : > { %v455_v54 = vmul.f32 0.044715, %v453_v53  ;;  %v454_v60 = vmul.f32 0.5, %v453_v53 }
  0xc0   : > { %v456_v55 = vmul.f32 %v455_v54, %v453_v53 }
  0xc2   : > { %v457_v56 = vmul.f32 %v456_v55, %v453_v53 }
  0xc4   : > { %v458_v57 = vadd.f32 %v457_v56, %v453_v53 }
  0xc6   : > { %v459_v58 = vmul.f32 0.7978846, %v458_v57 }
  0xc8   : > { %1038 = vtanh.f32 %v459_v58 }
  0xce   : > { %v1039_v59 = vpop.eup %1038 }
  0xcf   : > { %v461_v61 = vadd.f32 1.0, %v1039_v59 }
  0xd1   : > { %v462_v62 = vmul.f32 %v461_v61, %v454_v60 }
  0xd3   : > { %v463_v63 = vpack.c.bf16 %v462_v62, %v462_v62 }
  0xd5   : > { %537 = vmatmul.bf16.vlgmr.msra.gmra.mxu3 %v463_v63  ;;  %615 = vmatmul.bf16.vlgmr.msra.gmra.mxu0 %v463_v63  ;;  %v641_v0 = vunpack.c.l.b16 %v463_v63 }
  0xd7   : > { %v642_v1 = vpack.c.b16 %v641_v0, %v641_v0 }
  0xd9   : > { %v644_v2 = vshrl.u32 %v642_v1, 16 }
  0xdb   : > { %703 = vmatmul.bf16.vlgmr.msrb.gmra.mxu1 %v644_v2 }
 0x152   : > { %v616_v3 = vpop.f32.mrf.mxu0 }
 0x158   : > { %v538_v4 = vpop.f32.mrf.mxu3  ;;  %v704_v5 = vpop.f32.mrf.mxu1 }
 0x159   : > { %542 = vst [vmem:[#allocation2] sm:$0x3] %v538_v4 }
 0x15a   : > { %v618_v6 = vpop.f32.mrf.mxu0 }
 0x160   : > { %v620_v7 = vld [vmem:[#allocation2 + $0x1] sm:$0x1]  ;;  %v708_v8 = vld [vmem:[#allocation2] sm:$0x1]  ;;  %v540_v9 = vpop.f32.mrf.mxu3  ;;  %v706_v10 = vpop.f32.mrf.mxu1 }
 0x161   : > { %v621_v11 = vadd.f32 %v620_v7, %v616_v3  ;;  %v709_v12 = vadd.f32 %v708_v8, %v704_v5 }
 0x163   : > { %622 = vst [vmem:[#allocation2 + $0x1] sm:$0x1] %v621_v11 }
 0x164   : > { %710 = vst [vmem:[#allocation2] sm:$0x1] %v709_v12 }
 0x16b   : > { %v711_v15 = vld [vmem:[#allocation2] sm:$0x3] }
 0x16c   : > { %v716_v16 = vmul.f32 %v1036_v13, %v711_v15 }
 0x16e   : > { %v721_v17 = vadd.f32 %v1037_v14, %v716_v16 }
 0x170   : > { %v723_v18 = vmul.f32 0.044715, %v721_v17  ;;  %v722_v24 = vmul.f32 0.5, %v721_v17 }
 0x172   : > { %v724_v19 = vmul.f32 %v723_v18, %v721_v17 }
 0x174   : > { %v725_v20 = vmul.f32 %v724_v19, %v721_v17 }
 0x176   : > { %v726_v21 = vadd.f32 %v725_v20, %v721_v17 }
 0x178   : > { %v727_v22 = vmul.f32 0.7978846, %v726_v21 }
 0x17a   : > { %1040 = vtanh.f32 %v727_v22 }
 0x180   : > { %v1041_v23 = vpop.eup %1040 }
 0x181   : > { %v729_v25 = vadd.f32 1.0, %v1041_v23 }
 0x183   : > { %v730_v26 = vmul.f32 %v729_v25, %v722_v24 }
 0x185   : > { %v731_v27 = vpack.c.bf16 %v730_v26, %v730_v26 }
 0x187   : > { %732 = vst [vmem:[%s285_s8] sm:$0x1] %v731_v27 }
 0x188 PF: > { %s18_s24 = sadd.s32 1, %s1082_s24  }
 0x189   : > { %p15_p7 = scmp.ge.s32.totalorder %s18_s24, 4  }
 0x18b   :  { %17 = sbr.rel (!%p15_p7) target bundleno = 1 (0x1), region = 87 }
 0x190   :  { %750 = vsyncpa [#allocation4], 1 }
 0x191   :  { %752 = vsyncpa [#allocation4 + $0x1], 1 }

// kernel: unet_forward_pallas.15
= control target key start
LH: loop header
LB: loop body
LE: loop exit
PB: predicated region body
PF: predicated region fallthrough
CT: control target
= control target key end

     0   :  { %14 = vsyncpa [#allocation4], 0  ;;  %s1762_s30 = smov 0   ;;  %s1951_s0 = inlined_call_operand.vmem [shape: bf16[2,2,128], index: 0, kind: input, shape index: {}]   ;;  %s1952_s1 = inlined_call_operand.vmem [shape: bf16[2,2,128], index: 1, kind: input, shape index: {}]   ;;  %s1953_s2 = inlined_call_operand.vmem [shape: bf16[3,128,128], index: 2, kind: input, shape index: {}]   ;;  %s1954_s3 = inlined_call_operand.vmem [shape: bf16[3,128,128], index: 3, kind: input, shape index: {}]   ;;  %s1955_s4 = inlined_call_operand.vmem [shape: f32[1,128], index: 4, kind: input, shape index: {}]   ;;  %s1956_s5 = inlined_call_operand.vmem [shape: f32[1,128], index: 5, kind: input, shape index: {}]   ;;  %s1957_s6 = inlined_call_operand.hbm [shape: bf16[3,128,128], index: 6, kind: input, shape index: {}]   ;;  %s1958_s7 = inlined_call_operand.vmem [shape: f32[1,128], index: 7, kind: input, shape index: {}]   ;;  %s1959_s8 = inlined_call_operand.vmem [shape: f32[1,128], index: 8, kind: input, shape index: {}]   ;;  %s1960_s9 = inlined_call_operand.vmem [shape: bf16[2,2,128], index: 9, kind: output, shape index: {}]  }
   0x1 LB: > { %s273_s12 = sshll.u32 %s1957_s6, 4  ;;  %s1771_s13 = sadd.s32 4294967295, %s1707_s30   ;;  %s1707_s30 = sphi %s1762_s30, %s20_s30   ;;  %s274_s12 = int_to_ptr.hbm [resolvable:$true] %s273_s12 }
   0x2   : > { %p1207_p0 = scmp.ge.s32.totalorder %s1707_s30, 1  ;;  %p250_p1 = scmp.lt.s32.totalorder %s1707_s30, 3 }
   0x3   : > { %p1646_p2 = scmp.eq.s32.totalorder %s1771_s13, 0  ;;  %s1709_s14 = smov [#allocation3]  }
   0x4   : > { %p251_p3 = pnand %p1207_p0, %p250_p1  ;;  %s275_s15 = sshll.u32 %s1709_s14, 4  ;;  %s276_s15 = int_to_ptr.vmem [resolvable:$true] %s275_s15 }
   0x5   : > { %s1710_s16 = smov 64   ;;  %s1711_s17 = smov 4  }
   0x6   : > { %p1642_p4 = pneg %p251_p3  ;;  %309 = sbr.rel (%p251_p3) target bundleno = 419 (0x1a3), region = 56 }
   0x8   : > { %p1643_p5 = pnand %p1646_p2, %p1642_p4 }
   0xa   : > { %1645 = dma.hbm_to_vmem [thread:$0]  (!%p1643_p5), %s274_s12, 3072, %s276_s15, [#allocation4], %s1710_s16, %s1710_s16, %s1711_s17  }
   0xb   : > { %1702 = dma.done.wait (%p1646_p2), [#allocation4], 3072  }
   0xc   : > { %1704 = vsyncadd (%p1646_p2), [#allocation4], 4294964224  ;;  %v1573_v0 = vld [vmem:[%s1953_s2 + $0x78] sm:$0xff]  ;;  %p345_p6 = scmp.lt.s32.totalorder %s1771_s13, 1  ;;  %v1572_v3 = vld [vmem:[%s1953_s2 + $0x70] sm:$0xff] }
   0xd   : > { %v1581_v1 = vld [vmem:[%s1953_s2 + $0x38] sm:$0xff]  ;;  %420 = vmatpush.bf16.msra.mxu0 %v1573_v0  ;;  %v1580_v4 = vld [vmem:[%s1953_s2 + $0x30] sm:$0xff]  ;;  %v1571_v8 = vld [vmem:[%s1953_s2 + $0x68] sm:$0xff] }
   0xe   : > { %v1589_v2 = vld [vmem:[%s1953_s2 + $0xb8] sm:$0xff]  ;;  %498 = vmatpush.bf16.msra.mxu1 %v1581_v1  ;;  %v1588_v6 = vld [vmem:[%s1953_s2 + $0xb0] sm:$0xff]  ;;  %s1962_s13 = smov (!%p345_p6, %s1771_s13), 1  ;;  %v1579_v9 = vld [vmem:[%s1953_s2 + $0x28] sm:$0xff] }
   0xf   : > { %v1597_v5 = vld [vmem:[%s1954_s3 + $0x78] sm:$0xff]  ;;  %585 = vmatpush.bf16.msra.mxu2 %v1589_v2  ;;  %v1596_v7 = vld [vmem:[%s1954_s3 + $0x70] sm:$0xff]  ;;  %v1587_v10 = vld [vmem:[%s1953_s2 + $0xa8] sm:$0xff]  ;;  %s347_s25 = scalar_lea.vmem %s1951_s0, %s1962_s13  ;;  %s353_s16 = scalar_lea.vmem %s1960_s9, %s1962_s13 }
  0x10   : > { %667 = vmatpush.bf16.msra.mxu3 %v1597_v5  ;;  %v1595_v11 = vld [vmem:[%s1954_s3 + $0x68] sm:$0xff]  ;;  %v1570_v12 = vld [vmem:[%s1953_s2 + $0x60] sm:$0xff]  ;;  %v1569_v17 = vld [vmem:[%s1953_s2 + $0x58] sm:$0xff] }
  0x11   : > { %421 = vmatpush.bf16.msra.mxu0 %v1572_v3  ;;  %v1578_v13 = vld [vmem:[%s1953_s2 + $0x20] sm:$0xff]  ;;  %v1577_v18 = vld [vmem:[%s1953_s2 + $0x18] sm:$0xff]  ;;  %v1568_v21 = vld [vmem:[%s1953_s2 + $0x50] sm:$0xff] }
  0x12   : > { %499 = vmatpush.bf16.msra.mxu1 %v1580_v4  ;;  %v1586_v14 = vld [vmem:[%s1953_s2 + $0xa0] sm:$0xff]  ;;  %v1585_v19 = vld [vmem:[%s1953_s2 + $0x98] sm:$0xff]  ;;  %v1576_v22 = vld [vmem:[%s1953_s2 + $0x10] sm:$0xff] }
  0x13   : > { %586 = vmatpush.bf16.msra.mxu2 %v1588_v6  ;;  %v354_v15 = vld [vmem:[%s347_s25] sm:$0x1]  ;;  %v1593_v20 = vld [vmem:[%s1954_s3 + $0x58] sm:$0xff]  ;;  %s350_s25 = scalar_lea.vmem %s1952_s1, %s1962_s13  ;;  %v1584_v23 = vld [vmem:[%s1953_s2 + $0x90] sm:$0xff] }
  0x14   : > { %668 = vmatpush.bf16.msra.mxu3 %v1596_v7  ;;  %v1594_v16 = vld [vmem:[%s1954_s3 + $0x60] sm:$0xff]  ;;  %532 = vst [vmem:[#allocation1] ss:$9 sm:$0xff] %v354_v15  ;;  %v1592_v26 = vld [vmem:[%s1954_s3 + $0x50] sm:$0xff]  ;;  %v1567_v27 = vld [vmem:[%s1953_s2 + $0x48] sm:$0xff] }
  0x15   : > { %422 = vmatpush.bf16.msra.mxu0 %v1571_v8  ;;  %v601_v25 = vld [vmem:[%s350_s25] sm:$0x1]  ;;  %v1575_v28 = vld [vmem:[%s1953_s2 + $0x8] sm:$0xff]  ;;  %v1605_v34 = vld [vmem:[%s1954_s3 + $0x38] sm:$0xff] }
  0x16   : > { %500 = vmatpush.bf16.msra.mxu1 %v1579_v9  ;;  %v1583_v29 = vld [vmem:[%s1953_s2 + $0x88] sm:$0xff]  ;;  %v1566_v31 = vld [vmem:[%s1953_s2 + $0x40] sm:$0xff]  ;;  %v1613_v35 = vld [vmem:[%s1954_s3 + $0xb8] sm:$0xff] }
  0x17   : > { %587 = vmatpush.bf16.msra.mxu2 %v1587_v10  ;;  %v1591_v30 = vld [vmem:[%s1954_s3 + $0x48] sm:$0xff]  ;;  %v1574_v32 = vld [vmem:[%s1953_s2] sm:$0xff]  ;;  %v1604_v38 = vld [vmem:[%s1954_s3 + $0x30] sm:$0xff] }
  0x18   : > { %669 = vmatpush.bf16.msra.mxu3 %v1595_v11  ;;  %v1582_v33 = vld [vmem:[%s1953_s2 + $0x80] sm:$0xff]  ;;  %v1612_v39 = vld [vmem:[%s1954_s3 + $0xb0] sm:$0xff]  ;;  %v1603_v40 = vld [vmem:[%s1954_s3 + $0x28] sm:$0xff] }
  0x19   : > { %423 = vmatpush.bf16.msra.mxu0 %v1570_v12  ;;  %v1590_v36 = vld [vmem:[%s1954_s3 + $0x40] sm:$0xff]  ;;  %v1611_v41 = vld [vmem:[%s1954_s3 + $0xa8] sm:$0xff]  ;;  %v1601_v44 = vld [vmem:[%s1954_s3 + $0x18] sm:$0xff] }
  0x1a   : > { %501 = vmatpush.bf16.msra.mxu1 %v1578_v13  ;;  %v1602_v42 = vld [vmem:[%s1954_s3 + $0x20] sm:$0xff]  ;;  %v1609_v45 = vld [vmem:[%s1954_s3 + $0x98] sm:$0xff]  ;;  %v1600_v46 = vld [vmem:[%s1954_s3 + $0x10] sm:$0xff] }
  0x1b   : > { %588 = vmatpush.bf16.msra.mxu2 %v1586_v14  ;;  %v533_v24 = vld [vmem:[#allocation1] sm:$0xff]  ;;  %v1608_v47 = vld [vmem:[%s1954_s3 + $0x90] sm:$0xff]  ;;  %v1599_v48 = vld [vmem:[%s1954_s3 + $0x8] sm:$0xff] }
  0x1c   : > { %670 = vmatpush.bf16.msra.mxu3 %v1594_v16  ;;  %781 = vst [vmem:[#allocation1] ss:$9 sm:$0xff] %v601_v25  ;;  %v534_v37 = vshrl.u32 %v533_v24, 16  ;;  %v1610_v43 = vld [vmem:[%s1954_s3 + $0xa0] sm:$0xff]  ;;  %v1607_v49 = vld [vmem:[%s1954_s3 + $0x88] sm:$0xff]  ;;  %v1619_v62 = vld [vmem:[#allocation3 + $0x68] sm:$0xff] }
  0x1d   : > { %424 = vmatpush.bf16.msra.mxu0 %v1569_v17  ;;  %v1598_v50 = vld [vmem:[%s1954_s3] sm:$0xff]  ;;  %v1627_v3 = vld [vmem:[#allocation3 + $0x28] sm:$0xff]  ;;  %v1618_v8 = vld [vmem:[#allocation3 + $0x60] sm:$0xff] }
  0x1e   : > { %502 = vmatpush.bf16.msra.mxu1 %v1577_v18  ;;  %v1606_v51 = vld [vmem:[%s1954_s3 + $0x80] sm:$0xff]  ;;  %v1626_v9 = vld [vmem:[#allocation3 + $0x20] sm:$0xff]  ;;  %v1635_v10 = vld [vmem:[#allocation3 + $0xa8] sm:$0xff] }
  0x1f   : > { %589 = vmatpush.bf16.msra.mxu2 %v1585_v19  ;;  %v1621_v56 = vld [vmem:[#allocation3 + $0x78] sm:$0xff]  ;;  %v1620_v58 = vld [vmem:[#allocation3 + $0x70] sm:$0xff]  ;;  %v1614_v24 = vld [vmem:[#allocation3 + $0x40] sm:$0xff] }
  0x20   : > { %671 = vmatpush.bf16.msra.mxu3 %v1593_v20  ;;  %v1629_v57 = vld [vmem:[#allocation3 + $0x38] sm:$0xff]  ;;  %v1628_v59 = vld [vmem:[#allocation3 + $0x30] sm:$0xff] }
  0x21   : > { %425 = vmatpush.bf16.msra.mxu0 %v1568_v21  ;;  %v1637_v60 = vld [vmem:[#allocation3 + $0xb8] sm:$0xff]  ;;  %v1636_v7 = vld [vmem:[#allocation3 + $0xb0] sm:$0xff]  ;;  %v1615_v21 = vld [vmem:[#allocation3 + $0x48] sm:$0xff] }
  0x22   : > { %503 = vmatpush.bf16.msra.mxu1 %v1576_v22  ;;  %v1617_v12 = vld [vmem:[#allocation3 + $0x58] sm:$0xff]  ;;  %v1616_v18 = vld [vmem:[#allocation3 + $0x50] sm:$0xff]  ;;  %v1623_v22 = vld [vmem:[#allocation3 + $0x8] sm:$0xff] }
  0x23   : > { %590 = vmatpush.bf16.msra.mxu2 %v1584_v23  ;;  %v782_v52 = vld [vmem:[#allocation1] sm:$0xff] }
  0x24   : > { %672 = vmatpush.bf16.msra.mxu3 %v1592_v26  ;;  %v783_v53 = vshrl.u32 %v782_v52, 16  ;;  %v1625_v13 = vld [vmem:[#allocation3 + $0x18] sm:$0xff]  ;;  %v1624_v19 = vld [vmem:[#allocation3 + $0x10] sm:$0xff] }
  0x25   : > { %426 = vmatpush.bf16.msra.mxu0 %v1567_v27  ;;  %v1633_v20 = vld [vmem:[#allocation3 + $0x98] sm:$0xff]  ;;  %v1632_v23 = vld [vmem:[#allocation3 + $0x90] sm:$0xff] }
  0x26   : > { %504 = vmatpush.bf16.msra.mxu1 %v1575_v28 }
  0x27   : > { %591 = vmatpush.bf16.msra.mxu2 %v1583_v29  ;;  %v1631_v29 = vld [vmem:[#allocation3 + $0x88] sm:$0xff] }
  0x28   : > { %673 = vmatpush.bf16.msra.mxu3 %v1591_v30 }
  0x29   : > { %427 = vmatpush.bf16.msra.mxu0 %v1566_v31 }
  0x2a   : > { %505 = vmatpush.bf16.msra.mxu1 %v1574_v32 }
  0x2b   : > { %592 = vmatpush.bf16.msra.mxu2 %v1582_v33  ;;  %v1630_v33 = vld [vmem:[#allocation3 + $0x80] sm:$0xff] }
  0x2c   : > { %674 = vmatpush.bf16.msra.mxu3 %v1590_v36  ;;  %428 = vmatmul.bf16.vlgmr.msra.gmra.mxu0 %v354_v15 }
  0x2d   : > { %747 = vmatpush.bf16.msrb.mxu0 %v1605_v34  ;;  %506 = vmatmul.bf16.vlgmr.msra.gmra.mxu1 %v354_v15  ;;  %v1634_v15 = vld [vmem:[#allocation3 + $0xa0] sm:$0xff] }
  0x2e   : > { %834 = vmatpush.bf16.msrb.mxu1 %v1613_v35  ;;  %593 = vmatmul.bf16.vlgmr.msra.gmra.mxu2 %v534_v37  ;;  %v1659_v35 = vld [vmem:[%s1955_s4] ss:$0 sm:$0xff] }
  0x2f   : > { %675 = vmatmul.bf16.vlgmr.msra.gmra.mxu3 %v601_v25  ;;  %936 = vmatpush.bf16.msrb.mxu2 %v1621_v56  ;;  %v1660_v37 = vld [vmem:[%s1956_s5] ss:$0 sm:$0xff] }
  0x30   : > { %1014 = vmatpush.bf16.msrb.mxu3 %v1629_v57 }
  0x31   : > { %748 = vmatpush.bf16.msrb.mxu0 %v1604_v38 }
  0x32   : > { %835 = vmatpush.bf16.msrb.mxu1 %v1612_v39 }
  0x33   : > { %937 = vmatpush.bf16.msrb.mxu2 %v1620_v58 }
  0x34   : > { %1015 = vmatpush.bf16.msrb.mxu3 %v1628_v59 }
  0x35   : > { %749 = vmatpush.bf16.msrb.mxu0 %v1603_v40 }
  0x36   : > { %836 = vmatpush.bf16.msrb.mxu1 %v1611_v41 }
  0x37   : > { %938 = vmatpush.bf16.msrb.mxu2 %v1619_v62 }
  0x38   : > { %1016 = vmatpush.bf16.msrb.mxu3 %v1627_v3 }
  0x39   : > { %750 = vmatpush.bf16.msrb.mxu0 %v1602_v42 }
  0x3a   : > { %837 = vmatpush.bf16.msrb.mxu1 %v1610_v43 }
  0x3b   : > { %939 = vmatpush.bf16.msrb.mxu2 %v1618_v8 }
  0x3c   : > { %1017 = vmatpush.bf16.msrb.mxu3 %v1626_v9 }
  0x3d   : > { %751 = vmatpush.bf16.msrb.mxu0 %v1601_v44 }
  0x3e   : > { %838 = vmatpush.bf16.msrb.mxu1 %v1609_v45 }
  0x3f   : > { %940 = vmatpush.bf16.msrb.mxu2 %v1617_v12 }
  0x40   : > { %1018 = vmatpush.bf16.msrb.mxu3 %v1625_v13 }
  0x41   : > { %752 = vmatpush.bf16.msrb.mxu0 %v1600_v46 }
  0x42   : > { %839 = vmatpush.bf16.msrb.mxu1 %v1608_v47 }
  0x43   : > { %941 = vmatpush.bf16.msrb.mxu2 %v1616_v18 }
  0x44   : > { %1019 = vmatpush.bf16.msrb.mxu3 %v1624_v19 }
  0x45   : > { %753 = vmatpush.bf16.msrb.mxu0 %v1599_v48 }
  0x46   : > { %840 = vmatpush.bf16.msrb.mxu1 %v1607_v49 }
  0x47   : > { %942 = vmatpush.bf16.msrb.mxu2 %v1615_v21 }
  0x48   : > { %1020 = vmatpush.bf16.msrb.mxu3 %v1623_v22 }
  0x49   : > { %754 = vmatpush.bf16.msrb.mxu0 %v1598_v50 }
  0x4a   : > { %841 = vmatpush.bf16.msrb.mxu1 %v1606_v51 }
  0x4b   : > { %943 = vmatpush.bf16.msrb.mxu2 %v1614_v24 }
  0x4c   : > { %755 = vmatmul.bf16.vlgmr.msrb.gmra.mxu0 %v601_v25  ;;  %v1622_v25 = vld [vmem:[#allocation3] sm:$0xff] }
  0x4d   : > { %842 = vmatmul.bf16.vlgmr.msrb.gmra.mxu1 %v783_v53  ;;  %1102 = vmatpush.bf16.msra.mxu0 %v1637_v60 }
  0x4e   : > { %1021 = vmatpush.bf16.msrb.mxu3 %v1622_v25 }
  0x51   : > { %1103 = vmatpush.bf16.msra.mxu0 %v1636_v7 }
  0x55   : > { %1104 = vmatpush.bf16.msra.mxu0 %v1635_v10 }
  0x59   : > { %1105 = vmatpush.bf16.msra.mxu0 %v1634_v15 }
  0x5d   : > { %1106 = vmatpush.bf16.msra.mxu0 %v1633_v20 }
  0x61   : > { %1107 = vmatpush.bf16.msra.mxu0 %v1632_v23 }
  0x65   : > { %1108 = vmatpush.bf16.msra.mxu0 %v1631_v29 }
  0x69   : > { %1109 = vmatpush.bf16.msra.mxu0 %v1630_v33 }
  0xa9   : > { %v429_v54 = vpop.f32.mrf.mxu0 }
  0xaa   : > { %v507_v55 = vpop.f32.mrf.mxu1  ;;  %433 = vst [vmem:[#allocation2] sm:$0x3] %v429_v54 }
  0xb1   : > { %v594_v61 = vpop.f32.mrf.mxu2  ;;  %v511_v63 = vld [vmem:[#allocation2 + $0x1] sm:$0x1]  ;;  %v598_v0 = vld [vmem:[#allocation2] sm:$0x1]  ;;  %v431_v1 = vpop.f32.mrf.mxu0 }
  0xb2   : > { %v509_v2 = vpop.f32.mrf.mxu1  ;;  %v512_v4 = vadd.f32 %v511_v63, %v507_v55  ;;  %v599_v5 = vadd.f32 %v598_v0, %v594_v61  ;;  %v676_v6 = vpop.f32.mrf.mxu3  ;;  %v1661_v0 = vld [vmem:[%s1958_s7] ss:$0 sm:$0xff] }
  0xb3   : > { %v1662_v1 = vld [vmem:[%s1959_s8] ss:$0 sm:$0xff] }
  0xb4   : > { %513 = vst [vmem:[#allocation2 + $0x1] sm:$0x1] %v512_v4 }
  0xb5   : > { %600 = vst [vmem:[#allocation2] sm:$0x1] %v599_v5 }
  0xb9   : > { %v596_v11 = vpop.f32.mrf.mxu2 }
  0xba   : > { %v678_v14 = vpop.f32.mrf.mxu3 }
  0xbc   : > { %v680_v16 = vld [vmem:[#allocation2] sm:$0x3] }
  0xbd   : > { %v681_v17 = vadd.f32 %v680_v16, %v676_v6 }
  0xbf   : > { %682 = vst [vmem:[#allocation2] sm:$0x3] %v681_v17 }
  0xc6   : > { %v760_v27 = vld [vmem:[#allocation2 + $0x1] sm:$0x1]  ;;  %v847_v28 = vld [vmem:[#allocation2] sm:$0x1] }
  0xc9   : > { %v756_v26 = vpop.f32.mrf.mxu0 }
  0xca   : > { %v761_v30 = vadd.f32 %v760_v27, %v756_v26  ;;  %v843_v31 = vpop.f32.mrf.mxu1 }
  0xcb   : > { %v848_v32 = vadd.f32 %v847_v28, %v843_v31 }
  0xcc   : > { %762 = vst [vmem:[#allocation2 + $0x1] sm:$0x1] %v761_v30 }
  0xcd   : > { %849 = vst [vmem:[#allocation2] sm:$0x1] %v848_v32 }
  0xd1   : > { %v758_v34 = vpop.f32.mrf.mxu0 }
  0xd2   : > { %v845_v36 = vpop.f32.mrf.mxu1 }
  0xd4   : > { %v850_v38 = vld [vmem:[#allocation2] sm:$0x3] }
  0xd5   : > { %v855_v39 = vmul.f32 %v1659_v35, %v850_v38 }
  0xd7   : > { %v860_v40 = vadd.f32 %v1660_v37, %v855_v39 }
  0xd9   : > { %v862_v41 = vmul.f32 0.044715, %v860_v40  ;;  %v861_v47 = vmul.f32 0.5, %v860_v40 }
  0xdb   : > { %v863_v42 = vmul.f32 %v862_v41, %v860_v40 }
  0xdd   : > { %v864_v43 = vmul.f32 %v863_v42, %v860_v40 }
  0xdf   : > { %v865_v44 = vadd.f32 %v864_v43, %v860_v40 }
  0xe1   : > { %v866_v45 = vmul.f32 0.7978846, %v865_v44 }
  0xe3   : > { %1663 = vtanh.f32 %v866_v45 }
  0xe9   : > { %v1664_v46 = vpop.eup %1663 }
  0xea   : > { %v868_v48 = vadd.f32 1.0, %v1664_v46 }
  0xec   : > { %v869_v49 = vmul.f32 %v868_v48, %v861_v47 }
  0xee   : > { %v870_v50 = vpack.c.bf16 %v869_v49, %v869_v49 }
  0xf0   : > { %944 = vmatmul.bf16.vlgmr.msrb.gmra.mxu2 %v870_v50  ;;  %1022 = vmatmul.bf16.vlgmr.msrb.gmra.mxu3 %v870_v50  ;;  %v1048_v51 = vunpack.c.l.b16 %v870_v50 }
  0xf2   : > { %v1049_v52 = vpack.c.b16 %v1048_v51, %v1048_v51 }
  0xf4   : > { %v1051_v53 = vshrl.u32 %v1049_v52, 16 }
  0xf6   : > { %1110 = vmatmul.bf16.vlgmr.msra.gmra.mxu0 %v1051_v53 }
 0x173   : > { %v945_v54 = vpop.f32.mrf.mxu2  ;;  %v1023_v55 = vpop.f32.mrf.mxu3 }
 0x174   : > { %949 = vst [vmem:[#allocation2] sm:$0x3] %v945_v54  ;;  %v1111_v56 = vpop.f32.mrf.mxu0 }
 0x17b   : > { %v1027_v57 = vld [vmem:[#allocation2 + $0x1] sm:$0x1]  ;;  %v1115_v58 = vld [vmem:[#allocation2] sm:$0x1]  ;;  %v947_v59 = vpop.f32.mrf.mxu2  ;;  %v1025_v60 = vpop.f32.mrf.mxu3 }
 0x17c   : > { %v1028_v61 = vadd.f32 %v1027_v57, %v1023_v55  ;;  %v1116_v62 = vadd.f32 %v1115_v58, %v1111_v56  ;;  %v1113_v63 = vpop.f32.mrf.mxu0 }
 0x17e   : > { %1029 = vst [vmem:[#allocation2 + $0x1] sm:$0x1] %v1028_v61 }
 0x17f   : > { %1117 = vst [vmem:[#allocation2] sm:$0x1] %v1116_v62 }
 0x186   : > { %v1118_v2 = vld [vmem:[#allocation2] sm:$0x3] }
 0x187   : > { %v1123_v3 = vmul.f32 %v1661_v0, %v1118_v2 }
 0x189   : > { %v1128_v4 = vadd.f32 %v1662_v1, %v1123_v3 }
 0x18b   : > { %v1130_v5 = vmul.f32 0.044715, %v1128_v4  ;;  %v1129_v11 = vmul.f32 0.5, %v1128_v4 }
 0x18d   : > { %v1131_v6 = vmul.f32 %v1130_v5, %v1128_v4 }
 0x18f   : > { %v1132_v7 = vmul.f32 %v1131_v6, %v1128_v4 }
 0x191   : > { %v1133_v8 = vadd.f32 %v1132_v7, %v1128_v4 }
 0x193   : > { %v1134_v9 = vmul.f32 0.7978846, %v1133_v8 }
 0x195   : > { %1665 = vtanh.f32 %v1134_v9 }
 0x19b   : > { %v1666_v10 = vpop.eup %1665 }
 0x19c   : > { %v1136_v12 = vadd.f32 1.0, %v1666_v10 }
 0x19e   : > { %v1137_v13 = vmul.f32 %v1136_v12, %v1129_v11 }
 0x1a0   : > { %v1138_v14 = vpack.c.bf16 %v1137_v13, %v1137_v13 }
 0x1a2   : > { %1139 = vst [vmem:[%s353_s16] sm:$0x1] %v1138_v14 }
 0x1a3 PF: > { %s20_s30 = sadd.s32 1, %s1707_s30  }
 0x1a4   : > { %p17_p7 = scmp.ge.s32.totalorder %s20_s30, 4  }
 0x1a6   :  { %19 = sbr.rel (!%p17_p7) target bundleno = 1 (0x1), region = 100 }
 0x1ab   :  { %1157 = vsyncpa [#allocation4], 1 }
 0x1ac   :  { %1159 = vsyncpa [#allocation4 + $0x1], 1 }

// kernel: unet_forward_pallas.16
= control target key start
LH: loop header
LB: loop body
LE: loop exit
PB: predicated region body
PF: predicated region fallthrough
CT: control target
= control target key end

     0   :  { %14 = vsyncpa [#allocation4], 0  ;;  %s1972_s0 = inlined_call_operand.vmem [shape: bf16[2,4,128], index: 0, kind: input, shape index: {}]   ;;  %s1973_s1 = inlined_call_operand.vmem [shape: bf16[2,4,128], index: 1, kind: input, shape index: {}]   ;;  %s1974_s2 = inlined_call_operand.vmem [shape: bf16[3,128,128], index: 2, kind: input, shape index: {}]   ;;  %s1975_s3 = inlined_call_operand.hbm [shape: bf16[3,128,128], index: 3, kind: input, shape index: {}]   ;;  %s1976_s4 = inlined_call_operand.vmem [shape: f32[1,128], index: 4, kind: input, shape index: {}]   ;;  %s1977_s5 = inlined_call_operand.vmem [shape: f32[1,128], index: 5, kind: input, shape index: {}]   ;;  %s1978_s6 = inlined_call_operand.hbm [shape: bf16[3,128,128], index: 6, kind: input, shape index: {}]   ;;  %s1979_s7 = inlined_call_operand.vmem [shape: f32[1,128], index: 7, kind: input, shape index: {}]   ;;  %s1980_s8 = inlined_call_operand.vmem [shape: f32[1,128], index: 8, kind: input, shape index: {}]   ;;  %s1981_s9 = inlined_call_operand.vmem [shape: bf16[2,4,128], index: 9, kind: output, shape index: {}]  }
   0x1   :  { %15 = vsyncpa [#allocation6], 0  ;;  %s1839_s30 = smov 0  }
   0x2 LB: > { %s265_s12 = sshll.u32 %s1975_s3, 4  ;;  %s1264_s13 = sadd.s32 4294967295, %s1783_s30   ;;  %s1783_s30 = sphi %s1839_s30, %s21_s30   ;;  %s266_s12 = int_to_ptr.hbm [resolvable:$true] %s265_s12 }
   0x3   : > { %p1266_p0 = scmp.ge.s32.totalorder %s1783_s30, 1  ;;  %p251_p1 = scmp.lt.s32.totalorder %s1783_s30, 3 }
   0x4   : > { %p1685_p2 = scmp.eq.s32.totalorder %s1264_s13, 0  ;;  %s1785_s15 = smov [#allocation3]  }
   0x5   : > { %p1850_p3 = pnand %p1266_p0, %p251_p1  ;;  %s267_s16 = sshll.u32 %s1785_s15, 4  ;;  %s268_s16 = int_to_ptr.vmem [resolvable:$true] %s267_s16 }
   0x6   : > { %s285_s19 = sshll.u32 %s1978_s6, 4  ;;  %s1786_s20 = smov [#allocation5]   ;;  %s286_s19 = int_to_ptr.hbm [resolvable:$true] %s285_s19 }
   0x7   : > { %p1678_p4 = pneg %p1850_p3  ;;  %s287_s21 = sshll.u32 %s1786_s20, 4  ;;  %s288_s21 = int_to_ptr.vmem [resolvable:$true] %s287_s21 }
   0x8   : > { %s1787_s22 = smov 64   ;;  %s1788_s23 = smov 4  }
   0x9   : > { %p1679_p5 = pnand %p1685_p2, %p1678_p4  ;;  %323 = sbr.rel (%p1850_p3) target bundleno = 448 (0x1c0), region = 56 }
   0xb   : > { %1681 = dma.hbm_to_vmem [thread:$0]  (!%p1679_p5), %s266_s12, 3072, %s268_s16, [#allocation4], %s1787_s22, %s1787_s22, %s1788_s23  }
   0xc   : > { %1684 = dma.hbm_to_vmem [thread:$0]  (!%p1679_p5), %s286_s19, 3072, %s288_s21, [#allocation6], %s1787_s22, %s1787_s22, %s1788_s23  }
   0xe   : > { %1774 = dma.done.wait (%p1685_p2), [#allocation4], 3072  }
   0xf   : > { %1776 = vsyncadd (%p1685_p2), [#allocation4], 4294964224 }
  0x10   : > { %1778 = dma.done.wait (%p1685_p2), [#allocation6], 3072  }
  0x11   : > { %1780 = vsyncadd (%p1685_p2), [#allocation6], 4294964224  ;;  %p367_p6 = scmp.lt.s32.totalorder %s1264_s13, 1  ;;  %v1605_v0 = vld [vmem:[%s1974_s2 + $0x78] sm:$0xff]  ;;  %v1604_v3 = vld [vmem:[%s1974_s2 + $0x70] sm:$0xff] }
  0x12   : > { %v1613_v1 = vld [vmem:[%s1974_s2 + $0x38] sm:$0xff]  ;;  %445 = vmatpush.bf16.msra.mxu0 %v1605_v0  ;;  %v1612_v4 = vld [vmem:[%s1974_s2 + $0x30] sm:$0xff]  ;;  %v1629_v6 = vld [vmem:[#allocation3 + $0x78] sm:$0xff] }
  0x13   : > { %s1984_s13 = smov (!%p367_p6, %s1264_s13), 1  ;;  %v1621_v2 = vld [vmem:[%s1974_s2 + $0xb8] sm:$0xff]  ;;  %523 = vmatpush.bf16.msra.mxu1 %v1613_v1  ;;  %v1620_v5 = vld [vmem:[%s1974_s2 + $0xb0] sm:$0xff]  ;;  %696 = vmatpush.bf16.msra.mxu3 %v1629_v6  ;;  %v1603_v8 = vld [vmem:[%s1974_s2 + $0x68] sm:$0xff] }
  0x14   : > { %614 = vmatpush.bf16.msra.mxu2 %v1621_v2  ;;  %s1884_s17 = sshll.u32 %s1984_s13, 1  ;;  %v1628_v7 = vld [vmem:[#allocation3 + $0x70] sm:$0xff]  ;;  %v1611_v9 = vld [vmem:[%s1974_s2 + $0x28] sm:$0xff]  ;;  %v1627_v11 = vld [vmem:[#allocation3 + $0x68] sm:$0xff] }
  0x15   : > { %s370_s24 = scalar_lea.vmem %s1972_s0, %s1884_s17  ;;  %v1619_v10 = vld [vmem:[%s1974_s2 + $0xa8] sm:$0xff]  ;;  %v1602_v13 = vld [vmem:[%s1974_s2 + $0x60] sm:$0xff]  ;;  %v1601_v16 = vld [vmem:[%s1974_s2 + $0x58] sm:$0xff]  ;;  %s374_s20 = scalar_lea.vmem %s1973_s1, %s1884_s17 }
  0x16   : > { %446 = vmatpush.bf16.msra.mxu0 %v1604_v3  ;;  %v379_v12 = vld [vmem:[%s370_s24] sm:$0x3]  ;;  %v1609_v17 = vld [vmem:[%s1974_s2 + $0x18] sm:$0xff]  ;;  %v1626_v18 = vld [vmem:[#allocation3 + $0x60] sm:$0xff]  ;;  %s378_s11 = scalar_lea.vmem %s1981_s9, %s1884_s17 }
  0x17   : > { %524 = vmatpush.bf16.msra.mxu1 %v1612_v4  ;;  %697 = vmatpush.bf16.msra.mxu3 %v1628_v7  ;;  %v1610_v14 = vld [vmem:[%s1974_s2 + $0x20] sm:$0xff]  ;;  %557 = vst [vmem:[#allocation1] ss:$4 sm:$0xff] %v379_v12  ;;  %v1617_v19 = vld [vmem:[%s1974_s2 + $0x98] sm:$0xff]  ;;  %v1600_v23 = vld [vmem:[%s1974_s2 + $0x50] sm:$0xff] }
  0x18   : > { %615 = vmatpush.bf16.msra.mxu2 %v1620_v5  ;;  %v1618_v15 = vld [vmem:[%s1974_s2 + $0xa0] sm:$0xff]  ;;  %v1608_v24 = vld [vmem:[%s1974_s2 + $0x10] sm:$0xff]  ;;  %v1599_v27 = vld [vmem:[%s1974_s2 + $0x48] sm:$0xff] }
  0x19   : > { %v1625_v20 = vld [vmem:[#allocation3 + $0x58] sm:$0xff]  ;;  %v1921_v22 = vld [vmem:[%s374_s20] sm:$0x3]  ;;  %v1616_v25 = vld [vmem:[%s1974_s2 + $0x90] sm:$0xff] }
  0x1a   : > { %447 = vmatpush.bf16.msra.mxu0 %v1603_v8  ;;  %v1624_v26 = vld [vmem:[#allocation3 + $0x50] sm:$0xff]  ;;  %v1607_v28 = vld [vmem:[%s1974_s2 + $0x8] sm:$0xff]  ;;  %v1623_v31 = vld [vmem:[#allocation3 + $0x48] sm:$0xff] }
  0x1b   : > { %525 = vmatpush.bf16.msra.mxu1 %v1611_v9  ;;  %698 = vmatpush.bf16.msra.mxu3 %v1627_v11  ;;  %v1615_v30 = vld [vmem:[%s1974_s2 + $0x88] sm:$0xff]  ;;  %v1598_v32 = vld [vmem:[%s1974_s2 + $0x40] sm:$0xff]  ;;  %v1635_v43 = vld [vmem:[#allocation3 + $0x28] sm:$0xff] }
  0x1c   : > { %616 = vmatpush.bf16.msra.mxu2 %v1619_v10  ;;  %v1606_v33 = vld [vmem:[%s1974_s2] sm:$0xff]  ;;  %v1622_v40 = vld [vmem:[#allocation3 + $0x40] sm:$0xff]  ;;  %v1643_v44 = vld [vmem:[#allocation3 + $0xa8] sm:$0xff] }
  0x1d   : > { %v1637_v36 = vld [vmem:[#allocation3 + $0x38] sm:$0xff]  ;;  %v1636_v41 = vld [vmem:[#allocation3 + $0x30] sm:$0xff]  ;;  %v1634_v45 = vld [vmem:[#allocation3 + $0x20] sm:$0xff] }
  0x1e   : > { %448 = vmatpush.bf16.msra.mxu0 %v1602_v13  ;;  %v558_v21 = vld.sshfl [vmem:[#allocation1] sm:$0xff pattern:$0x73625140]  ;;  %v1642_v46 = vld [vmem:[#allocation3 + $0xa0] sm:$0xff]  ;;  %v1631_v52 = vld [vmem:[#allocation3 + $0x8] sm:$0xff] }
  0x1f   : > { %526 = vmatpush.bf16.msra.mxu1 %v1610_v14  ;;  %699 = vmatpush.bf16.msra.mxu3 %v1626_v18  ;;  %810 = vst [vmem:[#allocation1] ss:$4 sm:$0xff] %v1921_v22  ;;  %v561_v29 = vshll.u32 %v558_v21, 16  ;;  %v559_v34 = vshrl.u32 %v558_v21, 16  ;;  %v1614_v37 = vld [vmem:[%s1974_s2 + $0x80] sm:$0xff]  ;;  %v1639_v54 = vld [vmem:[#allocation3 + $0x88] sm:$0xff] }
  0x20   : > { %617 = vmatpush.bf16.msra.mxu2 %v1618_v15  ;;  %v1645_v38 = vld [vmem:[#allocation3 + $0xb8] sm:$0xff]  ;;  %v1644_v42 = vld [vmem:[#allocation3 + $0xb0] sm:$0xff]  ;;  %v1630_v55 = vld [vmem:[#allocation3] sm:$0xff] }
  0x21   : > { %v563_v35 = vrot.slane %v561_v29, 1  ;;  %v1633_v47 = vld [vmem:[#allocation3 + $0x18] sm:$0xff]  ;;  %v1632_v49 = vld [vmem:[#allocation3 + $0x10] sm:$0xff]  ;;  %v1638_v58 = vld [vmem:[#allocation3 + $0x80] sm:$0xff] }
  0x22   : > { %449 = vmatpush.bf16.msra.mxu0 %v1601_v16  ;;  %v1641_v48 = vld [vmem:[#allocation3 + $0x98] sm:$0xff]  ;;  %v1640_v50 = vld [vmem:[#allocation3 + $0x90] sm:$0xff]  ;;  %v1651_v14 = vld [vmem:[#allocation5 + $0x68] sm:$0xff] }
  0x23   : > { %527 = vmatpush.bf16.msra.mxu1 %v1609_v17  ;;  %700 = vmatpush.bf16.msra.mxu3 %v1625_v20  ;;  %v564_v39 = vor.u32 %v563_v35, %v559_v34  ;;  %v1653_v8 = vld [vmem:[#allocation5 + $0x78] sm:$0xff]  ;;  %v1652_v10 = vld [vmem:[#allocation5 + $0x70] sm:$0xff]  ;;  %v1659_v15 = vld [vmem:[#allocation5 + $0x28] sm:$0xff] }
  0x24   : > { %618 = vmatpush.bf16.msra.mxu2 %v1617_v19  ;;  %v1661_v9 = vld [vmem:[#allocation5 + $0x38] sm:$0xff]  ;;  %v1660_v11 = vld [vmem:[#allocation5 + $0x30] sm:$0xff]  ;;  %v1667_v16 = vld [vmem:[#allocation5 + $0xa8] sm:$0xff] }
  0x25   : > { %v1668_v13 = vld [vmem:[#allocation5 + $0xb0] sm:$0xff]  ;;  %v1650_v20 = vld [vmem:[#allocation5 + $0x60] sm:$0xff]  ;;  %v1647_v34 = vld [vmem:[#allocation5 + $0x48] sm:$0xff] }
  0x26   : > { %450 = vmatpush.bf16.msra.mxu0 %v1600_v23  ;;  %v811_v51 = vld.sshfl [vmem:[#allocation1] sm:$0xff pattern:$0x73625140]  ;;  %v1658_v21 = vld [vmem:[#allocation5 + $0x20] sm:$0xff]  ;;  %v1655_v35 = vld [vmem:[#allocation5 + $0x8] sm:$0xff] }
  0x27   : > { %528 = vmatpush.bf16.msra.mxu1 %v1608_v24  ;;  %701 = vmatpush.bf16.msra.mxu3 %v1624_v26  ;;  %v814_v53 = vshll.u32 %v811_v51, 16  ;;  %v812_v56 = vshrl.u32 %v811_v51, 16  ;;  %v1666_v23 = vld [vmem:[#allocation5 + $0xa0] sm:$0xff]  ;;  %v1649_v24 = vld [vmem:[#allocation5 + $0x58] sm:$0xff]  ;;  %v1656_v29 = vld [vmem:[#allocation5 + $0x10] sm:$0xff] }
  0x28   : > { %619 = vmatpush.bf16.msra.mxu2 %v1616_v25  ;;  %v1657_v25 = vld [vmem:[#allocation5 + $0x18] sm:$0xff] }
  0x29   : > { %v816_v57 = vrot.slane %v814_v53, 1  ;;  %v1665_v26 = vld [vmem:[#allocation5 + $0x98] sm:$0xff] }
  0x2a   : > { %451 = vmatpush.bf16.msra.mxu0 %v1599_v27 }
  0x2b   : > { %529 = vmatpush.bf16.msra.mxu1 %v1607_v28  ;;  %702 = vmatpush.bf16.msra.mxu3 %v1623_v31  ;;  %v817_v59 = vor.u32 %v816_v57, %v812_v56  ;;  %v1648_v28 = vld [vmem:[#allocation5 + $0x50] sm:$0xff] }
  0x2c   : > { %620 = vmatpush.bf16.msra.mxu2 %v1615_v30 }
  0x2e   : > { %452 = vmatpush.bf16.msra.mxu0 %v1598_v32 }
  0x2f   : > { %530 = vmatpush.bf16.msra.mxu1 %v1606_v33  ;;  %703 = vmatpush.bf16.msra.mxu3 %v1622_v40  ;;  %v1664_v33 = vld [vmem:[#allocation5 + $0x90] sm:$0xff] }
  0x30   : > { %621 = vmatpush.bf16.msra.mxu2 %v1614_v37  ;;  %v1654_v37 = vld [vmem:[#allocation5] sm:$0xff]  ;;  %v1701_v40 = vld [vmem:[%s1976_s4] ss:$0 sm:$0xff] }
  0x31   : > { %453 = vmatmul.bf16.vlgmr.msra.gmra.mxu0 %v379_v12 }
  0x32   : > { %776 = vmatpush.bf16.msrb.mxu0 %v1637_v36  ;;  %531 = vmatmul.bf16.vlgmr.msra.gmra.mxu1 %v379_v12  ;;  %v1669_v12 = vld [vmem:[#allocation5 + $0xb8] sm:$0xff]  ;;  %v1646_v36 = vld [vmem:[#allocation5 + $0x40] sm:$0xff] }
  0x33   : > { %867 = vmatpush.bf16.msrb.mxu1 %v1645_v38  ;;  %622 = vmatmul.bf16.vlgmr.msra.gmra.mxu2 %v564_v39 }
  0x34   : > { %704 = vmatmul.bf16.vlgmr.msra.gmra.mxu3 %v1921_v22  ;;  %969 = vmatpush.bf16.msrb.mxu2 %v1653_v8 }
  0x35   : > { %1047 = vmatpush.bf16.msrb.mxu3 %v1661_v9  ;;  %v1703_v9 = vld [vmem:[%s1979_s7] ss:$0 sm:$0xff] }
  0x36   : > { %777 = vmatpush.bf16.msrb.mxu0 %v1636_v41  ;;  %v1663_v41 = vld [vmem:[#allocation5 + $0x88] sm:$0xff] }
  0x37   : > { %868 = vmatpush.bf16.msrb.mxu1 %v1644_v42  ;;  %v1702_v42 = vld [vmem:[%s1977_s5] ss:$0 sm:$0xff] }
  0x38   : > { %970 = vmatpush.bf16.msrb.mxu2 %v1652_v10  ;;  %v1704_v10 = vld [vmem:[%s1980_s8] ss:$0 sm:$0xff] }
  0x39   : > { %1048 = vmatpush.bf16.msrb.mxu3 %v1660_v11 }
  0x3a   : > { %778 = vmatpush.bf16.msrb.mxu0 %v1635_v43  ;;  %v1662_v43 = vld [vmem:[#allocation5 + $0x80] sm:$0xff] }
  0x3b   : > { %869 = vmatpush.bf16.msrb.mxu1 %v1643_v44 }
  0x3c   : > { %971 = vmatpush.bf16.msrb.mxu2 %v1651_v14 }
  0x3d   : > { %1049 = vmatpush.bf16.msrb.mxu3 %v1659_v15 }
  0x3e   : > { %779 = vmatpush.bf16.msrb.mxu0 %v1634_v45 }
  0x3f   : > { %870 = vmatpush.bf16.msrb.mxu1 %v1642_v46 }
  0x40   : > { %972 = vmatpush.bf16.msrb.mxu2 %v1650_v20 }
  0x41   : > { %1050 = vmatpush.bf16.msrb.mxu3 %v1658_v21 }
  0x42   : > { %780 = vmatpush.bf16.msrb.mxu0 %v1633_v47 }
  0x43   : > { %871 = vmatpush.bf16.msrb.mxu1 %v1641_v48 }
  0x44   : > { %973 = vmatpush.bf16.msrb.mxu2 %v1649_v24 }
  0x45   : > { %1051 = vmatpush.bf16.msrb.mxu3 %v1657_v25 }
  0x46   : > { %781 = vmatpush.bf16.msrb.mxu0 %v1632_v49 }
  0x47   : > { %872 = vmatpush.bf16.msrb.mxu1 %v1640_v50 }
  0x48   : > { %974 = vmatpush.bf16.msrb.mxu2 %v1648_v28 }
  0x49   : > { %1052 = vmatpush.bf16.msrb.mxu3 %v1656_v29 }
  0x4a   : > { %782 = vmatpush.bf16.msrb.mxu0 %v1631_v52 }
  0x4b   : > { %873 = vmatpush.bf16.msrb.mxu1 %v1639_v54 }
  0x4c   : > { %975 = vmatpush.bf16.msrb.mxu2 %v1647_v34 }
  0x4d   : > { %1053 = vmatpush.bf16.msrb.mxu3 %v1655_v35 }
  0x4e   : > { %783 = vmatpush.bf16.msrb.mxu0 %v1630_v55 }
  0x4f   : > { %874 = vmatpush.bf16.msrb.mxu1 %v1638_v58 }
  0x50   : > { %976 = vmatpush.bf16.msrb.mxu2 %v1646_v36 }
  0x51   : > { %784 = vmatmul.bf16.vlgmr.msrb.gmra.mxu0 %v1921_v22  ;;  %1054 = vmatpush.bf16.msrb.mxu3 %v1654_v37 }
  0x52   : > { %875 = vmatmul.bf16.vlgmr.msrb.gmra.mxu1 %v817_v59  ;;  %1139 = vmatpush.bf16.msra.mxu0 %v1669_v12 }
  0x56   : > { %1140 = vmatpush.bf16.msra.mxu0 %v1668_v13 }
  0x5a   : > { %1141 = vmatpush.bf16.msra.mxu0 %v1667_v16 }
  0x5e   : > { %1142 = vmatpush.bf16.msra.mxu0 %v1666_v23 }
  0x62   : > { %1143 = vmatpush.bf16.msra.mxu0 %v1665_v26 }
  0x66   : > { %1144 = vmatpush.bf16.msra.mxu0 %v1664_v33 }
  0x6a   : > { %1145 = vmatpush.bf16.msra.mxu0 %v1663_v41 }
  0x6e   : > { %1146 = vmatpush.bf16.msra.mxu0 %v1662_v43 }
  0xae   : > { %v454_v60 = vpop.f32.mrf.mxu0 }
  0xaf   : > { %v532_v61 = vpop.f32.mrf.mxu1  ;;  %458 = vst [vmem:[#allocation2] sm:$0xf] %v454_v60 }
  0xb6   : > { %v623_v62 = vpop.f32.mrf.mxu2  ;;  %v536_v63 = vld [vmem:[#allocation2 + $0x1] sm:$0x7]  ;;  %v456_v0 = vpop.f32.mrf.mxu0 }
  0xb7   : > { %v534_v1 = vpop.f32.mrf.mxu1  ;;  %v537_v2 = vadd.f32 %v536_v63, %v532_v61  ;;  %v705_v3 = vpop.f32.mrf.mxu3 }
  0xb9   : > { %538 = vst [vmem:[#allocation2 + $0x1] sm:$0x7] %v537_v2 }
  0xbe   : > { %v625_v4 = vpop.f32.mrf.mxu2 }
  0xbf   : > { %v707_v6 = vpop.f32.mrf.mxu3 }
  0xc0   : > { %v627_v5 = vld [vmem:[#allocation2] sm:$0x7] }
  0xc1   : > { %v628_v7 = vadd.f32 %v627_v5, %v623_v62 }
  0xc3   : > { %629 = vst [vmem:[#allocation2] sm:$0x7] %v628_v7 }
  0xca   : > { %v709_v17 = vld [vmem:[#allocation2] sm:$0xf] }
  0xcb   : > { %v710_v18 = vadd.f32 %v709_v17, %v705_v3 }
  0xcd   : > { %711 = vst [vmem:[#allocation2] sm:$0xf] %v710_v18 }
  0xce   : > { %v785_v19 = vpop.f32.mrf.mxu0 }
  0xcf   : > { %v876_v22 = vpop.f32.mrf.mxu1 }
  0xd4   : > { %v789_v30 = vld [vmem:[#allocation2 + $0x1] sm:$0x7] }
  0xd5   : > { %v790_v32 = vadd.f32 %v789_v30, %v785_v19 }
  0xd6   : > { %v787_v27 = vpop.f32.mrf.mxu0 }
  0xd7   : > { %v878_v31 = vpop.f32.mrf.mxu1  ;;  %791 = vst [vmem:[#allocation2 + $0x1] sm:$0x7] %v790_v32 }
  0xde   : > { %v880_v38 = vld [vmem:[#allocation2] sm:$0x7] }
  0xdf   : > { %v881_v39 = vadd.f32 %v880_v38, %v876_v22 }
  0xe1   : > { %882 = vst [vmem:[#allocation2] sm:$0x7] %v881_v39 }
  0xe8   : > { %v883_v44 = vld [vmem:[#allocation2] sm:$0xf] }
  0xe9   : > { %v888_v45 = vmul.f32 %v1701_v40, %v883_v44 }
  0xeb   : > { %v893_v46 = vadd.f32 %v1702_v42, %v888_v45 }
  0xed   : > { %v895_v47 = vmul.f32 0.044715, %v893_v46  ;;  %v894_v53 = vmul.f32 0.5, %v893_v46 }
  0xef   : > { %v896_v48 = vmul.f32 %v895_v47, %v893_v46 }
  0xf1   : > { %v897_v49 = vmul.f32 %v896_v48, %v893_v46 }
  0xf3   : > { %v898_v50 = vadd.f32 %v897_v49, %v893_v46 }
  0xf5   : > { %v899_v51 = vmul.f32 0.7978846, %v898_v50 }
  0xf7   : > { %1705 = vtanh.f32 %v899_v51 }
  0xfd   : > { %v1706_v52 = vpop.eup %1705 }
  0xfe   : > { %v901_v54 = vadd.f32 1.0, %v1706_v52 }
 0x100   : > { %v902_v55 = vmul.f32 %v901_v54, %v894_v53 }
 0x102   : > { %v903_v56 = vpack.c.bf16 %v902_v55, %v902_v55 }
 0x104   : > { %977 = vmatmul.bf16.vlgmr.msrb.gmra.mxu2 %v903_v56  ;;  %v1081_v57 = vunpack.c.l.b16 %v903_v56  ;;  %1055 = vmatmul.bf16.vlgmr.msrb.gmra.mxu3 %v903_v56 }
 0x106   : > { %v1082_v58 = vpack.c.b16 %v1081_v57, %v1081_v57 }
 0x108   : > { %v1086_v59 = vshll.u32 %v1082_v58, 16  ;;  %v1084_v60 = vshrl.u32 %v1082_v58, 16 }
 0x10a   : > { %v1088_v61 = vrot.slane %v1086_v59, 1 }
 0x10c   : > { %v1089_v62 = vor.u32 %v1088_v61, %v1084_v60 }
 0x10e   : > { %1147 = vmatmul.bf16.vlgmr.msra.gmra.mxu0 %v1089_v62 }
 0x187   : > { %v978_v63 = vpop.f32.mrf.mxu2  ;;  %v1056_v0 = vpop.f32.mrf.mxu3 }
 0x188   : > { %982 = vst [vmem:[#allocation2] sm:$0xf] %v978_v63 }
 0x18b   : > { %v1148_v1 = vpop.f32.mrf.mxu0 }
 0x18f   : > { %v1060_v2 = vld [vmem:[#allocation2 + $0x1] sm:$0x7]  ;;  %v980_v3 = vpop.f32.mrf.mxu2  ;;  %v1058_v4 = vpop.f32.mrf.mxu3 }
 0x190   : > { %v1061_v5 = vadd.f32 %v1060_v2, %v1056_v0 }
 0x192   : > { %1062 = vst [vmem:[#allocation2 + $0x1] sm:$0x7] %v1061_v5 }
 0x193   : > { %v1150_v6 = vpop.f32.mrf.mxu0 }
 0x199   : > { %v1152_v7 = vld [vmem:[#allocation2] sm:$0x7] }
 0x19a   : > { %v1153_v8 = vadd.f32 %v1152_v7, %v1148_v1 }
 0x19c   : > { %1154 = vst [vmem:[#allocation2] sm:$0x7] %v1153_v8 }
 0x1a3   : > { %v1155_v11 = vld [vmem:[#allocation2] sm:$0xf] }
 0x1a4   : > { %v1160_v12 = vmul.f32 %v1703_v9, %v1155_v11 }
 0x1a6   : > { %v1165_v13 = vadd.f32 %v1704_v10, %v1160_v12 }
 0x1a8   : > { %v1167_v14 = vmul.f32 0.044715, %v1165_v13  ;;  %v1166_v20 = vmul.f32 0.5, %v1165_v13 }
 0x1aa   : > { %v1168_v15 = vmul.f32 %v1167_v14, %v1165_v13 }
 0x1ac   : > { %v1169_v16 = vmul.f32 %v1168_v15, %v1165_v13 }
 0x1ae   : > { %v1170_v17 = vadd.f32 %v1169_v16, %v1165_v13 }
 0x1b0   : > { %v1171_v18 = vmul.f32 0.7978846, %v1170_v17 }
 0x1b2   : > { %1707 = vtanh.f32 %v1171_v18 }
 0x1b8   : > { %v1708_v19 = vpop.eup %1707 }
 0x1b9   : > { %v1173_v21 = vadd.f32 1.0, %v1708_v19 }
 0x1bb   : > { %v1174_v22 = vmul.f32 %v1173_v21, %v1166_v20 }
 0x1bd   : > { %v1175_v23 = vpack.c.bf16 %v1174_v22, %v1174_v22 }
 0x1bf   : > { %1176 = vst [vmem:[%s378_s11] sm:$0x3] %v1175_v23 }
 0x1c0 PF: > { %s21_s30 = sadd.s32 1, %s1783_s30  }
 0x1c1   : > { %p18_p7 = scmp.ge.s32.totalorder %s21_s30, 4  }
 0x1c3   :  { %20 = sbr.rel (!%p18_p7) target bundleno = 2 (0x2), region = 104 }
 0x1c8   :  { %1196 = vsyncpa [#allocation4], 1 }
 0x1c9   :  { %1198 = vsyncpa [#allocation4 + $0x1], 1 }
 0x1ca   :  { %1199 = vsyncpa [#allocation6], 1 }

// kernel: unet_forward_pallas.17
= control target key start
LH: loop header
LB: loop body
LE: loop exit
PB: predicated region body
PF: predicated region fallthrough
CT: control target
= control target key end

     0   :  { %s1750_s30 = smov 0   ;;  %s2003_s0 = inlined_call_operand.vmem [shape: bf16[2,8,128], index: 0, kind: input, shape index: {}]   ;;  %s2004_s1 = inlined_call_operand.vmem [shape: bf16[2,8,128], index: 1, kind: input, shape index: {}]   ;;  %s2005_s2 = inlined_call_operand.vmem [shape: bf16[3,128,128], index: 2, kind: input, shape index: {}]   ;;  %s2006_s3 = inlined_call_operand.vmem [shape: bf16[3,128,128], index: 3, kind: input, shape index: {}]   ;;  %s2007_s4 = inlined_call_operand.vmem [shape: f32[1,128], index: 4, kind: input, shape index: {}]   ;;  %s2008_s5 = inlined_call_operand.vmem [shape: f32[1,128], index: 5, kind: input, shape index: {}]   ;;  %s2009_s6 = inlined_call_operand.vmem [shape: bf16[3,128,128], index: 6, kind: input, shape index: {}]   ;;  %s2010_s7 = inlined_call_operand.vmem [shape: f32[1,128], index: 7, kind: input, shape index: {}]   ;;  %s2011_s8 = inlined_call_operand.vmem [shape: f32[1,128], index: 8, kind: input, shape index: {}]   ;;  %s2012_s9 = inlined_call_operand.vmem [shape: bf16[2,8,128], index: 9, kind: output, shape index: {}]  }
   0x1 LB: > { %s1210_s10 = sadd.s32 4294967295, %s1698_s30   ;;  %p1214_p0 = scmp.ge.s32.totalorder %s1698_s30, 1  ;;  %s1698_s30 = sphi %s1750_s30, %s19_s30  }
   0x2   : > { %p295_p1 = scmp.lt.s32.totalorder %s1698_s30, 3 }
   0x4   : > { %p296_p2 = pnand %p1214_p0, %p295_p1 }
   0x5   : > { %p333_p3 = scmp.lt.s32.totalorder (!%p296_p2), %s1210_s10, 1 }
   0x6   : > { %299 = sbr.rel (%p296_p2) target bundleno = 442 (0x1ba), region = 56 }
   0xb   : > { %v1611_v0 = vld [vmem:[%s2005_s2 + $0x78] sm:$0xff]  ;;  %v1610_v3 = vld [vmem:[%s2005_s2 + $0x70] sm:$0xff]  ;;  %s2014_s10 = smov (!%p333_p3, %s1210_s10), 1  ;;  %v1609_v8 = vld [vmem:[%s2005_s2 + $0x68] sm:$0xff] }
   0xc   : > { %v1619_v1 = vld [vmem:[%s2005_s2 + $0x38] sm:$0xff]  ;;  %411 = vmatpush.bf16.msra.mxu0 %v1611_v0  ;;  %v1618_v4 = vld [vmem:[%s2005_s2 + $0x30] sm:$0xff]  ;;  %s1782_s27 = sshll.u32 %s2014_s10, 2  ;;  %v1617_v9 = vld [vmem:[%s2005_s2 + $0x28] sm:$0xff] }
   0xd   : > { %v1627_v2 = vld [vmem:[%s2005_s2 + $0xb8] sm:$0xff]  ;;  %489 = vmatpush.bf16.msra.mxu1 %v1619_v1  ;;  %v1626_v5 = vld [vmem:[%s2005_s2 + $0xb0] sm:$0xff]  ;;  %v1625_v10 = vld [vmem:[%s2005_s2 + $0xa8] sm:$0xff]  ;;  %s336_s10 = scalar_lea.vmem %s2003_s0, %s1782_s27  ;;  %s340_s11 = scalar_lea.vmem %s2004_s1, %s1782_s27 }
   0xe   : > { %581 = vmatpush.bf16.msra.mxu2 %v1627_v2  ;;  %v1635_v6 = vld [vmem:[%s2006_s3 + $0x78] sm:$0xff]  ;;  %v1634_v7 = vld [vmem:[%s2006_s3 + $0x70] sm:$0xff]  ;;  %v1633_v11 = vld [vmem:[%s2006_s3 + $0x68] sm:$0xff]  ;;  %s344_s19 = scalar_lea.vmem %s2012_s9, %s1782_s27 }
   0xf   : > { %663 = vmatpush.bf16.msra.mxu3 %v1635_v6  ;;  %v1608_v12 = vld [vmem:[%s2005_s2 + $0x60] sm:$0xff]  ;;  %v1607_v16 = vld [vmem:[%s2005_s2 + $0x58] sm:$0xff]  ;;  %v1606_v22 = vld [vmem:[%s2005_s2 + $0x50] sm:$0xff] }
  0x10   : > { %412 = vmatpush.bf16.msra.mxu0 %v1610_v3  ;;  %v1616_v13 = vld [vmem:[%s2005_s2 + $0x20] sm:$0xff]  ;;  %v1615_v18 = vld [vmem:[%s2005_s2 + $0x18] sm:$0xff]  ;;  %v1614_v23 = vld [vmem:[%s2005_s2 + $0x10] sm:$0xff] }
  0x11   : > { %490 = vmatpush.bf16.msra.mxu1 %v1618_v4  ;;  %v1624_v14 = vld [vmem:[%s2005_s2 + $0xa0] sm:$0xff]  ;;  %v1623_v20 = vld [vmem:[%s2005_s2 + $0x98] sm:$0xff]  ;;  %v1622_v25 = vld [vmem:[%s2005_s2 + $0x90] sm:$0xff] }
  0x12   : > { %582 = vmatpush.bf16.msra.mxu2 %v1626_v5  ;;  %v345_v15 = vld [vmem:[%s336_s10] sm:$0xf]  ;;  %v1631_v21 = vld [vmem:[%s2006_s3 + $0x58] sm:$0xff]  ;;  %v1630_v26 = vld [vmem:[%s2006_s3 + $0x50] sm:$0xff] }
  0x13   : > { %664 = vmatpush.bf16.msra.mxu3 %v1634_v7  ;;  %v1632_v17 = vld [vmem:[%s2006_s3 + $0x60] sm:$0xff]  ;;  %v523_v19 = vunpack.c.l.b16 %v345_v15  ;;  %v1605_v27 = vld [vmem:[%s2005_s2 + $0x48] sm:$0xff]  ;;  %v1643_v36 = vld [vmem:[%s2006_s3 + $0x38] sm:$0xff] }
  0x14   : > { %413 = vmatpush.bf16.msra.mxu0 %v1609_v8  ;;  %v1613_v28 = vld [vmem:[%s2005_s2 + $0x8] sm:$0xff]  ;;  %v1604_v32 = vld [vmem:[%s2005_s2 + $0x40] sm:$0xff]  ;;  %v1651_v38 = vld [vmem:[%s2006_s3 + $0xb8] sm:$0xff] }
  0x15   : > { %491 = vmatpush.bf16.msra.mxu1 %v1617_v9  ;;  %v524_v24 = vpack.c.b16 %v523_v19, %v523_v19  ;;  %v1621_v30 = vld [vmem:[%s2005_s2 + $0x88] sm:$0xff]  ;;  %v1612_v33 = vld [vmem:[%s2005_s2] sm:$0xff]  ;;  %v1642_v41 = vld [vmem:[%s2006_s3 + $0x30] sm:$0xff] }
  0x16   : > { %583 = vmatpush.bf16.msra.mxu2 %v1625_v10  ;;  %v1629_v31 = vld [vmem:[%s2006_s3 + $0x48] sm:$0xff]  ;;  %v1620_v37 = vld [vmem:[%s2005_s2 + $0x80] sm:$0xff]  ;;  %v1650_v42 = vld [vmem:[%s2006_s3 + $0xb0] sm:$0xff] }
  0x17   : > { %665 = vmatpush.bf16.msra.mxu3 %v1633_v11  ;;  %v528_v29 = vshll.u32 %v524_v24, 16  ;;  %v526_v34 = vshrl.u32 %v524_v24, 16  ;;  %v1628_v40 = vld [vmem:[%s2006_s3 + $0x40] sm:$0xff]  ;;  %v1641_v44 = vld [vmem:[%s2006_s3 + $0x28] sm:$0xff]  ;;  %v1639_v49 = vld [vmem:[%s2006_s3 + $0x18] sm:$0xff] }
  0x18   : > { %414 = vmatpush.bf16.msra.mxu0 %v1608_v12  ;;  %v597_v43 = vld [vmem:[%s340_s11] sm:$0xf]  ;;  %v1649_v45 = vld [vmem:[%s2006_s3 + $0xa8] sm:$0xff]  ;;  %v1647_v50 = vld [vmem:[%s2006_s3 + $0x98] sm:$0xff] }
  0x19   : > { %492 = vmatpush.bf16.msra.mxu1 %v1616_v13  ;;  %v530_v35 = vrot.slane %v528_v29, 1  ;;  %v1640_v46 = vld [vmem:[%s2006_s3 + $0x20] sm:$0xff]  ;;  %v777_v48 = vunpack.c.l.b16 %v597_v43  ;;  %v1638_v52 = vld [vmem:[%s2006_s3 + $0x10] sm:$0xff]  ;;  %v1637_v54 = vld [vmem:[%s2006_s3 + $0x8] sm:$0xff] }
  0x1a   : > { %584 = vmatpush.bf16.msra.mxu2 %v1624_v14  ;;  %v1648_v47 = vld [vmem:[%s2006_s3 + $0xa0] sm:$0xff]  ;;  %v1646_v53 = vld [vmem:[%s2006_s3 + $0x90] sm:$0xff]  ;;  %v1645_v56 = vld [vmem:[%s2006_s3 + $0x88] sm:$0xff] }
  0x1b   : > { %666 = vmatpush.bf16.msra.mxu3 %v1632_v17  ;;  %v531_v39 = vor.u32 %v530_v35, %v526_v34  ;;  %v778_v51 = vpack.c.b16 %v777_v48, %v777_v48  ;;  %v1636_v57 = vld [vmem:[%s2006_s3] sm:$0xff]  ;;  %v1659_v10 = vld [vmem:[%s2009_s6 + $0x78] sm:$0xff]  ;;  %v1658_v12 = vld [vmem:[%s2009_s6 + $0x70] sm:$0xff] }
  0x1c   : > { %415 = vmatpush.bf16.msra.mxu0 %v1607_v16  ;;  %v1644_v60 = vld [vmem:[%s2006_s3 + $0x80] sm:$0xff]  ;;  %v1667_v11 = vld [vmem:[%s2009_s6 + $0x38] sm:$0xff]  ;;  %v1666_v13 = vld [vmem:[%s2009_s6 + $0x30] sm:$0xff] }
  0x1d   : > { %493 = vmatpush.bf16.msra.mxu1 %v1615_v18  ;;  %v782_v55 = vshll.u32 %v778_v51, 16  ;;  %v780_v58 = vshrl.u32 %v778_v51, 16  ;;  %v1675_v14 = vld [vmem:[%s2009_s6 + $0xb8] sm:$0xff]  ;;  %v1657_v16 = vld [vmem:[%s2009_s6 + $0x68] sm:$0xff]  ;;  %v1670_v35 = vld [vmem:[%s2009_s6 + $0x90] sm:$0xff] }
  0x1e   : > { %585 = vmatpush.bf16.msra.mxu2 %v1623_v20  ;;  %v1665_v17 = vld [vmem:[%s2009_s6 + $0x28] sm:$0xff] }
  0x1f   : > { %667 = vmatpush.bf16.msra.mxu3 %v1631_v21  ;;  %v784_v59 = vrot.slane %v782_v55, 1  ;;  %v1673_v18 = vld [vmem:[%s2009_s6 + $0xa8] sm:$0xff] }
  0x20   : > { %416 = vmatpush.bf16.msra.mxu0 %v1606_v22  ;;  %v1656_v22 = vld [vmem:[%s2009_s6 + $0x60] sm:$0xff] }
  0x21   : > { %494 = vmatpush.bf16.msra.mxu1 %v1614_v23  ;;  %v785_v61 = vor.u32 %v784_v59, %v780_v58  ;;  %v1664_v23 = vld [vmem:[%s2009_s6 + $0x20] sm:$0xff] }
  0x22   : > { %586 = vmatpush.bf16.msra.mxu2 %v1622_v25  ;;  %v1672_v25 = vld [vmem:[%s2009_s6 + $0xa0] sm:$0xff] }
  0x23   : > { %668 = vmatpush.bf16.msra.mxu3 %v1630_v26  ;;  %v1655_v26 = vld [vmem:[%s2009_s6 + $0x58] sm:$0xff] }
  0x24   : > { %417 = vmatpush.bf16.msra.mxu0 %v1605_v27  ;;  %v1663_v27 = vld [vmem:[%s2009_s6 + $0x18] sm:$0xff] }
  0x25   : > { %495 = vmatpush.bf16.msra.mxu1 %v1613_v28  ;;  %v1671_v28 = vld [vmem:[%s2009_s6 + $0x98] sm:$0xff] }
  0x26   : > { %587 = vmatpush.bf16.msra.mxu2 %v1621_v30  ;;  %v1654_v30 = vld [vmem:[%s2009_s6 + $0x50] sm:$0xff] }
  0x27   : > { %669 = vmatpush.bf16.msra.mxu3 %v1629_v31  ;;  %v1662_v31 = vld [vmem:[%s2009_s6 + $0x10] sm:$0xff] }
  0x28   : > { %418 = vmatpush.bf16.msra.mxu0 %v1604_v32 }
  0x29   : > { %496 = vmatpush.bf16.msra.mxu1 %v1612_v33 }
  0x2a   : > { %588 = vmatpush.bf16.msra.mxu2 %v1620_v37  ;;  %v1661_v37 = vld [vmem:[%s2009_s6 + $0x8] sm:$0xff] }
  0x2b   : > { %419 = vmatmul.bf16.vlgmr.msra.gmra.mxu0 %v345_v15  ;;  %670 = vmatpush.bf16.msra.mxu3 %v1628_v40 }
  0x2c   : > { %743 = vmatpush.bf16.msrb.mxu0 %v1643_v36  ;;  %497 = vmatmul.bf16.vlgmr.msra.gmra.mxu1 %v345_v15  ;;  %v1674_v15 = vld [vmem:[%s2009_s6 + $0xb0] sm:$0xff]  ;;  %v1653_v36 = vld [vmem:[%s2009_s6 + $0x48] sm:$0xff] }
  0x2d   : > { %835 = vmatpush.bf16.msrb.mxu1 %v1651_v38  ;;  %589 = vmatmul.bf16.vlgmr.msra.gmra.mxu2 %v531_v39  ;;  %v1652_v38 = vld [vmem:[%s2009_s6 + $0x40] sm:$0xff] }
  0x2e   : > { %671 = vmatmul.bf16.vlgmr.msra.gmra.mxu3 %v597_v43  ;;  %937 = vmatpush.bf16.msrb.mxu2 %v1659_v10  ;;  %v1660_v39 = vld [vmem:[%s2009_s6] sm:$0xff] }
  0x2f   : > { %1015 = vmatpush.bf16.msrb.mxu3 %v1667_v11  ;;  %v1686_v11 = vld [vmem:[%s2010_s7] ss:$0 sm:$0xff] }
  0x30   : > { %744 = vmatpush.bf16.msrb.mxu0 %v1642_v41 }
  0x31   : > { %836 = vmatpush.bf16.msrb.mxu1 %v1650_v42  ;;  %v1684_v42 = vld [vmem:[%s2007_s4] ss:$0 sm:$0xff] }
  0x32   : > { %938 = vmatpush.bf16.msrb.mxu2 %v1658_v12  ;;  %v1687_v12 = vld [vmem:[%s2011_s8] ss:$0 sm:$0xff] }
  0x33   : > { %1016 = vmatpush.bf16.msrb.mxu3 %v1666_v13 }
  0x34   : > { %745 = vmatpush.bf16.msrb.mxu0 %v1641_v44  ;;  %v1685_v44 = vld [vmem:[%s2008_s5] ss:$0 sm:$0xff] }
  0x35   : > { %837 = vmatpush.bf16.msrb.mxu1 %v1649_v45  ;;  %v1668_v45 = vld [vmem:[%s2009_s6 + $0x80] sm:$0xff] }
  0x36   : > { %939 = vmatpush.bf16.msrb.mxu2 %v1657_v16 }
  0x37   : > { %1017 = vmatpush.bf16.msrb.mxu3 %v1665_v17 }
  0x38   : > { %746 = vmatpush.bf16.msrb.mxu0 %v1640_v46 }
  0x39   : > { %838 = vmatpush.bf16.msrb.mxu1 %v1648_v47 }
  0x3a   : > { %940 = vmatpush.bf16.msrb.mxu2 %v1656_v22 }
  0x3b   : > { %1018 = vmatpush.bf16.msrb.mxu3 %v1664_v23 }
  0x3c   : > { %747 = vmatpush.bf16.msrb.mxu0 %v1639_v49 }
  0x3d   : > { %839 = vmatpush.bf16.msrb.mxu1 %v1647_v50 }
  0x3e   : > { %941 = vmatpush.bf16.msrb.mxu2 %v1655_v26 }
  0x3f   : > { %1019 = vmatpush.bf16.msrb.mxu3 %v1663_v27 }
  0x40   : > { %748 = vmatpush.bf16.msrb.mxu0 %v1638_v52 }
  0x41   : > { %840 = vmatpush.bf16.msrb.mxu1 %v1646_v53 }
  0x42   : > { %942 = vmatpush.bf16.msrb.mxu2 %v1654_v30 }
  0x43   : > { %1020 = vmatpush.bf16.msrb.mxu3 %v1662_v31 }
  0x44   : > { %749 = vmatpush.bf16.msrb.mxu0 %v1637_v54 }
  0x45   : > { %841 = vmatpush.bf16.msrb.mxu1 %v1645_v56 }
  0x46   : > { %943 = vmatpush.bf16.msrb.mxu2 %v1653_v36 }
  0x47   : > { %1021 = vmatpush.bf16.msrb.mxu3 %v1661_v37 }
  0x48   : > { %750 = vmatpush.bf16.msrb.mxu0 %v1636_v57 }
  0x49   : > { %842 = vmatpush.bf16.msrb.mxu1 %v1644_v60 }
  0x4a   : > { %944 = vmatpush.bf16.msrb.mxu2 %v1652_v38 }
  0x4b   : > { %751 = vmatmul.bf16.vlgmr.msrb.gmra.mxu0 %v597_v43  ;;  %1022 = vmatpush.bf16.msrb.mxu3 %v1660_v39  ;;  %v1669_v43 = vld [vmem:[%s2009_s6 + $0x88] sm:$0xff] }
  0x4c   : > { %843 = vmatmul.bf16.vlgmr.msrb.gmra.mxu1 %v785_v61  ;;  %1107 = vmatpush.bf16.msra.mxu0 %v1675_v14 }
  0x50   : > { %1108 = vmatpush.bf16.msra.mxu0 %v1674_v15 }
  0x54   : > { %1109 = vmatpush.bf16.msra.mxu0 %v1673_v18 }
  0x58   : > { %1110 = vmatpush.bf16.msra.mxu0 %v1672_v25 }
  0x5c   : > { %1111 = vmatpush.bf16.msra.mxu0 %v1671_v28 }
  0x60   : > { %1112 = vmatpush.bf16.msra.mxu0 %v1670_v35 }
  0x64   : > { %1113 = vmatpush.bf16.msra.mxu0 %v1669_v43 }
  0x68   : > { %1114 = vmatpush.bf16.msra.mxu0 %v1668_v45 }
  0xa8   : > { %v420_v62 = vpop.f32.mrf.mxu0 }
  0xa9   : > { %v498_v63 = vpop.f32.mrf.mxu1  ;;  %424 = vst [vmem:[#allocation2] sm:$0xff] %v420_v62 }
  0xb0   : > { %v590_v0 = vpop.f32.mrf.mxu2  ;;  %v502_v1 = vld [vmem:[#allocation2 + $0x1] sm:$0x7f]  ;;  %v422_v2 = vpop.f32.mrf.mxu0 }
  0xb1   : > { %v500_v3 = vpop.f32.mrf.mxu1  ;;  %v503_v4 = vadd.f32 %v502_v1, %v498_v63  ;;  %v672_v5 = vpop.f32.mrf.mxu3 }
  0xb3   : > { %504 = vst [vmem:[#allocation2 + $0x1] sm:$0x7f] %v503_v4 }
  0xb8   : > { %v592_v6 = vpop.f32.mrf.mxu2 }
  0xb9   : > { %v674_v8 = vpop.f32.mrf.mxu3 }
  0xba   : > { %v594_v7 = vld [vmem:[#allocation2] sm:$0x7f] }
  0xbb   : > { %v595_v9 = vadd.f32 %v594_v7, %v590_v0 }
  0xbd   : > { %596 = vst [vmem:[#allocation2] sm:$0x7f] %v595_v9 }
  0xc4   : > { %v676_v19 = vld [vmem:[#allocation2] sm:$0xff] }
  0xc5   : > { %v677_v20 = vadd.f32 %v676_v19, %v672_v5 }
  0xc7   : > { %678 = vst [vmem:[#allocation2] sm:$0xff] %v677_v20 }
  0xc8   : > { %v752_v21 = vpop.f32.mrf.mxu0 }
  0xc9   : > { %v844_v24 = vpop.f32.mrf.mxu1 }
  0xce   : > { %v756_v32 = vld [vmem:[#allocation2 + $0x1] sm:$0x7f] }
  0xcf   : > { %v757_v34 = vadd.f32 %v756_v32, %v752_v21 }
  0xd0   : > { %v754_v29 = vpop.f32.mrf.mxu0 }
  0xd1   : > { %v846_v33 = vpop.f32.mrf.mxu1  ;;  %758 = vst [vmem:[#allocation2 + $0x1] sm:$0x7f] %v757_v34 }
  0xd8   : > { %v848_v40 = vld [vmem:[#allocation2] sm:$0x7f] }
  0xd9   : > { %v849_v41 = vadd.f32 %v848_v40, %v844_v24 }
  0xdb   : > { %850 = vst [vmem:[#allocation2] sm:$0x7f] %v849_v41 }
  0xe2   : > { %v851_v46 = vld [vmem:[#allocation2] sm:$0xff] }
  0xe3   : > { %v856_v47 = vmul.f32 %v1684_v42, %v851_v46 }
  0xe5   : > { %v861_v48 = vadd.f32 %v1685_v44, %v856_v47 }
  0xe7   : > { %v863_v49 = vmul.f32 0.044715, %v861_v48  ;;  %v862_v55 = vmul.f32 0.5, %v861_v48 }
  0xe9   : > { %v864_v50 = vmul.f32 %v863_v49, %v861_v48 }
  0xeb   : > { %v865_v51 = vmul.f32 %v864_v50, %v861_v48 }
  0xed   : > { %v866_v52 = vadd.f32 %v865_v51, %v861_v48 }
  0xef   : > { %v867_v53 = vmul.f32 0.7978846, %v866_v52 }
  0xf1   : > { %1688 = vtanh.f32 %v867_v53 }
  0xf7   : > { %v1689_v54 = vpop.eup %1688 }
  0xf8   : > { %v869_v56 = vadd.f32 1.0, %v1689_v54 }
  0xfa   : > { %v870_v57 = vmul.f32 %v869_v56, %v862_v55 }
  0xfc   : > { %v871_v58 = vpack.c.bf16 %v870_v57, %v870_v57 }
  0xfe   : > { %945 = vmatmul.bf16.vlgmr.msrb.gmra.mxu2 %v871_v58  ;;  %v1049_v59 = vunpack.c.l.b16 %v871_v58  ;;  %1023 = vmatmul.bf16.vlgmr.msrb.gmra.mxu3 %v871_v58 }
 0x100   : > { %v1050_v60 = vpack.c.b16 %v1049_v59, %v1049_v59 }
 0x102   : > { %v1054_v61 = vshll.u32 %v1050_v60, 16  ;;  %v1052_v62 = vshrl.u32 %v1050_v60, 16 }
 0x104   : > { %v1056_v63 = vrot.slane %v1054_v61, 1 }
 0x106   : > { %v1057_v0 = vor.u32 %v1056_v63, %v1052_v62 }
 0x108   : > { %1115 = vmatmul.bf16.vlgmr.msra.gmra.mxu0 %v1057_v0 }
 0x181   : > { %v946_v1 = vpop.f32.mrf.mxu2  ;;  %v1024_v2 = vpop.f32.mrf.mxu3 }
 0x182   : > { %950 = vst [vmem:[#allocation2] sm:$0xff] %v946_v1 }
 0x185   : > { %v1116_v3 = vpop.f32.mrf.mxu0 }
 0x189   : > { %v1028_v4 = vld [vmem:[#allocation2 + $0x1] sm:$0x7f]  ;;  %v948_v5 = vpop.f32.mrf.mxu2  ;;  %v1026_v6 = vpop.f32.mrf.mxu3 }
 0x18a   : > { %v1029_v7 = vadd.f32 %v1028_v4, %v1024_v2 }
 0x18c   : > { %1030 = vst [vmem:[#allocation2 + $0x1] sm:$0x7f] %v1029_v7 }
 0x18d   : > { %v1118_v8 = vpop.f32.mrf.mxu0 }
 0x193   : > { %v1120_v9 = vld [vmem:[#allocation2] sm:$0x7f] }
 0x194   : > { %v1121_v10 = vadd.f32 %v1120_v9, %v1116_v3 }
 0x196   : > { %1122 = vst [vmem:[#allocation2] sm:$0x7f] %v1121_v10 }
 0x19d   : > { %v1123_v13 = vld [vmem:[#allocation2] sm:$0xff] }
 0x19e   : > { %v1128_v14 = vmul.f32 %v1686_v11, %v1123_v13 }
 0x1a0   : > { %v1133_v15 = vadd.f32 %v1687_v12, %v1128_v14 }
 0x1a2   : > { %v1135_v16 = vmul.f32 0.044715, %v1133_v15  ;;  %v1134_v22 = vmul.f32 0.5, %v1133_v15 }
 0x1a4   : > { %v1136_v17 = vmul.f32 %v1135_v16, %v1133_v15 }
 0x1a6   : > { %v1137_v18 = vmul.f32 %v1136_v17, %v1133_v15 }
 0x1a8   : > { %v1138_v19 = vadd.f32 %v1137_v18, %v1133_v15 }
 0x1aa   : > { %v1139_v20 = vmul.f32 0.7978846, %v1138_v19 }
 0x1ac   : > { %1690 = vtanh.f32 %v1139_v20 }
 0x1b2   : > { %v1691_v21 = vpop.eup %1690 }
 0x1b3   : > { %v1141_v23 = vadd.f32 1.0, %v1691_v21 }
 0x1b5   : > { %v1142_v24 = vmul.f32 %v1141_v23, %v1134_v22 }
 0x1b7   : > { %v1143_v25 = vpack.c.bf16 %v1142_v24, %v1142_v24 }
 0x1b9   : > { %1144 = vst [vmem:[%s344_s19] sm:$0xf] %v1143_v25 }
 0x1ba PF: > { %s19_s30 = sadd.s32 1, %s1698_s30  }
 0x1bb   : > { %p16_p4 = scmp.ge.s32.totalorder %s19_s30, 4  }
 0x1bd   :  { %18 = sbr.rel (!%p16_p4) target bundleno = 1 (0x1), region = 95 }

// kernel: unet_forward_pallas.19
= control target key start
LH: loop header
LB: loop body
LE: loop exit
PB: predicated region body
PF: predicated region fallthrough
CT: control target
= control target key end

     0   :  { %s414_s12 = smov 0   ;;  %s458_s0 = inlined_call_operand.vmem [shape: bf16[2,16,128], index: 0, kind: input, shape index: {}]   ;;  %s459_s1 = inlined_call_operand.vmem [shape: bf16[128,64], index: 1, kind: input, shape index: {}]   ;;  %s460_s2 = inlined_call_operand.vmem [shape: f32[1,64], index: 2, kind: input, shape index: {}]   ;;  %s461_s3 = inlined_call_operand.vmem [shape: f32[2,16,64], index: 3, kind: output, shape index: {}]  }
   0x1 LB: > { %s319_s13 = sadd.s32 4294967295, %s392_s12   ;;  %p323_p0 = scmp.ge.s32.totalorder %s392_s12, 1  ;;  %s392_s12 = sphi %s414_s12, %s13_s12  }
   0x2   : > { %p137_p1 = scmp.lt.s32.totalorder %s392_s12, 3 }
   0x4   : > { %p138_p2 = pnand %p323_p0, %p137_p1 }
   0x5   : > { %p161_p3 = scmp.lt.s32.totalorder (!%p138_p2), %s319_s13, 1 }
   0x6   : > { %141 = sbr.rel (%p138_p2) target bundleno = 180 (0xb4), region = 32 }
   0xb   : > { %v376_v0 = vld [vmem:[%s459_s1 + $0x38] sm:$0xff]  ;;  %v375_v1 = vld [vmem:[%s459_s1 + $0x30] sm:$0xff]  ;;  %v374_v2 = vld [vmem:[%s459_s1 + $0x28] sm:$0xff]  ;;  %s463_s13 = smov (!%p161_p3, %s319_s13), 1  ;;  %vm261_vm0 = vcmask 523264  }
   0xc   : > { %247 = vmatpush.bf16.msra.mxu0 %v376_v0  ;;  %v373_v3 = vld [vmem:[%s459_s1 + $0x20] sm:$0xff]  ;;  %v372_v4 = vld [vmem:[%s459_s1 + $0x18] sm:$0xff]  ;;  %v371_v5 = vld [vmem:[%s459_s1 + $0x10] sm:$0xff]  ;;  %s366_s28 = sshll.u32 %s463_s13, 3  ;;  %s367_s7 = sshll.u32 %s463_s13, 4 }
   0xd   : > { %v370_v6 = vld [vmem:[%s459_s1 + $0x8] sm:$0xff]  ;;  %v369_v7 = vld [vmem:[%s459_s1] sm:$0xff]  ;;  %s165_s6 = scalar_lea.vmem %s458_s0, %s366_s28  ;;  %s170_s14 = scalar_lea.vmem %s461_s3, %s367_s7 }
   0xe   : > { %v368_v8 = vld [vmem:[%s165_s6] sm:$0xff] }
   0xf   : > { %v385_v9 = vld [vmem:[%s460_s2] ss:$0 sm:$0xff] }
  0x10   : > { %248 = vmatpush.bf16.msra.mxu0 %v375_v1 }
  0x14   : > { %249 = vmatpush.bf16.msra.mxu0 %v374_v2 }
  0x18   : > { %250 = vmatpush.bf16.msra.mxu0 %v373_v3 }
  0x1c   : > { %251 = vmatpush.bf16.msra.mxu0 %v372_v4 }
  0x20   : > { %252 = vmatpush.bf16.msra.mxu0 %v371_v5 }
  0x24   : > { %253 = vmatpush.bf16.msra.mxu0 %v370_v6 }
  0x28   : > { %254 = vmatpush.bf16.msra.mxu0 %v369_v7 }
  0x2b   : > { %255 = vmatmul.bf16.vlgmr.msra.gmra.mxu0 %v368_v8 }
  0xa8   : > { %v256_v10 = vpop.f32.mrf.mxu0 }
  0xa9   : > { %v257_v11 = vadd.f32 %v385_v9, %v256_v10 }
  0xab   : > { %262 = vst.msk [vmem:[%s170_s14] sm:$0xff] %vm261_vm0, %v257_v11 }
  0xb0   : > { %v258_v12 = vpop.f32.mrf.mxu0 }
  0xb1   : > { %v259_v13 = vadd.f32 %v385_v9, %v258_v12 }
  0xb3   : > { %263 = vst.msk [vmem:[%s170_s14 + $0x8] sm:$0xff] %vm261_vm0, %v259_v13 }
  0xb4 PF: > { %s13_s12 = sadd.s32 1, %s392_s12  }
  0xb5   : > { %p10_p4 = scmp.ge.s32.totalorder %s13_s12, 4  }
  0xb7   :  { %12 = sbr.rel (!%p10_p4) target bundleno = 1 (0x1), region = 62 }

// kernel: unet_forward_pallas.18
= control target key start
LH: loop header
LB: loop body
LE: loop exit
PB: predicated region body
PF: predicated region fallthrough
CT: control target
= control target key end

     0   :  { %s1855_s30 = smov 0   ;;  %s2108_s0 = inlined_call_operand.vmem [shape: bf16[2,16,128], index: 0, kind: input, shape index: {}]   ;;  %s2109_s1 = inlined_call_operand.vmem [shape: bf16[2,16,128], index: 1, kind: input, shape index: {}]   ;;  %s2110_s2 = inlined_call_operand.vmem [shape: bf16[3,128,128], index: 2, kind: input, shape index: {}]   ;;  %s2111_s3 = inlined_call_operand.vmem [shape: bf16[3,128,128], index: 3, kind: input, shape index: {}]   ;;  %s2112_s4 = inlined_call_operand.vmem [shape: f32[1,128], index: 4, kind: input, shape index: {}]   ;;  %s2113_s5 = inlined_call_operand.vmem [shape: f32[1,128], index: 5, kind: input, shape index: {}]   ;;  %s2114_s6 = inlined_call_operand.vmem [shape: bf16[3,128,128], index: 6, kind: input, shape index: {}]   ;;  %s2115_s7 = inlined_call_operand.vmem [shape: f32[1,128], index: 7, kind: input, shape index: {}]   ;;  %s2116_s8 = inlined_call_operand.vmem [shape: f32[1,128], index: 8, kind: input, shape index: {}]   ;;  %s2117_s9 = inlined_call_operand.vmem [shape: bf16[2,16,128], index: 9, kind: output, shape index: {}]  }
   0x1 LB: > { %s1290_s10 = sadd.s32 4294967295, %s1803_s30   ;;  %p1294_p0 = scmp.ge.s32.totalorder %s1803_s30, 1  ;;  %s1803_s30 = sphi %s1855_s30, %s19_s30  }
   0x2   : > { %p297_p1 = scmp.lt.s32.totalorder %s1803_s30, 3 }
   0x4   : > { %p298_p2 = pnand %p1294_p0, %p297_p1 }
   0x5   : > { %p338_p3 = scmp.lt.s32.totalorder (!%p298_p2), %s1290_s10, 1 }
   0x6   : > { %301 = sbr.rel (%p298_p2) target bundleno = 465 (0x1d1), region = 56 }
   0xb   : > { %v1706_v0 = vld [vmem:[%s2110_s2 + $0x78] sm:$0xff]  ;;  %v1705_v3 = vld [vmem:[%s2110_s2 + $0x70] sm:$0xff]  ;;  %v1704_v8 = vld [vmem:[%s2110_s2 + $0x68] sm:$0xff]  ;;  %s2119_s10 = smov (!%p338_p3, %s1290_s10), 1 }
   0xc   : > { %v1714_v1 = vld [vmem:[%s2110_s2 + $0x38] sm:$0xff]  ;;  %426 = vmatpush.bf16.msra.mxu0 %v1706_v0  ;;  %v1713_v4 = vld [vmem:[%s2110_s2 + $0x30] sm:$0xff]  ;;  %v1712_v9 = vld [vmem:[%s2110_s2 + $0x28] sm:$0xff]  ;;  %s1911_s24 = sshll.u32 %s2119_s10, 3 }
   0xd   : > { %v1722_v2 = vld [vmem:[%s2110_s2 + $0xb8] sm:$0xff]  ;;  %506 = vmatpush.bf16.msra.mxu1 %v1714_v1  ;;  %v1721_v5 = vld [vmem:[%s2110_s2 + $0xb0] sm:$0xff]  ;;  %v1720_v10 = vld [vmem:[%s2110_s2 + $0xa8] sm:$0xff]  ;;  %s342_s13 = scalar_lea.vmem %s2108_s0, %s1911_s24  ;;  %s347_s28 = scalar_lea.vmem %s2109_s1, %s1911_s24 }
   0xe   : > { %599 = vmatpush.bf16.msra.mxu2 %v1722_v2  ;;  %v1731_v6 = vld [vmem:[%s2111_s3 + $0x78] sm:$0xff]  ;;  %v1730_v7 = vld [vmem:[%s2111_s3 + $0x70] sm:$0xff]  ;;  %v1729_v11 = vld [vmem:[%s2111_s3 + $0x68] sm:$0xff]  ;;  %s352_s19 = scalar_lea.vmem %s2117_s9, %s1911_s24 }
   0xf   : > { %692 = vmatpush.bf16.msra.mxu3 %v1731_v6  ;;  %v1703_v12 = vld [vmem:[%s2110_s2 + $0x60] sm:$0xff]  ;;  %v1702_v15 = vld [vmem:[%s2110_s2 + $0x58] sm:$0xff]  ;;  %v1701_v20 = vld [vmem:[%s2110_s2 + $0x50] sm:$0xff] }
  0x10   : > { %427 = vmatpush.bf16.msra.mxu0 %v1705_v3  ;;  %v1711_v13 = vld [vmem:[%s2110_s2 + $0x20] sm:$0xff]  ;;  %v1710_v16 = vld [vmem:[%s2110_s2 + $0x18] sm:$0xff]  ;;  %v1709_v21 = vld [vmem:[%s2110_s2 + $0x10] sm:$0xff] }
  0x11   : > { %507 = vmatpush.bf16.msra.mxu1 %v1713_v4  ;;  %v1719_v14 = vld [vmem:[%s2110_s2 + $0xa0] sm:$0xff]  ;;  %v1718_v18 = vld [vmem:[%s2110_s2 + $0x98] sm:$0xff]  ;;  %v1717_v23 = vld [vmem:[%s2110_s2 + $0x90] sm:$0xff] }
  0x12   : > { %600 = vmatpush.bf16.msra.mxu2 %v1721_v5  ;;  %v1728_v17 = vld [vmem:[%s2111_s3 + $0x60] sm:$0xff]  ;;  %v1727_v19 = vld [vmem:[%s2111_s3 + $0x58] sm:$0xff]  ;;  %v1726_v24 = vld [vmem:[%s2111_s3 + $0x50] sm:$0xff] }
  0x13   : > { %693 = vmatpush.bf16.msra.mxu3 %v1730_v7  ;;  %v1698_v22 = vld [vmem:[%s342_s13] sm:$0xff]  ;;  %v1700_v25 = vld [vmem:[%s2110_s2 + $0x48] sm:$0xff]  ;;  %v1739_v34 = vld [vmem:[%s2111_s3 + $0x38] sm:$0xff] }
  0x14   : > { %428 = vmatpush.bf16.msra.mxu0 %v1704_v8  ;;  %v1708_v26 = vld [vmem:[%s2110_s2 + $0x8] sm:$0xff]  ;;  %v546_v27 = vshll.u32 %v1698_v22, 16  ;;  %v1699_v30 = vld [vmem:[%s2110_s2 + $0x40] sm:$0xff]  ;;  %v544_v32 = vshrl.u32 %v1698_v22, 16  ;;  %v1747_v36 = vld [vmem:[%s2111_s3 + $0xb8] sm:$0xff] }
  0x15   : > { %508 = vmatpush.bf16.msra.mxu1 %v1712_v9  ;;  %v1716_v28 = vld [vmem:[%s2110_s2 + $0x88] sm:$0xff]  ;;  %v1707_v31 = vld [vmem:[%s2110_s2] sm:$0xff]  ;;  %v1738_v39 = vld [vmem:[%s2111_s3 + $0x30] sm:$0xff] }
  0x16   : > { %601 = vmatpush.bf16.msra.mxu2 %v1720_v10  ;;  %v1725_v29 = vld [vmem:[%s2111_s3 + $0x48] sm:$0xff]  ;;  %v548_v33 = vrot.slane %v546_v27, 1  ;;  %v1715_v35 = vld [vmem:[%s2110_s2 + $0x80] sm:$0xff]  ;;  %v1746_v40 = vld [vmem:[%s2111_s3 + $0xb0] sm:$0xff] }
  0x17   : > { %694 = vmatpush.bf16.msra.mxu3 %v1729_v11  ;;  %v1724_v38 = vld [vmem:[%s2111_s3 + $0x40] sm:$0xff]  ;;  %v1737_v42 = vld [vmem:[%s2111_s3 + $0x28] sm:$0xff]  ;;  %v1735_v46 = vld [vmem:[%s2111_s3 + $0x18] sm:$0xff] }
  0x18   : > { %429 = vmatpush.bf16.msra.mxu0 %v1703_v12  ;;  %v549_v37 = vor.u32 %v548_v33, %v544_v32  ;;  %v1723_v41 = vld [vmem:[%s347_s28] sm:$0xff]  ;;  %v1745_v43 = vld [vmem:[%s2111_s3 + $0xa8] sm:$0xff]  ;;  %v1743_v47 = vld [vmem:[%s2111_s3 + $0x98] sm:$0xff] }
  0x19   : > { %509 = vmatpush.bf16.msra.mxu1 %v1711_v13  ;;  %v1736_v44 = vld [vmem:[%s2111_s3 + $0x20] sm:$0xff]  ;;  %v1734_v48 = vld [vmem:[%s2111_s3 + $0x10] sm:$0xff]  ;;  %v1733_v50 = vld [vmem:[%s2111_s3 + $0x8] sm:$0xff]  ;;  %v816_v51 = vshll.u32 %v1723_v41, 16  ;;  %v814_v54 = vshrl.u32 %v1723_v41, 16 }
  0x1a   : > { %602 = vmatpush.bf16.msra.mxu2 %v1719_v14  ;;  %v1744_v45 = vld [vmem:[%s2111_s3 + $0xa0] sm:$0xff]  ;;  %v1742_v49 = vld [vmem:[%s2111_s3 + $0x90] sm:$0xff]  ;;  %v1741_v52 = vld [vmem:[%s2111_s3 + $0x88] sm:$0xff] }
  0x1b   : > { %695 = vmatpush.bf16.msra.mxu3 %v1728_v17  ;;  %v1732_v53 = vld [vmem:[%s2111_s3] sm:$0xff]  ;;  %v818_v55 = vrot.slane %v816_v51, 1  ;;  %v1755_v10 = vld [vmem:[%s2114_s6 + $0x78] sm:$0xff]  ;;  %v1754_v13 = vld [vmem:[%s2114_s6 + $0x70] sm:$0xff] }
  0x1c   : > { %430 = vmatpush.bf16.msra.mxu0 %v1702_v15  ;;  %v1740_v56 = vld [vmem:[%s2111_s3 + $0x80] sm:$0xff]  ;;  %v1763_v11 = vld [vmem:[%s2114_s6 + $0x38] sm:$0xff]  ;;  %v1762_v14 = vld [vmem:[%s2114_s6 + $0x30] sm:$0xff] }
  0x1d   : > { %510 = vmatpush.bf16.msra.mxu1 %v1710_v16  ;;  %v819_v57 = vor.u32 %v818_v55, %v814_v54  ;;  %v1771_v12 = vld [vmem:[%s2114_s6 + $0xb8] sm:$0xff]  ;;  %v1770_v15 = vld [vmem:[%s2114_s6 + $0xb0] sm:$0xff]  ;;  %v1753_v16 = vld [vmem:[%s2114_s6 + $0x68] sm:$0xff] }
  0x1e   : > { %603 = vmatpush.bf16.msra.mxu2 %v1718_v18  ;;  %v1761_v17 = vld [vmem:[%s2114_s6 + $0x28] sm:$0xff]  ;;  %v1759_v27 = vld [vmem:[%s2114_s6 + $0x18] sm:$0xff]  ;;  %v1758_v33 = vld [vmem:[%s2114_s6 + $0x10] sm:$0xff] }
  0x1f   : > { %696 = vmatpush.bf16.msra.mxu3 %v1727_v19  ;;  %v1769_v18 = vld [vmem:[%s2114_s6 + $0xa8] sm:$0xff] }
  0x20   : > { %431 = vmatpush.bf16.msra.mxu0 %v1701_v20 }
  0x21   : > { %511 = vmatpush.bf16.msra.mxu1 %v1709_v21 }
  0x22   : > { %604 = vmatpush.bf16.msra.mxu2 %v1717_v23  ;;  %v1752_v23 = vld [vmem:[%s2114_s6 + $0x60] sm:$0xff] }
  0x23   : > { %697 = vmatpush.bf16.msra.mxu3 %v1726_v24  ;;  %v1760_v24 = vld [vmem:[%s2114_s6 + $0x20] sm:$0xff] }
  0x24   : > { %432 = vmatpush.bf16.msra.mxu0 %v1700_v25  ;;  %v1768_v25 = vld [vmem:[%s2114_s6 + $0xa0] sm:$0xff] }
  0x25   : > { %512 = vmatpush.bf16.msra.mxu1 %v1708_v26  ;;  %v1751_v26 = vld [vmem:[%s2114_s6 + $0x58] sm:$0xff] }
  0x26   : > { %605 = vmatpush.bf16.msra.mxu2 %v1716_v28  ;;  %v1767_v28 = vld [vmem:[%s2114_s6 + $0x98] sm:$0xff] }
  0x27   : > { %698 = vmatpush.bf16.msra.mxu3 %v1725_v29  ;;  %v1750_v29 = vld [vmem:[%s2114_s6 + $0x50] sm:$0xff] }
  0x28   : > { %433 = vmatpush.bf16.msra.mxu0 %v1699_v30 }
  0x29   : > { %513 = vmatpush.bf16.msra.mxu1 %v1707_v31 }
  0x2a   : > { %606 = vmatpush.bf16.msra.mxu2 %v1715_v35 }
  0x2b   : > { %434 = vmatmul.bf16.vlgmr.msra.gmra.mxu0 %v1698_v22  ;;  %699 = vmatpush.bf16.msra.mxu3 %v1724_v38  ;;  %v1749_v38 = vld [vmem:[%s2114_s6 + $0x48] sm:$0xff] }
  0x2c   : > { %776 = vmatpush.bf16.msrb.mxu0 %v1739_v34  ;;  %514 = vmatmul.bf16.vlgmr.msra.gmra.mxu1 %v1698_v22 }
  0x2d   : > { %869 = vmatpush.bf16.msrb.mxu1 %v1747_v36  ;;  %607 = vmatmul.bf16.vlgmr.msra.gmra.mxu2 %v549_v37  ;;  %v1766_v37 = vld [vmem:[%s2114_s6 + $0x90] sm:$0xff] }
  0x2e   : > { %700 = vmatmul.bf16.vlgmr.msra.gmra.mxu3 %v1723_v41  ;;  %994 = vmatpush.bf16.msrb.mxu2 %v1755_v10 }
  0x2f   : > { %1074 = vmatpush.bf16.msrb.mxu3 %v1763_v11 }
  0x30   : > { %777 = vmatpush.bf16.msrb.mxu0 %v1738_v39  ;;  %v1757_v39 = vld [vmem:[%s2114_s6 + $0x8] sm:$0xff] }
  0x31   : > { %870 = vmatpush.bf16.msrb.mxu1 %v1746_v40  ;;  %v1765_v40 = vld [vmem:[%s2114_s6 + $0x88] sm:$0xff] }
  0x32   : > { %995 = vmatpush.bf16.msrb.mxu2 %v1754_v13 }
  0x33   : > { %1075 = vmatpush.bf16.msrb.mxu3 %v1762_v14 }
  0x34   : > { %778 = vmatpush.bf16.msrb.mxu0 %v1737_v42  ;;  %v1756_v42 = vld [vmem:[%s2114_s6] sm:$0xff] }
  0x35   : > { %871 = vmatpush.bf16.msrb.mxu1 %v1745_v43  ;;  %v1785_v43 = vld [vmem:[%s2112_s4] ss:$0 sm:$0xff] }
  0x36   : > { %996 = vmatpush.bf16.msrb.mxu2 %v1753_v16 }
  0x37   : > { %1076 = vmatpush.bf16.msrb.mxu3 %v1761_v17 }
  0x38   : > { %779 = vmatpush.bf16.msrb.mxu0 %v1736_v44 }
  0x39   : > { %872 = vmatpush.bf16.msrb.mxu1 %v1744_v45 }
  0x3a   : > { %997 = vmatpush.bf16.msrb.mxu2 %v1752_v23 }
  0x3b   : > { %1077 = vmatpush.bf16.msrb.mxu3 %v1760_v24 }
  0x3c   : > { %780 = vmatpush.bf16.msrb.mxu0 %v1735_v46 }
  0x3d   : > { %873 = vmatpush.bf16.msrb.mxu1 %v1743_v47 }
  0x3e   : > { %998 = vmatpush.bf16.msrb.mxu2 %v1751_v26 }
  0x3f   : > { %1078 = vmatpush.bf16.msrb.mxu3 %v1759_v27 }
  0x40   : > { %781 = vmatpush.bf16.msrb.mxu0 %v1734_v48  ;;  %v1786_v48 = vld [vmem:[%s2113_s5] ss:$0 sm:$0xff] }
  0x41   : > { %874 = vmatpush.bf16.msrb.mxu1 %v1742_v49 }
  0x42   : > { %999 = vmatpush.bf16.msrb.mxu2 %v1750_v29 }
  0x43   : > { %1079 = vmatpush.bf16.msrb.mxu3 %v1758_v33  ;;  %v1788_v33 = vld [vmem:[%s2116_s8] ss:$0 sm:$0xff] }
  0x44   : > { %782 = vmatpush.bf16.msrb.mxu0 %v1733_v50 }
  0x45   : > { %875 = vmatpush.bf16.msrb.mxu1 %v1741_v52 }
  0x46   : > { %1000 = vmatpush.bf16.msrb.mxu2 %v1749_v38 }
  0x47   : > { %1080 = vmatpush.bf16.msrb.mxu3 %v1757_v39 }
  0x48   : > { %783 = vmatpush.bf16.msrb.mxu0 %v1732_v53 }
  0x49   : > { %876 = vmatpush.bf16.msrb.mxu1 %v1740_v56  ;;  %v1764_v56 = vld [vmem:[%s2114_s6 + $0x80] sm:$0xff] }
  0x4b   : > { %784 = vmatmul.bf16.vlgmr.msrb.gmra.mxu0 %v1723_v41  ;;  %v1748_v41 = vld [vmem:[%s2114_s6 + $0x40] sm:$0xff]  ;;  %1081 = vmatpush.bf16.msrb.mxu3 %v1756_v42 }
  0x4c   : > { %877 = vmatmul.bf16.vlgmr.msrb.gmra.mxu1 %v819_v57  ;;  %1167 = vmatpush.bf16.msra.mxu0 %v1771_v12 }
  0x4d   : > { %1001 = vmatpush.bf16.msrb.mxu2 %v1748_v41 }
  0x50   : > { %1168 = vmatpush.bf16.msra.mxu0 %v1770_v15 }
  0x54   : > { %1169 = vmatpush.bf16.msra.mxu0 %v1769_v18 }
  0x58   : > { %1170 = vmatpush.bf16.msra.mxu0 %v1768_v25 }
  0x5c   : > { %1171 = vmatpush.bf16.msra.mxu0 %v1767_v28  ;;  %v1787_v28 = vld [vmem:[%s2115_s7] ss:$0 sm:$0xff] }
  0x60   : > { %1172 = vmatpush.bf16.msra.mxu0 %v1766_v37 }
  0x64   : > { %1173 = vmatpush.bf16.msra.mxu0 %v1765_v40 }
  0x68   : > { %1174 = vmatpush.bf16.msra.mxu0 %v1764_v56 }
  0xa8   : > { %v435_v58 = vpop.f32.mrf.mxu0 }
  0xa9   : > { %440 = vst [vmem:[#allocation2] sm:$0xff] %v435_v58  ;;  %v515_v59 = vpop.f32.mrf.mxu1 }
  0xb0   : > { %v437_v60 = vpop.f32.mrf.mxu0  ;;  %v608_v2 = vpop.f32.mrf.mxu2 }
  0xb1   : > { %441 = vst [vmem:[#allocation2 + $0x8] sm:$0xff] %v437_v60  ;;  %v517_v62 = vpop.f32.mrf.mxu1  ;;  %v701_v7 = vpop.f32.mrf.mxu3 }
  0xb8   : > { %v520_v61 = vld [vmem:[#allocation2 + $0x1] sm:$0xff]  ;;  %v521_v63 = vld [vmem:[#allocation2 + $0x9] sm:$0x7f]  ;;  %v610_v5 = vpop.f32.mrf.mxu2 }
  0xb9   : > { %v522_v0 = vadd.f32 %v520_v61, %v515_v59  ;;  %v523_v1 = vadd.f32 %v521_v63, %v517_v62  ;;  %v703_v19 = vpop.f32.mrf.mxu3 }
  0xbb   : > { %524 = vst [vmem:[#allocation2 + $0x1] sm:$0xff] %v522_v0 }
  0xbc   : > { %525 = vst [vmem:[#allocation2 + $0x9] sm:$0x7f] %v523_v1 }
  0xc2   : > { %v613_v3 = vld [vmem:[#allocation2] sm:$0xff] }
  0xc3   : > { %v615_v4 = vadd.f32 %v613_v3, %v608_v2  ;;  %v614_v6 = vld [vmem:[#allocation2 + $0x8] sm:$0x7f] }
  0xc4   : > { %v616_v8 = vadd.f32 %v614_v6, %v610_v5 }
  0xc5   : > { %v708_v9 = vadd.f32 %v701_v7, %v615_v4 }
  0xc6   : > { %618 = vst [vmem:[#allocation2 + $0x8] sm:$0x7f] %v616_v8 }
  0xc7   : > { %710 = vst [vmem:[#allocation2] sm:$0xff] %v708_v9 }
  0xc8   : > { %v785_v21 = vpop.f32.mrf.mxu0 }
  0xc9   : > { %v878_v36 = vpop.f32.mrf.mxu1 }
  0xcd   : > { %v707_v20 = vld [vmem:[#allocation2 + $0x8] sm:$0xff] }
  0xce   : > { %v709_v22 = vadd.f32 %v707_v20, %v703_v19 }
  0xd0   : > { %711 = vst [vmem:[#allocation2 + $0x8] sm:$0xff] %v709_v22  ;;  %v787_v31 = vpop.f32.mrf.mxu0 }
  0xd1   : > { %v880_v46 = vpop.f32.mrf.mxu1 }
  0xd7   : > { %v790_v30 = vld [vmem:[#allocation2 + $0x1] sm:$0xff]  ;;  %v791_v32 = vld [vmem:[#allocation2 + $0x9] sm:$0x7f] }
  0xd8   : > { %v792_v34 = vadd.f32 %v790_v30, %v785_v21  ;;  %v793_v35 = vadd.f32 %v791_v32, %v787_v31 }
  0xda   : > { %794 = vst [vmem:[#allocation2 + $0x1] sm:$0xff] %v792_v34 }
  0xdb   : > { %795 = vst [vmem:[#allocation2 + $0x9] sm:$0x7f] %v793_v35 }
  0xe1   : > { %v883_v44 = vld [vmem:[#allocation2] sm:$0xff] }
  0xe2   : > { %v885_v45 = vadd.f32 %v883_v44, %v878_v36  ;;  %v884_v47 = vld [vmem:[#allocation2 + $0x8] sm:$0x7f] }
  0xe3   : > { %v886_v49 = vadd.f32 %v884_v47, %v880_v46 }
  0xe4   : > { %v895_v50 = vmul.f32 %v1785_v43, %v885_v45 }
  0xe5   : > { %888 = vst [vmem:[#allocation2 + $0x8] sm:$0x7f] %v886_v49 }
  0xe6   : > { %v901_v51 = vadd.f32 %v1786_v48, %v895_v50 }
  0xe8   : > { %v905_v52 = vmul.f32 0.044715, %v901_v51  ;;  %v903_v4 = vmul.f32 0.5, %v901_v51 }
  0xea   : > { %v907_v53 = vmul.f32 %v905_v52, %v901_v51 }
  0xec   : > { %v890_v54 = vld [vmem:[#allocation2 + $0x8] sm:$0xff]  ;;  %v909_v55 = vmul.f32 %v907_v53, %v901_v51 }
  0xed   : > { %v896_v57 = vmul.f32 %v1785_v43, %v890_v54 }
  0xee   : > { %v911_v58 = vadd.f32 %v909_v55, %v901_v51 }
  0xef   : > { %v902_v59 = vadd.f32 %v1786_v48, %v896_v57 }
  0xf0   : > { %v913_v60 = vmul.f32 0.7978846, %v911_v58 }
  0xf1   : > { %v906_v61 = vmul.f32 0.044715, %v902_v59  ;;  %v904_v7 = vmul.f32 0.5, %v902_v59 }
  0xf2   : > { %1789 = vtanh.f32 %v913_v60 }
  0xf3   : > { %v908_v62 = vmul.f32 %v906_v61, %v902_v59 }
  0xf5   : > { %v910_v63 = vmul.f32 %v908_v62, %v902_v59 }
  0xf7   : > { %v912_v0 = vadd.f32 %v910_v63, %v902_v59 }
  0xf8   : > { %v1790_v1 = vpop.eup %1789 }
  0xf9   : > { %v914_v2 = vmul.f32 0.7978846, %v912_v0  ;;  %v917_v3 = vadd.f32 1.0, %v1790_v1 }
  0xfb   : > { %1791 = vtanh.f32 %v914_v2  ;;  %v919_v5 = vmul.f32 %v917_v3, %v903_v4 }
  0xfd   : > { %v921_v10 = vpack.c.bf16 %v919_v5, %v919_v5 }
  0xff   : > { %v942_v12 = vunpack.c.l.b16 %v921_v10 }
 0x101   : > { %v1792_v6 = vpop.eup %1791 }
 0x102   : > { %v918_v8 = vadd.f32 1.0, %v1792_v6 }
 0x104   : > { %v920_v9 = vmul.f32 %v918_v8, %v904_v7 }
 0x106   : > { %v922_v11 = vpack.c.bf16 %v920_v9, %v920_v9 }
 0x108   : > { %v943_v13 = vunpack.c.l.b16 %v922_v11 }
 0x10a   : > { %v944_v14 = vpack.c.b16 %v943_v13, %v942_v12 }
 0x10c   : > { %1002 = vmatmul.bf16.vlgmr.msrb.gmra.mxu2 %v944_v14  ;;  %1082 = vmatmul.bf16.vlgmr.msrb.gmra.mxu3 %v944_v14  ;;  %v1114_v15 = vshll.u32 %v944_v14, 16  ;;  %v1112_v16 = vshrl.u32 %v944_v14, 16 }
 0x10e   : > { %v1116_v17 = vrot.slane %v1114_v15, 1 }
 0x110   : > { %v1117_v18 = vor.u32 %v1116_v17, %v1112_v16 }
 0x112   : > { %1175 = vmatmul.bf16.vlgmr.msra.gmra.mxu0 %v1117_v18 }
 0x18f   : > { %v1003_v19 = vpop.f32.mrf.mxu2  ;;  %v1083_v20 = vpop.f32.mrf.mxu3 }
 0x190   : > { %1008 = vst [vmem:[#allocation2] sm:$0xff] %v1003_v19  ;;  %v1176_v25 = vpop.f32.mrf.mxu0 }
 0x197   : > { %v1005_v21 = vpop.f32.mrf.mxu2  ;;  %v1085_v23 = vpop.f32.mrf.mxu3 }
 0x198   : > { %1009 = vst [vmem:[#allocation2 + $0x8] sm:$0xff] %v1005_v21  ;;  %v1178_v31 = vpop.f32.mrf.mxu0 }
 0x19f   : > { %v1088_v22 = vld [vmem:[#allocation2 + $0x1] sm:$0xff]  ;;  %v1089_v24 = vld [vmem:[#allocation2 + $0x9] sm:$0x7f] }
 0x1a0   : > { %v1090_v26 = vadd.f32 %v1088_v22, %v1083_v20  ;;  %v1091_v27 = vadd.f32 %v1089_v24, %v1085_v23 }
 0x1a2   : > { %1092 = vst [vmem:[#allocation2 + $0x1] sm:$0xff] %v1090_v26 }
 0x1a3   : > { %1093 = vst [vmem:[#allocation2 + $0x9] sm:$0x7f] %v1091_v27 }
 0x1a9   : > { %v1181_v29 = vld [vmem:[#allocation2] sm:$0xff] }
 0x1aa   : > { %v1183_v30 = vadd.f32 %v1181_v29, %v1176_v25  ;;  %v1182_v32 = vld [vmem:[#allocation2 + $0x8] sm:$0x7f] }
 0x1ab   : > { %v1184_v34 = vadd.f32 %v1182_v32, %v1178_v31 }
 0x1ac   : > { %1185 = vst [vmem:[#allocation2] sm:$0xff] %v1183_v30  ;;  %v1193_v35 = vmul.f32 %v1787_v28, %v1183_v30 }
 0x1ad   : > { %1186 = vst [vmem:[#allocation2 + $0x8] sm:$0x7f] %v1184_v34 }
 0x1ae   : > { %v1199_v36 = vadd.f32 %v1788_v33, %v1193_v35 }
 0x1b0   : > { %v1203_v37 = vmul.f32 0.044715, %v1199_v36  ;;  %v1201_v53 = vmul.f32 0.5, %v1199_v36 }
 0x1b2   : > { %v1205_v38 = vmul.f32 %v1203_v37, %v1199_v36 }
 0x1b4   : > { %v1188_v39 = vld [vmem:[#allocation2 + $0x8] sm:$0xff]  ;;  %v1207_v40 = vmul.f32 %v1205_v38, %v1199_v36 }
 0x1b5   : > { %v1194_v41 = vmul.f32 %v1787_v28, %v1188_v39 }
 0x1b6   : > { %v1209_v43 = vadd.f32 %v1207_v40, %v1199_v36 }
 0x1b7   : > { %v1200_v42 = vadd.f32 %v1788_v33, %v1194_v41 }
 0x1b8   : > { %v1211_v46 = vmul.f32 0.7978846, %v1209_v43 }
 0x1b9   : > { %v1204_v44 = vmul.f32 0.044715, %v1200_v42  ;;  %v1202_v54 = vmul.f32 0.5, %v1200_v42 }
 0x1ba   : > { %1793 = vtanh.f32 %v1211_v46 }
 0x1bb   : > { %v1206_v45 = vmul.f32 %v1204_v44, %v1200_v42 }
 0x1bd   : > { %v1208_v47 = vmul.f32 %v1206_v45, %v1200_v42 }
 0x1bf   : > { %v1210_v48 = vadd.f32 %v1208_v47, %v1200_v42 }
 0x1c0   : > { %v1794_v50 = vpop.eup %1793 }
 0x1c1   : > { %v1212_v49 = vmul.f32 0.7978846, %v1210_v48  ;;  %v1215_v51 = vadd.f32 1.0, %v1794_v50 }
 0x1c3   : > { %1795 = vtanh.f32 %v1212_v49  ;;  %v1217_v56 = vmul.f32 %v1215_v51, %v1201_v53 }
 0x1c9   : > { %v1796_v52 = vpop.eup %1795 }
 0x1ca   : > { %v1216_v55 = vadd.f32 1.0, %v1796_v52 }
 0x1cc   : > { %v1218_v57 = vmul.f32 %v1216_v55, %v1202_v54 }
 0x1ce   : > { %v1775_v58 = vpack.c.bf16 %v1218_v57, %v1217_v56 }
 0x1d0   : > { %1776 = vst [vmem:[%s352_s19] sm:$0xff] %v1775_v58  }
 0x1d1 PF: > { %s19_s30 = sadd.s32 1, %s1803_s30  }
 0x1d2   : > { %p16_p4 = scmp.ge.s32.totalorder %s19_s30, 4  }
 0x1d4   :  { %18 = sbr.rel (!%p16_p4) target bundleno = 1 (0x1), region = 95 }

</bundles_post_ra>
